<compile_context>
chip_gen: v7x
topology: tpu7x:2x2x1
jax: 0.10.0
libtpu: 0.0.40
codegen_flags: <defaults>
</compile_context>

<pallas_src>
import jax
import jax.numpy as jnp
import numpy as np
from jax.experimental import pallas as pl
from jax.experimental.pallas import tpu as pltpu


# --------------------------------------------------------------------------------
# In-kernel helpers
# --------------------------------------------------------------------------------
def _conv3x3_one_image(x_hwc, w_ref, pad_ref, col_ref):
    """'SAME' 3x3 conv of one image as a single im2col matmul on the MXU.

    x_hwc   : (H, W, C) bf16 value
    w_ref   : (9*C, Co) bf16 ref (rows ordered k*C + c, k = dy*3 + dx)
    pad_ref : (H+2, W+2, C) bf16 VMEM scratch (zero halo frame)
    col_ref : (H*W, 9*C)   bf16 VMEM scratch (im2col patches)
    returns : (H*W, Co) float32
    """
    H, W, C = x_hwc.shape
    # Only the 1-px frame really needs zeros; a full clear of this tiny per-image
    # scratch is a few vregs and keeps it correct under "parallel" core sharding.
    pad_ref[...] = jnp.zeros(pad_ref.shape, pad_ref.dtype)
    pad_ref[1:H + 1, 1:W + 1, :] = x_hwc
    for dy in range(3):
        for dx in range(3):
            k = dy * 3 + dx
            col_ref[:, k * C:(k + 1) * C] = (
                pad_ref[dy:dy + H, dx:dx + W, :].reshape(H * W, C))
    # Single MXU matmul with K = 9*C (instead of 9 K=C matmuls + 8 VPU adds).
    return jnp.dot(col_ref[...], w_ref[...], preferred_element_type=jnp.float32)


def _write_stats(s_ref, y):
    """Per-image, per-channel sum and sum-of-squares (f32) for BatchNorm."""
    s_ref[0, 0:1, :] = jnp.sum(y, axis=0, keepdims=True)
    s_ref[0, 1:2, :] = jnp.sum(y * y, axis=0, keepdims=True)


# --------------------------------------------------------------------------------
# Pass 1: conv1 (pre-BN, no bias) + per-image channel statistics
# --------------------------------------------------------------------------------
def _conv1_kernel(x_ref, w1_ref, y1_ref, s1_ref, pad_ref, col_ref):
    # x_ref: (1, H, W, Cin) bf16 ; w1_ref: (9*Cin, Cmid) bf16
    # y1_ref: (1, H*W, Cmid) bf16 out ; s1_ref: (1, 2, Cmid) f32 out
    y = _conv3x3_one_image(x_ref[0], w1_ref, pad_ref, col_ref)   # (H*W, Cmid) f32
    y1_ref[0] = y.astype(y1_ref.dtype)
    _write_stats(s1_ref, y)


# --------------------------------------------------------------------------------
# Pass 2: BN1 + ReLU + conv2 (pre-BN, no bias) + per-image channel statistics
# --------------------------------------------------------------------------------
def _bn_relu_conv2_kernel(y1_ref, sc1_ref, sh1_ref, w2_ref, y2_ref, s2_ref,
                          pad_ref, col_ref):
    # y1_ref: (1, H*W, Cmid) bf16 ; sc1/sh1: (1, Cmid) f32 ; w2_ref: (9*Cmid, Cout) bf16
    H = pad_ref.shape[0] - 2
    W = pad_ref.shape[1] - 2
    Cmid = pad_ref.shape[2]
    # BN1 (folded per-channel scale/shift, f32) + ReLU on the VPU.
    h1 = jnp.maximum(y1_ref[0].astype(jnp.float32) * sc1_ref[...] + sh1_ref[...], 0.0)
    y = _conv3x3_one_image(h1.astype(jnp.bfloat16).reshape(H, W, Cmid),
                           w2_ref, pad_ref, col_ref)             # (H*W, Cout) f32
    y2_ref[0] = y.astype(y2_ref.dtype)
    _write_stats(s2_ref, y)


# --------------------------------------------------------------------------------
# Pass 3: BN2 + residual 1x1 conv + ReLU
# --------------------------------------------------------------------------------
def _bn_residual_kernel(y2_ref, sc2_ref, sh2_ref, x_ref, wr_ref, o_ref):
    # y2_ref: (1, H*W, Cout) bf16 ; x_ref: (1, H, W, Cin) bf16 ; wr_ref: (Cin, Cout) bf16
    # sh2 already contains the residual-conv bias (folded in the wrapper).
    HW = y2_ref.shape[1]
    Cin = x_ref.shape[3]
    res = jnp.dot(x_ref[0].reshape(HW, Cin), wr_ref[...],
                  preferred_element_type=jnp.float32)            # (H*W, Cout) f32
    o_ref[0] = jnp.maximum(
        y2_ref[0].astype(jnp.float32) * sc2_ref[...] + sh2_ref[...] + res, 0.0)


# --------------------------------------------------------------------------------
# Wrapper
# --------------------------------------------------------------------------------
def _bn_scale_shift(stats, gamma, beta, count, eps=1e-5):
    """Reduce per-image (sum, sumsq) -> folded per-channel BN scale/shift (O(C))."""
    total = jnp.sum(stats.astype(jnp.float32), axis=0)           # (2, C)
    mean = total[0] / count
    var = jnp.maximum(total[1] / count - mean * mean, 0.0)       # biased (train-mode) var
    scale = gamma.reshape(-1) * jax.lax.rsqrt(var + eps)
    shift = beta.reshape(-1) - mean * scale
    return scale.reshape(1, -1).astype(jnp.float32), shift.reshape(1, -1).astype(jnp.float32)


def resconv_block(x_nchw, params):
    """params = (w1, b1, g1, be1, w2, b2, g2, be2, wr, br)."""
    w1, b1, g1, be1, w2, b2, g2, be2, wr, br = params
    del b1, b2  # cancelled exactly by the batch-mean subtraction of train-mode BN
    N, Cin, H, W = x_nchw.shape
    Cmid, Cout = w1.shape[-1], w2.shape[-1]
    count = N * H * W

    # NCHW -> NHWC once at the module boundary; bf16 for all MXU operands.
    x = jnp.transpose(x_nchw.astype(jnp.float32), (0, 2, 3, 1)).astype(jnp.bfloat16)
    w1m = w1.reshape(9 * Cin, Cmid).astype(jnp.bfloat16)
    w2m = w2.reshape(9 * Cmid, Cout).astype(jnp.bfloat16)
    wrm = wr.astype(jnp.bfloat16)

    cparams = pltpu.CompilerParams(
        dimension_semantics=("parallel",),        # independent images -> v7x 2-TC sharding
        vmem_limit_bytes=48 * 1024 * 1024,        # explicit budget (< v7x 64 MiB physical)
    )

    full = lambda n: (0, 0)                       # broadcast (weights / per-channel vecs)
    per_img3 = lambda n: (n, 0, 0)
    per_img4 = lambda n: (n, 0, 0, 0)

    # ---- pass 1: conv1 + stats ---------------------------------------------------
    y1, s1 = pl.pallas_call(
        _conv1_kernel,
        grid=(N,),
        in_specs=[pl.BlockSpec((1, H, W, Cin), per_img4),
                  pl.BlockSpec((9 * Cin, Cmid), full)],
        out_specs=(pl.BlockSpec((1, H * W, Cmid), per_img3),
                   pl.BlockSpec((1, 2, Cmid), per_img3)),
        out_shape=(jax.ShapeDtypeStruct((N, H * W, Cmid), jnp.bfloat16),
                   jax.ShapeDtypeStruct((N, 2, Cmid), jnp.float32)),
        scratch_shapes=[pltpu.VMEM((H + 2, W + 2, Cin), jnp.bfloat16),
                        pltpu.VMEM((H * W, 9 * Cin), jnp.bfloat16)],
        compiler_params=cparams,
    )(x, w1m)

    sc1, sh1 = _bn_scale_shift(s1, g1, be1, count)

    # ---- pass 2: BN1 + ReLU + conv2 + stats ---------------------------------------
    y2, s2 = pl.pallas_call(
        _bn_relu_conv2_kernel,
        grid=(N,),
        in_specs=[pl.BlockSpec((1, H * W, Cmid), per_img3),
                  pl.BlockSpec((1, Cmid), full),
                  pl.BlockSpec((1, Cmid), full),
                  pl.BlockSpec((9 * Cmid, Cout), full)],
        out_specs=(pl.BlockSpec((1, H * W, Cout), per_img3),
                   pl.BlockSpec((1, 2, Cout), per_img3)),
        out_shape=(jax.ShapeDtypeStruct((N, H * W, Cout), jnp.bfloat16),
                   jax.ShapeDtypeStruct((N, 2, Cout), jnp.float32)),
        scratch_shapes=[pltpu.VMEM((H + 2, W + 2, Cmid), jnp.bfloat16),
                        pltpu.VMEM((H * W, 9 * Cmid), jnp.bfloat16)],
        compiler_params=cparams,
    )(y1, sc1, sh1, w2m)

    sc2, sh2 = _bn_scale_shift(s2, g2, be2, count)
    sh2 = sh2 + br.astype(jnp.float32).reshape(1, Cout)   # fold residual-conv bias into BN2 shift

    # ---- pass 3: BN2 + residual + ReLU --------------------------------------------
    out = pl.pallas_call(
        _bn_residual_kernel,
        grid=(N,),
        in_specs=[pl.BlockSpec((1, H * W, Cout), per_img3),
                  pl.BlockSpec((1, Cout), full),
                  pl.BlockSpec((1, Cout), full),
                  pl.BlockSpec((1, H, W, Cin), per_img4),
                  pl.BlockSpec((Cin, Cout), full)],
        out_specs=pl.BlockSpec((1, H * W, Cout), per_img3),
        out_shape=jax.ShapeDtypeStruct((N, H * W, Cout), jnp.float32),
        compiler_params=cparams,
    )(y2, sc2, sh2, x, wrm)

    out = out.reshape(N, H, W, Cout)
    return jnp.transpose(out, (0, 3, 1, 2))               # back to NCHW


# --------------------------------------------------------------------------------
# Parameters + pure-JAX f32 reference (mirrors the PyTorch forward in train mode)
# --------------------------------------------------------------------------------
def make_params(key, in_channels, mid_channels, out_channels):
    ks = jax.random.split(key, 8)
    w1 = 0.2 * jax.random.normal(ks[0], (9, in_channels, mid_channels), jnp.float32)
    b1 = 0.1 * jax.random.normal(ks[1], (1, mid_channels), jnp.float32)
    g1 = 1.0 + 0.1 * jax.random.normal(ks[2], (1, mid_channels), jnp.float32)
    be1 = 0.1 * jax.random.normal(ks[3], (1, mid_channels), jnp.float32)
    w2 = 0.2 * jax.random.normal(ks[4], (9, mid_channels, out_channels), jnp.float32)
    b2 = 0.1 * jax.random.normal(ks[5], (1, out_channels), jnp.float32)
    g2 = 1.0 + 0.1 * jax.random.normal(ks[6], (1, out_channels), jnp.float32)
    be2 = 0.1 * jax.random.normal(ks[7], (1, out_channels), jnp.float32)
    if in_channels != out_channels:
        kr1, kr2 = jax.random.split(jax.random.fold_in(key, 99))
        wr = 0.2 * jax.random.normal(kr1, (in_channels, out_channels), jnp.float32)
        br = 0.1 * jax.random.normal(kr2, (1, out_channels), jnp.float32)
    else:
        # residual_conv is None in the PyTorch module -> identity residual path
        wr = jnp.eye(in_channels, dtype=jnp.float32)
        br = jnp.zeros((1, out_channels), jnp.float32)
    return (w1, b1, g1, be1, w2, b2, g2, be2, wr, br)


def reference_forward(x_nchw, params):
    w1, b1, g1, be1, w2, b2, g2, be2, wr, br = params
    eps = 1e-5
    x = jnp.transpose(x_nchw.astype(jnp.float32), (0, 2, 3, 1))

    def conv3(inp, w9, b):
        ci, co = w9.shape[1], w9.shape[2]
        w = w9.reshape(3, 3, ci, co)
        y = jax.lax.conv_general_dilated(
            inp, w, (1, 1), 'SAME', dimension_numbers=('NHWC', 'HWIO', 'NHWC'))
        return y + b

    def bn(y, g, be):
        m = jnp.mean(y, axis=(0, 1, 2), keepdims=True)
        v = jnp.mean((y - m) ** 2, axis=(0, 1, 2), keepdims=True)
        return (y - m) * jax.lax.rsqrt(v + eps) * g + be

    h = jnp.maximum(bn(conv3(x, w1, b1), g1, be1), 0.0)
    h2 = bn(conv3(h, w2, b2), g2, be2)
    res = jnp.einsum('nhwc,cd->nhwd', x, wr) + br
    out = jnp.maximum(h2 + res, 0.0)
    return jnp.transpose(out, (0, 3, 1, 2))


if __name__ == "__main__":
    key = jax.random.PRNGKey(0)
    k_x, k_p = jax.random.split(key)

    N, Cin, H, W = 2, 4, 16, 16
    Cmid, Cout = 8, 8  # in_channels != out_channels -> residual 1x1 conv path exercised

    x = jax.random.normal(k_x, (N, Cin, H, W), jnp.float32)
    params = make_params(k_p, Cin, Cmid, Cout)

    fwd = jax.jit(resconv_block)
    out = jax.block_until_ready(fwd(x, params))

    ref = jax.block_until_ready(reference_forward(x, params))
    # Tolerance widened vs. the pure-f32 version: the kernel feeds bf16 operands to
    # the MXU (f32 accumulation) and stores bf16 intermediates per the perf review.
    np.testing.assert_allclose(np.asarray(out), np.asarray(ref), rtol=3e-2, atol=3e-2)

    print("KERNEL_OK")
</pallas_src>

<mosaic_0001>
module attributes {stable_mosaic.version = 11 : i64} {
  func.func @_conv1_kernel(%arg0: i32, %arg1: memref<1x16x16x4xbf16, #tpu.memory_space<vmem>>, %arg2: memref<36x8xbf16, #tpu.memory_space<vmem>>, %arg3: memref<1x256x8xbf16, #tpu.memory_space<vmem>>, %arg4: memref<1x2x8xf32, #tpu.memory_space<vmem>>, %arg5: memref<18x18x4xbf16, #tpu.memory_space<vmem>>, %arg6: memref<256x36xbf16, #tpu.memory_space<vmem>>) attributes {dimension_semantics = [#tpu.dimension_semantics<parallel>], iteration_bounds = array<i64: 2>, scalar_prefetch = 0 : i64, scratch_operands = 2 : i64, tpu.core_type = #tpu.core_type<tc>, window_params = [{transform_indices = @transform_0, window_bounds = array<i64: 1, 16, 16, 4>}, {pipeline_mode = #tpu.pipeline_mode<synchronous>, transform_indices = @transform_1, window_bounds = array<i64: 36, 8>}, {transform_indices = @transform_2, window_bounds = array<i64: 1, 256, 8>}, {transform_indices = @transform_3, window_bounds = array<i64: 1, 2, 8>}]} {
    %c0 = arith.constant 0 : index
    %c0_0 = arith.constant 0 : index
    %c0_1 = arith.constant 0 : index
    %c0_2 = arith.constant 0 : index
    %0 = vector.load %arg1[%c0, %c0_0, %c0_1, %c0_2] : memref<1x16x16x4xbf16, #tpu.memory_space<vmem>>, vector<1x16x16x4xbf16>
    %1 = vector.shape_cast %0 : vector<1x16x16x4xbf16> to vector<16x16x4xbf16>
    %cst = arith.constant 0.000000e+00 : bf16
    %2 = vector.broadcast %cst : bf16 to vector<18x18x4xbf16>
    %c0_3 = arith.constant 0 : index
    %c0_4 = arith.constant 0 : index
    %c0_5 = arith.constant 0 : index
    %3 = vector.load %arg5[%c0_3, %c0_4, %c0_5] : memref<18x18x4xbf16, #tpu.memory_space<vmem>>, vector<18x18x4xbf16>
    tpu.vector_store %arg5[%c0_3, %c0_4, %c0_5], %2 {strides = array<i32>} : memref<18x18x4xbf16, #tpu.memory_space<vmem>>, vector<18x18x4xbf16>,
    %c1 = arith.constant 1 : index
    %c1_6 = arith.constant 1 : index
    %c0_7 = arith.constant 0 : index
    %4 = vector.load %arg5[%c1, %c1_6, %c0_7] : memref<18x18x4xbf16, #tpu.memory_space<vmem>>, vector<16x16x4xbf16>
    tpu.vector_store %arg5[%c1, %c1_6, %c0_7], %1 {strides = array<i32>} : memref<18x18x4xbf16, #tpu.memory_space<vmem>>, vector<16x16x4xbf16>,
    %c0_8 = arith.constant 0 : index
    %c0_9 = arith.constant 0 : index
    %c0_10 = arith.constant 0 : index
    %5 = vector.load %arg5[%c0_8, %c0_9, %c0_10] : memref<18x18x4xbf16, #tpu.memory_space<vmem>>, vector<16x16x4xbf16>
    %6 = vector.shape_cast %5 : vector<16x16x4xbf16> to vector<256x4xbf16>
    %c0_11 = arith.constant 0 : index
    %c0_12 = arith.constant 0 : index
    %7 = vector.load %arg6[%c0_11, %c0_12] : memref<256x36xbf16, #tpu.memory_space<vmem>>, vector<256x4xbf16>
    tpu.vector_store %arg6[%c0_11, %c0_12], %6 {strides = array<i32>} : memref<256x36xbf16, #tpu.memory_space<vmem>>, vector<256x4xbf16>,
    %c0_13 = arith.constant 0 : index
    %c1_14 = arith.constant 1 : index
    %c0_15 = arith.constant 0 : index
    %8 = vector.load %arg5[%c0_13, %c1_14, %c0_15] : memref<18x18x4xbf16, #tpu.memory_space<vmem>>, vector<16x16x4xbf16>
    %9 = vector.shape_cast %8 : vector<16x16x4xbf16> to vector<256x4xbf16>
    %c0_16 = arith.constant 0 : index
    %c4 = arith.constant 4 : index
    %10 = vector.load %arg6[%c0_16, %c4] : memref<256x36xbf16, #tpu.memory_space<vmem>>, vector<256x4xbf16>
    tpu.vector_store %arg6[%c0_16, %c4], %9 {strides = array<i32>} : memref<256x36xbf16, #tpu.memory_space<vmem>>, vector<256x4xbf16>,
    %c0_17 = arith.constant 0 : index
    %c2 = arith.constant 2 : index
    %c0_18 = arith.constant 0 : index
    %11 = vector.load %arg5[%c0_17, %c2, %c0_18] : memref<18x18x4xbf16, #tpu.memory_space<vmem>>, vector<16x16x4xbf16>
    %12 = vector.shape_cast %11 : vector<16x16x4xbf16> to vector<256x4xbf16>
    %c0_19 = arith.constant 0 : index
    %c8 = arith.constant 8 : index
    %13 = vector.load %arg6[%c0_19, %c8] : memref<256x36xbf16, #tpu.memory_space<vmem>>, vector<256x4xbf16>
    tpu.vector_store %arg6[%c0_19, %c8], %12 {strides = array<i32>} : memref<256x36xbf16, #tpu.memory_space<vmem>>, vector<256x4xbf16>,
    %c1_20 = arith.constant 1 : index
    %c0_21 = arith.constant 0 : index
    %c0_22 = arith.constant 0 : index
    %14 = vector.load %arg5[%c1_20, %c0_21, %c0_22] : memref<18x18x4xbf16, #tpu.memory_space<vmem>>, vector<16x16x4xbf16>
    %15 = vector.shape_cast %14 : vector<16x16x4xbf16> to vector<256x4xbf16>
    %c0_23 = arith.constant 0 : index
    %c12 = arith.constant 12 : index
    %16 = vector.load %arg6[%c0_23, %c12] : memref<256x36xbf16, #tpu.memory_space<vmem>>, vector<256x4xbf16>
    tpu.vector_store %arg6[%c0_23, %c12], %15 {strides = array<i32>} : memref<256x36xbf16, #tpu.memory_space<vmem>>, vector<256x4xbf16>,
    %c1_24 = arith.constant 1 : index
    %c1_25 = arith.constant 1 : index
    %c0_26 = arith.constant 0 : index
    %17 = vector.load %arg5[%c1_24, %c1_25, %c0_26] : memref<18x18x4xbf16, #tpu.memory_space<vmem>>, vector<16x16x4xbf16>
    %18 = vector.shape_cast %17 : vector<16x16x4xbf16> to vector<256x4xbf16>
    %c0_27 = arith.constant 0 : index
    %c16 = arith.constant 16 : index
    %19 = vector.load %arg6[%c0_27, %c16] : memref<256x36xbf16, #tpu.memory_space<vmem>>, vector<256x4xbf16>
    tpu.vector_store %arg6[%c0_27, %c16], %18 {strides = array<i32>} : memref<256x36xbf16, #tpu.memory_space<vmem>>, vector<256x4xbf16>,
    %c1_28 = arith.constant 1 : index
    %c2_29 = arith.constant 2 : index
    %c0_30 = arith.constant 0 : index
    %20 = vector.load %arg5[%c1_28, %c2_29, %c0_30] : memref<18x18x4xbf16, #tpu.memory_space<vmem>>, vector<16x16x4xbf16>
    %21 = vector.shape_cast %20 : vector<16x16x4xbf16> to vector<256x4xbf16>
    %c0_31 = arith.constant 0 : index
    %c20 = arith.constant 20 : index
    %22 = vector.load %arg6[%c0_31, %c20] : memref<256x36xbf16, #tpu.memory_space<vmem>>, vector<256x4xbf16>
    tpu.vector_store %arg6[%c0_31, %c20], %21 {strides = array<i32>} : memref<256x36xbf16, #tpu.memory_space<vmem>>, vector<256x4xbf16>,
    %c2_32 = arith.constant 2 : index
    %c0_33 = arith.constant 0 : index
    %c0_34 = arith.constant 0 : index
    %23 = vector.load %arg5[%c2_32, %c0_33, %c0_34] : memref<18x18x4xbf16, #tpu.memory_space<vmem>>, vector<16x16x4xbf16>
    %24 = vector.shape_cast %23 : vector<16x16x4xbf16> to vector<256x4xbf16>
    %c0_35 = arith.constant 0 : index
    %c24 = arith.constant 24 : index
    %25 = vector.load %arg6[%c0_35, %c24] : memref<256x36xbf16, #tpu.memory_space<vmem>>, vector<256x4xbf16>
    tpu.vector_store %arg6[%c0_35, %c24], %24 {strides = array<i32>} : memref<256x36xbf16, #tpu.memory_space<vmem>>, vector<256x4xbf16>,
    %c2_36 = arith.constant 2 : index
    %c1_37 = arith.constant 1 : index
    %c0_38 = arith.constant 0 : index
    %26 = vector.load %arg5[%c2_36, %c1_37, %c0_38] : memref<18x18x4xbf16, #tpu.memory_space<vmem>>, vector<16x16x4xbf16>
    %27 = vector.shape_cast %26 : vector<16x16x4xbf16> to vector<256x4xbf16>
    %c0_39 = arith.constant 0 : index
    %c28 = arith.constant 28 : index
    %28 = vector.load %arg6[%c0_39, %c28] : memref<256x36xbf16, #tpu.memory_space<vmem>>, vector<256x4xbf16>
    tpu.vector_store %arg6[%c0_39, %c28], %27 {strides = array<i32>} : memref<256x36xbf16, #tpu.memory_space<vmem>>, vector<256x4xbf16>,
    %c2_40 = arith.constant 2 : index
    %c2_41 = arith.constant 2 : index
    %c0_42 = arith.constant 0 : index
    %29 = vector.load %arg5[%c2_40, %c2_41, %c0_42] : memref<18x18x4xbf16, #tpu.memory_space<vmem>>, vector<16x16x4xbf16>
    %30 = vector.shape_cast %29 : vector<16x16x4xbf16> to vector<256x4xbf16>
    %c0_43 = arith.constant 0 : index
    %c32 = arith.constant 32 : index
    %31 = vector.load %arg6[%c0_43, %c32] : memref<256x36xbf16, #tpu.memory_space<vmem>>, vector<256x4xbf16>
    tpu.vector_store %arg6[%c0_43, %c32], %30 {strides = array<i32>} : memref<256x36xbf16, #tpu.memory_space<vmem>>, vector<256x4xbf16>,
    %c0_44 = arith.constant 0 : index
    %c0_45 = arith.constant 0 : index
    %32 = vector.load %arg6[%c0_44, %c0_45] : memref<256x36xbf16, #tpu.memory_space<vmem>>, vector<256x36xbf16>
    %c0_46 = arith.constant 0 : index
    %c0_47 = arith.constant 0 : index
    %33 = vector.load %arg2[%c0_46, %c0_47] : memref<36x8xbf16, #tpu.memory_space<vmem>>, vector<36x8xbf16>
    %cst_48 = arith.constant dense<0.000000e+00> : vector<256x8xf32>
    %34 = tpu.matmul %32, %33, %cst_48 {dimension_numbers = #tpu.dot_dimension_numbers<[1], [0], [0], [1], [0, 0, 1, 1], [], []>} : vector<256x36xbf16>, vector<36x8xbf16>, vector<256x8xf32> -> vector<256x8xf32>
    %35 = arith.truncf %34 : vector<256x8xf32> to vector<256x8xbf16>
    %c0_49 = arith.constant 0 : index
    %c0_50 = arith.constant 0 : index
    %c0_51 = arith.constant 0 : index
    %36 = vector.load %arg3[%c0_49, %c0_50, %c0_51] : memref<1x256x8xbf16, #tpu.memory_space<vmem>>, vector<1x256x8xbf16>
    %37 = vector.shape_cast %36 : vector<1x256x8xbf16> to vector<256x8xbf16>
    %38 = vector.shape_cast %35 : vector<256x8xbf16> to vector<1x256x8xbf16>
    tpu.vector_store %arg3[%c0_49, %c0_50, %c0_51], %38 {strides = array<i32>} : memref<1x256x8xbf16, #tpu.memory_space<vmem>>, vector<1x256x8xbf16>,
    %cst_52 = arith.constant dense<0.000000e+00> : vector<8xf32>
    %39 = vector.multi_reduction <add>, %34, %cst_52 [0] : vector<256x8xf32> to vector<8xf32>
    %40 = vector.shape_cast %39 : vector<8xf32> to vector<1x8xf32>
    %c0_53 = arith.constant 0 : index
    %c0_54 = arith.constant 0 : index
    %c0_55 = arith.constant 0 : index
    %41 = vector.load %arg4[%c0_53, %c0_54, %c0_55] : memref<1x2x8xf32, #tpu.memory_space<vmem>>, vector<1x1x8xf32>
    %42 = vector.shape_cast %41 : vector<1x1x8xf32> to vector<1x8xf32>
    %43 = vector.shape_cast %40 : vector<1x8xf32> to vector<1x1x8xf32>
    tpu.vector_store %arg4[%c0_53, %c0_54, %c0_55], %43 {strides = array<i32>} : memref<1x2x8xf32, #tpu.memory_space<vmem>>, vector<1x1x8xf32>,
    %44 = arith.mulf %34, %34 : vector<256x8xf32>
    %cst_56 = arith.constant dense<0.000000e+00> : vector<8xf32>
    %45 = vector.multi_reduction <add>, %44, %cst_56 [0] : vector<256x8xf32> to vector<8xf32>
    %46 = vector.shape_cast %45 : vector<8xf32> to vector<1x8xf32>
    %c0_57 = arith.constant 0 : index
    %c1_58 = arith.constant 1 : index
    %c0_59 = arith.constant 0 : index
    %47 = vector.load %arg4[%c0_57, %c1_58, %c0_59] : memref<1x2x8xf32, #tpu.memory_space<vmem>>, vector<1x1x8xf32>
    %48 = vector.shape_cast %47 : vector<1x1x8xf32> to vector<1x8xf32>
    %49 = vector.shape_cast %46 : vector<1x8xf32> to vector<1x1x8xf32>
    tpu.vector_store %arg4[%c0_57, %c1_58, %c0_59], %49 {strides = array<i32>} : memref<1x2x8xf32, #tpu.memory_space<vmem>>, vector<1x1x8xf32>,
    return
  }
  func.func @transform_0(%arg0: i32) -> (i32, i32, i32, i32) {
    %c0_i32 = arith.constant 0 : i32
    %c0_i32_0 = arith.constant 0 : i32
    %c0_i32_1 = arith.constant 0 : i32
    %c0_i32_2 = arith.constant 0 : i32
    return %arg0, %c0_i32, %c0_i32_0, %c0_i32_1 : i32, i32, i32, i32
  }
  func.func @transform_1(%arg0: i32) -> (i32, i32) {
    %c0_i32 = arith.constant 0 : i32
    %c0_i32_0 = arith.constant 0 : i32
    %c0_i32_1 = arith.constant 0 : i32
    return %c0_i32, %c0_i32_0 : i32, i32
  }
  func.func @transform_2(%arg0: i32) -> (i32, i32, i32) {
    %c0_i32 = arith.constant 0 : i32
    %c0_i32_0 = arith.constant 0 : i32
    %c0_i32_1 = arith.constant 0 : i32
    return %arg0, %c0_i32, %c0_i32_0 : i32, i32, i32
  }
  func.func @transform_3(%arg0: i32) -> (i32, i32, i32) {
    %c0_i32 = arith.constant 0 : i32
    %c0_i32_0 = arith.constant 0 : i32
    %c0_i32_1 = arith.constant 0 : i32
    return %arg0, %c0_i32, %c0_i32_0 : i32, i32, i32
  }
}

module attributes {stable_mosaic.version = 11 : i64} {
  func.func @_bn_relu_conv2_kernel(%arg0: i32, %arg1: memref<1x256x8xbf16, #tpu.memory_space<vmem>>, %arg2: memref<1x8xf32, #tpu.memory_space<vmem>>, %arg3: memref<1x8xf32, #tpu.memory_space<vmem>>, %arg4: memref<72x8xbf16, #tpu.memory_space<vmem>>, %arg5: memref<1x256x8xbf16, #tpu.memory_space<vmem>>, %arg6: memref<1x2x8xf32, #tpu.memory_space<vmem>>, %arg7: memref<18x18x8xbf16, #tpu.memory_space<vmem>>, %arg8: memref<256x72xbf16, #tpu.memory_space<vmem>>) attributes {dimension_semantics = [#tpu.dimension_semantics<parallel>], iteration_bounds = array<i64: 2>, scalar_prefetch = 0 : i64, scratch_operands = 2 : i64, tpu.core_type = #tpu.core_type<tc>, window_params = [{transform_indices = @transform_0, window_bounds = array<i64: 1, 256, 8>}, {pipeline_mode = #tpu.pipeline_mode<synchronous>, transform_indices = @transform_1, window_bounds = array<i64: 1, 8>}, {pipeline_mode = #tpu.pipeline_mode<synchronous>, transform_indices = @transform_2, window_bounds = array<i64: 1, 8>}, {pipeline_mode = #tpu.pipeline_mode<synchronous>, transform_indices = @transform_3, window_bounds = array<i64: 72, 8>}, {transform_indices = @transform_4, window_bounds = array<i64: 1, 256, 8>}, {transform_indices = @transform_5, window_bounds = array<i64: 1, 2, 8>}]} {
    %c0 = arith.constant 0 : index
    %c0_0 = arith.constant 0 : index
    %c0_1 = arith.constant 0 : index
    %0 = vector.load %arg1[%c0, %c0_0, %c0_1] : memref<1x256x8xbf16, #tpu.memory_space<vmem>>, vector<1x256x8xbf16>
    %1 = vector.shape_cast %0 : vector<1x256x8xbf16> to vector<256x8xbf16>
    %2 = arith.extf %1 : vector<256x8xbf16> to vector<256x8xf32>
    %c0_2 = arith.constant 0 : index
    %c0_3 = arith.constant 0 : index
    %3 = vector.load %arg2[%c0_2, %c0_3] : memref<1x8xf32, #tpu.memory_space<vmem>>, vector<1x8xf32>
    %4 = vector.broadcast %3 : vector<1x8xf32> to vector<256x8xf32>
    %5 = arith.mulf %2, %4 : vector<256x8xf32>
    %c0_4 = arith.constant 0 : index
    %c0_5 = arith.constant 0 : index
    %6 = vector.load %arg3[%c0_4, %c0_5] : memref<1x8xf32, #tpu.memory_space<vmem>>, vector<1x8xf32>
    %7 = vector.broadcast %6 : vector<1x8xf32> to vector<256x8xf32>
    %8 = arith.addf %5, %7 : vector<256x8xf32>
    %cst = arith.constant 0.000000e+00 : f32
    %9 = vector.broadcast %cst : f32 to vector<256x8xf32>
    %10 = arith.maximumf %8, %9 : vector<256x8xf32>
    %11 = arith.truncf %10 : vector<256x8xf32> to vector<256x8xbf16>
    %12 = vector.shape_cast %11 : vector<256x8xbf16> to vector<16x16x8xbf16>
    %cst_6 = arith.constant 0.000000e+00 : bf16
    %13 = vector.broadcast %cst_6 : bf16 to vector<18x18x8xbf16>
    %c0_7 = arith.constant 0 : index
    %c0_8 = arith.constant 0 : index
    %c0_9 = arith.constant 0 : index
    %14 = vector.load %arg7[%c0_7, %c0_8, %c0_9] : memref<18x18x8xbf16, #tpu.memory_space<vmem>>, vector<18x18x8xbf16>
    tpu.vector_store %arg7[%c0_7, %c0_8, %c0_9], %13 {strides = array<i32>} : memref<18x18x8xbf16, #tpu.memory_space<vmem>>, vector<18x18x8xbf16>,
    %c1 = arith.constant 1 : index
    %c1_10 = arith.constant 1 : index
    %c0_11 = arith.constant 0 : index
    %15 = vector.load %arg7[%c1, %c1_10, %c0_11] : memref<18x18x8xbf16, #tpu.memory_space<vmem>>, vector<16x16x8xbf16>
    tpu.vector_store %arg7[%c1, %c1_10, %c0_11], %12 {strides = array<i32>} : memref<18x18x8xbf16, #tpu.memory_space<vmem>>, vector<16x16x8xbf16>,
    %c0_12 = arith.constant 0 : index
    %c0_13 = arith.constant 0 : index
    %c0_14 = arith.constant 0 : index
    %16 = vector.load %arg7[%c0_12, %c0_13, %c0_14] : memref<18x18x8xbf16, #tpu.memory_space<vmem>>, vector<16x16x8xbf16>
    %17 = vector.shape_cast %16 : vector<16x16x8xbf16> to vector<256x8xbf16>
    %c0_15 = arith.constant 0 : index
    %c0_16 = arith.constant 0 : index
    %18 = vector.load %arg8[%c0_15, %c0_16] : memref<256x72xbf16, #tpu.memory_space<vmem>>, vector<256x8xbf16>
    tpu.vector_store %arg8[%c0_15, %c0_16], %17 {strides = array<i32>} : memref<256x72xbf16, #tpu.memory_space<vmem>>, vector<256x8xbf16>,
    %c0_17 = arith.constant 0 : index
    %c1_18 = arith.constant 1 : index
    %c0_19 = arith.constant 0 : index
    %19 = vector.load %arg7[%c0_17, %c1_18, %c0_19] : memref<18x18x8xbf16, #tpu.memory_space<vmem>>, vector<16x16x8xbf16>
    %20 = vector.shape_cast %19 : vector<16x16x8xbf16> to vector<256x8xbf16>
    %c0_20 = arith.constant 0 : index
    %c8 = arith.constant 8 : index
    %21 = vector.load %arg8[%c0_20, %c8] : memref<256x72xbf16, #tpu.memory_space<vmem>>, vector<256x8xbf16>
    tpu.vector_store %arg8[%c0_20, %c8], %20 {strides = array<i32>} : memref<256x72xbf16, #tpu.memory_space<vmem>>, vector<256x8xbf16>,
    %c0_21 = arith.constant 0 : index
    %c2 = arith.constant 2 : index
    %c0_22 = arith.constant 0 : index
    %22 = vector.load %arg7[%c0_21, %c2, %c0_22] : memref<18x18x8xbf16, #tpu.memory_space<vmem>>, vector<16x16x8xbf16>
    %23 = vector.shape_cast %22 : vector<16x16x8xbf16> to vector<256x8xbf16>
    %c0_23 = arith.constant 0 : index
    %c16 = arith.constant 16 : index
    %24 = vector.load %arg8[%c0_23, %c16] : memref<256x72xbf16, #tpu.memory_space<vmem>>, vector<256x8xbf16>
    tpu.vector_store %arg8[%c0_23, %c16], %23 {strides = array<i32>} : memref<256x72xbf16, #tpu.memory_space<vmem>>, vector<256x8xbf16>,
    %c1_24 = arith.constant 1 : index
    %c0_25 = arith.constant 0 : index
    %c0_26 = arith.constant 0 : index
    %25 = vector.load %arg7[%c1_24, %c0_25, %c0_26] : memref<18x18x8xbf16, #tpu.memory_space<vmem>>, vector<16x16x8xbf16>
    %26 = vector.shape_cast %25 : vector<16x16x8xbf16> to vector<256x8xbf16>
    %c0_27 = arith.constant 0 : index
    %c24 = arith.constant 24 : index
    %27 = vector.load %arg8[%c0_27, %c24] : memref<256x72xbf16, #tpu.memory_space<vmem>>, vector<256x8xbf16>
    tpu.vector_store %arg8[%c0_27, %c24], %26 {strides = array<i32>} : memref<256x72xbf16, #tpu.memory_space<vmem>>, vector<256x8xbf16>,
    %c1_28 = arith.constant 1 : index
    %c1_29 = arith.constant 1 : index
    %c0_30 = arith.constant 0 : index
    %28 = vector.load %arg7[%c1_28, %c1_29, %c0_30] : memref<18x18x8xbf16, #tpu.memory_space<vmem>>, vector<16x16x8xbf16>
    %29 = vector.shape_cast %28 : vector<16x16x8xbf16> to vector<256x8xbf16>
    %c0_31 = arith.constant 0 : index
    %c32 = arith.constant 32 : index
    %30 = vector.load %arg8[%c0_31, %c32] : memref<256x72xbf16, #tpu.memory_space<vmem>>, vector<256x8xbf16>
    tpu.vector_store %arg8[%c0_31, %c32], %29 {strides = array<i32>} : memref<256x72xbf16, #tpu.memory_space<vmem>>, vector<256x8xbf16>,
    %c1_32 = arith.constant 1 : index
    %c2_33 = arith.constant 2 : index
    %c0_34 = arith.constant 0 : index
    %31 = vector.load %arg7[%c1_32, %c2_33, %c0_34] : memref<18x18x8xbf16, #tpu.memory_space<vmem>>, vector<16x16x8xbf16>
    %32 = vector.shape_cast %31 : vector<16x16x8xbf16> to vector<256x8xbf16>
    %c0_35 = arith.constant 0 : index
    %c40 = arith.constant 40 : index
    %33 = vector.load %arg8[%c0_35, %c40] : memref<256x72xbf16, #tpu.memory_space<vmem>>, vector<256x8xbf16>
    tpu.vector_store %arg8[%c0_35, %c40], %32 {strides = array<i32>} : memref<256x72xbf16, #tpu.memory_space<vmem>>, vector<256x8xbf16>,
    %c2_36 = arith.constant 2 : index
    %c0_37 = arith.constant 0 : index
    %c0_38 = arith.constant 0 : index
    %34 = vector.load %arg7[%c2_36, %c0_37, %c0_38] : memref<18x18x8xbf16, #tpu.memory_space<vmem>>, vector<16x16x8xbf16>
    %35 = vector.shape_cast %34 : vector<16x16x8xbf16> to vector<256x8xbf16>
    %c0_39 = arith.constant 0 : index
    %c48 = arith.constant 48 : index
    %36 = vector.load %arg8[%c0_39, %c48] : memref<256x72xbf16, #tpu.memory_space<vmem>>, vector<256x8xbf16>
    tpu.vector_store %arg8[%c0_39, %c48], %35 {strides = array<i32>} : memref<256x72xbf16, #tpu.memory_space<vmem>>, vector<256x8xbf16>,
    %c2_40 = arith.constant 2 : index
    %c1_41 = arith.constant 1 : index
    %c0_42 = arith.constant 0 : index
    %37 = vector.load %arg7[%c2_40, %c1_41, %c0_42] : memref<18x18x8xbf16, #tpu.memory_space<vmem>>, vector<16x16x8xbf16>
    %38 = vector.shape_cast %37 : vector<16x16x8xbf16> to vector<256x8xbf16>
    %c0_43 = arith.constant 0 : index
    %c56 = arith.constant 56 : index
    %39 = vector.load %arg8[%c0_43, %c56] : memref<256x72xbf16, #tpu.memory_space<vmem>>, vector<256x8xbf16>
    tpu.vector_store %arg8[%c0_43, %c56], %38 {strides = array<i32>} : memref<256x72xbf16, #tpu.memory_space<vmem>>, vector<256x8xbf16>,
    %c2_44 = arith.constant 2 : index
    %c2_45 = arith.constant 2 : index
    %c0_46 = arith.constant 0 : index
    %40 = vector.load %arg7[%c2_44, %c2_45, %c0_46] : memref<18x18x8xbf16, #tpu.memory_space<vmem>>, vector<16x16x8xbf16>
    %41 = vector.shape_cast %40 : vector<16x16x8xbf16> to vector<256x8xbf16>
    %c0_47 = arith.constant 0 : index
    %c64 = arith.constant 64 : index
    %42 = vector.load %arg8[%c0_47, %c64] : memref<256x72xbf16, #tpu.memory_space<vmem>>, vector<256x8xbf16>
    tpu.vector_store %arg8[%c0_47, %c64], %41 {strides = array<i32>} : memref<256x72xbf16, #tpu.memory_space<vmem>>, vector<256x8xbf16>,
    %c0_48 = arith.constant 0 : index
    %c0_49 = arith.constant 0 : index
    %43 = vector.load %arg8[%c0_48, %c0_49] : memref<256x72xbf16, #tpu.memory_space<vmem>>, vector<256x72xbf16>
    %c0_50 = arith.constant 0 : index
    %c0_51 = arith.constant 0 : index
    %44 = vector.load %arg4[%c0_50, %c0_51] : memref<72x8xbf16, #tpu.memory_space<vmem>>, vector<72x8xbf16>
    %cst_52 = arith.constant dense<0.000000e+00> : vector<256x8xf32>
    %45 = tpu.matmul %43, %44, %cst_52 {dimension_numbers = #tpu.dot_dimension_numbers<[1], [0], [0], [1], [0, 0, 1, 1], [], []>} : vector<256x72xbf16>, vector<72x8xbf16>, vector<256x8xf32> -> vector<256x8xf32>
    %46 = arith.truncf %45 : vector<256x8xf32> to vector<256x8xbf16>
    %c0_53 = arith.constant 0 : index
    %c0_54 = arith.constant 0 : index
    %c0_55 = arith.constant 0 : index
    %47 = vector.load %arg5[%c0_53, %c0_54, %c0_55] : memref<1x256x8xbf16, #tpu.memory_space<vmem>>, vector<1x256x8xbf16>
    %48 = vector.shape_cast %47 : vector<1x256x8xbf16> to vector<256x8xbf16>
    %49 = vector.shape_cast %46 : vector<256x8xbf16> to vector<1x256x8xbf16>
    tpu.vector_store %arg5[%c0_53, %c0_54, %c0_55], %49 {strides = array<i32>} : memref<1x256x8xbf16, #tpu.memory_space<vmem>>, vector<1x256x8xbf16>,
    %cst_56 = arith.constant dense<0.000000e+00> : vector<8xf32>
    %50 = vector.multi_reduction <add>, %45, %cst_56 [0] : vector<256x8xf32> to vector<8xf32>
    %51 = vector.shape_cast %50 : vector<8xf32> to vector<1x8xf32>
    %c0_57 = arith.constant 0 : index
    %c0_58 = arith.constant 0 : index
    %c0_59 = arith.constant 0 : index
    %52 = vector.load %arg6[%c0_57, %c0_58, %c0_59] : memref<1x2x8xf32, #tpu.memory_space<vmem>>, vector<1x1x8xf32>
    %53 = vector.shape_cast %52 : vector<1x1x8xf32> to vector<1x8xf32>
    %54 = vector.shape_cast %51 : vector<1x8xf32> to vector<1x1x8xf32>
    tpu.vector_store %arg6[%c0_57, %c0_58, %c0_59], %54 {strides = array<i32>} : memref<1x2x8xf32, #tpu.memory_space<vmem>>, vector<1x1x8xf32>,
    %55 = arith.mulf %45, %45 : vector<256x8xf32>
    %cst_60 = arith.constant dense<0.000000e+00> : vector<8xf32>
    %56 = vector.multi_reduction <add>, %55, %cst_60 [0] : vector<256x8xf32> to vector<8xf32>
    %57 = vector.shape_cast %56 : vector<8xf32> to vector<1x8xf32>
    %c0_61 = arith.constant 0 : index
    %c1_62 = arith.constant 1 : index
    %c0_63 = arith.constant 0 : index
    %58 = vector.load %arg6[%c0_61, %c1_62, %c0_63] : memref<1x2x8xf32, #tpu.memory_space<vmem>>, vector<1x1x8xf32>
    %59 = vector.shape_cast %58 : vector<1x1x8xf32> to vector<1x8xf32>
    %60 = vector.shape_cast %57 : vector<1x8xf32> to vector<1x1x8xf32>
    tpu.vector_store %arg6[%c0_61, %c1_62, %c0_63], %60 {strides = array<i32>} : memref<1x2x8xf32, #tpu.memory_space<vmem>>, vector<1x1x8xf32>,
    return
  }
  func.func @transform_0(%arg0: i32) -> (i32, i32, i32) {
    %c0_i32 = arith.constant 0 : i32
    %c0_i32_0 = arith.constant 0 : i32
    %c0_i32_1 = arith.constant 0 : i32
    return %arg0, %c0_i32, %c0_i32_0 : i32, i32, i32
  }
  func.func @transform_1(%arg0: i32) -> (i32, i32) {
    %c0_i32 = arith.constant 0 : i32
    %c0_i32_0 = arith.constant 0 : i32
    %c0_i32_1 = arith.constant 0 : i32
    return %c0_i32, %c0_i32_0 : i32, i32
  }
  func.func @transform_2(%arg0: i32) -> (i32, i32) {
    %c0_i32 = arith.constant 0 : i32
    %c0_i32_0 = arith.constant 0 : i32
    %c0_i32_1 = arith.constant 0 : i32
    return %c0_i32, %c0_i32_0 : i32, i32
  }
  func.func @transform_3(%arg0: i32) -> (i32, i32) {
    %c0_i32 = arith.constant 0 : i32
    %c0_i32_0 = arith.constant 0 : i32
    %c0_i32_1 = arith.constant 0 : i32
    return %c0_i32, %c0_i32_0 : i32, i32
  }
  func.func @transform_4(%arg0: i32) -> (i32, i32, i32) {
    %c0_i32 = arith.constant 0 : i32
    %c0_i32_0 = arith.constant 0 : i32
    %c0_i32_1 = arith.constant 0 : i32
    return %arg0, %c0_i32, %c0_i32_0 : i32, i32, i32
  }
  func.func @transform_5(%arg0: i32) -> (i32, i32, i32) {
    %c0_i32 = arith.constant 0 : i32
    %c0_i32_0 = arith.constant 0 : i32
    %c0_i32_1 = arith.constant 0 : i32
    return %arg0, %c0_i32, %c0_i32_0 : i32, i32, i32
  }
}

module attributes {stable_mosaic.version = 11 : i64} {
  func.func @_bn_residual_kernel(%arg0: i32, %arg1: memref<1x256x8xbf16, #tpu.memory_space<vmem>>, %arg2: memref<1x8xf32, #tpu.memory_space<vmem>>, %arg3: memref<1x8xf32, #tpu.memory_space<vmem>>, %arg4: memref<1x16x16x4xbf16, #tpu.memory_space<vmem>>, %arg5: memref<4x8xbf16, #tpu.memory_space<vmem>>, %arg6: memref<1x256x8xf32, #tpu.memory_space<vmem>>) attributes {dimension_semantics = [#tpu.dimension_semantics<parallel>], iteration_bounds = array<i64: 2>, scalar_prefetch = 0 : i64, scratch_operands = 0 : i64, tpu.core_type = #tpu.core_type<tc>, window_params = [{transform_indices = @transform_0, window_bounds = array<i64: 1, 256, 8>}, {pipeline_mode = #tpu.pipeline_mode<synchronous>, transform_indices = @transform_1, window_bounds = array<i64: 1, 8>}, {pipeline_mode = #tpu.pipeline_mode<synchronous>, transform_indices = @transform_2, window_bounds = array<i64: 1, 8>}, {transform_indices = @transform_3, window_bounds = array<i64: 1, 16, 16, 4>}, {pipeline_mode = #tpu.pipeline_mode<synchronous>, transform_indices = @transform_4, window_bounds = array<i64: 4, 8>}, {transform_indices = @transform_5, window_bounds = array<i64: 1, 256, 8>}]} {
    %c0 = arith.constant 0 : index
    %c0_0 = arith.constant 0 : index
    %c0_1 = arith.constant 0 : index
    %c0_2 = arith.constant 0 : index
    %0 = vector.load %arg4[%c0, %c0_0, %c0_1, %c0_2] : memref<1x16x16x4xbf16, #tpu.memory_space<vmem>>, vector<1x16x16x4xbf16>
    %1 = vector.shape_cast %0 : vector<1x16x16x4xbf16> to vector<16x16x4xbf16>
    %2 = vector.shape_cast %1 : vector<16x16x4xbf16> to vector<256x4xbf16>
    %c0_3 = arith.constant 0 : index
    %c0_4 = arith.constant 0 : index
    %3 = vector.load %arg5[%c0_3, %c0_4] : memref<4x8xbf16, #tpu.memory_space<vmem>>, vector<4x8xbf16>
    %cst = arith.constant dense<0.000000e+00> : vector<256x8xf32>
    %4 = tpu.matmul %2, %3, %cst {dimension_numbers = #tpu.dot_dimension_numbers<[1], [0], [0], [1], [0, 0, 1, 1], [], []>} : vector<256x4xbf16>, vector<4x8xbf16>, vector<256x8xf32> -> vector<256x8xf32>
    %c0_5 = arith.constant 0 : index
    %c0_6 = arith.constant 0 : index
    %c0_7 = arith.constant 0 : index
    %5 = vector.load %arg1[%c0_5, %c0_6, %c0_7] : memref<1x256x8xbf16, #tpu.memory_space<vmem>>, vector<1x256x8xbf16>
    %6 = vector.shape_cast %5 : vector<1x256x8xbf16> to vector<256x8xbf16>
    %7 = arith.extf %6 : vector<256x8xbf16> to vector<256x8xf32>
    %c0_8 = arith.constant 0 : index
    %c0_9 = arith.constant 0 : index
    %8 = vector.load %arg2[%c0_8, %c0_9] : memref<1x8xf32, #tpu.memory_space<vmem>>, vector<1x8xf32>
    %9 = vector.broadcast %8 : vector<1x8xf32> to vector<256x8xf32>
    %10 = arith.mulf %7, %9 : vector<256x8xf32>
    %c0_10 = arith.constant 0 : index
    %c0_11 = arith.constant 0 : index
    %11 = vector.load %arg3[%c0_10, %c0_11] : memref<1x8xf32, #tpu.memory_space<vmem>>, vector<1x8xf32>
    %12 = vector.broadcast %11 : vector<1x8xf32> to vector<256x8xf32>
    %13 = arith.addf %10, %12 : vector<256x8xf32>
    %14 = arith.addf %13, %4 : vector<256x8xf32>
    %cst_12 = arith.constant 0.000000e+00 : f32
    %15 = vector.broadcast %cst_12 : f32 to vector<256x8xf32>
    %16 = arith.maximumf %14, %15 : vector<256x8xf32>
    %c0_13 = arith.constant 0 : index
    %c0_14 = arith.constant 0 : index
    %c0_15 = arith.constant 0 : index
    %17 = vector.load %arg6[%c0_13, %c0_14, %c0_15] : memref<1x256x8xf32, #tpu.memory_space<vmem>>, vector<1x256x8xf32>
    %18 = vector.shape_cast %17 : vector<1x256x8xf32> to vector<256x8xf32>
    %19 = vector.shape_cast %16 : vector<256x8xf32> to vector<1x256x8xf32>
    tpu.vector_store %arg6[%c0_13, %c0_14, %c0_15], %19 {strides = array<i32>} : memref<1x256x8xf32, #tpu.memory_space<vmem>>, vector<1x256x8xf32>,
    return
  }
  func.func @transform_0(%arg0: i32) -> (i32, i32, i32) {
    %c0_i32 = arith.constant 0 : i32
    %c0_i32_0 = arith.constant 0 : i32
    %c0_i32_1 = arith.constant 0 : i32
    return %arg0, %c0_i32, %c0_i32_0 : i32, i32, i32
  }
  func.func @transform_1(%arg0: i32) -> (i32, i32) {
    %c0_i32 = arith.constant 0 : i32
    %c0_i32_0 = arith.constant 0 : i32
    %c0_i32_1 = arith.constant 0 : i32
    return %c0_i32, %c0_i32_0 : i32, i32
  }
  func.func @transform_2(%arg0: i32) -> (i32, i32) {
    %c0_i32 = arith.constant 0 : i32
    %c0_i32_0 = arith.constant 0 : i32
    %c0_i32_1 = arith.constant 0 : i32
    return %c0_i32, %c0_i32_0 : i32, i32
  }
  func.func @transform_3(%arg0: i32) -> (i32, i32, i32, i32) {
    %c0_i32 = arith.constant 0 : i32
    %c0_i32_0 = arith.constant 0 : i32
    %c0_i32_1 = arith.constant 0 : i32
    %c0_i32_2 = arith.constant 0 : i32
    return %arg0, %c0_i32, %c0_i32_0, %c0_i32_1 : i32, i32, i32, i32
  }
  func.func @transform_4(%arg0: i32) -> (i32, i32) {
    %c0_i32 = arith.constant 0 : i32
    %c0_i32_0 = arith.constant 0 : i32
    %c0_i32_1 = arith.constant 0 : i32
    return %c0_i32, %c0_i32_0 : i32, i32
  }
  func.func @transform_5(%arg0: i32) -> (i32, i32, i32) {
    %c0_i32 = arith.constant 0 : i32
    %c0_i32_0 = arith.constant 0 : i32
    %c0_i32_1 = arith.constant 0 : i32
    return %arg0, %c0_i32, %c0_i32_0 : i32, i32, i32
  }
}

</mosaic_0001>

<bundles_post_ra>
// kernel: resconv_block.5
= control target key start
LH: loop header
LB: loop body
LE: loop exit
PB: predicated region body
PF: predicated region fallthrough
CT: control target
= control target key end

     0   :  { %s1125_s18 = smov 0   ;;  %s1401_s0 = inlined_call_operand.vmem [shape: bf16[2,256,8], index: 0, kind: input, shape index: {}]   ;;  %s1402_s1 = inlined_call_operand.vmem [shape: f32[1,8], index: 1, kind: input, shape index: {}]   ;;  %s1403_s2 = inlined_call_operand.vmem [shape: f32[1,8], index: 2, kind: input, shape index: {}]   ;;  %s1404_s3 = inlined_call_operand.vmem [shape: bf16[2,16,16,4], index: 3, kind: input, shape index: {}]   ;;  %s1405_s4 = inlined_call_operand.vmem [shape: bf16[4,8], index: 4, kind: input, shape index: {}]   ;;  %s1406_s5 = inlined_call_operand.vmem [shape: f32[2,256,8], index: 5, kind: output, shape index: {}]  }
   0x1 LB: > { %s879_s19 = sadd.s32 4294967295, %s1093_s18   ;;  %p883_p0 = scmp.ge.s32.totalorder %s1093_s18, 1  ;;  %s1093_s18 = sphi %s1125_s18, %s15_s18  }
   0x2   : > { %p197_p1 = scmp.lt.s32.totalorder %s1093_s18, 3 }
   0x4   : > { %p198_p2 = pnand %p883_p0, %p197_p1 }
   0x5   : > { %v278_v0 = vld [vmem:[%s1405_s4] sm:$0x3] (!%p198_p2)  ;;  %vm408_vm0 = vcmask (!%p198_p2), 1041408   ;;  %p230_p3 = scmp.lt.s32.totalorder (!%p198_p2), %s879_s19, 1  ;;  %vm359_vm1 = vcmask (!%p198_p2), 31744   ;;  %vm779_vm2 = vcmask (!%p198_p2), 64512  }
   0x6   : > { %201 = sbr.rel (%p198_p2) target bundleno = 263 (0x107), region = 40  ;;  %1061 = vmatprep.subr.msk.bf16.mxu0 (!%p198_p2), %vm408_vm0, %v278_v0  ;;  %1062 = vmatprep.subr.msk.bf16.mxu1 (!%p198_p2), %vm408_vm0, %v278_v0  ;;  %v410_v1 = vsel (!%p198_p2), %vm408_vm0, %v278_v0, 0  ;;  %v1192_v23 = vld [vmem:[%s1402_s1] ss:$0 sm:$0xff] (!%p198_p2) }
   0x7   : > { %1026 = vmatpush3.bf16.msra.mxu0 (!%p198_p2), %v410_v1  ;;  %1060 = vmatpush3.bf16.msra.mxu1 (!%p198_p2), %v410_v1  ;;  %v1202_v33 = vld [vmem:[%s1403_s2] ss:$0 sm:$0xff] (!%p198_p2) }
   0xd   : > { %s1408_s19 = smov (!%p230_p3, %s879_s19), 1 }
   0xe   : > { %s926_s22 = sshll.u32 %s1408_s19, 7  ;;  %s928_s8 = sshll.u32 %s1408_s19, 8 }
   0xf   : > { %s1144_s25 = scalar_lea.vmem %s1404_s3, %s926_s22  ;;  %s1183_s28 = scalar_lea.vmem %s1401_s0, %s926_s22 }
  0x10   : > { %v1071_v2 = vld [vmem:[%s1144_s25] sm:$0xff]   ;;  %v1073_v4 = vld [vmem:[%s1144_s25 + $0x8] sm:$0xff]   ;;  %v1075_v6 = vld [vmem:[%s1144_s25 + $0x10] sm:$0xff]   ;;  %s1266_s11 = scalar_lea.vmem %s1406_s5, %s928_s8 }
  0x11   : > { %v1072_v3 = vld [vmem:[%s1144_s25 + $0x40] sm:$0xff]   ;;  %1027 = vmatprep.mubr.msk.bf16.mxu0 %vm359_vm1, %v1071_v2  ;;  %v1074_v5 = vld [vmem:[%s1144_s25 + $0x48] sm:$0xff]   ;;  %v1076_v7 = vld [vmem:[%s1144_s25 + $0x50] sm:$0xff]  }
  0x12   : > { %1043 = vmatprep.mubr.msk.bf16.mxu1 %vm359_vm1, %v1072_v3  ;;  %1028 = vmatmul.mubr.msk.bf16.vlgmr.msra.gmra.mrb[0].mxu0 %vm359_vm1, %v1073_v4  ;;  %v1077_v8 = vld [vmem:[%s1144_s25 + $0x18] sm:$0xff]   ;;  %v1079_v10 = vld [vmem:[%s1144_s25 + $0x20] sm:$0xff]   ;;  %v1081_v12 = vld [vmem:[%s1144_s25 + $0x28] sm:$0xff]  }
  0x13   : > { %1044 = vmatmul.mubr.msk.bf16.vlgmr.msra.gmra.mrb[0].mxu1 %vm359_vm1, %v1074_v5  ;;  %1031 = vmatprep.mubr.msk.bf16.mxu0 %vm359_vm1, %v1075_v6  ;;  %v1078_v9 = vld [vmem:[%s1144_s25 + $0x58] sm:$0xff]   ;;  %v1080_v11 = vld [vmem:[%s1144_s25 + $0x60] sm:$0xff]   ;;  %v1082_v13 = vld [vmem:[%s1144_s25 + $0x68] sm:$0xff]  }
  0x14   : > { %1047 = vmatprep.mubr.msk.bf16.mxu1 %vm359_vm1, %v1076_v7  ;;  %v1083_v14 = vld [vmem:[%s1144_s25 + $0x30] sm:$0xff]   ;;  %v1085_v16 = vld [vmem:[%s1144_s25 + $0x38] sm:$0xff]   ;;  %v993_v18 = vld [vmem:[%s1183_s28 + $0x8] sm:$0xff]  }
  0x15   : > { %v1084_v15 = vld [vmem:[%s1144_s25 + $0x70] sm:$0xff]   ;;  %v1086_v17 = vld [vmem:[%s1144_s25 + $0x78] sm:$0xff]   ;;  %v1001_v19 = vld [vmem:[%s1183_s28 + $0x48] sm:$0xff]   ;;  %v935_v22 = vunpack.c.l.bf16 %v993_v18  ;;  %v936_v27 = vunpack.c.h.bf16 %v993_v18 }
  0x16   : > { %v930_v20 = vld [vmem:[%s1183_s28] sm:$0xff]   ;;  %v967_v24 = vunpack.c.l.bf16 %v1001_v19  ;;  %v995_v28 = vld [vmem:[%s1183_s28 + $0x18] sm:$0xff]   ;;  %v994_v31 = vld [vmem:[%s1183_s28 + $0x10] sm:$0xff]   ;;  %v968_v36 = vunpack.c.h.bf16 %v1001_v19 }
  0x17   : > { %v1000_v21 = vld [vmem:[%s1183_s28 + $0x40] sm:$0xff]   ;;  %v931_v25 = vunpack.c.l.bf16 %v930_v20  ;;  %v646_v29 = vmul.f32 %v935_v22, %v1192_v23  ;;  %v1003_v30 = vld [vmem:[%s1183_s28 + $0x58] sm:$0xff]   ;;  %v1002_v32 = vld [vmem:[%s1183_s28 + $0x50] sm:$0xff]   ;;  %v932_v37 = vunpack.c.h.bf16 %v930_v20  ;;  %v647_v39 = vmul.f32 %v936_v27, %v1192_v23 }
  0x18   : > { %v963_v26 = vunpack.c.l.bf16 %v1000_v21  ;;  %v662_v34 = vmul.f32 %v967_v24, %v1192_v23  ;;  %v964_v40 = vunpack.c.h.bf16 %v1000_v21  ;;  %v943_v41 = vunpack.c.l.bf16 %v995_v28  ;;  %v1214_v51 = vld [vmem:[%s1183_s28 + $0x28] sm:$0xff]   ;;  %v1227_v61 = vld [vmem:[%s1183_s28 + $0x20] sm:$0xff]  }
  0x19   : > { %v644_v35 = vmul.f32 %v931_v25, %v1192_v23  ;;  %v975_v42 = vunpack.c.l.bf16 %v1003_v30  ;;  %v939_v43 = vunpack.c.l.bf16 %v994_v31  ;;  %v971_v44 = vunpack.c.l.bf16 %v1002_v32  ;;  %v1221_v56 = vld [vmem:[%s1183_s28 + $0x68] sm:$0xff]   ;;  %v1230_v62 = vld [vmem:[%s1183_s28 + $0x60] sm:$0xff]  }
  0x1a   : > { %1032 = vmatmul.mubr.msk.bf16.gmra.mrb[4].mxu0 %vm359_vm1, %v1077_v8  ;;  %v660_v38 = vmul.f32 %v963_v26, %v1192_v23  ;;  %v685_v45 = vadd.f32 %v1202_v33, %v646_v29  ;;  %v944_v46 = vunpack.c.h.bf16 %v995_v28  ;;  %v701_v47 = vadd.f32 %v1202_v33, %v662_v34 }
  0x1b   : > { %1048 = vmatmul.mubr.msk.bf16.gmra.mrb[4].mxu1 %vm359_vm1, %v1078_v9  ;;  %1035 = vmatprep.mubr.msk.bf16.mxu0 %vm359_vm1, %v1079_v10  ;;  %v683_v48 = vadd.f32 %v1202_v33, %v644_v35  ;;  %v663_v49 = vmul.f32 %v968_v36, %v1192_v23  ;;  %v645_v50 = vmul.f32 %v932_v37, %v1192_v23  ;;  %v976_v60 = vunpack.c.h.bf16 %v1003_v30 }
  0x1c   : > { %1051 = vmatprep.mubr.msk.bf16.mxu1 %vm359_vm1, %v1080_v11  ;;  %v699_v52 = vadd.f32 %v1202_v33, %v660_v38  ;;  %v686_v53 = vadd.f32 %v1202_v33, %v647_v39  ;;  %v661_v54 = vmul.f32 %v964_v40, %v1192_v23  ;;  %v650_v55 = vmul.f32 %v943_v41, %v1192_v23 }
  0x1d   : > { %v666_v57 = vmul.f32 %v975_v42, %v1192_v23  ;;  %v648_v58 = vmul.f32 %v939_v43, %v1192_v23  ;;  %v664_v59 = vmul.f32 %v971_v44, %v1192_v23  ;;  %v651_v63 = vmul.f32 %v944_v46, %v1192_v23 }
  0x1e   : > { %v940_v0 = vunpack.c.h.bf16 %v994_v31  ;;  %v972_v1 = vunpack.c.h.bf16 %v1002_v32  ;;  %v951_v2 = vunpack.c.l.bf16 %v1214_v51  ;;  %v702_v3 = vadd.f32 %v1202_v33, %v663_v49 }
  0x1f   : > { %v684_v4 = vadd.f32 %v1202_v33, %v645_v50  ;;  %v983_v5 = vunpack.c.l.bf16 %v1221_v56  ;;  %v700_v6 = vadd.f32 %v1202_v33, %v661_v54  ;;  %v1239_v7 = vadd.f32 %v1202_v33, %v650_v55 }
  0x20   : > { %v947_v8 = vunpack.c.l.bf16 %v1227_v61  ;;  %v979_v9 = vunpack.c.l.bf16 %v1230_v62  ;;  %v1245_v10 = vadd.f32 %v1202_v33, %v666_v57  ;;  %v1248_v11 = vadd.f32 %v1202_v33, %v648_v58  ;;  %v1293_v57 = vld [vmem:[%s1183_s28 + $0x78] sm:$0xff]   ;;  %v1296_v58 = vld [vmem:[%s1183_s28 + $0x30] sm:$0xff]  }
  0x21   : > { %v654_v18 = vmul.f32 %v951_v2, %v1192_v23  ;;  %v670_v22 = vmul.f32 %v983_v5, %v1192_v23  ;;  %v952_v24 = vunpack.c.h.bf16 %v1214_v51  ;;  %v984_v25 = vunpack.c.h.bf16 %v1221_v56 }
  0x22   : > { %1036 = vmatmul.mubr.msk.bf16.gmra.mrb[8].mxu0 %vm359_vm1, %v1081_v12  ;;  %v1251_v12 = vadd.f32 %v1202_v33, %v664_v59  ;;  %v652_v30 = vmul.f32 %v947_v8, %v1192_v23  ;;  %v668_v31 = vmul.f32 %v979_v9, %v1192_v23  ;;  %v948_v38 = vunpack.c.h.bf16 %v1227_v61 }
  0x23   : > { %1052 = vmatmul.mubr.msk.bf16.gmra.mrb[8].mxu1 %vm359_vm1, %v1082_v13  ;;  %1039 = vmatprep.mubr.msk.bf16.mxu0 %vm359_vm1, %v1083_v14  ;;  %v667_v13 = vmul.f32 %v976_v60, %v1192_v23  ;;  %v693_v55 = vadd.f32 %v1202_v33, %v654_v18  ;;  %v1290_v56 = vadd.f32 %v1202_v33, %v670_v22 }
  0x24   : > { %1055 = vmatprep.mubr.msk.bf16.mxu1 %vm359_vm1, %v1084_v15  ;;  %v1255_v15 = vadd.f32 %v1202_v33, %v651_v63  ;;  %v691_v60 = vadd.f32 %v1202_v33, %v652_v30  ;;  %v1304_v61 = vadd.f32 %v1202_v33, %v668_v31  ;;  %v671_v63 = vmul.f32 %v984_v25, %v1192_v23 }
  0x25   : > { %v706_v50 = vadd.f32 %v1202_v33, %v667_v13 }
  0x2a   : > { %1040 = vmatmul.mubr.msk.bf16.gmra.mrb[12].mxu0 %vm359_vm1, %v1085_v16  ;;  %v649_v16 = vmul.f32 %v940_v0, %v1192_v23  ;;  %v1309_v0 = vld [vmem:[%s1183_s28 + $0x70] sm:$0xff]  }
  0x2b   : > { %1056 = vmatmul.mubr.msk.bf16.gmra.mrb[12].mxu1 %vm359_vm1, %v1086_v17  ;;  %v665_v17 = vmul.f32 %v972_v1, %v1192_v23 }
  0x2c   : > { %v688_v51 = vadd.f32 %v1202_v33, %v649_v16  ;;  %v991_v16 = vunpack.c.l.bf16 %v1293_v57 }
  0x2d   : > { %v704_v54 = vadd.f32 %v1202_v33, %v665_v17  ;;  %v955_v17 = vunpack.c.l.bf16 %v1296_v58 }
  0xe5   : > { %v1029_v14 = vpop.f32.mrb[0].mxu0 }
  0xe6   : > { %v717_v19 = vadd.f32 %v1029_v14, %v685_v45  ;;  %v1045_v20 = vpop.f32.mrb[0].mxu1  ;;  %v446_v21 = vpop.f32.mrb[1].mxu0 }
  0xe7   : > { %v733_v26 = vadd.f32 %v1045_v20, %v701_v47  ;;  %v715_v27 = vadd.f32 %v683_v48, %v446_v21  ;;  %v510_v28 = vpop.f32.mrb[1].mxu1  ;;  %v1030_v29 = vpop.f32.mrb[2].mxu0  ;;  %v980_v47 = vunpack.c.h.bf16 %v1230_v62  ;;  %v655_v62 = vmul.f32 %v952_v24, %v1192_v23 }
  0xe8   : > { %v749_v32 = vmax.f32 %v717_v19, 0.0  ;;  %v731_v34 = vadd.f32 %v699_v52, %v510_v28  ;;  %v718_v35 = vadd.f32 %v1030_v29, %v686_v53  ;;  %v1046_v36 = vpop.f32.mrb[2].mxu1  ;;  %v449_v37 = vpop.f32.mrb[3].mxu0  ;;  %v1281_v52 = vld [vmem:[%s1183_s28 + $0x38] sm:$0xff]  }
  0xe9   : > { %v765_v39 = vmax.f32 %v733_v26, 0.0  ;;  %v747_v40 = vmax.f32 %v715_v27, 0.0  ;;  %v734_v41 = vadd.f32 %v1046_v36, %v702_v3  ;;  %v716_v42 = vadd.f32 %v684_v4, %v449_v37  ;;  %v513_v43 = vpop.f32.mrb[3].mxu1 }
  0xea   : > { %782 = vst.msk [vmem:[%s1266_s11 + $0x10] sm:$0xff] %vm779_vm2, %v749_v32  ;;  %v763_v44 = vmax.f32 %v731_v34, 0.0  ;;  %v750_v45 = vmax.f32 %v718_v35, 0.0  ;;  %v732_v46 = vadd.f32 %v700_v6, %v513_v43  ;;  %v653_v4 = vmul.f32 %v948_v38, %v1192_v23 }
  0xeb   : > { %798 = vst.msk [vmem:[%s1266_s11 + $0x90] sm:$0xff] %vm779_vm2, %v765_v39  ;;  %780 = vst.msk [vmem:[%s1266_s11] sm:$0xff] %vm779_vm2, %v747_v40  ;;  %v766_v48 = vmax.f32 %v734_v41, 0.0  ;;  %v748_v49 = vmax.f32 %v716_v42, 0.0  ;;  %v669_v5 = vmul.f32 %v980_v47, %v1192_v23  ;;  %v959_v6 = vunpack.c.l.bf16 %v1281_v52 }
  0xec   : > { %796 = vst.msk [vmem:[%s1266_s11 + $0x80] sm:$0xff] %vm779_vm2, %v763_v44  ;;  %783 = vst.msk [vmem:[%s1266_s11 + $0x18] sm:$0xff] %vm779_vm2, %v750_v45  ;;  %v764_v53 = vmax.f32 %v732_v46, 0.0  ;;  %v960_v31 = vunpack.c.h.bf16 %v1281_v52  ;;  %v992_v32 = vunpack.c.h.bf16 %v1293_v57  ;;  %v694_v35 = vadd.f32 %v1202_v33, %v655_v62 }
  0xed   : > { %799 = vst.msk [vmem:[%s1266_s11 + $0x98] sm:$0xff] %vm779_vm2, %v766_v48  ;;  %781 = vst.msk [vmem:[%s1266_s11 + $0x8] sm:$0xff] %vm779_vm2, %v748_v49  ;;  %v1033_v59 = vpop.f32.mrb[4].mxu0  ;;  %v710_v36 = vadd.f32 %v1202_v33, %v671_v63  ;;  %v956_v37 = vunpack.c.h.bf16 %v1296_v58  ;;  %v692_v39 = vadd.f32 %v1202_v33, %v653_v4  ;;  %v708_v40 = vadd.f32 %v1202_v33, %v669_v5 }
  0xee   : > { %797 = vst.msk [vmem:[%s1266_s11 + $0x88] sm:$0xff] %vm779_vm2, %v764_v53  ;;  %v721_v1 = vadd.f32 %v1033_v59, %v1239_v7  ;;  %v1049_v2 = vpop.f32.mrb[4].mxu1  ;;  %v462_v3 = vpop.f32.mrb[5].mxu0  ;;  %v674_v41 = vmul.f32 %v991_v16, %v1192_v23  ;;  %v656_v42 = vmul.f32 %v955_v17, %v1192_v23  ;;  %v988_v48 = vunpack.c.h.bf16 %v1309_v0 }
  0xef   : > { %v737_v8 = vadd.f32 %v1049_v2, %v1245_v10  ;;  %v719_v9 = vadd.f32 %v1248_v11, %v462_v3  ;;  %v526_v13 = vpop.f32.mrb[5].mxu1  ;;  %v1034_v14 = vpop.f32.mrb[6].mxu0  ;;  %v987_v10 = vunpack.c.l.bf16 %v1309_v0  ;;  %v659_v53 = vmul.f32 %v960_v31, %v1192_v23 }
  0xf0   : > { %v753_v7 = vmax.f32 %v721_v1, 0.0  ;;  %v735_v18 = vadd.f32 %v1251_v12, %v526_v13  ;;  %v722_v19 = vadd.f32 %v1034_v14, %v1255_v15  ;;  %v1050_v20 = vpop.f32.mrb[6].mxu1  ;;  %v465_v21 = vpop.f32.mrb[7].mxu0  ;;  %v658_v15 = vmul.f32 %v959_v6, %v1192_v23 }
  0xf1   : > { %v769_v22 = vmax.f32 %v737_v8, 0.0  ;;  %v751_v11 = vmax.f32 %v719_v9, 0.0  ;;  %v738_v24 = vadd.f32 %v1050_v20, %v706_v50  ;;  %v720_v25 = vadd.f32 %v688_v51, %v465_v21  ;;  %v529_v26 = vpop.f32.mrb[7].mxu1 }
  0xf2   : > { %786 = vst.msk [vmem:[%s1266_s11 + $0x30] sm:$0xff] %vm779_vm2, %v753_v7  ;;  %v767_v27 = vmax.f32 %v735_v18, 0.0  ;;  %v754_v28 = vmax.f32 %v722_v19, 0.0  ;;  %v736_v12 = vadd.f32 %v704_v54, %v529_v26  ;;  %v697_v46 = vadd.f32 %v1202_v33, %v658_v15 }
  0xf3   : > { %802 = vst.msk [vmem:[%s1266_s11 + $0xb0] sm:$0xff] %vm779_vm2, %v769_v22  ;;  %784 = vst.msk [vmem:[%s1266_s11 + $0x20] sm:$0xff] %vm779_vm2, %v751_v11  ;;  %v770_v29 = vmax.f32 %v738_v24, 0.0  ;;  %v752_v30 = vmax.f32 %v720_v25, 0.0  ;;  %v672_v47 = vmul.f32 %v987_v10, %v1192_v23  ;;  %v675_v54 = vmul.f32 %v992_v32, %v1192_v23 }
  0xf4   : > { %800 = vst.msk [vmem:[%s1266_s11 + $0xa0] sm:$0xff] %vm779_vm2, %v767_v27  ;;  %787 = vst.msk [vmem:[%s1266_s11 + $0x38] sm:$0xff] %vm779_vm2, %v754_v28  ;;  %v768_v34 = vmax.f32 %v736_v12, 0.0  ;;  %v657_v63 = vmul.f32 %v956_v37, %v1192_v23  ;;  %v673_v5 = vmul.f32 %v988_v48, %v1192_v23  ;;  %v713_v9 = vadd.f32 %v1202_v33, %v674_v41 }
  0xf5   : > { %803 = vst.msk [vmem:[%s1266_s11 + $0xb8] sm:$0xff] %vm779_vm2, %v770_v29  ;;  %785 = vst.msk [vmem:[%s1266_s11 + $0x28] sm:$0xff] %vm779_vm2, %v752_v30  ;;  %v1037_v38 = vpop.f32.mrb[8].mxu0  ;;  %v695_v13 = vadd.f32 %v1202_v33, %v656_v42  ;;  %v711_v16 = vadd.f32 %v1202_v33, %v672_v47  ;;  %v698_v23 = vadd.f32 %v1202_v33, %v659_v53 }
  0xf6   : > { %801 = vst.msk [vmem:[%s1266_s11 + $0xa8] sm:$0xff] %vm779_vm2, %v768_v34  ;;  %v725_v43 = vadd.f32 %v1037_v38, %v693_v55  ;;  %v1053_v44 = vpop.f32.mrb[8].mxu1  ;;  %v478_v45 = vpop.f32.mrb[9].mxu0  ;;  %v714_v7 = vadd.f32 %v1202_v33, %v675_v54  ;;  %v696_v18 = vadd.f32 %v1202_v33, %v657_v63  ;;  %v712_v10 = vadd.f32 %v1202_v33, %v673_v5 }
  0xf7   : > { %v741_v49 = vadd.f32 %v1053_v44, %v1290_v56  ;;  %v723_v50 = vadd.f32 %v691_v60, %v478_v45  ;;  %v542_v51 = vpop.f32.mrb[9].mxu1  ;;  %v1038_v52 = vpop.f32.mrb[10].mxu0 }
  0xf8   : > { %v757_v57 = vmax.f32 %v725_v43, 0.0  ;;  %v739_v55 = vadd.f32 %v1304_v61, %v542_v51  ;;  %v726_v58 = vadd.f32 %v1038_v52, %v694_v35  ;;  %v1054_v59 = vpop.f32.mrb[10].mxu1  ;;  %v481_v62 = vpop.f32.mrb[11].mxu0 }
  0xf9   : > { %v773_v0 = vmax.f32 %v741_v49, 0.0  ;;  %v755_v56 = vmax.f32 %v723_v50, 0.0  ;;  %v742_v60 = vadd.f32 %v1054_v59, %v710_v36  ;;  %v724_v1 = vadd.f32 %v692_v39, %v481_v62  ;;  %v545_v2 = vpop.f32.mrb[11].mxu1 }
  0xfa   : > { %790 = vst.msk [vmem:[%s1266_s11 + $0x50] sm:$0xff] %vm779_vm2, %v757_v57  ;;  %v771_v3 = vmax.f32 %v739_v55, 0.0  ;;  %v758_v4 = vmax.f32 %v726_v58, 0.0  ;;  %v740_v61 = vadd.f32 %v708_v40, %v545_v2 }
  0xfb   : > { %806 = vst.msk [vmem:[%s1266_s11 + $0xd0] sm:$0xff] %vm779_vm2, %v773_v0  ;;  %788 = vst.msk [vmem:[%s1266_s11 + $0x40] sm:$0xff] %vm779_vm2, %v755_v56  ;;  %v774_v6 = vmax.f32 %v742_v60, 0.0  ;;  %v756_v8 = vmax.f32 %v724_v1, 0.0 }
  0xfc   : > { %804 = vst.msk [vmem:[%s1266_s11 + $0xc0] sm:$0xff] %vm779_vm2, %v771_v3  ;;  %791 = vst.msk [vmem:[%s1266_s11 + $0x58] sm:$0xff] %vm779_vm2, %v758_v4  ;;  %v772_v14 = vmax.f32 %v740_v61, 0.0 }
  0xfd   : > { %807 = vst.msk [vmem:[%s1266_s11 + $0xd8] sm:$0xff] %vm779_vm2, %v774_v6  ;;  %789 = vst.msk [vmem:[%s1266_s11 + $0x48] sm:$0xff] %vm779_vm2, %v756_v8  ;;  %v1041_v17 = vpop.f32.mrb[12].mxu0 }
  0xfe   : > { %805 = vst.msk [vmem:[%s1266_s11 + $0xc8] sm:$0xff] %vm779_vm2, %v772_v14  ;;  %v729_v19 = vadd.f32 %v1041_v17, %v697_v46  ;;  %v1057_v20 = vpop.f32.mrb[12].mxu1  ;;  %v494_v21 = vpop.f32.mrb[13].mxu0 }
  0xff   : > { %v745_v22 = vadd.f32 %v1057_v20, %v713_v9  ;;  %v727_v11 = vadd.f32 %v695_v13, %v494_v21  ;;  %v558_v24 = vpop.f32.mrb[13].mxu1  ;;  %v1042_v25 = vpop.f32.mrb[14].mxu0 }
 0x100   : > { %v761_v26 = vmax.f32 %v729_v19, 0.0  ;;  %v743_v27 = vadd.f32 %v711_v16, %v558_v24  ;;  %v730_v28 = vadd.f32 %v1042_v25, %v698_v23  ;;  %v1058_v12 = vpop.f32.mrb[14].mxu1  ;;  %v497_v15 = vpop.f32.mrb[15].mxu0 }
 0x101   : > { %v777_v29 = vmax.f32 %v745_v22, 0.0  ;;  %v759_v30 = vmax.f32 %v727_v11, 0.0  ;;  %v746_v31 = vadd.f32 %v1058_v12, %v714_v7  ;;  %v728_v33 = vadd.f32 %v696_v18, %v497_v15  ;;  %v561_v32 = vpop.f32.mrb[15].mxu1 }
 0x102   : > { %794 = vst.msk [vmem:[%s1266_s11 + $0x70] sm:$0xff] %vm779_vm2, %v761_v26  ;;  %v775_v34 = vmax.f32 %v743_v27, 0.0  ;;  %v762_v35 = vmax.f32 %v730_v28, 0.0  ;;  %v744_v36 = vadd.f32 %v712_v10, %v561_v32 }
 0x103   : > { %810 = vst.msk [vmem:[%s1266_s11 + $0xf0] sm:$0xff] %vm779_vm2, %v777_v29  ;;  %792 = vst.msk [vmem:[%s1266_s11 + $0x60] sm:$0xff] %vm779_vm2, %v759_v30  ;;  %v778_v37 = vmax.f32 %v746_v31, 0.0  ;;  %v760_v38 = vmax.f32 %v728_v33, 0.0 }
 0x104   : > { %808 = vst.msk [vmem:[%s1266_s11 + $0xe0] sm:$0xff] %vm779_vm2, %v775_v34  ;;  %795 = vst.msk [vmem:[%s1266_s11 + $0x78] sm:$0xff] %vm779_vm2, %v762_v35  ;;  %v776_v39 = vmax.f32 %v744_v36, 0.0 }
 0x105   : > { %811 = vst.msk [vmem:[%s1266_s11 + $0xf8] sm:$0xff] %vm779_vm2, %v778_v37  ;;  %793 = vst.msk [vmem:[%s1266_s11 + $0x68] sm:$0xff] %vm779_vm2, %v760_v38 }
 0x106   : > { %809 = vst.msk [vmem:[%s1266_s11 + $0xe8] sm:$0xff] %vm779_vm2, %v776_v39 }
 0x107 PF: > { %s15_s18 = sadd.s32 1, %s1093_s18  }
 0x108   : > { %p12_p4 = scmp.ge.s32.totalorder %s15_s18, 4  }
 0x10a   :  { %14 = sbr.rel (!%p12_p4) target bundleno = 1 (0x1), region = 73 }

// kernel: resconv_block.3
= control target key start
LH: loop header
LB: loop body
LE: loop exit
PB: predicated region body
PF: predicated region fallthrough
CT: control target
= control target key end

     0   :  { %s4946_s12 = smov 0   ;;  %s6202_s0 = inlined_call_operand.vmem [shape: bf16[2,16,16,4], index: 0, kind: input, shape index: {}]   ;;  %s6203_s1 = inlined_call_operand.vmem [shape: bf16[36,8], index: 1, kind: input, shape index: {}]   ;;  %s6204_s2 = inlined_call_operand.vmem [shape: bf16[2,256,8], index: 2, kind: output, shape index: {0}]   ;;  %s6205_s3 = inlined_call_operand.vmem [shape: f32[2,2,8], index: 3, kind: output, shape index: {1}]  }
   0x1 LB: > { %s4487_s13 = sadd.s32 4294967295, %s4915_s12   ;;  %p4491_p0 = scmp.ge.s32.totalorder %s4915_s12, 1  ;;  %s4915_s12 = sphi %s4946_s12, %s14_s12  }
   0x2   : > { %p140_p1 = scmp.lt.s32.totalorder %s4915_s12, 3 }
   0x4   : > { %p141_p2 = pnand %p4491_p0, %p140_p1 }
   0x5   : > { %vm215_vm0 = vcmask (!%p141_p2), 27648   ;;  %vm218_vm1 = vcmask (!%p141_p2), 24576   ;;  %v4917_v0 = vmov (!%p141_p2), 0   ;;  %p168_p3 = scmp.lt.s32.totalorder (!%p141_p2), %s4487_s13, 1  ;;  %vm905_vm2 = vsmask.f32 (!%p141_p2), 3328 }
   0x6   : > { %144 = sbr.rel (%p141_p2) target bundleno = 760 (0x2f8), region = 28  ;;  %216 = vst.msk [vmem:[#allocation2] sm:$0xf] (!%p141_p2), %vm215_vm0, %v4917_v0  ;;  %217 = vst.msk [vmem:[#allocation2 + $0x4] sm:$0xf] (!%p141_p2), %vm215_vm0, %v4917_v0  ;;  %vm1501_vm4 = vcmask (!%p141_p2), 1042432  }
   0x7   : > { %219 = vst.msk [vmem:[#allocation2 + $0x8] sm:$0x1] (!%p141_p2), %vm218_vm1, %v4917_v0  ;;  %222 = vst.msk [vmem:[#allocation2 + $0x14] sm:$0x1] (!%p141_p2), %vm218_vm1, %v4917_v0  ;;  %vm906_vm3 = vsmask.f32 (!%p141_p2), 7440 }
   0x8   : > { %220 = vst.msk [vmem:[#allocation2 + $0xc] sm:$0xf] (!%p141_p2), %vm215_vm0, %v4917_v0  ;;  %221 = vst.msk [vmem:[#allocation2 + $0x10] sm:$0xf] (!%p141_p2), %vm215_vm0, %v4917_v0  ;;  %vm1502_vm5 = vcmask (!%p141_p2), 1046532   ;;  %s4918_s18 = smov (!%p141_p2), 8  }
   0x9   : > { %223 = vst.msk [vmem:[#allocation2 + $0x18] sm:$0xf] (!%p141_p2), %vm215_vm0, %v4917_v0  ;;  %224 = vst.msk [vmem:[#allocation2 + $0x1c] sm:$0xf] (!%p141_p2), %vm215_vm0, %v4917_v0  ;;  %vm271_vm6 = vsmask.f32 (!%p141_p2), 256 }
   0xa   : > { %225 = vst.msk [vmem:[#allocation2 + $0x20] sm:$0x1] (!%p141_p2), %vm218_vm1, %v4917_v0  ;;  %228 = vst.msk [vmem:[#allocation2 + $0x2c] sm:$0x1] (!%p141_p2), %vm218_vm1, %v4917_v0  ;;  %vm272_vm7 = vsmask.f32 (!%p141_p2), 4368 }
   0xb   : > { %226 = vst.msk [vmem:[#allocation2 + $0x24] sm:$0xf] (!%p141_p2), %vm215_vm0, %v4917_v0  ;;  %227 = vst.msk [vmem:[#allocation2 + $0x28] sm:$0xf] (!%p141_p2), %vm215_vm0, %v4917_v0  ;;  %vm596_vm8 = vsmask.f32 (!%p141_p2), 7938 }
   0xc   : > { %229 = vst.msk [vmem:[#allocation2 + $0x30] sm:$0xf] (!%p141_p2), %vm215_vm0, %v4917_v0  ;;  %230 = vst.msk [vmem:[#allocation2 + $0x34] sm:$0xf] (!%p141_p2), %vm215_vm0, %v4917_v0  ;;  %s4919_s19 = smov (!%p141_p2), 4   ;;  %s4920_s20 = smov (!%p141_p2), 12  }
   0xd   : > { %231 = vst.msk [vmem:[#allocation2 + $0x38] sm:$0x1] %vm218_vm1, %v4917_v0  ;;  %234 = vst.msk [vmem:[#allocation2 + $0x44] sm:$0x1] %vm218_vm1, %v4917_v0  ;;  %s6227_s13 = smov (!%p168_p3, %s4487_s13), 1  ;;  %s4921_s21 = smov 24  }
   0xe   : > { %232 = vst.msk [vmem:[#allocation2 + $0x3c] sm:$0xf] %vm215_vm0, %v4917_v0  ;;  %233 = vst.msk [vmem:[#allocation2 + $0x40] sm:$0xf] %vm215_vm0, %v4917_v0  ;;  %s4742_s14 = sshll.u32 %s6227_s13, 7  ;;  %s4922_s22 = smov 20  }
   0xf   : > { %235 = vst.msk [vmem:[#allocation2 + $0x48] sm:$0xf] %vm215_vm0, %v4917_v0  ;;  %236 = vst.msk [vmem:[#allocation2 + $0x4c] sm:$0xf] %vm215_vm0, %v4917_v0  ;;  %s5020_s17 = scalar_lea.vmem %s6202_s0, %s4742_s14  ;;  %v857_v2 = vld [vmem:[#allocation2] sm:$0xf]  ;;  %s6043_s7 = scalar_lea.vmem %s6204_s2, %s4742_s14 }
  0x10   : > { %237 = vst.msk [vmem:[#allocation2 + $0x50] sm:$0x1] %vm218_vm1, %v4917_v0  ;;  %240 = vst.msk [vmem:[#allocation2 + $0x5c] sm:$0x1] %vm218_vm1, %v4917_v0  ;;  %v183_v1 = vld [vmem:[%s5020_s17] sm:$0xf] }
  0x11   : > { %238 = vst.msk [vmem:[#allocation2 + $0x54] sm:$0xf] %vm215_vm0, %v4917_v0  ;;  %239 = vst.msk [vmem:[#allocation2 + $0x58] sm:$0xf] %vm215_vm0, %v4917_v0  ;;  %v858_v3 = vld [vmem:[#allocation2 + $0x4] sm:$0xf] }
  0x12   : > { %241 = vst.msk [vmem:[#allocation2 + $0x60] sm:$0xf] %vm215_vm0, %v4917_v0  ;;  %242 = vst.msk [vmem:[#allocation2 + $0x64] sm:$0xf] %vm215_vm0, %v4917_v0  ;;  %v859_v4 = vld [vmem:[#allocation2 + $0x8] sm:$0x1] }
  0x13   : > { %243 = vst.msk [vmem:[#allocation2 + $0x68] sm:$0x1] %vm218_vm1, %v4917_v0  ;;  %246 = vst.msk [vmem:[#allocation2 + $0x74] sm:$0x1] %vm218_vm1, %v4917_v0  ;;  %v184_v5 = vld [vmem:[%s5020_s17 + $0x4] sm:$0xf] }
  0x14   : > { %244 = vst.msk [vmem:[#allocation2 + $0x6c] sm:$0xf] %vm215_vm0, %v4917_v0  ;;  %245 = vst.msk [vmem:[#allocation2 + $0x70] sm:$0xf] %vm215_vm0, %v4917_v0  ;;  %v909_v6 = vshrl.u32 %v857_v2, 16  ;;  %v912_v7 = vshll.u32 %v857_v2, 16 }
  0x15   : > { %247 = vst.msk [vmem:[#allocation2 + $0x78] sm:$0xf] %vm215_vm0, %v4917_v0  ;;  %248 = vst.msk [vmem:[#allocation2 + $0x7c] sm:$0xf] %vm215_vm0, %v4917_v0  ;;  %v918_v8 = vshll.u32 %v858_v3, 16  ;;  %v922_v9 = vshrl.u32 %v858_v3, 16 }
  0x16   : > { %249 = vst.msk [vmem:[#allocation2 + $0x80] sm:$0x1] %vm218_vm1, %v4917_v0  ;;  %252 = vst.msk [vmem:[#allocation2 + $0x8c] sm:$0x1] %vm218_vm1, %v4917_v0  ;;  %v1405_v10 = vld [vmem:[#allocation2] sm:$0xe] }
  0x17   : > { %250 = vst.msk [vmem:[#allocation2 + $0x84] sm:$0xf] %vm215_vm0, %v4917_v0  ;;  %251 = vst.msk [vmem:[#allocation2 + $0x88] sm:$0xf] %vm215_vm0, %v4917_v0  ;;  %v928_v11 = vshll.u32 %v859_v4, 16  ;;  %v4529_v14 = vrot.slane %v1405_v10, 9 }
  0x18   : > { %253 = vst.msk [vmem:[#allocation2 + $0x90] sm:$0xf] %vm215_vm0, %v4917_v0  ;;  %254 = vst.msk [vmem:[#allocation2 + $0x94] sm:$0xf] %vm215_vm0, %v4917_v0  ;;  %v1406_v12 = vld [vmem:[#allocation2 + $0x4] sm:$0xf] }
  0x19   : > { %255 = vst.msk [vmem:[#allocation2 + $0x98] sm:$0x1] %vm218_vm1, %v4917_v0  ;;  %258 = vst.msk [vmem:[#allocation2 + $0xa4] sm:$0x1] %vm218_vm1, %v4917_v0  ;;  %v1407_v13 = vld [vmem:[#allocation2 + $0x8] sm:$0x1] }
  0x1a   : > { %256 = vst.msk [vmem:[#allocation2 + $0x9c] sm:$0xf] %vm215_vm0, %v4917_v0  ;;  %257 = vst.msk [vmem:[#allocation2 + $0xa0] sm:$0xf] %vm215_vm0, %v4917_v0  ;;  %v911_v15 = vrot.slane %v909_v6, 4  ;;  %v914_v16 = vrot.slane %v912_v7, 5 }
  0x1b   : > { %259 = vst.msk [vmem:[#allocation2 + $0xa8] sm:$0xf] %vm215_vm0, %v4917_v0  ;;  %260 = vst.msk [vmem:[#allocation2 + $0xac] sm:$0xf] %vm215_vm0, %v4917_v0  ;;  %v920_v17 = vrot.slane %v918_v8, 5  ;;  %v924_v18 = vrot.slane %v922_v9, 4 }
  0x1c   : > { %261 = vst.msk [vmem:[#allocation2 + $0xb0] sm:$0x1] %vm218_vm1, %v4917_v0  ;;  %264 = vst.msk [vmem:[#allocation2 + $0xbc] sm:$0x1] %vm218_vm1, %v4917_v0  ;;  %v930_v20 = vrot.slane %v928_v11, 5  ;;  %v1506_v21 = vrot.slane %v1406_v12, 5  ;;  %v915_v25 = vor.u32 %v914_v16, %v911_v15 }
  0x1d   : > { %262 = vst.msk [vmem:[#allocation2 + $0xb4] sm:$0xf] %vm215_vm0, %v4917_v0  ;;  %263 = vst.msk [vmem:[#allocation2 + $0xb8] sm:$0xf] %vm215_vm0, %v4917_v0  ;;  %v1509_v22 = vrot.slane %v1407_v13, 5  ;;  %v275_v23 = vshrl.u32 %v183_v1, 16  ;;  %v925_v26 = vor.u32 %v924_v18, %v920_v17 }
  0x1e   : > { %265 = vst.msk [vmem:[#allocation2 + $0xc0] sm:$0xf] %vm215_vm0, %v4917_v0  ;;  %266 = vst.msk [vmem:[#allocation2 + $0xc4] sm:$0xf] %vm215_vm0, %v4917_v0  ;;  %v185_v24 = vld [vmem:[%s5020_s17 + $0x8] sm:$0xf] }
  0x1f   : > { %267 = vst.msk [vmem:[#allocation2 + $0xc8] sm:$0x1] %vm218_vm1, %v4917_v0  ;;  %270 = vst.msk [vmem:[#allocation2 + $0xd4] sm:$0x1] %vm218_vm1, %v4917_v0  ;;  %v278_v27 = vshll.u32 %v183_v1, 16  ;;  %v283_v28 = vshrl.u32 %v184_v5, 16 }
  0x20   : > { %268 = vst.msk [vmem:[#allocation2 + $0xcc] sm:$0xf] %vm215_vm0, %v4917_v0  ;;  %269 = vst.msk [vmem:[#allocation2 + $0xd0] sm:$0xf] %vm215_vm0, %v4917_v0  ;;  %v1508_v31 = vrot.slane %v1506_v21, 4  ;;  %v277_v32 = vrot.slane %v275_v23, 7 }
  0x21   : > { %vm5026_vm9 = vmor %vm1501_vm4, %vm1502_vm5  ;;  %v286_v33 = vshll.u32 %v184_v5, 16  ;;  %v916_v34 = vrot.slane %v915_v25, 4  ;;  %v926_v35 = vrot.slane %v925_v26, 4  ;;  %v285_v36 = vrot.slane %v283_v28, 7  ;;  %v598_v38 = vld [vmem:[#allocation2 + $0xc] sm:$0xf] }
  0x22   : > { %vm5033_vm10 = vmor %vm905_vm2, %vm906_vm3  ;;  %v1507_v30 = vsel %vm5026_vm9, %v4529_v14, %v1506_v21  ;;  %v292_v39 = vshrl.u32 %v185_v24, 16  ;;  %v1510_v40 = vsel %vm5026_vm9, %v1508_v31, %v1509_v22  ;;  %v280_v42 = vor.u32 %v278_v27, %v277_v32  ;;  %v186_v44 = vld [vmem:[%s5020_s17 + $0xc] sm:$0xf]  ;;  %v187_v46 = vld [vmem:[%s5020_s17 + $0x10] sm:$0xf]  ;;  %s4923_s23 = smov 32  }
  0x23   : > { %vm5041_vm11 = vmand %vm215_vm0, %vm596_vm8  ;;  %v281_v43 = vrot.slane %v277_v32, 4  ;;  %v295_v45 = vshll.u32 %v185_v24, 16  ;;  %v921_v47 = vsel %vm5033_vm10, %v916_v34, %v920_v17  ;;  %v931_v48 = vsel %vm5033_vm10, %v926_v35, %v930_v20  ;;  %v188_v51 = vld [vmem:[%s5020_s17 + $0x14] sm:$0xf]  ;;  %v607_v57 = vld [vmem:[#allocation2 + $0x18] sm:$0xf] }
  0x24   : > { %vm5049_vm12 = vmor %vm271_vm6, %vm272_vm7  ;;  %v4545_v49 = vcombine.low %v1507_v30, %v1510_v40  ;;  %v288_v50 = vor.u32 %v286_v33, %v285_v36  ;;  %v4513_v52 = vcombine.low %v921_v47, %v931_v48  ;;  %v290_v53 = vrot.slane %v285_v36, 4  ;;  %v604_v58 = vld [vmem:[#allocation2 + $0x14] sm:$0x1]  ;;  %v189_v63 = vld [vmem:[%s5020_s17 + $0x18] sm:$0xf]  ;;  %s4924_s24 = smov 16  }
  0x25   : > { %v599_v54 = vsel %vm5041_vm11, %v280_v42, %v598_v38  ;;  %vm5064_vm13 = vmand %vm218_vm1, %vm271_vm6  ;;  %v294_v56 = vrot.slane %v292_v39, 7  ;;  %v300_v60 = vshrl.u32 %v186_v44, 16  ;;  %v303_v61 = vshll.u32 %v186_v44, 16  ;;  %v614_v7 = vld [vmem:[#allocation2 + $0x24] sm:$0xf]  ;;  %s4925_s25 = smov 28  }
  0x26   : > { %1664 = vrot.lane.b32.xlu1 %v4545_v49, %s4918_s18  ;;  %v289_v59 = vsel %vm5049_vm12, %v281_v43, %v288_v50  ;;  %600 = vst [vmem:[#allocation2 + $0xc] sm:$0xf] %v599_v54  ;;  %v309_v62 = vshrl.u32 %v187_v46, 16  ;;  %1340 = vrot.lane.b32.xlu0 %v4513_v52, %s4919_s19  ;;  %v312_v2 = vshll.u32 %v187_v46, 16  ;;  %v317_v3 = vshrl.u32 %v188_v51, 16  ;;  %s4496_s8 = sshll.u32 %s6227_s13, 1 }
  0x27   : > { %601 = vst.msk [vmem:[#allocation2 + $0x10] sm:$0xf] %vm215_vm0, %v289_v59  ;;  %v297_v0 = vor.u32 %v295_v45, %v294_v56  ;;  %v298_v1 = vrot.slane %v294_v56, 4  ;;  %v302_v4 = vrot.slane %v300_v60, 7  ;;  %v320_v6 = vshll.u32 %v188_v51, 16  ;;  %s181_s11 = scalar_lea.vmem %s6205_s3, %s4496_s8 }
  0x28   : > { %v311_v5 = vrot.slane %v309_v62, 7  ;;  %v605_v8 = vsel %vm5064_vm13, %v290_v53, %v604_v58  ;;  %v319_v10 = vrot.slane %v317_v3, 7  ;;  %v611_v11 = vld [vmem:[#allocation2 + $0x20] sm:$0x1]  ;;  %v326_v12 = vshrl.u32 %v189_v63, 16 }
  0x29   : > { %v608_v9 = vsel %vm5041_vm11, %v297_v0, %v607_v57  ;;  %606 = vst [vmem:[#allocation2 + $0x14] sm:$0x1] %v605_v8  ;;  %v329_v13 = vshll.u32 %v189_v63, 16  ;;  %v305_v14 = vor.u32 %v303_v61, %v302_v4  ;;  %v307_v15 = vrot.slane %v302_v4, 4  ;;  %v618_v18 = vld [vmem:[#allocation2 + $0x2c] sm:$0x1] }
  0x2a   : > { %609 = vst [vmem:[#allocation2 + $0x18] sm:$0xf] %v608_v9  ;;  %v314_v16 = vor.u32 %v312_v2, %v311_v5  ;;  %v315_v17 = vrot.slane %v311_v5, 4  ;;  %v322_v20 = vor.u32 %v320_v6, %v319_v10  ;;  %v324_v21 = vrot.slane %v319_v10, 4  ;;  %v5079_v22 = vld [vmem:[%s5020_s17 + $0x1c] sm:$0xf] }
  0x2b   : > { %v5081_v23 = vrot.slane %v326_v12, 7  ;;  %v306_v24 = vsel %vm5049_vm12, %v298_v1, %v305_v14  ;;  %v612_v26 = vsel %vm5064_vm13, %v307_v15, %v611_v11  ;;  %v621_v27 = vld [vmem:[#allocation2 + $0x30] sm:$0xf]  ;;  %v334_v36 = vshrl.u32 %v5079_v22, 16 }
  0x2c   : > { %v615_v25 = vsel %vm5041_vm11, %v314_v16, %v614_v7  ;;  %610 = vst.msk [vmem:[#allocation2 + $0x1c] sm:$0xf] %vm215_vm0, %v306_v24  ;;  %v323_v28 = vsel %vm5049_vm12, %v315_v17, %v322_v20  ;;  %613 = vst [vmem:[#allocation2 + $0x20] sm:$0x1] %v612_v26  ;;  %v619_v32 = vsel %vm5064_vm13, %v324_v21, %v618_v18  ;;  %v337_v42 = vshll.u32 %v5079_v22, 16 }
  0x2d   : > { %616 = vst [vmem:[#allocation2 + $0x24] sm:$0xf] %v615_v25  ;;  %v2451_v30 = vld [vmem:[#allocation2 + $0xc] sm:$0xe]  ;;  %v331_v33 = vor.u32 %v329_v13, %v5081_v23  ;;  %617 = vst.msk [vmem:[#allocation2 + $0x28] sm:$0xf] %vm215_vm0, %v323_v28 }
  0x2e   : > { %v1408_v31 = vld [vmem:[#allocation2 + $0xc] sm:$0xe]  ;;  %v2452_v35 = vld [vmem:[#allocation2 + $0x10] sm:$0xf]  ;;  %620 = vst [vmem:[#allocation2 + $0x2c] sm:$0x1] %v619_v32 }
  0x2f   : > { %v4858_v34 = vld [vmem:[#allocation2 + $0xc] sm:$0xff]   ;;  %v2549_v38 = vrot.slane %v2452_v35, 5  ;;  %v622_v43 = vsel %vm5041_vm11, %v331_v33, %v621_v27  ;;  %v4593_v45 = vrot.slane %v2451_v30, 9  ;;  %v4530_v50 = vrot.slane %v1408_v31, 9 }
  0x30   : > { %v1409_v39 = vld [vmem:[#allocation2 + $0x10] sm:$0xf]  ;;  %v5097_v40 = vld [vmem:[#allocation2 + $0xc] sm:$0xf]  ;;  %1841 = vrot.lane.b32.xlu0 %v4858_v34, %s4920_s20  ;;  %v2453_v44 = vld [vmem:[#allocation2 + $0x14] sm:$0x1] }
  0x31   : > { %v1410_v46 = vld [vmem:[#allocation2 + $0x14] sm:$0x1]  ;;  %v1513_v47 = vrot.slane %v1409_v39, 5  ;;  %623 = vst [vmem:[#allocation2 + $0x30] sm:$0xf] %v622_v43  ;;  %v2551_v48 = vrot.slane %v2549_v38, 4  ;;  %v2550_v61 = vsel %vm5026_vm9, %v4593_v45, %v2549_v38 }
  0x32   : > { %v2552_v49 = vrot.slane %v2453_v44, 5  ;;  %v3495_v51 = vld [vmem:[#allocation2 + $0x18] sm:$0xe]  ;;  %v933_v53 = vshrl.u32 %v5097_v40, 16  ;;  %v1516_v56 = vrot.slane %v1410_v46, 5  ;;  %vm840_vm14 = vcmask 31744  }
  0x33   : > { %v2454_v52 = vld [vmem:[#allocation2 + $0x18] sm:$0xe]  ;;  %v1515_v54 = vrot.slane %v1513_v47, 4  ;;  %v4657_v57 = vrot.slane %v3495_v51, 9  ;;  %v1514_v3 = vsel %vm5026_vm9, %v4530_v50, %v1513_v47  ;;  %v3496_v4 = vld [vmem:[#allocation2 + $0x1c] sm:$0xf] }
  0x34   : > { %v4594_v58 = vrot.slane %v2454_v52, 9  ;;  %v1909_v59 = vld [vmem:[#allocation2 + $0x18] sm:$0xf]  ;;  %v2553_v62 = vsel %vm5026_vm9, %v2551_v48, %v2552_v49  ;;  %v4861_v2 = vld [vmem:[#allocation2 + $0x24] sm:$0xff]   ;;  %v3497_v5 = vld [vmem:[#allocation2 + $0x20] sm:$0x1] }
  0x35   : > { %v4859_v60 = vld [vmem:[#allocation2 + $0x18] sm:$0xff]   ;;  %v1979_v63 = vshrl.u32 %v1909_v59, 16  ;;  %v1982_v1 = vshll.u32 %v1909_v59, 16  ;;  %v4609_v7 = vcombine.low %v2550_v61, %v2553_v62  ;;  %v1517_v8 = vsel %vm5026_vm9, %v1515_v54, %v1516_v56  ;;  %v2456_v12 = vld [vmem:[#allocation2 + $0x20] sm:$0x1] }
  0x36   : > { %v4860_v0 = vld [vmem:[#allocation2 + $0x18] sm:$0xff]   ;;  %1843 = vrot.lane.b32.xlu1 %v4859_v60, %s4920_s20  ;;  %v3593_v9 = vrot.slane %v3496_v4, 5  ;;  %v3596_v10 = vrot.slane %v3497_v5, 5  ;;  %v2559_v14 = vrot.slane %v2456_v12, 5  ;;  %v3498_v15 = vld [vmem:[#allocation2 + $0x24] sm:$0xe]  ;;  %v4546_v25 = vcombine.low %v1514_v3, %v1517_v8 }
  0x37   : > { %v1981_v6 = vrot.slane %v1979_v63, 4  ;;  %2885 = vrot.lane.b32.xlu0 %v4860_v0, %s4921_s21  ;;  %v2455_v11 = vld [vmem:[#allocation2 + $0x1c] sm:$0xf]  ;;  %v3499_v16 = vld [vmem:[#allocation2 + $0x28] sm:$0xf]  ;;  %v4658_v21 = vrot.slane %v3498_v15, 9 }
  0x38   : > { %v2556_v13 = vrot.slane %v2455_v11, 5  ;;  %v3594_v17 = vsel %vm5026_vm9, %v4657_v57, %v3593_v9  ;;  %v3595_v18 = vrot.slane %v3593_v9, 4  ;;  %v3500_v20 = vld [vmem:[#allocation2 + $0x2c] sm:$0x1]  ;;  %v3600_v24 = vrot.slane %v3499_v16, 5 }
  0x39   : > { %v3603_v28 = vrot.slane %v3500_v20, 5  ;;  %v1910_v30 = vld [vmem:[#allocation2 + $0x1c] sm:$0xf]  ;;  %v1911_v31 = vld [vmem:[#allocation2 + $0x20] sm:$0x1]  ;;  %v1984_v35 = vrot.slane %v1982_v1, 5 }
  0x3a   : > { %2887 = vrot.lane.b32.xlu1 %v4861_v2, %s4921_s21  ;;  %v2557_v26 = vsel %vm5026_vm9, %v4594_v58, %v2556_v13  ;;  %v2558_v27 = vrot.slane %v2556_v13, 4  ;;  %v3597_v32 = vsel %vm5026_vm9, %v3595_v18, %v3596_v10  ;;  %v3601_v33 = vsel %vm5026_vm9, %v4658_v21, %v3600_v24  ;;  %v861_v45 = vld [vmem:[#allocation2 + $0x10] sm:$0xf]  ;;  %v862_v50 = vld [vmem:[#allocation2 + $0x14] sm:$0x1] }
  0x3b   : > { %2707 = vrot.lane.b32.xlu0 %v4609_v7, %s4922_s22  ;;  %v3602_v34 = vrot.slane %v3600_v24, 4  ;;  %v4673_v38 = vcombine.low %v3594_v17, %v3597_v32  ;;  %v1988_v43 = vshll.u32 %v1910_v30, 16  ;;  %v1992_v44 = vshrl.u32 %v1910_v30, 16  ;;  %v2953_v51 = vld [vmem:[#allocation2 + $0x24] sm:$0xf] }
  0x3c   : > { %v2560_v39 = vsel %vm5026_vm9, %v2558_v27, %v2559_v14  ;;  %v1985_v48 = vor.u32 %v1984_v35, %v1981_v6  ;;  %v1998_v49 = vshll.u32 %v1911_v31, 16  ;;  %v935_v57 = vrot.slane %v933_v53, 4  ;;  %v2954_v62 = vld [vmem:[#allocation2 + $0x28] sm:$0xf]  ;;  %v2955_v2 = vld [vmem:[#allocation2 + $0x2c] sm:$0x1] }
  0x3d   : > { %v4610_v46 = vcombine.low %v2557_v26, %v2560_v39  ;;  %v3604_v47 = vsel %vm5026_vm9, %v3602_v34, %v3603_v28  ;;  %v1990_v54 = vrot.slane %v1988_v43, 5  ;;  %v1994_v56 = vrot.slane %v1992_v44, 4  ;;  %v1906_v7 = vld [vmem:[#allocation2 + $0xc] sm:$0xf]  ;;  %v1907_v18 = vld [vmem:[#allocation2 + $0x10] sm:$0xf] }
  0x3e   : > { %1666 = vrot.lane.b32.xlu1 %v4546_v25, %s4918_s18  ;;  %v4674_v52 = vcombine.low %v3601_v33, %v3604_v47  ;;  %v1986_v58 = vrot.slane %v1985_v48, 4  ;;  %v2000_v59 = vrot.slane %v1998_v49, 5  ;;  %v936_v60 = vshll.u32 %v5097_v40, 16  ;;  %v1908_v27 = vld [vmem:[#allocation2 + $0x14] sm:$0x1] }
  0x3f   : > { %3751 = vrot.lane.b32.xlu0 %v4673_v38, %s4923_s23  ;;  %v942_v61 = vshll.u32 %v861_v45, 16  ;;  %v1995_v63 = vor.u32 %v1994_v56, %v1990_v54  ;;  %v946_v0 = vshrl.u32 %v861_v45, 16  ;;  %v952_v1 = vshll.u32 %v862_v50, 16  ;;  %v863_v39 = vld [vmem:[#allocation2 + $0x18] sm:$0xf] }
  0x40   : > { %v3023_v3 = vshrl.u32 %v2953_v51, 16  ;;  %v1991_v4 = vsel %vm5033_vm10, %v1986_v58, %v1990_v54  ;;  %v938_v5 = vrot.slane %v936_v60, 5  ;;  %v3026_v53 = vshll.u32 %v2953_v51, 16  ;;  %v864_v47 = vld [vmem:[#allocation2 + $0x1c] sm:$0xf] }
  0x41   : > { %v944_v6 = vrot.slane %v942_v61, 5  ;;  %v1996_v8 = vrot.slane %v1995_v63, 4  ;;  %v948_v9 = vrot.slane %v946_v0, 4  ;;  %v954_v10 = vrot.slane %v952_v1, 5  ;;  %v2950_v54 = vld [vmem:[#allocation2 + $0x18] sm:$0xf] }
  0x42   : > { %2709 = vrot.lane.b32.xlu1 %v4610_v46, %s4922_s22  ;;  %v3025_v40 = vrot.slane %v3023_v3, 4  ;;  %v939_v11 = vor.u32 %v938_v5, %v935_v57  ;;  %v3028_v12 = vrot.slane %v3026_v53, 5  ;;  %v3032_v13 = vshll.u32 %v2954_v62, 16 }
  0x43   : > { %3753 = vrot.lane.b32.xlu0 %v4674_v52, %s4923_s23  ;;  %v3036_v14 = vshrl.u32 %v2954_v62, 16  ;;  %v2001_v15 = vsel %vm5033_vm10, %v1996_v8, %v2000_v59  ;;  %v949_v16 = vor.u32 %v948_v9, %v944_v6  ;;  %v3042_v17 = vshll.u32 %v2955_v2, 16  ;;  %v865_v52 = vld [vmem:[#allocation2 + $0x20] sm:$0x1] }
  0x44   : > { %v1955_v20 = vshrl.u32 %v1906_v7, 16  ;;  %v4578_v21 = vcombine.low %v1991_v4, %v2001_v15  ;;  %v940_v24 = vrot.slane %v939_v11, 4  ;;  %v3029_v25 = vor.u32 %v3028_v12, %v3025_v40  ;;  %v2951_v4 = vld [vmem:[#allocation2 + $0x1c] sm:$0xf] }
  0x45   : > { %v3034_v26 = vrot.slane %v3032_v13, 5  ;;  %v950_v28 = vrot.slane %v949_v16, 4  ;;  %v3038_v30 = vrot.slane %v3036_v14, 4  ;;  %v3044_v31 = vrot.slane %v3042_v17, 5  ;;  %v2952_v13 = vld [vmem:[#allocation2 + $0x20] sm:$0x1] }
  0x46   : > { %v1957_v32 = vrot.slane %v1955_v20, 4  ;;  %2388 = vrot.lane.b32.xlu1 %v4578_v21, %s4924_s24  ;;  %v945_v33 = vsel %vm5033_vm10, %v940_v24, %v944_v6  ;;  %v3030_v34 = vrot.slane %v3029_v25, 4  ;;  %v1958_v35 = vshll.u32 %v1906_v7, 16  ;;  %v866_v16 = vld [vmem:[#allocation2 + $0x24] sm:$0xf] }
  0x47   : > { %v1964_v38 = vshll.u32 %v1907_v18, 16  ;;  %v955_v43 = vsel %vm5033_vm10, %v950_v28, %v954_v10  ;;  %v3039_v44 = vor.u32 %v3038_v30, %v3034_v26  ;;  %v1968_v45 = vshrl.u32 %v1907_v18, 16  ;;  %v867_v24 = vld [vmem:[#allocation2 + $0x28] sm:$0xf] }
  0x48   : > { %v1974_v46 = vshll.u32 %v1908_v27, 16  ;;  %v4514_v48 = vcombine.low %v945_v33, %v955_v43  ;;  %v3035_v49 = vsel %vm5033_vm10, %v3030_v34, %v3034_v26  ;;  %v1960_v50 = vrot.slane %v1958_v35, 5 }
  0x49   : > { %v1966_v51 = vrot.slane %v1964_v38, 5  ;;  %v3040_v56 = vrot.slane %v3039_v44, 4  ;;  %v1970_v57 = vrot.slane %v1968_v45, 4  ;;  %v957_v59 = vshrl.u32 %v863_v39, 16  ;;  %v868_v38 = vld [vmem:[#allocation2 + $0x2c] sm:$0x1] }
  0x4a   : > { %v1976_v58 = vrot.slane %v1974_v46, 5  ;;  %1342 = vrot.lane.b32.xlu0 %v4514_v48, %s4919_s19  ;;  %v1961_v60 = vor.u32 %v1960_v50, %v1957_v32  ;;  %v960_v61 = vshll.u32 %v863_v39, 16  ;;  %v966_v62 = vshll.u32 %v864_v47, 16  ;;  %v1411_v44 = vld [vmem:[#allocation2 + $0x18] sm:$0xe] }
  0x4b   : > { %v970_v63 = vshrl.u32 %v864_v47, 16  ;;  %v3045_v0 = vsel %vm5033_vm10, %v3040_v56, %v3044_v31  ;;  %v1971_v1 = vor.u32 %v1970_v57, %v1966_v51  ;;  %v959_v2 = vrot.slane %v957_v59, 4  ;;  %v1413_v50 = vld [vmem:[#allocation2 + $0x20] sm:$0x1]  ;;  %v1414_v57 = vld [vmem:[#allocation2 + $0x24] sm:$0xe] }
  0x4c   : > { %v976_v3 = vshll.u32 %v865_v52, 16  ;;  %v4642_v5 = vcombine.low %v3035_v49, %v3045_v0  ;;  %v1962_v6 = vrot.slane %v1961_v60, 4  ;;  %v962_v53 = vrot.slane %v960_v61, 5  ;;  %v1412_v49 = vld [vmem:[#allocation2 + $0x1c] sm:$0xf] }
  0x4d   : > { %v968_v7 = vrot.slane %v966_v62, 5  ;;  %v1972_v8 = vrot.slane %v1971_v1, 4  ;;  %v972_v9 = vrot.slane %v970_v63, 4  ;;  %v2999_v40 = vshrl.u32 %v2950_v54, 16 }
  0x4e   : > { %v978_v10 = vrot.slane %v976_v3, 5  ;;  %3432 = vrot.lane.b32.xlu1 %v4642_v5, %s4925_s25  ;;  %v1967_v11 = vsel %vm5033_vm10, %v1962_v6, %v1966_v51  ;;  %v963_v12 = vor.u32 %v962_v53, %v959_v2  ;;  %v3002_v14 = vshll.u32 %v2950_v54, 16  ;;  %v1415_v2 = vld [vmem:[#allocation2 + $0x28] sm:$0xf]  ;;  %v1416_v3 = vld [vmem:[#allocation2 + $0x2c] sm:$0x1] }
  0x4f   : > { %v3008_v15 = vshll.u32 %v2951_v4, 16  ;;  %v1977_v17 = vsel %vm5033_vm10, %v1972_v8, %v1976_v58  ;;  %v973_v18 = vor.u32 %v972_v9, %v968_v7  ;;  %v3001_v20 = vrot.slane %v2999_v40, 4 }
  0x50   : > { %v3012_v21 = vshrl.u32 %v2951_v4, 16  ;;  %v4577_v25 = vcombine.low %v1967_v11, %v1977_v17  ;;  %v964_v26 = vrot.slane %v963_v12, 4  ;;  %v3004_v27 = vrot.slane %v3002_v14, 5 }
  0x51   : > { %v3010_v28 = vrot.slane %v3008_v15, 5  ;;  %v974_v30 = vrot.slane %v973_v18, 4  ;;  %v3018_v32 = vshll.u32 %v2952_v13, 16  ;;  %v981_v33 = vshrl.u32 %v866_v16, 16  ;;  %v1913_v15 = vld [vmem:[#allocation2 + $0x28] sm:$0xf] }
  0x52   : > { %v3014_v31 = vrot.slane %v3012_v21, 4  ;;  %2386 = vrot.lane.b32.xlu0 %v4577_v25, %s4924_s24  ;;  %v969_v34 = vsel %vm5033_vm10, %v964_v26, %v968_v7  ;;  %v3005_v35 = vor.u32 %v3004_v27, %v3001_v20  ;;  %v984_v39 = vshll.u32 %v866_v16, 16  ;;  %v1912_v7 = vld [vmem:[#allocation2 + $0x24] sm:$0xf]  ;;  %v625_v21 = vld [vmem:[#allocation2 + $0x38] sm:$0x1] }
  0x53   : > { %v990_v43 = vshll.u32 %v867_v24, 16  ;;  %v979_v45 = vsel %vm5033_vm10, %v974_v30, %v978_v10  ;;  %v3020_v47 = vrot.slane %v3018_v32, 5  ;;  %v983_v48 = vrot.slane %v981_v33, 4  ;;  %v1914_v27 = vld [vmem:[#allocation2 + $0x2c] sm:$0x1] }
  0x54   : > { %v3015_v46 = vor.u32 %v3014_v31, %v3010_v28  ;;  %v4515_v51 = vcombine.low %v969_v34, %v979_v45  ;;  %v3006_v52 = vrot.slane %v3005_v35, 4  ;;  %v986_v54 = vrot.slane %v984_v39, 5  ;;  %v2457_v34 = vld [vmem:[#allocation2 + $0x24] sm:$0xe] }
  0x55   : > { %v992_v56 = vrot.slane %v990_v43, 5  ;;  %v994_v59 = vshrl.u32 %v867_v24, 16  ;;  %v1000_v60 = vshll.u32 %v868_v38, 16  ;;  %v4531_v61 = vrot.slane %v1411_v44, 9  ;;  %v2458_v43 = vld [vmem:[#allocation2 + $0x28] sm:$0xf] }
  0x56   : > { %v3016_v58 = vrot.slane %v3015_v46, 4  ;;  %1344 = vrot.lane.b32.xlu1 %v4515_v51, %s4919_s19  ;;  %v3011_v62 = vsel %vm5033_vm10, %v3006_v52, %v3010_v28  ;;  %v987_v63 = vor.u32 %v986_v54, %v983_v48  ;;  %v1520_v0 = vrot.slane %v1412_v49, 5  ;;  %v1915_v28 = vld [vmem:[#allocation2 + $0x30] sm:$0xf]  ;;  %v2459_v44 = vld [vmem:[#allocation2 + $0x2c] sm:$0x1] }
  0x57   : > { %v1523_v1 = vrot.slane %v1413_v50, 5  ;;  %v996_v5 = vrot.slane %v994_v59, 4  ;;  %v1002_v6 = vrot.slane %v1000_v60, 5  ;;  %v4532_v53 = vrot.slane %v1414_v57, 9  ;;  %v2460_v48 = vld [vmem:[#allocation2 + $0x30] sm:$0xe] }
  0x58   : > { %v3021_v4 = vsel %vm5033_vm10, %v3016_v58, %v3020_v47  ;;  %v988_v9 = vrot.slane %v987_v63, 4  ;;  %v1521_v10 = vsel %vm5026_vm9, %v4531_v61, %v1520_v0  ;;  %v1522_v40 = vrot.slane %v1520_v0, 4  ;;  %v191_v49 = vld [vmem:[%s5020_s17 + $0x20] sm:$0xf] }
  0x59   : > { %v4641_v8 = vcombine.low %v3011_v62, %v3021_v4  ;;  %v997_v11 = vor.u32 %v996_v5, %v992_v56  ;;  %v1527_v12 = vrot.slane %v1415_v2, 5  ;;  %v1530_v13 = vrot.slane %v1416_v3, 5 }
  0x5a   : > { %v332_v14 = vrot.slane %v5081_v23, 4  ;;  %v993_v16 = vsel %vm5033_vm10, %v988_v9, %v992_v56  ;;  %v1524_v17 = vsel %vm5026_vm9, %v1522_v40, %v1523_v1  ;;  %v336_v18 = vrot.slane %v334_v36, 7  ;;  %v5188_v56 = vld [vmem:[%s5020_s17 + $0x24] sm:$0xf] }
  0x5b   : > { %3430 = vrot.lane.b32.xlu0 %v4641_v8, %s4925_s25  ;;  %v2003_v20 = vshrl.u32 %v1912_v7, 16  ;;  %v998_v24 = vrot.slane %v997_v11, 4  ;;  %v4547_v25 = vcombine.low %v1521_v10, %v1524_v17  ;;  %v1528_v26 = vsel %vm5026_vm9, %v4532_v53, %v1527_v12 }
  0x5c   : > { %v1529_v23 = vrot.slane %v1527_v12, 4  ;;  %v339_v30 = vor.u32 %v337_v42, %v336_v18  ;;  %v341_v31 = vrot.slane %v336_v18, 4  ;;  %v2006_v33 = vshll.u32 %v1912_v7, 16  ;;  %v4862_v42 = vld [vmem:[#allocation2 + $0x24] sm:$0xff]  }
  0x5d   : > { %v2005_v32 = vrot.slane %v2003_v20, 4  ;;  %v1003_v36 = vsel %vm5033_vm10, %v998_v24, %v1002_v6  ;;  %v2012_v38 = vshll.u32 %v1913_v15, 16  ;;  %v2016_v39 = vshrl.u32 %v1913_v15, 16  ;;  %v628_v20 = vld [vmem:[#allocation2 + $0x3c] sm:$0xf] }
  0x5e   : > { %v1531_v35 = vsel %vm5026_vm9, %v1529_v23, %v1530_v13  ;;  %v4516_v45 = vcombine.low %v993_v16, %v1003_v36  ;;  %v340_v46 = vsel %vm5049_vm12, %v332_v14, %v339_v30  ;;  %v2008_v47 = vrot.slane %v2006_v33, 5 }
  0x5f   : > { %1668 = vrot.lane.b32.xlu0 %v4547_v25, %s4918_s18  ;;  %v4548_v22 = vcombine.low %v1528_v26, %v1531_v35  ;;  %624 = vst.msk [vmem:[#allocation2 + $0x34] sm:$0xf] %vm215_vm0, %v340_v46  ;;  %v2014_v50 = vrot.slane %v2012_v38, 5  ;;  %v2018_v51 = vrot.slane %v2016_v39, 4  ;;  %v2022_v52 = vshll.u32 %v1914_v27, 16 }
  0x60   : > { %v626_v54 = vsel %vm5064_vm13, %v341_v31, %v625_v21  ;;  %1346 = vrot.lane.b32.xlu1 %v4516_v45, %s4919_s19  ;;  %v2009_v57 = vor.u32 %v2008_v47, %v2005_v32  ;;  %v2027_v58 = vshrl.u32 %v1915_v28, 16  ;;  %v2030_v59 = vshll.u32 %v1915_v28, 16  ;;  %v2956_v21 = vld [vmem:[#allocation2 + $0x30] sm:$0xf] }
  0x61   : > { %627 = vst [vmem:[#allocation2 + $0x38] sm:$0x1] %v626_v54  ;;  %v4595_v60 = vrot.slane %v2457_v34, 9  ;;  %v2019_v61 = vor.u32 %v2018_v51, %v2014_v50  ;;  %v2024_v62 = vrot.slane %v2022_v52, 5  ;;  %v2563_v63 = vrot.slane %v2458_v43, 5 }
  0x62   : > { %v2566_v0 = vrot.slane %v2459_v44, 5  ;;  %v2010_v1 = vrot.slane %v2009_v57, 4  ;;  %v2029_v2 = vrot.slane %v2027_v58, 4  ;;  %v2032_v3 = vrot.slane %v2030_v59, 5  ;;  %v869_v58 = vld [vmem:[#allocation2 + $0x30] sm:$0xf] }
  0x63   : > { %1845 = vrot.lane.b32.xlu0 %v4862_v42, %s4920_s20  ;;  %v4596_v4 = vrot.slane %v2460_v48, 9  ;;  %v2020_v5 = vrot.slane %v2019_v61, 4  ;;  %v2564_v6 = vsel %vm5026_vm9, %v4595_v60, %v2563_v63  ;;  %v2565_v53 = vrot.slane %v2563_v63, 4 }
  0x64   : > { %v343_v7 = vshrl.u32 %v191_v49, 16  ;;  %1670 = vrot.lane.b32.xlu1 %v4548_v22, %s4918_s18  ;;  %v2015_v8 = vsel %vm5033_vm10, %v2010_v1, %v2014_v50  ;;  %v2033_v9 = vor.u32 %v2032_v3, %v2029_v2  ;;  %v346_v10 = vshll.u32 %v191_v49, 16  ;;  %v632_v22 = vld [vmem:[#allocation2 + $0x44] sm:$0x1]  ;;  %v3501_v50 = vld [vmem:[#allocation2 + $0x30] sm:$0xe] }
  0x65   : > { %v351_v40 = vshrl.u32 %v5188_v56, 16  ;;  %v2025_v11 = vsel %vm5033_vm10, %v2020_v5, %v2024_v62  ;;  %v2567_v12 = vsel %vm5026_vm9, %v2565_v53, %v2566_v0  ;;  %v354_v14 = vshll.u32 %v5188_v56, 16 }
  0x66   : > { %v345_v13 = vrot.slane %v343_v7, 7  ;;  %v4863_v15 = vld [vmem:[#allocation2 + $0x30] sm:$0xff]   ;;  %v4579_v16 = vcombine.low %v2015_v8, %v2025_v11  ;;  %v2034_v18 = vrot.slane %v2033_v9, 4  ;;  %v4611_v30 = vcombine.low %v2564_v6, %v2567_v12 }
  0x67   : > { %v1916_v17 = vld [vmem:[#allocation2 + $0x34] sm:$0xf]  ;;  %v353_v44 = vrot.slane %v351_v40, 7  ;;  %v3047_v49 = vshrl.u32 %v2956_v21, 16  ;;  %v3050_v57 = vshll.u32 %v2956_v21, 16  ;;  %v4659_v7 = vrot.slane %v3501_v50, 9 }
  0x68   : > { %v1917_v24 = vld [vmem:[#allocation2 + $0x38] sm:$0x1]  ;;  %v2036_v25 = vshll.u32 %v1916_v17, 16  ;;  %v2040_v26 = vshrl.u32 %v1916_v17, 16  ;;  %v2461_v23 = vld [vmem:[#allocation2 + $0x34] sm:$0xf]  ;;  %v348_v27 = vor.u32 %v346_v10, %v345_v13  ;;  %1847 = vrot.lane.b32.xlu1 %v4863_v15, %s4920_s20  ;;  %2390 = vrot.lane.b32.xlu0 %v4579_v16, %s4924_s24 }
  0x69   : > { %v2046_v28 = vshll.u32 %v1917_v24, 16  ;;  %v2462_v31 = vld [vmem:[#allocation2 + $0x38] sm:$0x1]  ;;  %v2570_v32 = vrot.slane %v2461_v23, 5  ;;  %v349_v35 = vrot.slane %v345_v13, 4  ;;  %v4864_v52 = vld [vmem:[#allocation2 + $0x30] sm:$0xff]   ;;  %v356_v54 = vor.u32 %v354_v14, %v353_v44 }
  0x6a   : > { %v2038_v33 = vrot.slane %v2036_v25, 5  ;;  %v2042_v34 = vrot.slane %v2040_v26, 4  ;;  %v2573_v36 = vrot.slane %v2462_v31, 5  ;;  %v2957_v45 = vld [vmem:[#allocation2 + $0x34] sm:$0xf]  ;;  %v629_v47 = vsel %vm5041_vm11, %v348_v27, %v628_v20 }
  0x6b   : > { %v2048_v38 = vrot.slane %v2046_v28, 5  ;;  %v5207_v39 = vsel %vm5026_vm9, %v4596_v4, %v2570_v32  ;;  %v2572_v43 = vrot.slane %v2570_v32, 4  ;;  %v2958_v48 = vld [vmem:[#allocation2 + $0x38] sm:$0x1]  ;;  %v358_v56 = vrot.slane %v353_v44, 4 }
  0x6c   : > { %v2039_v42 = vsel %vm5033_vm10, %v2034_v18, %v2038_v33  ;;  %v2043_v46 = vor.u32 %v2042_v34, %v2038_v33  ;;  %2711 = vrot.lane.b32.xlu0 %v4611_v30, %s4922_s22  ;;  %630 = vst [vmem:[#allocation2 + $0x3c] sm:$0xf] %v629_v47  ;;  %v3049_v61 = vrot.slane %v3047_v49, 4  ;;  %v3056_v62 = vshll.u32 %v2957_v45, 16  ;;  %v3502_v63 = vld [vmem:[#allocation2 + $0x34] sm:$0xf] }
  0x6d   : > { %v2574_v51 = vsel %vm5026_vm9, %v2572_v43, %v2573_v36  ;;  %v357_v0 = vsel %vm5049_vm12, %v349_v35, %v356_v54  ;;  %v3052_v1 = vrot.slane %v3050_v57, 5  ;;  %v3060_v2 = vshrl.u32 %v2957_v45, 16  ;;  %v3503_v4 = vld [vmem:[#allocation2 + $0x38] sm:$0x1]  ;;  %v870_v8 = vld [vmem:[#allocation2 + $0x34] sm:$0xf] }
  0x6e   : > { %v2044_v59 = vrot.slane %v2043_v46, 4  ;;  %v4612_v60 = vcombine.low %v5207_v39, %v2574_v51  ;;  %v3066_v3 = vshll.u32 %v2958_v48, 16  ;;  %631 = vst.msk [vmem:[#allocation2 + $0x40] sm:$0xf] %vm215_vm0, %v357_v0  ;;  %v3058_v6 = vrot.slane %v3056_v62, 5 }
  0x6f   : > { %v633_v53 = vsel %vm5064_vm13, %v358_v56, %v632_v22  ;;  %v3053_v10 = vor.u32 %v3052_v1, %v3049_v61  ;;  %v3062_v40 = vrot.slane %v3060_v2, 4  ;;  %v3607_v12 = vrot.slane %v3502_v63, 5  ;;  %v871_v31 = vld [vmem:[#allocation2 + $0x38] sm:$0x1]  ;;  %v1417_v2 = vld [vmem:[#allocation2 + $0x30] sm:$0xe] }
  0x70   : > { %v2049_v5 = vsel %vm5033_vm10, %v2044_v59, %v2048_v38  ;;  %2889 = vrot.lane.b32.xlu0 %v4864_v52, %s4921_s21  ;;  %v3068_v11 = vrot.slane %v3066_v3, 5  ;;  %634 = vst [vmem:[#allocation2 + $0x44] sm:$0x1] %v633_v53  ;;  %v3610_v13 = vrot.slane %v3503_v4, 5  ;;  %v1005_v14 = vshrl.u32 %v869_v58, 16 }
  0x71   : > { %v4580_v9 = vcombine.low %v2039_v42, %v2049_v5  ;;  %v1008_v15 = vshll.u32 %v869_v58, 16  ;;  %v3054_v16 = vrot.slane %v3053_v10, 4  ;;  %v3063_v17 = vor.u32 %v3062_v40, %v3058_v6 }
  0x72   : > { %v1014_v18 = vshll.u32 %v870_v8, 16  ;;  %v1018_v20 = vshrl.u32 %v870_v8, 16  ;;  %v3608_v24 = vsel %vm5026_vm9, %v4659_v7, %v3607_v12  ;;  %v3609_v25 = vrot.slane %v3607_v12, 4 }
  0x73   : > { %2392 = vrot.lane.b32.xlu1 %v4580_v9, %s4924_s24  ;;  %v2959_v21 = vld [vmem:[#allocation2 + $0x3c] sm:$0xf]  ;;  %v1007_v26 = vrot.slane %v1005_v14, 4  ;;  %v3059_v23 = vsel %vm5033_vm10, %v3054_v16, %v3058_v6  ;;  %v3064_v27 = vrot.slane %v3063_v17, 4  ;;  %v1010_v33 = vrot.slane %v1008_v15, 5  ;;  %v4879_v17 = vld [vmem:[%s6203_s1] sm:$0xff]  }
  0x74   : > { %v3071_v28 = vshrl.u32 %v2959_v21, 16  ;;  %v3074_v30 = vshll.u32 %v2959_v21, 16  ;;  %v3611_v32 = vsel %vm5026_vm9, %v3609_v25, %v3610_v13  ;;  %v1016_v34 = vrot.slane %v1014_v18, 5  ;;  %v3504_v35 = vld [vmem:[#allocation2 + $0x3c] sm:$0xe]  ;;  %4795 = vmatprep.subr.bf16.mxu0 %v4879_v17  ;;  %4833 = vmatprep.subr.bf16.mxu1 %v4879_v17 }
  0x75   : > { %v1020_v36 = vrot.slane %v1018_v20, 4  ;;  %v4865_v38 = vld [vmem:[#allocation2 + $0x3c] sm:$0xff]   ;;  %v3069_v39 = vsel %vm5033_vm10, %v3064_v27, %v3068_v11  ;;  %v4675_v45 = vcombine.low %v3608_v24, %v3611_v32  ;;  %v1011_v50 = vor.u32 %v1010_v33, %v1007_v26  ;;  %v1418_v11 = vld [vmem:[#allocation2 + $0x34] sm:$0xf]  ;;  %v1419_v16 = vld [vmem:[#allocation2 + $0x38] sm:$0x1]  ;;  %4796 = vmatpush3.bf16.msra.mxu0 %v4879_v17  ;;  %4836 = vmatpush3.bf16.msra.mxu1 %v4879_v17 }
  0x76   : > { %v2960_v43 = vld [vmem:[#allocation2 + $0x40] sm:$0xf]  ;;  %v3073_v44 = vrot.slane %v3071_v28, 4  ;;  %v4643_v22 = vcombine.low %v3059_v23, %v3069_v39  ;;  %v3076_v46 = vrot.slane %v3074_v30, 5  ;;  %v1024_v52 = vshll.u32 %v871_v31, 16 }
  0x77   : > { %2713 = vrot.lane.b32.xlu1 %v4612_v60, %s4922_s22  ;;  %v2961_v42 = vld [vmem:[#allocation2 + $0x44] sm:$0x1]  ;;  %v3080_v47 = vshll.u32 %v2960_v43, 16  ;;  %v3084_v48 = vshrl.u32 %v2960_v43, 16  ;;  %v1021_v51 = vor.u32 %v1020_v36, %v1016_v34  ;;  %v3505_v54 = vld [vmem:[#allocation2 + $0x40] sm:$0xf] }
  0x78   : > { %v3090_v49 = vshll.u32 %v2961_v42, 16  ;;  %v3506_v56 = vld [vmem:[#allocation2 + $0x44] sm:$0x1]  ;;  %3434 = vrot.lane.b32.xlu0 %v4643_v22, %s4925_s25  ;;  %v3077_v57 = vor.u32 %v3076_v46, %v3073_v44  ;;  %v4660_v60 = vrot.slane %v3504_v35, 9  ;;  %v872_v61 = vld [vmem:[#allocation2 + $0x3c] sm:$0xf] }
  0x79   : > { %v3082_v58 = vrot.slane %v3080_v47, 5  ;;  %v3086_v59 = vrot.slane %v3084_v48, 4  ;;  %v1012_v63 = vrot.slane %v1011_v50, 4  ;;  %v1022_v0 = vrot.slane %v1021_v51, 4  ;;  %v873_v53 = vld [vmem:[#allocation2 + $0x40] sm:$0xf] }
  0x7a   : > { %v3092_v62 = vrot.slane %v3090_v49, 5  ;;  %v1026_v1 = vrot.slane %v1024_v52, 5  ;;  %v3078_v3 = vrot.slane %v3077_v57, 4  ;;  %v3614_v5 = vrot.slane %v3505_v54, 5  ;;  %v874_v9 = vld [vmem:[#allocation2 + $0x44] sm:$0x1] }
  0x7b   : > { %2891 = vrot.lane.b32.xlu1 %v4865_v38, %s4921_s21  ;;  %v3087_v4 = vor.u32 %v3086_v59, %v3082_v58  ;;  %v3617_v6 = vrot.slane %v3506_v56, 5  ;;  %v1017_v7 = vsel %vm5033_vm10, %v1012_v63, %v1016_v34  ;;  %v1029_v10 = vshrl.u32 %v872_v61, 16  ;;  %v1420_v25 = vld [vmem:[#allocation2 + $0x3c] sm:$0xe]  ;;  %v1421_v30 = vld [vmem:[#allocation2 + $0x40] sm:$0xf] }
  0x7c   : > { %v1027_v8 = vsel %vm5033_vm10, %v1022_v0, %v1026_v1  ;;  %v1032_v40 = vshll.u32 %v872_v61, 16  ;;  %v3083_v12 = vsel %vm5033_vm10, %v3078_v3, %v3082_v58  ;;  %3755 = vrot.lane.b32.xlu0 %v4675_v45, %s4923_s23  ;;  %v3615_v15 = vsel %vm5026_vm9, %v4660_v60, %v3614_v5  ;;  %v1422_v36 = vld [vmem:[#allocation2 + $0x44] sm:$0x1]  ;;  %v4882_v35 = vld [vmem:[%s6203_s1 + $0x8] sm:$0xff]   ;;  %v1918_v59 = vld [vmem:[#allocation2 + $0x3c] sm:$0xf] }
  0x7d   : > { %v3088_v13 = vrot.slane %v3087_v4, 4  ;;  %v4517_v14 = vcombine.low %v1017_v7, %v1027_v8  ;;  %v3616_v18 = vrot.slane %v3614_v5, 4  ;;  %v1031_v20 = vrot.slane %v1029_v10, 4  ;;  %v193_v45 = vld [vmem:[%s5020_s17 + $0x28] sm:$0xf]  ;;  %4797 = vmatprep.subr.bf16.mxu0 %v4882_v35  ;;  %4834 = vmatprep.subr.bf16.mxu1 %v4882_v35 }
  0x7e   : > { %v1034_v21 = vrot.slane %v1032_v40, 5  ;;  %v1038_v24 = vshll.u32 %v873_v53, 16  ;;  %v1042_v23 = vshrl.u32 %v873_v53, 16  ;;  %v1048_v27 = vshll.u32 %v874_v9, 16  ;;  %v194_v48 = vld [vmem:[%s5020_s17 + $0x2c] sm:$0xf]  ;;  %4798 = vmatpush3.bf16.msra.mxu0 %v4882_v35  ;;  %4837 = vmatpush3.bf16.msra.mxu1 %v4882_v35 }
  0x7f   : > { %v3093_v26 = vsel %vm5033_vm10, %v3088_v13, %v3092_v62  ;;  %v4533_v28 = vrot.slane %v1417_v2, 9  ;;  %v3618_v32 = vsel %vm5026_vm9, %v3616_v18, %v3617_v6  ;;  %v1534_v44 = vrot.slane %v1418_v11, 5  ;;  %v635_v0 = vld [vmem:[#allocation2 + $0x48] sm:$0xf]  ;;  %v1919_v5 = vld [vmem:[#allocation2 + $0x40] sm:$0xf] }
  0x80   : > { %v4644_v31 = vcombine.low %v3083_v12, %v3093_v26  ;;  %v1035_v33 = vor.u32 %v1034_v21, %v1031_v20  ;;  %v1040_v34 = vrot.slane %v1038_v24, 5  ;;  %v4676_v38 = vcombine.low %v3615_v15, %v3618_v32  ;;  %v639_v6 = vld [vmem:[#allocation2 + $0x50] sm:$0x1]  ;;  %v1920_v9 = vld [vmem:[#allocation2 + $0x44] sm:$0x1]  ;;  %v4866_v11 = vld [vmem:[#allocation2 + $0x3c] sm:$0xff]  }
  0x81   : > { %v1044_v39 = vrot.slane %v1042_v23, 4  ;;  %v1050_v43 = vrot.slane %v1048_v27, 5  ;;  %v1537_v42 = vrot.slane %v1419_v16, 5  ;;  %v4534_v46 = vrot.slane %v1420_v25, 9  ;;  %v2463_v15 = vld [vmem:[#allocation2 + $0x3c] sm:$0xe] }
  0x82   : > { %3436 = vrot.lane.b32.xlu1 %v4644_v31, %s4925_s25  ;;  %v1036_v22 = vrot.slane %v1035_v33, 4  ;;  %v1541_v47 = vrot.slane %v1421_v30, 5  ;;  %3757 = vrot.lane.b32.xlu0 %v4676_v38, %s4923_s23  ;;  %v1535_v50 = vsel %vm5026_vm9, %v4533_v28, %v1534_v44  ;;  %v1536_v51 = vrot.slane %v1534_v44, 4  ;;  %v195_v16 = vld [vmem:[%s5020_s17 + $0x30] sm:$0xf] }
  0x83   : > { %v1045_v49 = vor.u32 %v1044_v39, %v1040_v34  ;;  %v1544_v52 = vrot.slane %v1422_v36, 5  ;;  %v360_v58 = vshrl.u32 %v193_v45, 16  ;;  %v363_v62 = vshll.u32 %v193_v45, 16  ;;  %v2464_v24 = vld [vmem:[#allocation2 + $0x40] sm:$0xf] }
  0x84   : > { %v1041_v54 = vsel %vm5033_vm10, %v1036_v22, %v1040_v34  ;;  %v1542_v56 = vsel %vm5026_vm9, %v4534_v46, %v1541_v47  ;;  %v1543_v57 = vrot.slane %v1541_v47, 4  ;;  %v1538_v61 = vsel %vm5026_vm9, %v1536_v51, %v1537_v42  ;;  %v196_v28 = vld [vmem:[%s5020_s17 + $0x34] sm:$0xf]  ;;  %v2465_v33 = vld [vmem:[#allocation2 + $0x44] sm:$0x1] }
  0x85   : > { %v1046_v60 = vrot.slane %v1045_v49, 4  ;;  %v368_v63 = vshrl.u32 %v194_v48, 16  ;;  %v4549_v1 = vcombine.low %v1535_v50, %v1538_v61  ;;  %v362_v3 = vrot.slane %v360_v58, 7 }
  0x86   : > { %1348 = vrot.lane.b32.xlu1 %v4517_v14, %s4919_s19  ;;  %v1545_v2 = vsel %vm5026_vm9, %v1543_v57, %v1544_v52  ;;  %v371_v4 = vshll.u32 %v194_v48, 16  ;;  %v2051_v10 = vshrl.u32 %v1918_v59, 16  ;;  %v2054_v14 = vshll.u32 %v1918_v59, 16 }
  0x87   : > { %v1051_v53 = vsel %vm5033_vm10, %v1046_v60, %v1050_v43  ;;  %v4550_v7 = vcombine.low %v1542_v56, %v1545_v2  ;;  %v370_v8 = vrot.slane %v368_v63, 7  ;;  %1672 = vrot.lane.b32.xlu0 %v4549_v1, %s4918_s18  ;;  %v365_v12 = vor.u32 %v363_v62, %v362_v3 }
  0x88   : > { %v4518_v40 = vcombine.low %v1041_v54, %v1051_v53  ;;  %v366_v13 = vrot.slane %v362_v3, 4  ;;  %v2053_v20 = vrot.slane %v2051_v10, 4  ;;  %v2060_v21 = vshll.u32 %v1919_v5, 16  ;;  %v642_v54 = vld [vmem:[#allocation2 + $0x54] sm:$0xf] }
  0x89   : > { %v373_v17 = vor.u32 %v371_v4, %v370_v8  ;;  %v375_v18 = vrot.slane %v370_v8, 4  ;;  %v636_v25 = vsel %vm5041_vm11, %v365_v12, %v635_v0  ;;  %v2056_v26 = vrot.slane %v2054_v14, 5  ;;  %v5298_v0 = vld [vmem:[%s5020_s17 + $0x38] sm:$0xf] }
  0x8a   : > { %1350 = vrot.lane.b32.xlu1 %v4518_v40, %s4919_s19  ;;  %v2064_v23 = vshrl.u32 %v1919_v5, 16  ;;  %v2070_v27 = vshll.u32 %v1920_v9, 16  ;;  %637 = vst [vmem:[#allocation2 + $0x48] sm:$0xf] %v636_v25  ;;  %v2062_v31 = vrot.slane %v2060_v21, 5  ;;  %v4597_v35 = vrot.slane %v2463_v15, 9 }
  0x8b   : > { %v374_v30 = vsel %vm5049_vm12, %v366_v13, %v373_v17  ;;  %v640_v32 = vsel %vm5064_vm13, %v375_v18, %v639_v6  ;;  %1849 = vrot.lane.b32.xlu0 %v4866_v11, %s4920_s20  ;;  %v2057_v34 = vor.u32 %v2056_v26, %v2053_v20  ;;  %v2577_v38 = vrot.slane %v2464_v24, 5  ;;  %v646_v20 = vld [vmem:[#allocation2 + $0x5c] sm:$0x1] }
  0x8c   : > { %638 = vst.msk [vmem:[#allocation2 + $0x4c] sm:$0xf] %vm215_vm0, %v374_v30  ;;  %v2066_v36 = vrot.slane %v2064_v23, 4  ;;  %641 = vst [vmem:[#allocation2 + $0x50] sm:$0x1] %v640_v32  ;;  %v2072_v39 = vrot.slane %v2070_v27, 5 }
  0x8d   : > { %v377_v43 = vshrl.u32 %v195_v16, 16  ;;  %v380_v44 = vshll.u32 %v195_v16, 16  ;;  %v385_v45 = vshrl.u32 %v196_v28, 16  ;;  %v2058_v22 = vrot.slane %v2057_v34, 4 }
  0x8e   : > { %1674 = vrot.lane.b32.xlu1 %v4550_v7, %s4918_s18  ;;  %v2067_v42 = vor.u32 %v2066_v36, %v2062_v31  ;;  %v2579_v46 = vrot.slane %v2577_v38, 4  ;;  %v2580_v47 = vrot.slane %v2465_v33, 5  ;;  %v388_v50 = vshll.u32 %v196_v28, 16 }
  0x8f   : > { %v379_v48 = vrot.slane %v377_v43, 7  ;;  %v5286_v49 = vrot.slane %v385_v45, 7  ;;  %v2063_v51 = vsel %vm5033_vm10, %v2058_v22, %v2062_v31  ;;  %v2578_v61 = vsel %vm5026_vm9, %v4597_v35, %v2577_v38 }
  0x90   : > { %v2068_v52 = vrot.slane %v2067_v42, 4  ;;  %v2581_v62 = vsel %vm5026_vm9, %v2579_v46, %v2580_v47  ;;  %v394_v26 = vshrl.u32 %v5298_v0, 16  ;;  %vm1388_vm15 = vcmask 64544  }
  0x91   : > { %v382_v56 = vor.u32 %v380_v44, %v379_v48  ;;  %v383_v57 = vrot.slane %v379_v48, 4  ;;  %v390_v58 = vor.u32 %v388_v50, %v5286_v49  ;;  %v1921_v60 = vld [vmem:[#allocation2 + $0x48] sm:$0xf]  ;;  %v4613_v12 = vcombine.low %v2578_v61, %v2581_v62 }
  0x92   : > { %v2073_v59 = vsel %vm5033_vm10, %v2068_v52, %v2072_v39  ;;  %v2466_v63 = vld [vmem:[#allocation2 + $0x48] sm:$0xe]  ;;  %v2075_v4 = vshrl.u32 %v1921_v60, 16  ;;  %v2078_v7 = vshll.u32 %v1921_v60, 16  ;;  %v392_v25 = vrot.slane %v5286_v49, 4 }
  0x93   : > { %v4867_v1 = vld [vmem:[#allocation2 + $0x48] sm:$0xff]   ;;  %v4581_v2 = vcombine.low %v2063_v51, %v2073_v59  ;;  %v391_v5 = vsel %vm5049_vm12, %v383_v57, %v390_v58  ;;  %v643_v6 = vsel %vm5041_vm11, %v382_v56, %v642_v54  ;;  %v1923_v53 = vld [vmem:[#allocation2 + $0x50] sm:$0x1]  ;;  %v4598_v10 = vrot.slane %v2466_v63, 9 }
  0x94   : > { %v1922_v3 = vld [vmem:[#allocation2 + $0x4c] sm:$0xf]  ;;  %644 = vst [vmem:[#allocation2 + $0x54] sm:$0xf] %v643_v6  ;;  %645 = vst.msk [vmem:[#allocation2 + $0x58] sm:$0xf] %vm215_vm0, %v391_v5  ;;  %1851 = vrot.lane.b32.xlu1 %v4867_v1, %s4920_s20  ;;  %v647_v48 = vsel %vm5064_vm13, %v392_v25, %v646_v20 }
  0x95   : > { %v2084_v8 = vshll.u32 %v1922_v3, 16  ;;  %v2088_v9 = vshrl.u32 %v1922_v3, 16  ;;  %2394 = vrot.lane.b32.xlu0 %v4581_v2, %s4924_s24  ;;  %v2077_v40 = vrot.slane %v2075_v4, 4  ;;  %v2094_v11 = vshll.u32 %v1923_v53, 16  ;;  %v2467_v13 = vld [vmem:[#allocation2 + $0x4c] sm:$0xf] }
  0x96   : > { %v2468_v14 = vld [vmem:[#allocation2 + $0x50] sm:$0x1]  ;;  %v2080_v15 = vrot.slane %v2078_v7, 5  ;;  %v2584_v18 = vrot.slane %v2467_v13, 5  ;;  %v4868_v31 = vld [vmem:[#allocation2 + $0x48] sm:$0xff]   ;;  %v397_v49 = vshll.u32 %v5298_v0, 16 }
  0x97   : > { %v2086_v16 = vrot.slane %v2084_v8, 5  ;;  %v2090_v17 = vrot.slane %v2088_v9, 4  ;;  %v2096_v21 = vrot.slane %v2094_v11, 5  ;;  %v2587_v24 = vrot.slane %v2468_v14, 5  ;;  %v2962_v32 = vld [vmem:[#allocation2 + $0x48] sm:$0xf] }
  0x98   : > { %v2081_v23 = vor.u32 %v2080_v15, %v2077_v40  ;;  %v5311_v28 = vsel %vm5026_vm9, %v4598_v10, %v2584_v18  ;;  %v2586_v30 = vrot.slane %v2584_v18, 4  ;;  %v2963_v33 = vld [vmem:[#allocation2 + $0x4c] sm:$0xf]  ;;  %v2964_v34 = vld [vmem:[#allocation2 + $0x50] sm:$0x1]  ;;  %v3095_v36 = vshrl.u32 %v2962_v32, 16  ;;  %v5324_v58 = vpop.permute.xlu0 %1340  ;;  %v5330_v18 = vpop.permute.xlu1 %1664 }
  0x99   : > { %v2091_v27 = vor.u32 %v2090_v17, %v2086_v16  ;;  %2715 = vrot.lane.b32.xlu0 %v4613_v12, %s4922_s22  ;;  %v3098_v35 = vshll.u32 %v2962_v32, 16  ;;  %v3104_v38 = vshll.u32 %v2963_v33, 16  ;;  %v3108_v39 = vshrl.u32 %v2963_v33, 16  ;;  %v3507_v42 = vld [vmem:[#allocation2 + $0x48] sm:$0xe]  ;;  %v4887_v0 = vld [vmem:[#allocation2 + $0x30] sm:$0xff]  }
  0x9a   : > { %v2082_v43 = vrot.slane %v2081_v23, 4  ;;  %v2588_v45 = vsel %vm5026_vm9, %v2586_v30, %v2587_v24  ;;  %v3114_v22 = vshll.u32 %v2964_v34, 16  ;;  %v3097_v47 = vrot.slane %v3095_v36, 4  ;;  %648 = vst [vmem:[#allocation2 + $0x5c] sm:$0x1] %v647_v48  ;;  %845 = vst.msk [vmem:[#allocation3 + $0x20] sm:$0xff] %vm840_vm14, %v4887_v0 }
  0x9b   : > { %v2092_v44 = vrot.slane %v2091_v27, 4  ;;  %v4614_v46 = vcombine.low %v5311_v28, %v2588_v45  ;;  %v3100_v52 = vrot.slane %v3098_v35, 5  ;;  %v3106_v54 = vrot.slane %v3104_v38, 5  ;;  %v2965_v56 = vld [vmem:[#allocation2 + $0x54] sm:$0xf] }
  0x9c   : > { %v2087_v50 = vsel %vm5033_vm10, %v2082_v43, %v2086_v16  ;;  %v2966_v57 = vld [vmem:[#allocation2 + $0x58] sm:$0xf]  ;;  %v3110_v60 = vrot.slane %v3108_v39, 4  ;;  %v3116_v61 = vrot.slane %v3114_v22, 5  ;;  %v3119_v62 = vshrl.u32 %v2965_v56, 16 }
  0x9d   : > { %v2097_v51 = vsel %vm5033_vm10, %v2092_v44, %v2096_v21  ;;  %2893 = vrot.lane.b32.xlu0 %v4868_v31, %s4921_s21  ;;  %v3508_v63 = vld [vmem:[#allocation2 + $0x4c] sm:$0xf]  ;;  %v3101_v1 = vor.u32 %v3100_v52, %v3097_v47  ;;  %v3122_v2 = vshll.u32 %v2965_v56, 16  ;;  %v3128_v3 = vshll.u32 %v2966_v57, 16  ;;  %v3509_v5 = vld [vmem:[#allocation2 + $0x50] sm:$0x1] }
  0x9e   : > { %v4582_v59 = vcombine.low %v2087_v50, %v2097_v51  ;;  %v3132_v4 = vshrl.u32 %v2966_v57, 16  ;;  %v3111_v6 = vor.u32 %v3110_v60, %v3106_v54  ;;  %v3121_v53 = vrot.slane %v3119_v62, 4  ;;  %v875_v9 = vld [vmem:[#allocation2 + $0x48] sm:$0xf]  ;;  %v876_v13 = vld [vmem:[#allocation2 + $0x4c] sm:$0xf] }
  0x9f   : > { %v4661_v7 = vrot.slane %v3507_v42, 9  ;;  %v3621_v8 = vrot.slane %v3508_v63, 5  ;;  %v3102_v10 = vrot.slane %v3101_v1, 4  ;;  %v3124_v40 = vrot.slane %v3122_v2, 5  ;;  %v4869_v20 = vld [vmem:[#allocation2 + $0x54] sm:$0xff]  }
  0xa0   : > { %2396 = vrot.lane.b32.xlu1 %v4582_v59, %s4924_s24  ;;  %v3130_v11 = vrot.slane %v3128_v3, 5  ;;  %v3134_v12 = vrot.slane %v3132_v4, 4  ;;  %v3112_v14 = vrot.slane %v3111_v6, 4  ;;  %v3624_v17 = vrot.slane %v3509_v5, 5  ;;  %v877_v23 = vld [vmem:[#allocation2 + $0x50] sm:$0x1] }
  0xa1   : > { %v3622_v15 = vsel %vm5026_vm9, %v4661_v7, %v3621_v8  ;;  %v3623_v16 = vrot.slane %v3621_v8, 4  ;;  %v3107_v21 = vsel %vm5033_vm10, %v3102_v10, %v3106_v54  ;;  %v3125_v24 = vor.u32 %v3124_v40, %v3121_v53  ;;  %v3510_v28 = vld [vmem:[#allocation2 + $0x54] sm:$0xe]  ;;  %v2967_v32 = vld [vmem:[#allocation2 + $0x5c] sm:$0x1] }
  0xa2   : > { %v3135_v25 = vor.u32 %v3134_v12, %v3130_v11  ;;  %v1053_v27 = vshrl.u32 %v875_v9, 16  ;;  %v5334_v30 = vpop.permute.xlu0 %1841  ;;  %v3117_v31 = vsel %vm5033_vm10, %v3112_v14, %v3116_v61  ;;  %v1056_v34 = vshll.u32 %v875_v9, 16  ;;  %v3511_v35 = vld [vmem:[#allocation2 + $0x58] sm:$0xf]  ;;  %v3512_v45 = vld [vmem:[#allocation2 + $0x5c] sm:$0x1] }
  0xa3   : > { %v3625_v33 = vsel %vm5026_vm9, %v3623_v16, %v3624_v17  ;;  %v1062_v36 = vshll.u32 %v876_v13, 16  ;;  %v4645_v38 = vcombine.low %v3107_v21, %v3117_v31  ;;  %v3126_v39 = vrot.slane %v3125_v24, 4  ;;  %v879_v56 = vld [vmem:[#allocation2 + $0x58] sm:$0xf]  ;;  %v880_v62 = vld [vmem:[#allocation2 + $0x5c] sm:$0x1] }
  0xa4   : > { %2717 = vrot.lane.b32.xlu1 %v4614_v46, %s4922_s22  ;;  %v3136_v43 = vrot.slane %v3135_v25, 4  ;;  %v3138_v44 = vshll.u32 %v2967_v32, 16  ;;  %v4677_v22 = vcombine.low %v3622_v15, %v3625_v33  ;;  %v1055_v42 = vrot.slane %v1053_v27, 4  ;;  %v878_v46 = vld [vmem:[#allocation2 + $0x54] sm:$0xf] }
  0xa5   : > { %v1058_v47 = vrot.slane %v1056_v34, 5  ;;  %v1064_v48 = vrot.slane %v1062_v36, 5  ;;  %3438 = vrot.lane.b32.xlu0 %v4645_v38, %s4925_s25  ;;  %v3131_v50 = vsel %vm5033_vm10, %v3126_v39, %v3130_v11  ;;  %v1066_v52 = vshrl.u32 %v876_v13, 16  ;;  %v1423_v5 = vld [vmem:[#allocation2 + $0x48] sm:$0xe] }
  0xa6   : > { %v3140_v51 = vrot.slane %v3138_v44, 5  ;;  %v1072_v54 = vshll.u32 %v877_v23, 16  ;;  %v4662_v59 = vrot.slane %v3510_v28, 9  ;;  %v3628_v60 = vrot.slane %v3511_v35, 5  ;;  %v1424_v10 = vld [vmem:[#allocation2 + $0x4c] sm:$0xf] }
  0xa7   : > { %v1059_v57 = vor.u32 %v1058_v47, %v1055_v42  ;;  %v3631_v61 = vrot.slane %v3512_v45, 5  ;;  %v1068_v2 = vrot.slane %v1066_v52, 4  ;;  %v1077_v4 = vshrl.u32 %v878_v46, 16  ;;  %v1425_v40 = vld [vmem:[#allocation2 + $0x50] sm:$0x1] }
  0xa8   : > { %2895 = vrot.lane.b32.xlu1 %v4869_v20, %s4921_s21  ;;  %v5345_v63 = vpop.permute.xlu1 %1843  ;;  %v3141_v1 = vsel %vm5033_vm10, %v3136_v43, %v3140_v51  ;;  %v1074_v3 = vrot.slane %v1072_v54, 5  ;;  %v3629_v8 = vsel %vm5026_vm9, %v4662_v59, %v3628_v60  ;;  %v3630_v9 = vrot.slane %v3628_v60, 4  ;;  %v1426_v15 = vld [vmem:[#allocation2 + $0x54] sm:$0xe]  ;;  %v1427_v24 = vld [vmem:[#allocation2 + $0x58] sm:$0xf] }
  0xa9   : > { %v5349_v6 = vpop.permute.xlu0 %2885  ;;  %v4646_v53 = vcombine.low %v3131_v50, %v3141_v1  ;;  %v1060_v7 = vrot.slane %v1059_v57, 4  ;;  %3759 = vrot.lane.b32.xlu0 %v4677_v22, %s4923_s23  ;;  %v1069_v11 = vor.u32 %v1068_v2, %v1064_v48  ;;  %v1079_v12 = vrot.slane %v1077_v4, 4  ;;  %v1428_v38 = vld [vmem:[#allocation2 + $0x5c] sm:$0x1]  ;;  %v1924_v1 = vld [vmem:[#allocation2 + $0x54] sm:$0xf] }
  0xaa   : > { %v1080_v13 = vshll.u32 %v878_v46, 16  ;;  %v1086_v14 = vshll.u32 %v879_v56, 16  ;;  %v3632_v17 = vsel %vm5026_vm9, %v3630_v9, %v3631_v61  ;;  %v1090_v20 = vshrl.u32 %v879_v56, 16  ;;  %v198_v22 = vld [vmem:[%s5020_s17 + $0x3c] sm:$0xf] }
  0xab   : > { %v1065_v16 = vsel %vm5033_vm10, %v1060_v7, %v1064_v48  ;;  %v1096_v21 = vshll.u32 %v880_v62, 16  ;;  %v1070_v23 = vrot.slane %v1069_v11, 4  ;;  %v4678_v27 = vcombine.low %v3629_v8, %v3632_v17  ;;  %v653_v7 = vld [vmem:[#allocation2 + $0x68] sm:$0x1]  ;;  %v1925_v11 = vld [vmem:[#allocation2 + $0x58] sm:$0xf] }
  0xac   : > { %3440 = vrot.lane.b32.xlu1 %v4646_v53, %s4925_s25  ;;  %v5359_v25 = vpop.permute.xlu1 %2887  ;;  %v1082_v28 = vrot.slane %v1080_v13, 5  ;;  %v1088_v31 = vrot.slane %v1086_v14, 5  ;;  %v1092_v33 = vrot.slane %v1090_v20, 4  ;;  %v4535_v36 = vrot.slane %v1423_v5, 9  ;;  %v4870_v5 = vld [vmem:[#allocation2 + $0x54] sm:$0xff]  }
  0xad   : > { %v5361_v32 = vpop.permute.xlu0 %2707  ;;  %v1098_v34 = vrot.slane %v1096_v21, 5  ;;  %v1548_v35 = vrot.slane %v1424_v10, 5  ;;  %v1075_v39 = vsel %vm5033_vm10, %v1070_v23, %v1074_v3  ;;  %3761 = vrot.lane.b32.xlu0 %v4678_v27, %s4923_s23  ;;  %v1551_v44 = vrot.slane %v1425_v40, 5  ;;  %v649_v53 = vld [vmem:[#allocation2 + $0x60] sm:$0xf]  ;;  %v4878_v23 = vld [vmem:[#allocation2 + $0x18] sm:$0xff]  }
  0xae   : > { %v1083_v43 = vor.u32 %v1082_v28, %v1079_v12  ;;  %v4536_v45 = vrot.slane %v1426_v15, 9  ;;  %v4519_v42 = vcombine.low %v1065_v16, %v1075_v39  ;;  %v1093_v47 = vor.u32 %v1092_v33, %v1088_v31  ;;  %v1926_v12 = vld [vmem:[#allocation2 + $0x5c] sm:$0x1]  ;;  %v2469_v17 = vld [vmem:[#allocation2 + $0x54] sm:$0xe]  ;;  %v4872_v21 = vld [vmem:[#allocation2] sm:$0xff]  }
  0xaf   : > { %v1549_v48 = vsel %vm5026_vm9, %v4535_v36, %v1548_v35  ;;  %v1550_v46 = vrot.slane %v1548_v35, 4  ;;  %v1555_v51 = vrot.slane %v1427_v24, 5  ;;  %v1558_v52 = vrot.slane %v1428_v38, 5  ;;  %v2470_v20 = vld [vmem:[#allocation2 + $0x58] sm:$0xf]  ;;  %v4877_v24 = vld [vmem:[#allocation2 + $0xc] sm:$0xff]  }
  0xb0   : > { %v1084_v50 = vrot.slane %v1083_v43, 4  ;;  %v396_v54 = vrot.slane %v394_v26, 7  ;;  %v5371_v56 = vpop.permute.xlu1 %1666  ;;  %1352 = vrot.lane.b32.xlu1 %v4519_v42, %s4919_s19  ;;  %v1094_v59 = vrot.slane %v1093_v47, 4  ;;  %v402_v61 = vshrl.u32 %v198_v22, 16  ;;  %v4880_v27 = vld [vmem:[#allocation2 + $0x24] sm:$0xff]   ;;  %v4888_v36 = vld [vmem:[#allocation2 + $0x3c] sm:$0xff]  }
  0xb1   : > { %v5373_v57 = vpop.permute.xlu0 %3751  ;;  %v1552_v60 = vsel %vm5026_vm9, %v1550_v46, %v1551_v44  ;;  %v405_v62 = vshll.u32 %v198_v22, 16  ;;  %v1556_v26 = vsel %vm5026_vm9, %v4536_v45, %v1555_v51  ;;  %v1557_v4 = vrot.slane %v1555_v51, 4  ;;  %841 = vst.msk [vmem:[#allocation3] sm:$0xff] %vm840_vm14, %v4872_v21  ;;  %842 = vst.msk [vmem:[#allocation3 + $0x8] sm:$0xff] %vm840_vm14, %v4877_v24  ;;  %v656_v0 = vld [vmem:[#allocation2 + $0x6c] sm:$0xf] }
  0xb2   : > { %v1089_v2 = vsel %vm5033_vm10, %v1084_v50, %v1088_v31  ;;  %v4551_v3 = vcombine.low %v1549_v48, %v1552_v60  ;;  %v1099_v8 = vsel %vm5033_vm10, %v1094_v59, %v1098_v34  ;;  %v399_v9 = vor.u32 %v397_v49, %v396_v54  ;;  %v2471_v34 = vld [vmem:[#allocation2 + $0x5c] sm:$0x1]  ;;  %v5404_v60 = vld [vmem:[%s5020_s17 + $0x44] sm:$0xf]  ;;  %843 = vst.msk [vmem:[#allocation3 + $0x10] sm:$0xff] %vm840_vm14, %v4878_v23 }
  0xb3   : > { %v400_v10 = vrot.slane %v396_v54, 4  ;;  %v404_v40 = vrot.slane %v402_v61, 7  ;;  %v4520_v13 = vcombine.low %v1089_v2, %v1099_v8  ;;  %v1559_v14 = vsel %vm5026_vm9, %v1557_v4, %v1558_v52  ;;  %v199_v52 = vld [vmem:[%s5020_s17 + $0x40] sm:$0xf]  ;;  %844 = vst.msk [vmem:[#allocation3 + $0x18] sm:$0xff] %vm840_vm14, %v4880_v27  ;;  %846 = vst.msk [vmem:[#allocation3 + $0x28] sm:$0xff] %vm840_vm14, %v4888_v36 }
  0xb4   : > { %1676 = vrot.lane.b32.xlu0 %v4551_v3, %s4918_s18  ;;  %v2099_v15 = vshrl.u32 %v1924_v1, 16  ;;  %v2102_v16 = vshll.u32 %v1924_v1, 16  ;;  %v4552_v49 = vcombine.low %v1556_v26, %v1559_v14  ;;  %v650_v33 = vsel %vm5041_vm11, %v399_v9, %v649_v53  ;;  %v5392_v44 = vpop.permute.xlu1 %2709  ;;  %1389 = vst.msk [vmem:[#allocation3] sm:$0xff] %vm1388_vm15, %v5324_v58 }
  0xb5   : > { %v407_v28 = vor.u32 %v405_v62, %v404_v40  ;;  %v409_v31 = vrot.slane %v404_v40, 4  ;;  %1354 = vrot.lane.b32.xlu1 %v4520_v13, %s4919_s19  ;;  %651 = vst [vmem:[#allocation2 + $0x60] sm:$0xf] %v650_v33  ;;  %v2108_v39 = vshll.u32 %v1925_v11, 16  ;;  %v2112_v43 = vshrl.u32 %v1925_v11, 16  ;;  %v5394_v45 = vpop.permute.xlu0 %3753 }
  0xb6   : > { %v2101_v35 = vrot.slane %v2099_v15, 4  ;;  %v2104_v38 = vrot.slane %v2102_v16, 5  ;;  %v2118_v42 = vshll.u32 %v1926_v12, 16  ;;  %v2591_v51 = vrot.slane %v2470_v20, 5 }
  0xb7   : > { %v408_v22 = vsel %vm5049_vm12, %v400_v10, %v407_v28  ;;  %v654_v47 = vsel %vm5064_vm13, %v409_v31, %v653_v7  ;;  %v2110_v46 = vrot.slane %v2108_v39, 5  ;;  %v2114_v50 = vrot.slane %v2112_v43, 4 }
  0xb8   : > { %1853 = vrot.lane.b32.xlu0 %v4870_v5, %s4920_s20  ;;  %652 = vst.msk [vmem:[#allocation2 + $0x64] sm:$0xf] %vm215_vm0, %v408_v22  ;;  %v2105_v48 = vor.u32 %v2104_v38, %v2101_v35  ;;  %655 = vst [vmem:[#allocation2 + $0x68] sm:$0x1] %v654_v47  ;;  %v4599_v54 = vrot.slane %v2469_v17, 9  ;;  %v2594_v59 = vrot.slane %v2471_v34, 5  ;;  %v5420_v7 = vpop.permute.xlu1 %2388 }
  0xb9   : > { %1678 = vrot.lane.b32.xlu1 %v4552_v49, %s4918_s18  ;;  %v2115_v62 = vor.u32 %v2114_v50, %v2110_v46  ;;  %v2120_v1 = vrot.slane %v2118_v42, 5  ;;  %v2593_v2 = vrot.slane %v2591_v51, 4  ;;  %vm1712_vm1 = vcmask 97344  }
  0xba   : > { %v2106_v61 = vrot.slane %v2105_v48, 4  ;;  %v411_v3 = vshrl.u32 %v199_v52, 16  ;;  %1713 = vst.msk [vmem:[#allocation3] sm:$0xff] %vm1712_vm1, %v5330_v18  ;;  %v414_v5 = vshll.u32 %v199_v52, 16  ;;  %v419_v53 = vshrl.u32 %v5404_v60, 16 }
  0xbb   : > { %v2116_v4 = vrot.slane %v2115_v62, 4  ;;  %v2592_v10 = vsel %vm5026_vm9, %v4599_v54, %v2591_v51  ;;  %v2595_v58 = vsel %vm5026_vm9, %v2593_v2, %v2594_v59  ;;  %vm1889_vm2 = vcmask 130144  }
  0xbc   : > { %v2111_v26 = vsel %vm5033_vm10, %v2106_v61, %v2110_v46  ;;  %v1343_v8 = vpop.permute.xlu0 %1342  ;;  %v1927_v9 = vld [vmem:[#allocation2 + $0x60] sm:$0xf]  ;;  %v413_v17 = vrot.slane %v411_v3, 7  ;;  %v4615_v28 = vcombine.low %v2592_v10, %v2595_v58  ;;  %v421_v48 = vrot.slane %v419_v53, 7  ;;  %1890 = vst.msk [vmem:[#allocation3] sm:$0xff] %vm1889_vm2, %v5334_v30 }
  0xbd   : > { %v2472_v40 = vld [vmem:[#allocation2 + $0x60] sm:$0xe]  ;;  %1390 = vst.msk [vmem:[#allocation3 + $0x8] sm:$0xff] %vm1388_vm15, %v1343_v8  ;;  %v2121_v11 = vsel %vm5033_vm10, %v2116_v4, %v2120_v1  ;;  %v2123_v18 = vshrl.u32 %v1927_v9, 16  ;;  %v2126_v12 = vshll.u32 %v1927_v9, 16  ;;  %vm2434_vm3 = vcmask 162944  }
  0xbe   : > { %v4600_v13 = vrot.slane %v2472_v40, 9  ;;  %1714 = vst.msk [vmem:[#allocation3 + $0x8] sm:$0xff] %vm1712_vm1, %v5371_v56  ;;  %v4583_v15 = vcombine.low %v2111_v26, %v2121_v11  ;;  %v416_v34 = vor.u32 %v414_v5, %v413_v17  ;;  %v422_v56 = vshll.u32 %v5404_v60, 16  ;;  %v2968_v46 = vld [vmem:[#allocation2 + $0x60] sm:$0xf] }
  0xbf   : > { %v4871_v14 = vld [vmem:[#allocation2 + $0x60] sm:$0xff]   ;;  %v1929_v20 = vld [vmem:[#allocation2 + $0x68] sm:$0x1]  ;;  %v2125_v21 = vrot.slane %v2123_v18, 4  ;;  %v2128_v24 = vrot.slane %v2126_v12, 5  ;;  %v417_v47 = vrot.slane %v413_v17, 4 }
  0xc0   : > { %v1928_v16 = vld [vmem:[#allocation2 + $0x64] sm:$0xf]  ;;  %1855 = vrot.lane.b32.xlu1 %v4871_v14, %s4920_s20  ;;  %2398 = vrot.lane.b32.xlu0 %v4583_v15, %s4924_s24  ;;  %v2142_v49 = vshll.u32 %v1929_v20, 16  ;;  %v2474_v33 = vld [vmem:[#allocation2 + $0x68] sm:$0x1]  ;;  %v5434_v43 = vpop.permute.xlu1 %3432  ;;  %v424_v61 = vor.u32 %v422_v56, %v421_v48  ;;  %v426_v62 = vrot.slane %v421_v48, 4  ;;  %v657_v1 = vsel %vm5041_vm11, %v416_v34, %v656_v0 }
  0xc1   : > { %v2132_v23 = vshll.u32 %v1928_v16, 16  ;;  %v2136_v27 = vshrl.u32 %v1928_v16, 16  ;;  %v2473_v31 = vld [vmem:[#allocation2 + $0x64] sm:$0xf]  ;;  %v2129_v36 = vor.u32 %v2128_v24, %v2125_v21  ;;  %v2601_v42 = vrot.slane %v2474_v33, 5  ;;  %1891 = vst.msk [vmem:[#allocation3 + $0x8] sm:$0xff] %vm1889_vm2, %v5345_v63 }
  0xc2   : > { %v2598_v39 = vrot.slane %v2473_v31, 5  ;;  %v2144_v22 = vrot.slane %v2142_v49, 5  ;;  %v2969_v59 = vld [vmem:[#allocation2 + $0x64] sm:$0xf]  ;;  %v2970_v2 = vld [vmem:[#allocation2 + $0x68] sm:$0x1]  ;;  %v425_v58 = vsel %vm5049_vm12, %v417_v47, %v424_v61 }
  0xc3   : > { %v2134_v35 = vrot.slane %v2132_v23, 5  ;;  %v2138_v38 = vrot.slane %v2136_v27, 4  ;;  %v2130_v50 = vrot.slane %v2129_v36, 4  ;;  %v4873_v60 = vld [vmem:[#allocation2 + $0x60] sm:$0xff]   ;;  %658 = vst [vmem:[#allocation2 + $0x6c] sm:$0xf] %v657_v1 }
  0xc4   : > { %v5438_v52 = vsel %vm5026_vm9, %v4600_v13, %v2598_v39  ;;  %v2600_v54 = vrot.slane %v2598_v39, 4  ;;  %2719 = vrot.lane.b32.xlu0 %v4615_v28, %s4922_s22  ;;  %v3143_v5 = vshrl.u32 %v2968_v46, 16  ;;  %v660_v53 = vld [vmem:[#allocation2 + $0x74] sm:$0x1]  ;;  %v3513_v8 = vld [vmem:[#allocation2 + $0x60] sm:$0xe]  ;;  %v5451_v9 = vpop.permute.xlu0 %2386 }
  0xc5   : > { %v2139_v51 = vor.u32 %v2138_v38, %v2134_v35  ;;  %v2135_v3 = vsel %vm5033_vm10, %v2130_v50, %v2134_v35  ;;  %v3146_v40 = vshll.u32 %v2968_v46, 16  ;;  %v3152_v11 = vshll.u32 %v2969_v59, 16  ;;  %v3514_v18 = vld [vmem:[#allocation2 + $0x64] sm:$0xf]  ;;  %v3515_v12 = vld [vmem:[#allocation2 + $0x68] sm:$0x1] }
  0xc6   : > { %v2602_v4 = vsel %vm5026_vm9, %v2600_v54, %v2601_v42  ;;  %659 = vst.msk [vmem:[#allocation2 + $0x70] sm:$0xf] %vm215_vm0, %v425_v58  ;;  %v3145_v13 = vrot.slane %v3143_v5, 4  ;;  %v3156_v14 = vshrl.u32 %v2969_v59, 16  ;;  %v3162_v15 = vshll.u32 %v2970_v2, 16 }
  0xc7   : > { %v2140_v26 = vrot.slane %v2139_v51, 4  ;;  %v4616_v10 = vcombine.low %v5438_v52, %v2602_v4  ;;  %v881_v63 = vld [vmem:[#allocation2 + $0x60] sm:$0xf]  ;;  %v3148_v20 = vrot.slane %v3146_v40, 5  ;;  %v3154_v21 = vrot.slane %v3152_v11, 5  ;;  %2436 = vst.msk [vmem:[#allocation3 + $0x8] sm:$0xff] %vm2434_vm3, %v5420_v7 }
  0xc8   : > { %v1345_v16 = vpop.permute.xlu1 %1344  ;;  %2897 = vrot.lane.b32.xlu0 %v4873_v60, %s4921_s21  ;;  %v661_v24 = vsel %vm5064_vm13, %v426_v62, %v660_v53  ;;  %v882_v23 = vld [vmem:[#allocation2 + $0x64] sm:$0xf]  ;;  %v3158_v27 = vrot.slane %v3156_v14, 4  ;;  %v3164_v0 = vrot.slane %v3162_v15, 5  ;;  %v4663_v49 = vrot.slane %v3513_v8, 9  ;;  %2435 = vst.msk [vmem:[#allocation3] sm:$0xff] %vm2434_vm3, %v5451_v9 }
  0xc9   : > { %v2145_v30 = vsel %vm5033_vm10, %v2140_v26, %v2144_v22  ;;  %1391 = vst.msk [vmem:[#allocation3 + $0x10] sm:$0xff] %vm1388_vm15, %v1345_v16  ;;  %662 = vst [vmem:[#allocation2 + $0x74] sm:$0x1] %v661_v24  ;;  %v3635_v28 = vrot.slane %v3514_v18, 5  ;;  %v3149_v31 = vor.u32 %v3148_v20, %v3145_v13  ;;  %v3638_v33 = vrot.slane %v3515_v12, 5 }
  0xca   : > { %v4584_v17 = vcombine.low %v2135_v3, %v2145_v30  ;;  %v1101_v34 = vshrl.u32 %v881_v63, 16  ;;  %v1104_v56 = vshll.u32 %v881_v63, 16  ;;  %v3159_v36 = vor.u32 %v3158_v27, %v3154_v21  ;;  %v2971_v47 = vld [vmem:[#allocation2 + $0x6c] sm:$0xf]  ;;  %v883_v54 = vld [vmem:[#allocation2 + $0x68] sm:$0x1] }
  0xcb   : > { %v5466_v35 = vsel %vm5026_vm9, %v4663_v49, %v3635_v28  ;;  %v3637_v38 = vrot.slane %v3635_v28, 4  ;;  %v1110_v39 = vshll.u32 %v882_v23, 16  ;;  %v3150_v42 = vrot.slane %v3149_v31, 4  ;;  %v3516_v5 = vld [vmem:[#allocation2 + $0x6c] sm:$0xe] }
  0xcc   : > { %2400 = vrot.lane.b32.xlu1 %v4584_v17, %s4924_s24  ;;  %v1103_v48 = vrot.slane %v1101_v34, 4  ;;  %v3160_v46 = vrot.slane %v3159_v36, 4  ;;  %v3167_v50 = vshrl.u32 %v2971_v47, 16  ;;  %v3170_v51 = vshll.u32 %v2971_v47, 16  ;;  %v884_v24 = vld [vmem:[#allocation2 + $0x6c] sm:$0xf] }
  0xcd   : > { %v5468_v22 = vpop.permute.xlu0 %3430  ;;  %v3639_v52 = vsel %vm5026_vm9, %v3637_v38, %v3638_v33  ;;  %v4874_v59 = vld [vmem:[#allocation2 + $0x6c] sm:$0xff]   ;;  %v3155_v60 = vsel %vm5033_vm10, %v3150_v42, %v3154_v21  ;;  %v1106_v1 = vrot.slane %v1104_v56, 5  ;;  %v5478_v11 = vrot.slane %v1110_v39, 5 }
  0xce   : > { %v2972_v61 = vld [vmem:[#allocation2 + $0x70] sm:$0xf]  ;;  %v4679_v62 = vcombine.low %v5466_v35, %v3639_v52  ;;  %v3165_v2 = vsel %vm5033_vm10, %v3160_v46, %v3164_v0  ;;  %v3169_v3 = vrot.slane %v3167_v50, 4  ;;  %v3172_v26 = vrot.slane %v3170_v51, 5  ;;  %v4893_v50 = vld [vmem:[#allocation2 + $0x48] sm:$0xff]  }
  0xcf   : > { %v3176_v4 = vshll.u32 %v2972_v61, 16  ;;  %v4647_v8 = vcombine.low %v3155_v60, %v3165_v2  ;;  %v3180_v40 = vshrl.u32 %v2972_v61, 16  ;;  %v3517_v18 = vld [vmem:[#allocation2 + $0x70] sm:$0xf]  ;;  %v1114_v14 = vshrl.u32 %v882_v23, 16  ;;  %847 = vst.msk [vmem:[#allocation3 + $0x30] sm:$0xff] %vm840_vm14, %v4893_v50 }
  0xd0   : > { %2721 = vrot.lane.b32.xlu1 %v4616_v10, %s4922_s22  ;;  %v2973_v58 = vld [vmem:[#allocation2 + $0x74] sm:$0x1]  ;;  %v1107_v10 = vor.u32 %v1106_v1, %v1103_v48  ;;  %v3173_v12 = vor.u32 %v3172_v26, %v3169_v3  ;;  %v1120_v20 = vshll.u32 %v883_v54, 16  ;;  %v4664_v21 = vrot.slane %v3516_v5, 9  ;;  %v885_v31 = vld [vmem:[#allocation2 + $0x70] sm:$0xf] }
  0xd1   : > { %v1669_v53 = vpop.permute.xlu0 %1668  ;;  %v3178_v30 = vrot.slane %v3176_v4, 5  ;;  %v3186_v13 = vshll.u32 %v2973_v58, 16  ;;  %v3518_v15 = vld [vmem:[#allocation2 + $0x74] sm:$0x1]  ;;  %3442 = vrot.lane.b32.xlu0 %v4647_v8, %s4925_s25  ;;  %v3182_v16 = vrot.slane %v3180_v40, 4  ;;  %v1116_v49 = vrot.slane %v1114_v14, 4 }
  0xd2   : > { %1715 = vst.msk [vmem:[#allocation3 + $0x10] sm:$0xff] %vm1712_vm1, %v1669_v53  ;;  %v1347_v63 = vpop.permute.xlu1 %1346  ;;  %v1108_v17 = vrot.slane %v1107_v10, 4  ;;  %v3174_v27 = vrot.slane %v3173_v12, 4  ;;  %v3642_v28 = vrot.slane %v3517_v18, 5  ;;  %v1122_v56 = vrot.slane %v1120_v20, 5  ;;  %v4894_v4 = vld [vmem:[#allocation2 + $0x54] sm:$0xff]  }
  0xd3   : > { %1392 = vst.msk [vmem:[#allocation3 + $0x18] sm:$0xff] %vm1388_vm15, %v1347_v63  ;;  %v3188_v0 = vrot.slane %v3186_v13, 5  ;;  %v3183_v23 = vor.u32 %v3182_v16, %v3178_v30  ;;  %v3645_v36 = vrot.slane %v3518_v15, 5  ;;  %v886_v35 = vld [vmem:[#allocation2 + $0x74] sm:$0x1]  ;;  %v1117_v39 = vor.u32 %v1116_v49, %v5478_v11 }
  0xd4   : > { %2899 = vrot.lane.b32.xlu1 %v4874_v59, %s4921_s21  ;;  %v1113_v34 = vsel %vm5033_vm10, %v1108_v17, %v5478_v11  ;;  %v3179_v38 = vsel %vm5033_vm10, %v3174_v27, %v3178_v30  ;;  %v3643_v42 = vsel %vm5026_vm9, %v4664_v21, %v3642_v28  ;;  %v3644_v47 = vrot.slane %v3642_v28, 4  ;;  %v1429_v48 = vld [vmem:[#allocation2 + $0x60] sm:$0xe]  ;;  %v1430_v3 = vld [vmem:[#allocation2 + $0x64] sm:$0xf]  ;;  %848 = vst.msk [vmem:[#allocation3 + $0x38] sm:$0xff] %vm840_vm14, %v4894_v4 }
  0xd5   : > { %v1846_v33 = vpop.permute.xlu0 %1845  ;;  %v3184_v51 = vrot.slane %v3183_v23, 4  ;;  %3763 = vrot.lane.b32.xlu0 %v4679_v62, %s4923_s23  ;;  %v1125_v52 = vshrl.u32 %v884_v24, 16  ;;  %v1128_v54 = vshll.u32 %v884_v24, 16  ;;  %v1134_v59 = vshll.u32 %v885_v31, 16  ;;  %v201_v26 = vld [vmem:[%s5020_s17 + $0x48] sm:$0xf] }
  0xd6   : > { %1892 = vst.msk [vmem:[#allocation3 + $0x10] sm:$0xff] %vm1889_vm2, %v1846_v33  ;;  %v1671_v46 = vpop.permute.xlu1 %1670  ;;  %v1118_v60 = vrot.slane %v1117_v39, 4  ;;  %v3646_v61 = vsel %vm5026_vm9, %v3644_v47, %v3645_v36  ;;  %v1138_v1 = vshrl.u32 %v885_v31, 16  ;;  %v1144_v2 = vshll.u32 %v886_v35, 16  ;;  %v1431_v58 = vld [vmem:[#allocation2 + $0x68] sm:$0x1] }
  0xd7   : > { %1716 = vst.msk [vmem:[#allocation3 + $0x18] sm:$0xff] %vm1712_vm1, %v1671_v46  ;;  %v3189_v5 = vsel %vm5033_vm10, %v3184_v51, %v3188_v0  ;;  %v4680_v62 = vcombine.low %v3643_v42, %v3646_v61  ;;  %v1127_v53 = vrot.slane %v1125_v52, 4  ;;  %v1130_v8 = vrot.slane %v1128_v54, 5  ;;  %v1432_v40 = vld [vmem:[#allocation2 + $0x6c] sm:$0xe] }
  0xd8   : > { %v4648_v10 = vcombine.low %v3179_v38, %v3189_v5  ;;  %v1123_v11 = vsel %vm5033_vm10, %v1118_v60, %v1122_v56  ;;  %v1136_v18 = vrot.slane %v1134_v59, 5  ;;  %v1140_v12 = vrot.slane %v1138_v1, 4  ;;  %v1433_v30 = vld [vmem:[#allocation2 + $0x70] sm:$0xf]  ;;  %v1434_v13 = vld [vmem:[#allocation2 + $0x74] sm:$0x1] }
  0xd9   : > { %v4521_v63 = vcombine.low %v1113_v34, %v1123_v11  ;;  %3765 = vrot.lane.b32.xlu0 %v4680_v62, %s4923_s23  ;;  %v1131_v16 = vor.u32 %v1130_v8, %v1127_v53  ;;  %v1146_v17 = vrot.slane %v1144_v2, 5  ;;  %v4537_v20 = vrot.slane %v1429_v48, 9  ;;  %v202_v33 = vld [vmem:[%s5020_s17 + $0x4c] sm:$0xf]  ;;  %v663_v38 = vld [vmem:[#allocation2 + $0x78] sm:$0xf] }
  0xda   : > { %v1848_v14 = vpop.permute.xlu1 %1847  ;;  %v2391_v15 = vpop.permute.xlu0 %2390  ;;  %3444 = vrot.lane.b32.xlu1 %v4648_v10, %s4925_s25  ;;  %v1141_v21 = vor.u32 %v1140_v12, %v1136_v18  ;;  %v1562_v24 = vrot.slane %v1430_v3, 5  ;;  %v1565_v27 = vrot.slane %v1431_v58, 5  ;;  %v4538_v0 = vrot.slane %v1432_v40, 9  ;;  %v1930_v2 = vld [vmem:[#allocation2 + $0x6c] sm:$0xf] }
  0xdb   : > { %1893 = vst.msk [vmem:[#allocation3 + $0x18] sm:$0xff] %vm1889_vm2, %v1848_v14  ;;  %v1132_v49 = vrot.slane %v1131_v16, 4  ;;  %v1569_v28 = vrot.slane %v1433_v30, 5  ;;  %v1572_v31 = vrot.slane %v1434_v13, 5  ;;  %v428_v23 = vshrl.u32 %v201_v26, 16  ;;  %v4875_v58 = vld [vmem:[#allocation2 + $0x6c] sm:$0xff]  }
  0xdc   : > { %v1142_v56 = vrot.slane %v1141_v21, 4  ;;  %v1563_v34 = vsel %vm5026_vm9, %v4537_v20, %v1562_v24  ;;  %v1564_v36 = vrot.slane %v1562_v24, 4  ;;  %v431_v35 = vshll.u32 %v201_v26, 16  ;;  %v1931_v3 = vld [vmem:[#allocation2 + $0x70] sm:$0xf]  ;;  %2437 = vst.msk [vmem:[#allocation3 + $0x10] sm:$0xff] %vm2434_vm3, %v2391_v15 }
  0xdd   : > { %v1137_v42 = vsel %vm5033_vm10, %v1132_v49, %v1136_v18  ;;  %v5514_v47 = vsel %vm5026_vm9, %v4538_v0, %v1569_v28  ;;  %v1571_v48 = vrot.slane %v1569_v28, 4  ;;  %v430_v46 = vrot.slane %v428_v23, 7  ;;  %v667_v26 = vld [vmem:[#allocation2 + $0x80] sm:$0x1]  ;;  %v1932_v53 = vld [vmem:[#allocation2 + $0x74] sm:$0x1] }
  0xde   : > { %v2712_v39 = vpop.permute.xlu0 %2711  ;;  %1356 = vrot.lane.b32.xlu1 %v4521_v63, %s4919_s19  ;;  %v1147_v50 = vsel %vm5033_vm10, %v1142_v56, %v1146_v17  ;;  %v1566_v51 = vsel %vm5026_vm9, %v1564_v36, %v1565_v27  ;;  %v436_v52 = vshrl.u32 %v202_v33, 16  ;;  %v439_v54 = vshll.u32 %v202_v33, 16  ;;  %v5532_v10 = vld [vmem:[%s5020_s17 + $0x50] sm:$0xf]  ;;  %v2475_v7 = vld [vmem:[#allocation2 + $0x6c] sm:$0xe] }
  0xdf   : > { %v4522_v59 = vcombine.low %v1137_v42, %v1147_v50  ;;  %v4553_v60 = vcombine.low %v1563_v34, %v1566_v51  ;;  %v1573_v61 = vsel %vm5026_vm9, %v1571_v48, %v1572_v31  ;;  %v433_v1 = vor.u32 %v431_v35, %v430_v46  ;;  %v5541_v30 = vld [vmem:[%s5020_s17 + $0x54] sm:$0xf]  ;;  %v670_v36 = vld [vmem:[#allocation2 + $0x84] sm:$0xf] }
  0xe0   : > { %v4554_v4 = vcombine.low %v5514_v47, %v1573_v61  ;;  %v434_v5 = vrot.slane %v430_v46, 4  ;;  %v438_v62 = vrot.slane %v436_v52, 7  ;;  %vm2755_vm4 = vcmask 195744   ;;  %v2477_v17 = vld [vmem:[#allocation2 + $0x74] sm:$0x1] }
  0xe1   : > { %1680 = vrot.lane.b32.xlu0 %v4553_v60, %s4918_s18  ;;  %v664_v40 = vsel %vm5041_vm11, %v433_v1, %v663_v38  ;;  %vm2933_vm5 = vcmask 228544   ;;  %vm3478_vm6 = vcmask 261344   ;;  %vm6206_vm7 = vcmask 294144   ;;  %2757 = vst.msk [vmem:[#allocation3 + $0x8] sm:$0xff] %vm2755_vm4, %v5392_v44  ;;  %2756 = vst.msk [vmem:[#allocation3] sm:$0xff] %vm2755_vm4, %v5361_v32 }
  0xe2   : > { %v2890_v8 = vpop.permute.xlu0 %2889  ;;  %1358 = vrot.lane.b32.xlu1 %v4522_v59, %s4919_s19  ;;  %v441_v11 = vor.u32 %v439_v54, %v438_v62  ;;  %v443_v18 = vrot.slane %v438_v62, 4  ;;  %665 = vst [vmem:[#allocation2 + $0x78] sm:$0xf] %v664_v40  ;;  %v2147_v12 = vshrl.u32 %v1930_v2, 16  ;;  %2758 = vst.msk [vmem:[#allocation3 + $0x10] sm:$0xff] %vm2755_vm4, %v2712_v39  ;;  %v2150_v13 = vshll.u32 %v1930_v2, 16 }
  0xe3   : > { %2935 = vst.msk [vmem:[#allocation3 + $0x8] sm:$0xff] %vm2933_vm5, %v5359_v25  ;;  %v2156_v14 = vshll.u32 %v1931_v3, 16  ;;  %v2160_v15 = vshrl.u32 %v1931_v3, 16  ;;  %v2166_v63 = vshll.u32 %v1932_v53, 16  ;;  %2934 = vst.msk [vmem:[#allocation3] sm:$0xff] %vm2933_vm5, %v5349_v6  ;;  %v4601_v24 = vrot.slane %v2475_v7, 9 }
  0xe4   : > { %v2476_v44 = vld [vmem:[#allocation2 + $0x70] sm:$0xf]  ;;  %2936 = vst.msk [vmem:[#allocation3 + $0x10] sm:$0xff] %vm2933_vm5, %v2890_v8  ;;  %v442_v32 = vsel %vm5049_vm12, %v434_v5, %v441_v11  ;;  %v2149_v16 = vrot.slane %v2147_v12, 4  ;;  %v668_v25 = vsel %vm5064_vm13, %v443_v18, %v667_v26  ;;  %v445_v0 = vshrl.u32 %v5532_v10, 16 }
  0xe5   : > { %v2393_v9 = vpop.permute.xlu1 %2392  ;;  %3480 = vst.msk [vmem:[#allocation3 + $0x8] sm:$0xff] %vm3478_vm6, %v5434_v43  ;;  %3479 = vst.msk [vmem:[#allocation3] sm:$0xff] %vm3478_vm6, %v5468_v22  ;;  %v5561_v6 = vld [vmem:[%s6203_s1 + $0x10] ss:$0 sps:$4 sm:$0x33]   ;;  %1857 = vrot.lane.b32.xlu0 %v4875_v58, %s4920_s20  ;;  %v2152_v43 = vrot.slane %v2150_v13, 5 }
  0xe6   : > { %2438 = vst.msk [vmem:[#allocation3 + $0x18] sm:$0xff] %vm2434_vm3, %v2393_v9  ;;  %v2158_v20 = vrot.slane %v2156_v14, 5  ;;  %v2162_v21 = vrot.slane %v2160_v15, 4  ;;  %669 = vst [vmem:[#allocation2 + $0x80] sm:$0x1] %v668_v25  ;;  %1682 = vrot.lane.b32.xlu1 %v4554_v4, %s4918_s18  ;;  %v2168_v22 = vrot.slane %v2166_v63, 5 }
  0xe7   : > { %666 = vst.msk [vmem:[#allocation2 + $0x7c] sm:$0xf] %vm215_vm0, %v442_v32  ;;  %v2605_v27 = vrot.slane %v2476_v44, 5  ;;  %v448_v49 = vshll.u32 %v5532_v10, 16  ;;  %v2153_v31 = vor.u32 %v2152_v43, %v2149_v16  ;;  %v453_v23 = vshrl.u32 %v5541_v30, 16 }
  0xe8   : > { %3801 = vst.msk [vmem:[#allocation3 + $0x8] sm:$0xff] %vm6206_vm7, %v5394_v45  ;;  %3800 = vst.msk [vmem:[#allocation3] sm:$0xff] %vm6206_vm7, %v5373_v57  ;;  %v2163_v33 = vor.u32 %v2162_v21, %v2158_v20  ;;  %v2608_v45 = vrot.slane %v2477_v17, 5  ;;  %v5574_v34 = vrot.slane %v445_v0, 7  ;;  %v456_v57 = vshll.u32 %v5541_v30, 16 }
  0xe9   : > { %v2714_v28 = vpop.permute.xlu1 %2713  ;;  %v2607_v56 = vrot.slane %v2605_v27, 4  ;;  %vm3901_vm8 = vcmask 1041408   ;;  %v2154_v35 = vrot.slane %v2153_v31, 4  ;;  %v1933_v39 = vld [vmem:[#allocation2 + $0x78] sm:$0xf]  ;;  %v2606_v59 = vsel %vm5026_vm9, %v4601_v24, %v2605_v27 }
  0xea   : > { %2759 = vst.msk [vmem:[#allocation3 + $0x18] sm:$0xff] %vm2755_vm4, %v2714_v28  ;;  %v2164_v38 = vrot.slane %v2163_v33, 4  ;;  %4839 = vmatprep.subr.msk.bf16.mxu0 %vm3901_vm8, %v5561_v6  ;;  %v3435_v42 = vpop.permute.xlu0 %3434  ;;  %4840 = vmatprep.subr.msk.bf16.mxu1 %vm3901_vm8, %v5561_v6  ;;  %v2171_v47 = vshrl.u32 %v1933_v39, 16  ;;  %v2174_v48 = vshll.u32 %v1933_v39, 16  ;;  %v2478_v46 = vld [vmem:[#allocation2 + $0x78] sm:$0xe]  ;;  %v450_v50 = vor.u32 %v448_v49, %v5574_v34 }
  0xeb   : > { %3481 = vst.msk [vmem:[#allocation3 + $0x10] sm:$0xff] %vm3478_vm6, %v3435_v42  ;;  %v2159_v52 = vsel %vm5033_vm10, %v2154_v35, %v2158_v20  ;;  %v2609_v60 = vsel %vm5026_vm9, %v2607_v56, %v2608_v45  ;;  %v2974_v61 = vld [vmem:[#allocation2 + $0x78] sm:$0xf]  ;;  %v4602_v58 = vrot.slane %v2478_v46, 9  ;;  %v451_v7 = vrot.slane %v5574_v34, 4 }
  0xec   : > { %v2169_v54 = vsel %vm5033_vm10, %v2164_v38, %v2168_v22  ;;  %v2173_v26 = vrot.slane %v2171_v47, 4  ;;  %v671_v4 = vsel %vm5041_vm11, %v450_v50, %v670_v36  ;;  %v2176_v62 = vrot.slane %v2174_v48, 5  ;;  %v674_v21 = vld [vmem:[#allocation2 + $0x8c] sm:$0x1]  ;;  %v3519_v34 = vld [vmem:[#allocation2 + $0x78] sm:$0xe] }
  0xed   : > { %v2892_v51 = vpop.permute.xlu1 %2891  ;;  %v4585_v2 = vcombine.low %v2159_v52, %v2169_v54  ;;  %v1935_v5 = vld [vmem:[#allocation2 + $0x80] sm:$0x1]  ;;  %672 = vst [vmem:[#allocation2 + $0x84] sm:$0xf] %v671_v4  ;;  %v4617_v11 = vcombine.low %v2606_v59, %v2609_v60  ;;  %v455_v44 = vrot.slane %v453_v23, 7  ;;  %v3191_v16 = vshrl.u32 %v2974_v61, 16 }
  0xee   : > { %2937 = vst.msk [vmem:[#allocation3 + $0x18] sm:$0xff] %vm2933_vm5, %v2892_v51  ;;  %v4876_v1 = vld [vmem:[#allocation2 + $0x78] sm:$0xff]   ;;  %v3756_v40 = vpop.permute.xlu0 %3755  ;;  %v2190_v10 = vshll.u32 %v1935_v5, 16  ;;  %v2480_v12 = vld [vmem:[#allocation2 + $0x80] sm:$0x1]  ;;  %v2177_v30 = vor.u32 %v2176_v62, %v2173_v26  ;;  %v3194_v28 = vshll.u32 %v2974_v61, 16 }
  0xef   : > { %v1934_v3 = vld [vmem:[#allocation2 + $0x7c] sm:$0xf]  ;;  %1859 = vrot.lane.b32.xlu1 %v4876_v1, %s4920_s20  ;;  %2402 = vrot.lane.b32.xlu0 %v4585_v2, %s4924_s24  ;;  %3802 = vst.msk [vmem:[#allocation3 + $0x10] sm:$0xff] %vm6206_vm7, %v3756_v40  ;;  %v2615_v63 = vrot.slane %v2480_v12, 5  ;;  %v458_v22 = vor.u32 %v456_v57, %v455_v44  ;;  %v460_v27 = vrot.slane %v455_v44, 4  ;;  %v3193_v49 = vrot.slane %v3191_v16, 4 }
  0xf0   : > { %v2180_v53 = vshll.u32 %v1934_v3, 16  ;;  %v2184_v8 = vshrl.u32 %v1934_v3, 16  ;;  %v2479_v18 = vld [vmem:[#allocation2 + $0x7c] sm:$0xf]  ;;  %v2192_v15 = vrot.slane %v2190_v10, 5  ;;  %v2178_v25 = vrot.slane %v2177_v30, 4 }
  0xf1   : > { %v2612_v14 = vrot.slane %v2479_v18, 5  ;;  %v2975_v32 = vld [vmem:[#allocation2 + $0x7c] sm:$0xf]  ;;  %v2976_v0 = vld [vmem:[#allocation2 + $0x80] sm:$0x1]  ;;  %v459_v57 = vsel %vm5049_vm12, %v451_v7, %v458_v22  ;;  %v3196_v38 = vrot.slane %v3194_v28, 5  ;;  %v675_v50 = vsel %vm5064_vm13, %v460_v27, %v674_v21 }
  0xf2   : > { %v2182_v9 = vrot.slane %v2180_v53, 5  ;;  %v2186_v13 = vrot.slane %v2184_v8, 4  ;;  %v4881_v24 = vld [vmem:[#allocation2 + $0x78] sm:$0xff]   ;;  %v3200_v56 = vshll.u32 %v2975_v32, 16  ;;  %v3204_v39 = vshrl.u32 %v2975_v32, 16  ;;  %v3817_v30 = vld [vmem:[#allocation3 + $0x8] sm:$0xff] }
  0xf3   : > { %v5600_v43 = vsel %vm5026_vm9, %v4602_v58, %v2612_v14  ;;  %v2614_v20 = vrot.slane %v2612_v14, 4  ;;  %2723 = vrot.lane.b32.xlu0 %v4617_v11, %s4922_s22  ;;  %673 = vst.msk [vmem:[#allocation2 + $0x88] sm:$0xf] %vm215_vm0, %v459_v57  ;;  %v3210_v46 = vshll.u32 %v2976_v0, 16  ;;  %v3520_v51 = vld [vmem:[#allocation2 + $0x7c] sm:$0xf]  ;;  %v3197_v54 = vor.u32 %v3196_v38, %v3193_v49 }
  0xf4   : > { %v2187_v17 = vor.u32 %v2186_v13, %v2182_v9  ;;  %v3437_v31 = vpop.permute.xlu1 %3436  ;;  %v2183_v33 = vsel %vm5033_vm10, %v2178_v25, %v2182_v9  ;;  %v3758_v36 = vpop.permute.xlu0 %3757  ;;  %v2977_v42 = vld [vmem:[#allocation2 + $0x84] sm:$0xf]  ;;  %v3202_v48 = vrot.slane %v3200_v56, 5  ;;  %v3206_v59 = vrot.slane %v3204_v39, 4  ;;  %676 = vst [vmem:[#allocation2 + $0x8c] sm:$0x1] %v675_v50 }
  0xf5   : > { %v2616_v23 = vsel %vm5026_vm9, %v2614_v20, %v2615_v63  ;;  %3482 = vst.msk [vmem:[#allocation3 + $0x18] sm:$0xff] %vm3478_vm6, %v3437_v31  ;;  %v3215_v60 = vshrl.u32 %v2977_v42, 16  ;;  %v3521_v61 = vld [vmem:[#allocation2 + $0x80] sm:$0x1]  ;;  %v887_v1 = vld [vmem:[#allocation2 + $0x78] sm:$0xf] }
  0xf6   : > { %v2188_v45 = vrot.slane %v2187_v17, 4  ;;  %v4618_v35 = vcombine.low %v5600_v43, %v2616_v23  ;;  %3803 = vst.msk [vmem:[#allocation3 + $0x18] sm:$0xff] %vm6206_vm7, %v3758_v36  ;;  %v3212_v3 = vrot.slane %v3210_v46, 5  ;;  %v3218_v26 = vshll.u32 %v2977_v42, 16  ;;  %v3816_v62 = vld [vmem:[#allocation3] sm:$0xff]  ;;  %v4899_v38 = vld [vmem:[#allocation2 + $0x60] sm:$0xff]  }
  0xf7   : > { %2901 = vrot.lane.b32.xlu0 %v4881_v24, %s4921_s21  ;;  %v3903_v4 = vsel %vm3901_vm8, %v5561_v6, 0  ;;  %v4665_v5 = vrot.slane %v3519_v34, 9  ;;  %v3198_v53 = vrot.slane %v3197_v54, 4  ;;  %v3207_v8 = vor.u32 %v3206_v59, %v3202_v48  ;;  %v888_v10 = vld [vmem:[#allocation2 + $0x7c] sm:$0xf]  ;;  %v3818_v6 = vld [vmem:[#allocation3 + $0x10] sm:$0xff] }
  0xf8   : > { %v2193_v47 = vsel %vm5033_vm10, %v2188_v45, %v2192_v15  ;;  %v1349_v2 = vpop.permute.xlu1 %1348  ;;  %v3217_v58 = vrot.slane %v3215_v60, 4  ;;  %4800 = vmatpush3.bf16.msra.mxu0 %v3903_v4  ;;  %v3649_v40 = vrot.slane %v3520_v51, 5  ;;  %v3220_v18 = vrot.slane %v3218_v26, 5  ;;  %4838 = vmatpush3.bf16.msra.mxu1 %v3903_v4  ;;  %v889_v63 = vld [vmem:[#allocation2 + $0x80] sm:$0x1]  ;;  %849 = vst.msk [vmem:[#allocation3 + $0x40] sm:$0xff] %vm840_vm14, %v4899_v38 }
  0xf9   : > { %v4586_v52 = vcombine.low %v2183_v33, %v2193_v47  ;;  %1393 = vst.msk [vmem:[#allocation3 + $0x20] sm:$0xff] %vm1388_vm15, %v1349_v2  ;;  %v1673_v11 = vpop.permute.xlu0 %1672  ;;  %v3652_v12 = vrot.slane %v3521_v61, 5  ;;  %vm3852_vm7 = vcmask 293888   ;;  %v1149_v7 = vshrl.u32 %v887_v1, 16  ;;  %v3522_v43 = vld [vmem:[#allocation2 + $0x84] sm:$0xe] }
  0xfa   : > { %1717 = vst.msk [vmem:[#allocation3 + $0x20] sm:$0xff] %vm1712_vm1, %v1673_v11  ;;  %v3203_v9 = vsel %vm5033_vm10, %v3198_v53, %v3202_v48  ;;  %v3208_v13 = vrot.slane %v3207_v8, 4  ;;  %v3650_v14 = vsel %vm5026_vm9, %v4665_v5, %v3649_v40  ;;  %v3651_v15 = vrot.slane %v3649_v40, 4  ;;  %4801 = vmatprep.mubr.msk.bf16.mxu0 %vm3852_vm7, %v3816_v62  ;;  %v4883_v20 = vld [vmem:[#allocation2 + $0x84] sm:$0xff]   ;;  %v1435_v8 = vld [vmem:[#allocation2 + $0x78] sm:$0xe] }
  0xfb   : > { %2404 = vrot.lane.b32.xlu1 %v4586_v52, %s4924_s24  ;;  %v3221_v32 = vor.u32 %v3220_v18, %v3217_v58  ;;  %v1151_v16 = vrot.slane %v1149_v7, 4  ;;  %v1152_v25 = vshll.u32 %v887_v1, 16  ;;  %v1158_v17 = vshll.u32 %v888_v10, 16  ;;  %4802 = vmatmul.mubr.msk.bf16.vlgmr.msra.gmra.mrb[0].mxu0 %vm3852_vm7, %v3817_v30  ;;  %v2978_v24 = vld [vmem:[#allocation2 + $0x88] sm:$0xf]  ;;  %v4900_v40 = vld [vmem:[#allocation2 + $0x6c] sm:$0xff]  }
  0xfc   : > { %v1351_v44 = vpop.permute.xlu1 %1350  ;;  %v3213_v21 = vsel %vm5033_vm10, %v3208_v13, %v3212_v3  ;;  %v3653_v22 = vsel %vm5026_vm9, %v3651_v15, %v3652_v12  ;;  %v1162_v27 = vshrl.u32 %v888_v10, 16  ;;  %4805 = vmatprep.mubr.msk.bf16.mxu0 %vm3852_vm7, %v3818_v6  ;;  %v2979_v28 = vld [vmem:[#allocation2 + $0x8c] sm:$0x1]  ;;  %v3224_v33 = vshll.u32 %v2978_v24, 16  ;;  %v890_v59 = vld [vmem:[#allocation2 + $0x84] sm:$0xf] }
  0xfd   : > { %1394 = vst.msk [vmem:[#allocation3 + $0x28] sm:$0xff] %vm1388_vm15, %v1351_v44  ;;  %v1850_v0 = vpop.permute.xlu0 %1849  ;;  %v4649_v49 = vcombine.low %v3203_v9, %v3213_v21  ;;  %v3222_v31 = vrot.slane %v3221_v32, 4  ;;  %v3228_v45 = vshrl.u32 %v2978_v24, 16  ;;  %v3234_v23 = vshll.u32 %v2979_v28, 16  ;;  %v3524_v46 = vld [vmem:[#allocation2 + $0x8c] sm:$0x1] }
  0xfe   : > { %1894 = vst.msk [vmem:[#allocation3 + $0x20] sm:$0xff] %vm1889_vm2, %v1850_v0  ;;  %v4681_v56 = vcombine.low %v3650_v14, %v3653_v22  ;;  %v1154_v34 = vrot.slane %v1152_v25, 5  ;;  %v1160_v36 = vrot.slane %v1158_v17, 5  ;;  %v3226_v39 = vrot.slane %v3224_v33, 5  ;;  %v3819_v60 = vld [vmem:[#allocation3 + $0x18] sm:$0xff] }
  0xff   : > { %2725 = vrot.lane.b32.xlu1 %v4618_v35, %s4922_s22  ;;  %v3523_v35 = vld [vmem:[#allocation2 + $0x88] sm:$0xf]  ;;  %3446 = vrot.lane.b32.xlu0 %v4649_v49, %s4925_s25  ;;  %v3230_v42 = vrot.slane %v3228_v45, 4  ;;  %v1164_v47 = vrot.slane %v1162_v27, 4  ;;  %v1168_v48 = vshll.u32 %v889_v63, 16  ;;  %v3236_v50 = vrot.slane %v3234_v23, 5 }
 0x100   : > { %v1675_v57 = vpop.permute.xlu1 %1674  ;;  %v1155_v51 = vor.u32 %v1154_v34, %v1151_v16  ;;  %v4666_v52 = vrot.slane %v3522_v43, 9  ;;  %v3656_v54 = vrot.slane %v3523_v35, 5  ;;  %v3227_v61 = vsel %vm5033_vm10, %v3222_v31, %v3226_v39  ;;  %v891_v26 = vld [vmem:[#allocation2 + $0x88] sm:$0xf]  ;;  %v1436_v58 = vld [vmem:[#allocation2 + $0x7c] sm:$0xf] }
 0x101   : > { %1718 = vst.msk [vmem:[#allocation3 + $0x28] sm:$0xff] %vm1712_vm1, %v1675_v57  ;;  %v3231_v1 = vor.u32 %v3230_v42, %v3226_v39  ;;  %v1165_v2 = vor.u32 %v1164_v47, %v1160_v36  ;;  %v1170_v3 = vrot.slane %v1168_v48, 5  ;;  %v3659_v53 = vrot.slane %v3524_v46, 5  ;;  %v892_v6 = vld [vmem:[#allocation2 + $0x8c] sm:$0x1] }
 0x102   : > { %v1156_v4 = vrot.slane %v1155_v51, 4  ;;  %v3657_v5 = vsel %vm5026_vm9, %v4666_v52, %v3656_v54  ;;  %v3658_v62 = vrot.slane %v3656_v54, 4  ;;  %v1173_v18 = vshrl.u32 %v890_v59, 16  ;;  %v1437_v14 = vld [vmem:[#allocation2 + $0x80] sm:$0x1]  ;;  %850 = vst.msk [vmem:[#allocation3 + $0x48] sm:$0xff] %vm840_vm14, %v4900_v40 }
 0x103   : > { %2903 = vrot.lane.b32.xlu1 %v4883_v20, %s4921_s21  ;;  %v3232_v10 = vrot.slane %v3231_v1, 4  ;;  %3767 = vrot.lane.b32.xlu0 %v4681_v56, %s4923_s23  ;;  %v1166_v11 = vrot.slane %v1165_v2, 4  ;;  %v1176_v12 = vshll.u32 %v890_v59, 16  ;;  %v1182_v9 = vshll.u32 %v891_v26, 16  ;;  %v1438_v16 = vld [vmem:[#allocation2 + $0x84] sm:$0xe] }
 0x104   : > { %4806 = vmatmul.mubr.msk.bf16.gmra.mrb[4].mxu0 %vm3852_vm7, %v3819_v60  ;;  %v1161_v7 = vsel %vm5033_vm10, %v1156_v4, %v1160_v36  ;;  %v3660_v30 = vsel %vm5026_vm9, %v3658_v62, %v3659_v53  ;;  %v1186_v13 = vshrl.u32 %v891_v26, 16  ;;  %v1175_v32 = vrot.slane %v1173_v18, 4  ;;  %v1439_v25 = vld [vmem:[#allocation2 + $0x88] sm:$0xf]  ;;  %v1440_v31 = vld [vmem:[#allocation2 + $0x8c] sm:$0x1] }
 0x105   : > { %v3237_v15 = vsel %vm5033_vm10, %v3232_v10, %v3236_v50  ;;  %v1171_v63 = vsel %vm5033_vm10, %v1166_v11, %v1170_v3  ;;  %v4682_v44 = vcombine.low %v3657_v5, %v3660_v30  ;;  %v1178_v24 = vrot.slane %v1176_v12, 5  ;;  %v205_v34 = vld [vmem:[%s5020_s17 + $0x58] sm:$0xf]  ;;  %v206_v39 = vld [vmem:[%s5020_s17 + $0x5c] sm:$0xf]  ;;  %v4885_v12 = vld [vmem:[#allocation2 + $0x84] sm:$0xff]  }
 0x106   : > { %v1852_v17 = vpop.permute.xlu1 %1851  ;;  %v4650_v20 = vcombine.low %v3227_v61, %v3237_v15  ;;  %v4523_v21 = vcombine.low %v1161_v7, %v1171_v63  ;;  %v1184_v22 = vrot.slane %v1182_v9, 5  ;;  %v1188_v27 = vrot.slane %v1186_v13, 4  ;;  %v1936_v51 = vld [vmem:[#allocation2 + $0x84] sm:$0xf]  ;;  %v1937_v61 = vld [vmem:[#allocation2 + $0x88] sm:$0xf] }
 0x107   : > { %v2395_v43 = vpop.permute.xlu0 %2394  ;;  %1895 = vst.msk [vmem:[#allocation3 + $0x28] sm:$0xff] %vm1889_vm2, %v1852_v17  ;;  %3769 = vrot.lane.b32.xlu0 %v4682_v44, %s4923_s23  ;;  %v1192_v0 = vshll.u32 %v892_v6, 16  ;;  %v4539_v49 = vrot.slane %v1435_v8, 9  ;;  %v1576_v28 = vrot.slane %v1436_v58, 5  ;;  %v1179_v33 = vor.u32 %v1178_v24, %v1175_v32  ;;  %v677_v4 = vld [vmem:[#allocation2 + $0x90] sm:$0xf] }
 0x108   : > { %2439 = vst.msk [vmem:[#allocation3 + $0x20] sm:$0xff] %vm2434_vm3, %v2395_v43  ;;  %3448 = vrot.lane.b32.xlu1 %v4650_v20, %s4925_s25  ;;  %v1579_v45 = vrot.slane %v1437_v14, 5  ;;  %v4540_v23 = vrot.slane %v1438_v16, 9  ;;  %v1583_v56 = vrot.slane %v1439_v25, 5  ;;  %v1189_v36 = vor.u32 %v1188_v27, %v1184_v22  ;;  %v1938_v5 = vld [vmem:[#allocation2 + $0x8c] sm:$0x1] }
 0x109   : > { %v1194_v35 = vrot.slane %v1192_v0, 5  ;;  %v1577_v57 = vsel %vm5026_vm9, %v4539_v49, %v1576_v28  ;;  %v1578_v38 = vrot.slane %v1576_v28, 4  ;;  %v1180_v47 = vrot.slane %v1179_v33, 4  ;;  %v681_v40 = vld [vmem:[#allocation2 + $0x98] sm:$0x1]  ;;  %v4904_v13 = vld [vmem:[#allocation2 + $0x84] sm:$0xff]  }
 0x10a   : > { %v5666_v48 = vsel %vm5026_vm9, %v4540_v23, %v1583_v56  ;;  %v1585_v46 = vrot.slane %v1583_v56, 4  ;;  %v1586_v50 = vrot.slane %v1440_v31, 5  ;;  %v1190_v52 = vrot.slane %v1189_v36, 4  ;;  %v2481_v10 = vld [vmem:[#allocation2 + $0x84] sm:$0xe]  ;;  %v4903_v9 = vld [vmem:[#allocation2 + $0x78] sm:$0xff]  }
 0x10b   : > { %v2716_v42 = vpop.permute.xlu0 %2715  ;;  %v1580_v54 = vsel %vm5026_vm9, %v1578_v38, %v1579_v45  ;;  %v462_v59 = vshrl.u32 %v205_v34, 16  ;;  %v465_v60 = vshll.u32 %v205_v34, 16  ;;  %v1185_v1 = vsel %vm5033_vm10, %v1180_v47, %v1184_v22  ;;  %v2482_v32 = vld [vmem:[#allocation2 + $0x88] sm:$0xf]  ;;  %v207_v16 = vld [vmem:[%s5020_s17 + $0x60] sm:$0xf] }
 0x10c   : > { %2760 = vst.msk [vmem:[#allocation3 + $0x20] sm:$0xff] %vm2755_vm4, %v2716_v42  ;;  %1360 = vrot.lane.b32.xlu1 %v4523_v21, %s4919_s19  ;;  %v4555_v2 = vcombine.low %v1577_v57, %v1580_v54  ;;  %v1587_v3 = vsel %vm5026_vm9, %v1585_v46, %v1586_v50  ;;  %v470_v26 = vshrl.u32 %v206_v39, 16  ;;  %v1195_v62 = vsel %vm5033_vm10, %v1190_v52, %v1194_v35  ;;  %v2483_v24 = vld [vmem:[#allocation2 + $0x8c] sm:$0x1]  ;;  %v208_v28 = vld [vmem:[%s5020_s17 + $0x64] sm:$0xf] }
 0x10d   : > { %v4556_v53 = vcombine.low %v5666_v48, %v1587_v3  ;;  %v464_v8 = vrot.slane %v462_v59, 7  ;;  %v473_v58 = vshll.u32 %v206_v39, 16  ;;  %v4524_v18 = vcombine.low %v1185_v1, %v1195_v62  ;;  %851 = vst.msk [vmem:[#allocation3 + $0x50] sm:$0xff] %vm840_vm14, %v4903_v9  ;;  %852 = vst.msk [vmem:[#allocation3 + $0x58] sm:$0xff] %vm840_vm14, %v4904_v13  ;;  %v5698_v48 = vld [vmem:[%s5020_s17 + $0x68] sm:$0xf] }
 0x10e   : > { %1684 = vrot.lane.b32.xlu0 %v4555_v2, %s4918_s18  ;;  %v472_v7 = vrot.slane %v470_v26, 7  ;;  %v2195_v30 = vshrl.u32 %v1936_v51, 16  ;;  %v2198_v6 = vshll.u32 %v1936_v51, 16  ;;  %v2204_v63 = vshll.u32 %v1937_v61, 16  ;;  %v5701_v52 = vld [vmem:[%s5020_s17 + $0x6c] sm:$0xf] }
 0x10f   : > { %v2894_v11 = vpop.permute.xlu0 %2893  ;;  %v467_v14 = vor.u32 %v465_v60, %v464_v8  ;;  %v468_v15 = vrot.slane %v464_v8, 4  ;;  %v2208_v44 = vshrl.u32 %v1937_v61, 16  ;;  %v2214_v49 = vshll.u32 %v1938_v5, 16  ;;  %v684_v26 = vld [vmem:[#allocation2 + $0x9c] sm:$0xf] }
 0x110   : > { %2938 = vst.msk [vmem:[#allocation3 + $0x20] sm:$0xff] %vm2933_vm5, %v2894_v11  ;;  %1362 = vrot.lane.b32.xlu1 %v4524_v18, %s4919_s19  ;;  %v475_v17 = vor.u32 %v473_v58, %v472_v7  ;;  %v477_v43 = vrot.slane %v472_v7, 4  ;;  %v2197_v20 = vrot.slane %v2195_v30, 4  ;;  %v2200_v21 = vrot.slane %v2198_v6, 5 }
 0x111   : > { %v678_v22 = vsel %vm5041_vm11, %v467_v14, %v677_v4  ;;  %v2206_v27 = vrot.slane %v2204_v63, 5  ;;  %v2210_v0 = vrot.slane %v2208_v44, 4  ;;  %v4603_v23 = vrot.slane %v2481_v10, 9 }
 0x112   : > { %v2397_v25 = vpop.permute.xlu1 %2396  ;;  %1861 = vrot.lane.b32.xlu0 %v4885_v12, %s4920_s20  ;;  %v476_v31 = vsel %vm5049_vm12, %v468_v15, %v475_v17  ;;  %679 = vst [vmem:[#allocation2 + $0x90] sm:$0xf] %v678_v22  ;;  %v2201_v33 = vor.u32 %v2200_v21, %v2197_v20  ;;  %v682_v45 = vsel %vm5064_vm13, %v477_v43, %v681_v40  ;;  %v2216_v34 = vrot.slane %v2214_v49, 5 }
 0x113   : > { %2440 = vst.msk [vmem:[#allocation3 + $0x28] sm:$0xff] %vm2434_vm3, %v2397_v25  ;;  %v2211_v56 = vor.u32 %v2210_v0, %v2206_v27  ;;  %683 = vst [vmem:[#allocation2 + $0x98] sm:$0x1] %v682_v45  ;;  %v2619_v36 = vrot.slane %v2482_v32, 5  ;;  %v2622_v35 = vrot.slane %v2483_v24, 5  ;;  %v479_v39 = vshrl.u32 %v207_v16, 16 }
 0x114   : > { %680 = vst.msk [vmem:[#allocation2 + $0x94] sm:$0xf] %vm215_vm0, %v476_v31  ;;  %1686 = vrot.lane.b32.xlu1 %v4556_v53, %s4918_s18  ;;  %v2202_v38 = vrot.slane %v2201_v33, 4  ;;  %v482_v42 = vshll.u32 %v207_v16, 16  ;;  %v487_v47 = vshrl.u32 %v208_v28, 16  ;;  %v490_v51 = vshll.u32 %v208_v28, 16 }
 0x115   : > { %v2212_v46 = vrot.slane %v2211_v56, 4  ;;  %v2621_v50 = vrot.slane %v2619_v36, 4  ;;  %v2620_v59 = vsel %vm5026_vm9, %v4603_v23, %v2619_v36  ;;  %v481_v60 = vrot.slane %v479_v39, 7 }
 0x116   : > { %v2718_v57 = vpop.permute.xlu1 %2717  ;;  %v2207_v54 = vsel %vm5033_vm10, %v2202_v38, %v2206_v27  ;;  %v5707_v61 = vrot.slane %v487_v47, 7  ;;  %v496_v5 = vshrl.u32 %v5698_v48, 16  ;;  %v499_v62 = vshll.u32 %v5698_v48, 16  ;;  %v688_v38 = vld [vmem:[#allocation2 + $0xa4] sm:$0x1] }
 0x117   : > { %2761 = vst.msk [vmem:[#allocation3 + $0x28] sm:$0xff] %vm2755_vm4, %v2718_v57  ;;  %v3439_v1 = vpop.permute.xlu0 %3438  ;;  %v2217_v2 = vsel %vm5033_vm10, %v2212_v46, %v2216_v34  ;;  %v2623_v3 = vsel %vm5026_vm9, %v2621_v50, %v2622_v35  ;;  %v484_v8 = vor.u32 %v482_v42, %v481_v60  ;;  %v485_v58 = vrot.slane %v481_v60, 4 }
 0x118   : > { %3483 = vst.msk [vmem:[#allocation3 + $0x20] sm:$0xff] %vm3478_vm6, %v3439_v1  ;;  %v4587_v53 = vcombine.low %v2207_v54, %v2217_v2  ;;  %v504_v40 = vshrl.u32 %v5701_v52, 16  ;;  %v492_v18 = vor.u32 %v490_v51, %v5707_v61  ;;  %v4619_v6 = vcombine.low %v2620_v59, %v2623_v3 }
 0x119   : > { %v1939_v10 = vld [vmem:[#allocation2 + $0x90] sm:$0xf]  ;;  %v685_v9 = vsel %vm5041_vm11, %v484_v8, %v684_v26  ;;  %vm6217_vm8 = vcmask 294144   ;;  %v494_v33 = vrot.slane %v5707_v61, 4 }
 0x11a   : > { %v2896_v4 = vpop.permute.xlu1 %2895  ;;  %v2484_v11 = vld [vmem:[#allocation2 + $0x90] sm:$0xe]  ;;  %2406 = vrot.lane.b32.xlu0 %v4587_v53, %s4924_s24  ;;  %v2219_v30 = vshrl.u32 %v1939_v10, 16  ;;  %v1941_v14 = vld [vmem:[#allocation2 + $0x98] sm:$0x1]  ;;  %v2222_v15 = vshll.u32 %v1939_v10, 16  ;;  %v493_v21 = vsel %vm5049_vm12, %v485_v58, %v492_v18 }
 0x11b   : > { %2939 = vst.msk [vmem:[#allocation3 + $0x28] sm:$0xff] %vm2933_vm5, %v2896_v4  ;;  %v4886_v12 = vld [vmem:[#allocation2 + $0x90] sm:$0xff]   ;;  %v3760_v13 = vpop.permute.xlu0 %3759  ;;  %v4604_v32 = vrot.slane %v2484_v11, 9  ;;  %686 = vst [vmem:[#allocation2 + $0x9c] sm:$0xf] %v685_v9  ;;  %v2238_v17 = vshll.u32 %v1941_v14, 16 }
 0x11c   : > { %v1940_v7 = vld [vmem:[#allocation2 + $0x94] sm:$0xf]  ;;  %3804 = vst.msk [vmem:[#allocation3 + $0x20] sm:$0xff] %vm6217_vm8, %v3760_v13  ;;  %1863 = vrot.lane.b32.xlu1 %v4886_v12, %s4920_s20  ;;  %v2221_v25 = vrot.slane %v2219_v30, 4  ;;  %v2486_v20 = vld [vmem:[#allocation2 + $0x98] sm:$0x1] }
 0x11d   : > { %v2228_v63 = vshll.u32 %v1940_v7, 16  ;;  %v2232_v44 = vshrl.u32 %v1940_v7, 16  ;;  %v2485_v43 = vld [vmem:[#allocation2 + $0x94] sm:$0xf]  ;;  %v2224_v24 = vrot.slane %v2222_v15, 5  ;;  %v2240_v49 = vrot.slane %v2238_v17, 5 }
 0x11e   : > { %v3441_v16 = vpop.permute.xlu1 %3440  ;;  %v2626_v0 = vrot.slane %v2485_v43, 5  ;;  %687 = vst.msk [vmem:[#allocation2 + $0xa0] sm:$0xf] %vm215_vm0, %v493_v21  ;;  %2727 = vrot.lane.b32.xlu0 %v4619_v6, %s4922_s22  ;;  %v2629_v28 = vrot.slane %v2486_v20, 5  ;;  %v4889_v31 = vld [vmem:[#allocation2 + $0x90] sm:$0xff]   ;;  %v689_v6 = vsel %vm5064_vm13, %v494_v33, %v688_v38 }
 0x11f   : > { %3484 = vst.msk [vmem:[#allocation3 + $0x28] sm:$0xff] %vm3478_vm6, %v3441_v16  ;;  %v2230_v22 = vrot.slane %v2228_v63, 5  ;;  %v2234_v27 = vrot.slane %v2232_v44, 4  ;;  %v3762_v45 = vpop.permute.xlu0 %3761  ;;  %v2225_v23 = vor.u32 %v2224_v24, %v2221_v25  ;;  %v2980_v35 = vld [vmem:[#allocation2 + $0x90] sm:$0xf] }
 0x120   : > { %v5732_v34 = vsel %vm5026_vm9, %v4604_v32, %v2626_v0  ;;  %v2628_v36 = vrot.slane %v2626_v0, 4  ;;  %v2981_v57 = vld [vmem:[#allocation2 + $0x94] sm:$0xf]  ;;  %3805 = vst.msk [vmem:[#allocation3 + $0x28] sm:$0xff] %vm6217_vm8, %v3762_v45  ;;  %v2982_v39 = vld [vmem:[#allocation2 + $0x98] sm:$0x1] }
 0x121   : > { %v2235_v56 = vor.u32 %v2234_v27, %v2230_v22  ;;  %v3239_v42 = vshrl.u32 %v2980_v35, 16  ;;  %v3242_v47 = vshll.u32 %v2980_v35, 16  ;;  %v3248_v46 = vshll.u32 %v2981_v57, 16  ;;  %v3525_v61 = vld [vmem:[#allocation2 + $0x90] sm:$0xe] }
 0x122   : > { %v3252_v50 = vshrl.u32 %v2981_v57, 16  ;;  %v2226_v51 = vrot.slane %v2225_v23, 4  ;;  %v2630_v59 = vsel %vm5026_vm9, %v2628_v36, %v2629_v28  ;;  %v3258_v60 = vshll.u32 %v2982_v39, 16  ;;  %v1353_v1 = vpop.permute.xlu1 %1352  ;;  %2905 = vrot.lane.b32.xlu0 %v4889_v31, %s4921_s21  ;;  %v2983_v18 = vld [vmem:[#allocation2 + $0x9c] sm:$0xf] }
 0x123   : > { %v2236_v54 = vrot.slane %v2235_v56, 4  ;;  %v4620_v2 = vcombine.low %v5732_v34, %v2630_v59  ;;  %v3241_v3 = vrot.slane %v3239_v42, 4  ;;  %v3244_v26 = vrot.slane %v3242_v47, 5  ;;  %1395 = vst.msk [vmem:[#allocation3 + $0x30] sm:$0xff] %vm1388_vm15, %v1353_v1  ;;  %v3820_v53 = vld [vmem:[#allocation3 + $0x20] sm:$0xff] }
 0x124   : > { %v3250_v4 = vrot.slane %v3248_v46, 5  ;;  %v2231_v8 = vsel %vm5033_vm10, %v2226_v51, %v2230_v22  ;;  %v3254_v10 = vrot.slane %v3252_v50, 4  ;;  %v3260_v11 = vrot.slane %v3258_v60, 5  ;;  %v3526_v12 = vld [vmem:[#allocation2 + $0x94] sm:$0xf]  ;;  %4809 = vmatprep.mubr.msk.bf16.mxu0 %vm3852_vm7, %v3820_v53 }
 0x125   : > { %v2241_v58 = vsel %vm5033_vm10, %v2236_v54, %v2240_v49  ;;  %v3245_v30 = vor.u32 %v3244_v26, %v3241_v3  ;;  %v2984_v9 = vld [vmem:[#allocation2 + $0xa0] sm:$0xf]  ;;  %v3263_v13 = vshrl.u32 %v2983_v18, 16  ;;  %690 = vst [vmem:[#allocation2 + $0xa4] sm:$0x1] %v689_v6  ;;  %v3266_v63 = vshll.u32 %v2983_v18, 16 }
 0x126   : > { %v4588_v7 = vcombine.low %v2231_v8, %v2241_v58  ;;  %v1677_v14 = vpop.permute.xlu0 %1676  ;;  %v3255_v15 = vor.u32 %v3254_v10, %v3250_v4  ;;  %v3272_v44 = vshll.u32 %v2984_v9, 16  ;;  %v3276_v32 = vshrl.u32 %v2984_v9, 16  ;;  %v3527_v16 = vld [vmem:[#allocation2 + $0x98] sm:$0x1]  ;;  %v893_v21 = vld [vmem:[#allocation2 + $0x90] sm:$0xf] }
 0x127   : > { %1719 = vst.msk [vmem:[#allocation3 + $0x30] sm:$0xff] %vm1712_vm1, %v1677_v14  ;;  %v3246_v25 = vrot.slane %v3245_v30, 4  ;;  %v3265_v17 = vrot.slane %v3263_v13, 4  ;;  %v4667_v43 = vrot.slane %v3525_v61, 9  ;;  %v3663_v20 = vrot.slane %v3526_v12, 5  ;;  %v1355_v24 = vpop.permute.xlu1 %1354  ;;  %v4890_v31 = vld [vmem:[#allocation2 + $0x9c] sm:$0xff]  }
 0x128   : > { %2408 = vrot.lane.b32.xlu1 %v4588_v7, %s4924_s24  ;;  %v3256_v22 = vrot.slane %v3255_v15, 4  ;;  %v3268_v27 = vrot.slane %v3266_v63, 5  ;;  %v5749_v0 = vrot.slane %v3272_v44, 5  ;;  %v3278_v49 = vrot.slane %v3276_v32, 4  ;;  %v894_v28 = vld [vmem:[#allocation2 + $0x94] sm:$0xf] }
 0x129   : > { %1396 = vst.msk [vmem:[#allocation3 + $0x38] sm:$0xff] %vm1388_vm15, %v1355_v24  ;;  %v3251_v33 = vsel %vm5033_vm10, %v3246_v25, %v3250_v4  ;;  %v3664_v45 = vsel %vm5026_vm9, %v4667_v43, %v3663_v20  ;;  %v3665_v23 = vrot.slane %v3663_v20, 4  ;;  %v3666_v56 = vrot.slane %v3527_v16, 5  ;;  %v895_v38 = vld [vmem:[#allocation2 + $0x98] sm:$0x1]  ;;  %v3821_v47 = vld [vmem:[#allocation3 + $0x28] sm:$0xff] }
 0x12a   : > { %v1854_v34 = vpop.permute.xlu0 %1853  ;;  %v3261_v36 = vsel %vm5033_vm10, %v3256_v22, %v3260_v11  ;;  %v3269_v35 = vor.u32 %v3268_v27, %v3265_v17  ;;  %v3279_v57 = vor.u32 %v3278_v49, %v5749_v0  ;;  %v1197_v39 = vshrl.u32 %v893_v21, 16  ;;  %v3528_v42 = vld [vmem:[#allocation2 + $0x9c] sm:$0xe]  ;;  %v3529_v59 = vld [vmem:[#allocation2 + $0xa0] sm:$0xf]  ;;  %4810 = vmatmul.mubr.msk.bf16.gmra.mrb[8].mxu0 %vm3852_vm7, %v3821_v47  ;;  %v4905_v8 = vld [vmem:[#allocation2 + $0x90] sm:$0xff]  }
 0x12b   : > { %1896 = vst.msk [vmem:[#allocation3 + $0x30] sm:$0xff] %vm1889_vm2, %v1854_v34  ;;  %v4651_v46 = vcombine.low %v3251_v33, %v3261_v36  ;;  %v3667_v50 = vsel %vm5026_vm9, %v3665_v23, %v3666_v56  ;;  %v1200_v51 = vshll.u32 %v893_v21, 16  ;;  %v1206_v54 = vshll.u32 %v894_v28, 16  ;;  %v896_v60 = vld [vmem:[#allocation2 + $0x9c] sm:$0xf]  ;;  %v1679_v61 = vpop.permute.xlu1 %1678 }
 0x12c   : > { %2729 = vrot.lane.b32.xlu1 %v4620_v2, %s4922_s22  ;;  %v3270_v1 = vrot.slane %v3269_v35, 4  ;;  %v3280_v3 = vrot.slane %v3279_v57, 4  ;;  %v4683_v26 = vcombine.low %v3664_v45, %v3667_v50  ;;  %v1199_v4 = vrot.slane %v1197_v39, 4  ;;  %v897_v53 = vld [vmem:[#allocation2 + $0xa0] sm:$0xf]  ;;  %1720 = vst.msk [vmem:[#allocation3 + $0x38] sm:$0xff] %vm1712_vm1, %v1679_v61 }
 0x12d   : > { %3450 = vrot.lane.b32.xlu0 %v4651_v46, %s4925_s25  ;;  %v2985_v2 = vld [vmem:[#allocation2 + $0xa4] sm:$0x1]  ;;  %v1202_v58 = vrot.slane %v1200_v51, 5  ;;  %v1208_v10 = vrot.slane %v1206_v54, 5  ;;  %v1210_v11 = vshrl.u32 %v894_v28, 16  ;;  %v1216_v18 = vshll.u32 %v895_v38, 16 }
 0x12e   : > { %v3275_v12 = vsel %vm5033_vm10, %v3270_v1, %v5749_v0  ;;  %v3282_v7 = vshll.u32 %v2985_v2, 16  ;;  %v3530_v30 = vld [vmem:[#allocation2 + $0xa4] sm:$0x1]  ;;  %v4668_v6 = vrot.slane %v3528_v42, 9  ;;  %v3670_v9 = vrot.slane %v3529_v59, 5  ;;  %853 = vst.msk [vmem:[#allocation3 + $0x60] sm:$0xff] %vm840_vm14, %v4905_v8 }
 0x12f   : > { %v4906_v13 = vld [vmem:[#allocation2 + $0x9c] sm:$0xff]   ;;  %v1203_v14 = vor.u32 %v1202_v58, %v1199_v4  ;;  %v1212_v15 = vrot.slane %v1210_v11, 4  ;;  %v1218_v63 = vrot.slane %v1216_v18, 5  ;;  %v3673_v44 = vrot.slane %v3530_v30, 5  ;;  %v1441_v43 = vld [vmem:[#allocation2 + $0x90] sm:$0xe] }
 0x130   : > { %2907 = vrot.lane.b32.xlu1 %v4890_v31, %s4921_s21  ;;  %v3284_v32 = vrot.slane %v3282_v7, 5  ;;  %v3671_v16 = vsel %vm5026_vm9, %v4668_v6, %v3670_v9  ;;  %v3672_v25 = vrot.slane %v3670_v9, 4  ;;  %v1221_v17 = vshrl.u32 %v896_v60, 16  ;;  %v1442_v20 = vld [vmem:[#allocation2 + $0x94] sm:$0xf]  ;;  %854 = vst.msk [vmem:[#allocation3 + $0x68] sm:$0xff] %vm840_vm14, %v4906_v13 }
 0x131   : > { %3771 = vrot.lane.b32.xlu0 %v4683_v26, %s4923_s23  ;;  %v1204_v21 = vrot.slane %v1203_v14, 4  ;;  %v1213_v24 = vor.u32 %v1212_v15, %v1208_v10  ;;  %v898_v22 = vld [vmem:[#allocation2 + $0xa4] sm:$0x1]  ;;  %v1224_v27 = vshll.u32 %v896_v60, 16  ;;  %v1230_v0 = vshll.u32 %v897_v53, 16 }
 0x132   : > { %v3285_v49 = vsel %vm5033_vm10, %v3280_v3, %v3284_v32  ;;  %v3674_v28 = vsel %vm5026_vm9, %v3672_v25, %v3673_v44  ;;  %v1223_v31 = vrot.slane %v1221_v17, 4  ;;  %v1234_v33 = vshrl.u32 %v897_v53, 16  ;;  %v1443_v45 = vld [vmem:[#allocation2 + $0x98] sm:$0x1]  ;;  %v1444_v23 = vld [vmem:[#allocation2 + $0x9c] sm:$0xe]  ;;  %v1856_v56 = vpop.permute.xlu1 %1855  ;;  %v2399_v34 = vpop.permute.xlu0 %2398 }
 0x133   : > { %v4652_v36 = vcombine.low %v3275_v12, %v3285_v49  ;;  %v1209_v35 = vsel %vm5033_vm10, %v1204_v21, %v1208_v10  ;;  %v1214_v57 = vrot.slane %v1213_v24, 4  ;;  %v4684_v38 = vcombine.low %v3671_v16, %v3674_v28  ;;  %1897 = vst.msk [vmem:[#allocation3 + $0x38] sm:$0xff] %vm1889_vm2, %v1856_v56  ;;  %v1445_v50 = vld [vmem:[#allocation2 + $0xa0] sm:$0xf]  ;;  %v1446_v61 = vld [vmem:[#allocation2 + $0xa4] sm:$0x1] }
 0x134   : > { %2441 = vst.msk [vmem:[#allocation3 + $0x30] sm:$0xff] %vm2434_vm3, %v2399_v34  ;;  %v1226_v39 = vrot.slane %v1224_v27, 5  ;;  %v1232_v42 = vrot.slane %v1230_v0, 5  ;;  %v1236_v47 = vrot.slane %v1234_v33, 4  ;;  %v1240_v46 = vshll.u32 %v898_v22, 16  ;;  %v4891_v49 = vld [vmem:[#allocation2 + $0x9c] sm:$0xff]  }
 0x135   : > { %3452 = vrot.lane.b32.xlu1 %v4652_v36, %s4925_s25  ;;  %v1219_v51 = vsel %vm5033_vm10, %v1214_v57, %v1218_v63  ;;  %3773 = vrot.lane.b32.xlu0 %v4684_v38, %s4923_s23  ;;  %v4541_v54 = vrot.slane %v1441_v43, 9  ;;  %v1590_v59 = vrot.slane %v1442_v20, 5  ;;  %v1593_v60 = vrot.slane %v1443_v45, 5  ;;  %v691_v11 = vld [vmem:[#allocation2 + $0xa8] sm:$0xf] }
 0x136   : > { %v4525_v1 = vcombine.low %v1209_v35, %v1219_v51  ;;  %v1227_v3 = vor.u32 %v1226_v39, %v1223_v31  ;;  %v1237_v26 = vor.u32 %v1236_v47, %v1232_v42  ;;  %v1242_v4 = vrot.slane %v1240_v46, 5  ;;  %v2720_v53 = vpop.permute.xlu0 %2719  ;;  %v1942_v6 = vld [vmem:[#allocation2 + $0x9c] sm:$0xf]  ;;  %v695_v63 = vld [vmem:[#allocation2 + $0xb0] sm:$0x1] }
 0x137   : > { %v1591_v8 = vsel %vm5026_vm9, %v4541_v54, %v1590_v59  ;;  %v1592_v2 = vrot.slane %v1590_v59, 4  ;;  %v4542_v58 = vrot.slane %v1444_v23, 9  ;;  %v1597_v10 = vrot.slane %v1445_v50, 5  ;;  %2762 = vst.msk [vmem:[#allocation3 + $0x30] sm:$0xff] %vm2755_vm4, %v2720_v53  ;;  %v1943_v25 = vld [vmem:[#allocation2 + $0xa0] sm:$0xf] }
 0x138   : > { %v1228_v18 = vrot.slane %v1227_v3, 4  ;;  %v1238_v12 = vrot.slane %v1237_v26, 4  ;;  %v1600_v7 = vrot.slane %v1446_v61, 5  ;;  %v498_v30 = vrot.slane %v496_v5, 7  ;;  %v1944_v24 = vld [vmem:[#allocation2 + $0xa4] sm:$0x1] }
 0x139   : > { %1364 = vrot.lane.b32.xlu1 %v4525_v1, %s4919_s19  ;;  %v1594_v9 = vsel %vm5026_vm9, %v1592_v2, %v1593_v60  ;;  %v1598_v13 = vsel %vm5026_vm9, %v4542_v58, %v1597_v10  ;;  %v1599_v14 = vrot.slane %v1597_v10, 4  ;;  %v506_v15 = vrot.slane %v504_v40, 7  ;;  %v2487_v22 = vld [vmem:[#allocation2 + $0x9c] sm:$0xe]  ;;  %v211_v27 = vld [vmem:[%s5020_s17 + $0x70] sm:$0xf] }
 0x13a   : > { %v1233_v44 = vsel %vm5033_vm10, %v1228_v18, %v1232_v42  ;;  %v1243_v5 = vsel %vm5033_vm10, %v1238_v12, %v1242_v4  ;;  %v4557_v32 = vcombine.low %v1591_v8, %v1594_v9  ;;  %v501_v16 = vor.u32 %v499_v62, %v498_v30  ;;  %v2898_v17 = vpop.permute.xlu0 %2897  ;;  %v2488_v31 = vld [vmem:[#allocation2 + $0xa0] sm:$0xf]  ;;  %v2489_v34 = vld [vmem:[#allocation2 + $0xa4] sm:$0x1]  ;;  %v212_v39 = vld [vmem:[%s5020_s17 + $0x74] sm:$0xf] }
 0x13b   : > { %v4526_v43 = vcombine.low %v1233_v44, %v1243_v5  ;;  %v1601_v20 = vsel %vm5026_vm9, %v1599_v14, %v1600_v7  ;;  %v502_v21 = vrot.slane %v498_v30, 4  ;;  %v507_v40 = vshll.u32 %v5701_v52, 16  ;;  %2940 = vst.msk [vmem:[#allocation3 + $0x30] sm:$0xff] %vm2933_vm5, %v2898_v17  ;;  %v5823_v1 = vld [vmem:[%s5020_s17 + $0x78] sm:$0xf] }
 0x13c   : > { %1688 = vrot.lane.b32.xlu0 %v4557_v32, %s4918_s18  ;;  %v4558_v0 = vcombine.low %v1598_v13, %v1601_v20  ;;  %v511_v48 = vrot.slane %v506_v15, 4  ;;  %v692_v62 = vsel %vm5041_vm11, %v501_v16, %v691_v11  ;;  %v2243_v28 = vshrl.u32 %v1942_v6, 16  ;;  %v698_v12 = vld [vmem:[#allocation2 + $0xb4] sm:$0xf] }
 0x13d   : > { %1366 = vrot.lane.b32.xlu1 %v4526_v43, %s4919_s19  ;;  %v509_v52 = vor.u32 %v507_v40, %v506_v15  ;;  %693 = vst [vmem:[#allocation2 + $0xa8] sm:$0xf] %v692_v62  ;;  %v2246_v45 = vshll.u32 %v1942_v6, 16  ;;  %v2252_v23 = vshll.u32 %v1943_v25, 16  ;;  %v2256_v56 = vshrl.u32 %v1943_v25, 16 }
 0x13e   : > { %v2401_v33 = vpop.permute.xlu1 %2400  ;;  %v2245_v36 = vrot.slane %v2243_v28, 4  ;;  %v2262_v35 = vshll.u32 %v1944_v24, 16  ;;  %v696_v57 = vsel %vm5064_vm13, %v511_v48, %v695_v63  ;;  %v4605_v38 = vrot.slane %v2487_v22, 9 }
 0x13f   : > { %2442 = vst.msk [vmem:[#allocation3 + $0x38] sm:$0xff] %vm2434_vm3, %v2401_v33  ;;  %v510_v42 = vsel %vm5049_vm12, %v502_v21, %v509_v52  ;;  %v2248_v47 = vrot.slane %v2246_v45, 5  ;;  %v2254_v46 = vrot.slane %v2252_v23, 5  ;;  %v2258_v50 = vrot.slane %v2256_v56, 4  ;;  %697 = vst [vmem:[#allocation2 + $0xb0] sm:$0x1] %v696_v57 }
 0x140   : > { %1865 = vrot.lane.b32.xlu0 %v4891_v49, %s4920_s20  ;;  %694 = vst.msk [vmem:[#allocation2 + $0xac] sm:$0xf] %vm215_vm0, %v510_v42  ;;  %v2264_v51 = vrot.slane %v2262_v35, 5  ;;  %v2633_v54 = vrot.slane %v2488_v31, 5  ;;  %v2636_v59 = vrot.slane %v2489_v34, 5  ;;  %v513_v60 = vshrl.u32 %v211_v27, 16 }
 0x141   : > { %1690 = vrot.lane.b32.xlu1 %v4558_v0, %s4918_s18  ;;  %v2249_v3 = vor.u32 %v2248_v47, %v2245_v36  ;;  %v2259_v26 = vor.u32 %v2258_v50, %v2254_v46  ;;  %v516_v4 = vshll.u32 %v211_v27, 16  ;;  %v521_v53 = vshrl.u32 %v212_v39, 16 }
 0x142   : > { %v2722_v61 = vpop.permute.xlu1 %2721  ;;  %v2635_v8 = vrot.slane %v2633_v54, 4  ;;  %v515_v2 = vrot.slane %v513_v60, 7  ;;  %v524_v58 = vshll.u32 %v212_v39, 16  ;;  %v530_v7 = vshrl.u32 %v5823_v1, 16 }
 0x143   : > { %2763 = vst.msk [vmem:[#allocation3 + $0x38] sm:$0xff] %vm2755_vm4, %v2722_v61  ;;  %v2250_v10 = vrot.slane %v2249_v3, 4  ;;  %v2260_v11 = vrot.slane %v2259_v26, 4  ;;  %v5827_v18 = vrot.slane %v521_v53, 7  ;;  %v2634_v6 = vsel %vm5026_vm9, %v4605_v38, %v2633_v54  ;;  %v3443_v63 = vpop.permute.xlu0 %3442 }
 0x144   : > { %v1945_v30 = vld [vmem:[#allocation2 + $0xa8] sm:$0xf]  ;;  %v2637_v9 = vsel %vm5026_vm9, %v2635_v8, %v2636_v59  ;;  %v518_v14 = vor.u32 %v516_v4, %v515_v2  ;;  %3485 = vst.msk [vmem:[#allocation3 + $0x30] sm:$0xff] %vm3478_vm6, %v3443_v63  ;;  %v519_v21 = vrot.slane %v515_v2, 4  ;;  %v702_v4 = vld [vmem:[#allocation2 + $0xbc] sm:$0x1] }
 0x145   : > { %v2490_v13 = vld [vmem:[#allocation2 + $0xa8] sm:$0xe]  ;;  %v2255_v44 = vsel %vm5033_vm10, %v2250_v10, %v2254_v46  ;;  %v2265_v5 = vsel %vm5033_vm10, %v2260_v11, %v2264_v51  ;;  %v2267_v32 = vshrl.u32 %v1945_v30, 16  ;;  %v2270_v16 = vshll.u32 %v1945_v30, 16 }
 0x146   : > { %v2900_v15 = vpop.permute.xlu1 %2899  ;;  %v4589_v25 = vcombine.low %v2255_v44, %v2265_v5  ;;  %v1947_v17 = vld [vmem:[#allocation2 + $0xb0] sm:$0x1]  ;;  %v4606_v20 = vrot.slane %v2490_v13, 9  ;;  %v2986_v40 = vld [vmem:[#allocation2 + $0xa8] sm:$0xf]  ;;  %v4621_v0 = vcombine.low %v2634_v6, %v2637_v9  ;;  %v526_v49 = vor.u32 %v524_v58, %v5827_v18 }
 0x147   : > { %2941 = vst.msk [vmem:[#allocation3 + $0x38] sm:$0xff] %vm2933_vm5, %v2900_v15  ;;  %v2492_v43 = vld [vmem:[#allocation2 + $0xb0] sm:$0x1]  ;;  %v4892_v24 = vld [vmem:[#allocation2 + $0xa8] sm:$0xff]   ;;  %v2269_v27 = vrot.slane %v2267_v32, 4  ;;  %v699_v48 = vsel %vm5041_vm11, %v518_v14, %v698_v12  ;;  %v2272_v62 = vrot.slane %v2270_v16, 5  ;;  %v3764_v45 = vpop.permute.xlu0 %3763 }
 0x148   : > { %v1946_v22 = vld [vmem:[#allocation2 + $0xac] sm:$0xf]  ;;  %2410 = vrot.lane.b32.xlu0 %v4589_v25, %s4924_s24  ;;  %v2286_v33 = vshll.u32 %v1947_v17, 16  ;;  %700 = vst [vmem:[#allocation2 + $0xb4] sm:$0xf] %v699_v48  ;;  %1867 = vrot.lane.b32.xlu1 %v4892_v24, %s4920_s20  ;;  %v2643_v56 = vrot.slane %v2492_v43, 5  ;;  %v527_v34 = vsel %vm5049_vm12, %v519_v21, %v526_v49 }
 0x149   : > { %v2276_v28 = vshll.u32 %v1946_v22, 16  ;;  %v2280_v31 = vshrl.u32 %v1946_v22, 16  ;;  %v2491_v52 = vld [vmem:[#allocation2 + $0xac] sm:$0xf]  ;;  %v528_v36 = vrot.slane %v5827_v18, 4  ;;  %3806 = vst.msk [vmem:[#allocation3 + $0x30] sm:$0xff] %vm6217_vm8, %v3764_v45  ;;  %v2273_v35 = vor.u32 %v2272_v62, %v2269_v27 }
 0x14a   : > { %v2640_v23 = vrot.slane %v2491_v52, 5  ;;  %v2288_v39 = vrot.slane %v2286_v33, 5  ;;  %701 = vst.msk [vmem:[#allocation2 + $0xb8] sm:$0xf] %vm215_vm0, %v527_v34  ;;  %v2987_v42 = vld [vmem:[#allocation2 + $0xac] sm:$0xf] }
 0x14b   : > { %v2278_v57 = vrot.slane %v2276_v28, 5  ;;  %v2282_v38 = vrot.slane %v2280_v31, 4  ;;  %v2988_v50 = vld [vmem:[#allocation2 + $0xb0] sm:$0x1]  ;;  %v3287_v51 = vshrl.u32 %v2986_v40, 16  ;;  %v3290_v54 = vshll.u32 %v2986_v40, 16  ;;  %v3766_v53 = vpop.permute.xlu0 %3765 }
 0x14c   : > { %v5852_v47 = vsel %vm5026_vm9, %v4606_v20, %v2640_v23  ;;  %v2642_v46 = vrot.slane %v2640_v23, 4  ;;  %v2274_v59 = vrot.slane %v2273_v35, 4  ;;  %2731 = vrot.lane.b32.xlu0 %v4621_v0, %s4922_s22  ;;  %v4895_v61 = vld [vmem:[#allocation2 + $0xa8] sm:$0xff]   ;;  %v3296_v3 = vshll.u32 %v2987_v42, 16  ;;  %v3445_v18 = vpop.permute.xlu1 %3444  ;;  %v3533_v13 = vld [vmem:[#allocation2 + $0xb0] sm:$0x1] }
 0x14d   : > { %v2283_v60 = vor.u32 %v2282_v38, %v2278_v57  ;;  %v3300_v26 = vshrl.u32 %v2987_v42, 16  ;;  %v3289_v2 = vrot.slane %v3287_v51, 4  ;;  %v3292_v58 = vrot.slane %v3290_v54, 5  ;;  %v3531_v11 = vld [vmem:[#allocation2 + $0xa8] sm:$0xe]  ;;  %3486 = vst.msk [vmem:[#allocation3 + $0x38] sm:$0xff] %vm3478_vm6, %v3445_v18 }
 0x14e   : > { %v5857_v8 = vsel %vm5026_vm9, %v2642_v46, %v2643_v56  ;;  %v3306_v10 = vshll.u32 %v2988_v50, 16  ;;  %v2279_v12 = vsel %vm5033_vm10, %v2274_v59, %v2278_v57  ;;  %v3298_v6 = vrot.slane %v3296_v3, 5  ;;  %v3532_v9 = vld [vmem:[#allocation2 + $0xac] sm:$0xf]  ;;  %3807 = vst.msk [vmem:[#allocation3 + $0x38] sm:$0xff] %vm6217_vm8, %v3766_v53 }
 0x14f   : > { %v2284_v30 = vrot.slane %v2283_v60, 4  ;;  %v4622_v14 = vcombine.low %v5852_v47, %v5857_v8  ;;  %v3293_v15 = vor.u32 %v3292_v58, %v3289_v2  ;;  %v3302_v63 = vrot.slane %v3300_v26, 4  ;;  %v2989_v5 = vld [vmem:[#allocation2 + $0xb4] sm:$0xf]  ;;  %v899_v43 = vld [vmem:[#allocation2 + $0xa8] sm:$0xf] }
 0x150   : > { %v703_v44 = vsel %vm5064_vm13, %v528_v36, %v702_v4  ;;  %2909 = vrot.lane.b32.xlu0 %v4895_v61, %s4921_s21  ;;  %v3308_v16 = vrot.slane %v3306_v10, 5  ;;  %v3311_v25 = vshrl.u32 %v2989_v5, 16  ;;  %v3314_v17 = vshll.u32 %v2989_v5, 16  ;;  %v3822_v20 = vld [vmem:[#allocation3 + $0x30] sm:$0xff]  ;;  %v1357_v0 = vpop.permute.xlu1 %1356  ;;  %v901_v50 = vld [vmem:[#allocation2 + $0xb0] sm:$0x1] }
 0x151   : > { %v2289_v32 = vsel %vm5033_vm10, %v2284_v30, %v2288_v39  ;;  %704 = vst [vmem:[#allocation2 + $0xbc] sm:$0x1] %v703_v44  ;;  %v3294_v40 = vrot.slane %v3293_v15, 4  ;;  %v3303_v24 = vor.u32 %v3302_v63, %v3298_v6  ;;  %v2990_v22 = vld [vmem:[#allocation2 + $0xb8] sm:$0xf]  ;;  %v4669_v27 = vrot.slane %v3531_v11, 9  ;;  %4813 = vmatprep.mubr.msk.bf16.mxu0 %vm3852_vm7, %v3822_v20 }
 0x152   : > { %v4590_v21 = vcombine.low %v2279_v12, %v2289_v32  ;;  %v3313_v49 = vrot.slane %v3311_v25, 4  ;;  %v3316_v48 = vrot.slane %v3314_v17, 5  ;;  %v3320_v62 = vshll.u32 %v2990_v22, 16  ;;  %1397 = vst.msk [vmem:[#allocation3 + $0x40] sm:$0xff] %vm1388_vm15, %v1357_v0  ;;  %v900_v36 = vld [vmem:[#allocation2 + $0xac] sm:$0xf] }
 0x153   : > { %v3324_v28 = vshrl.u32 %v2990_v22, 16  ;;  %v3299_v31 = vsel %vm5033_vm10, %v3294_v40, %v3298_v6  ;;  %v3304_v33 = vrot.slane %v3303_v24, 4  ;;  %v3677_v52 = vrot.slane %v3532_v9, 5  ;;  %v1681_v57 = vpop.permute.xlu0 %1680  ;;  %v4907_v38 = vld [vmem:[#allocation2 + $0xa8] sm:$0xff]   ;;  %v4896_v39 = vld [vmem:[#allocation2 + $0xb4] sm:$0xff]  }
 0x154   : > { %2412 = vrot.lane.b32.xlu1 %v4590_v21, %s4924_s24  ;;  %v3680_v45 = vrot.slane %v3533_v13, 5  ;;  %v3317_v23 = vor.u32 %v3316_v48, %v3313_v49  ;;  %v5875_v56 = vrot.slane %v3320_v62, 5  ;;  %v1245_v35 = vshrl.u32 %v899_v43, 16  ;;  %v1359_v54 = vpop.permute.xlu1 %1358  ;;  %1721 = vst.msk [vmem:[#allocation3 + $0x40] sm:$0xff] %vm1712_vm1, %v1681_v57  ;;  %v3534_v26 = vld [vmem:[#allocation2 + $0xb4] sm:$0xe] }
 0x155   : > { %v3326_v34 = vrot.slane %v3324_v28, 4  ;;  %v3309_v42 = vsel %vm5033_vm10, %v3304_v33, %v3308_v16  ;;  %v3678_v47 = vsel %vm5026_vm9, %v4669_v27, %v3677_v52  ;;  %v3679_v46 = vrot.slane %v3677_v52, 4  ;;  %v3535_v4 = vld [vmem:[#allocation2 + $0xb8] sm:$0xf]  ;;  %1398 = vst.msk [vmem:[#allocation3 + $0x48] sm:$0xff] %vm1388_vm15, %v1359_v54  ;;  %v3823_v11 = vld [vmem:[#allocation3 + $0x38] sm:$0xff] }
 0x156   : > { %v1248_v51 = vshll.u32 %v899_v43, 16  ;;  %v4653_v59 = vcombine.low %v3299_v31, %v3309_v42  ;;  %v3318_v60 = vrot.slane %v3317_v23, 4  ;;  %v1247_v3 = vrot.slane %v1245_v35, 4  ;;  %855 = vst.msk [vmem:[#allocation3 + $0x70] sm:$0xff] %vm840_vm14, %v4907_v38  ;;  %v902_v13 = vld [vmem:[#allocation2 + $0xb4] sm:$0xf]  ;;  %4814 = vmatmul.mubr.msk.bf16.gmra.mrb[12].mxu0 %vm3852_vm7, %v3823_v11 }
 0x157   : > { %v3327_v61 = vor.u32 %v3326_v34, %v5875_v56  ;;  %v3681_v8 = vsel %vm5026_vm9, %v3679_v46, %v3680_v45  ;;  %v1254_v58 = vshll.u32 %v900_v36, 16  ;;  %v1258_v10 = vshrl.u32 %v900_v36, 16  ;;  %v4908_v16 = vld [vmem:[#allocation2 + $0xb4] sm:$0xff]   ;;  %v1447_v0 = vld [vmem:[#allocation2 + $0xa8] sm:$0xe] }
 0x158   : > { %2733 = vrot.lane.b32.xlu1 %v4622_v14, %s4922_s22  ;;  %v2991_v53 = vld [vmem:[#allocation2 + $0xbc] sm:$0x1]  ;;  %v1250_v2 = vrot.slane %v1248_v51, 5  ;;  %3454 = vrot.lane.b32.xlu0 %v4653_v59, %s4925_s25  ;;  %v3323_v18 = vsel %vm5033_vm10, %v3318_v60, %v5875_v56  ;;  %v4685_v6 = vcombine.low %v3678_v47, %v3681_v8  ;;  %v1858_v14 = vpop.permute.xlu0 %1857  ;;  %v1264_v5 = vshll.u32 %v901_v50, 16  ;;  %v1683_v32 = vpop.permute.xlu1 %1682  ;;  %v903_v21 = vld [vmem:[#allocation2 + $0xb8] sm:$0xf] }
 0x159   : > { %v3328_v12 = vrot.slane %v3327_v61, 4  ;;  %v3330_v30 = vshll.u32 %v2991_v53, 16  ;;  %v3536_v9 = vld [vmem:[#allocation2 + $0xbc] sm:$0x1]  ;;  %v1256_v63 = vrot.slane %v1254_v58, 5  ;;  %v1260_v44 = vrot.slane %v1258_v10, 4 }
 0x15a   : > { %v1251_v15 = vor.u32 %v1250_v2, %v1247_v3  ;;  %1898 = vst.msk [vmem:[#allocation3 + $0x40] sm:$0xff] %vm1889_vm2, %v1858_v14  ;;  %v4670_v17 = vrot.slane %v3534_v26, 9  ;;  %v3684_v43 = vrot.slane %v3535_v4, 5  ;;  %v3687_v20 = vrot.slane %v3536_v9, 5  ;;  %v904_v28 = vld [vmem:[#allocation2 + $0xbc] sm:$0x1] }
 0x15b   : > { %v3332_v25 = vrot.slane %v3330_v30, 5  ;;  %1722 = vst.msk [vmem:[#allocation3 + $0x48] sm:$0xff] %vm1712_vm1, %v1683_v32  ;;  %v1261_v24 = vor.u32 %v1260_v44, %v1256_v63  ;;  %v1266_v22 = vrot.slane %v1264_v5, 5  ;;  %v1269_v27 = vshrl.u32 %v902_v13, 16  ;;  %v1448_v33 = vld [vmem:[#allocation2 + $0xac] sm:$0xf] }
 0x15c   : > { %2911 = vrot.lane.b32.xlu1 %v4896_v39, %s4921_s21  ;;  %v1252_v40 = vrot.slane %v1251_v15, 4  ;;  %856 = vst.msk [vmem:[#allocation3 + $0x78] sm:$0xff] %vm840_vm14, %v4908_v16  ;;  %3775 = vrot.lane.b32.xlu0 %v4685_v6, %s4923_s23  ;;  %v3685_v48 = vsel %vm5026_vm9, %v4670_v17, %v3684_v43  ;;  %v3686_v62 = vrot.slane %v3684_v43, 4  ;;  %v1272_v31 = vshll.u32 %v902_v13, 16  ;;  %v1449_v34 = vld [vmem:[#allocation2 + $0xb0] sm:$0x1] }
 0x15d   : > { %v3333_v49 = vsel %vm5033_vm10, %v3328_v12, %v3332_v25  ;;  %v1262_v23 = vrot.slane %v1261_v24, 4  ;;  %v1271_v56 = vrot.slane %v1269_v27, 4  ;;  %v1278_v57 = vshll.u32 %v903_v21, 16  ;;  %v1450_v39 = vld [vmem:[#allocation2 + $0xb4] sm:$0xe] }
 0x15e   : > { %v4654_v52 = vcombine.low %v3323_v18, %v3333_v49  ;;  %v1257_v45 = vsel %vm5033_vm10, %v1252_v40, %v1256_v63  ;;  %v3688_v36 = vsel %vm5026_vm9, %v3686_v62, %v3687_v20  ;;  %v1274_v35 = vrot.slane %v1272_v31, 5  ;;  %v1451_v51 = vld [vmem:[#allocation2 + $0xb8] sm:$0xf]  ;;  %v1452_v54 = vld [vmem:[#allocation2 + $0xbc] sm:$0x1] }
 0x15f   : > { %v1282_v38 = vshrl.u32 %v903_v21, 16  ;;  %v1267_v42 = vsel %vm5033_vm10, %v1262_v23, %v1266_v22  ;;  %v4686_v47 = vcombine.low %v3685_v48, %v3688_v36  ;;  %v1288_v46 = vshll.u32 %v904_v28, 16  ;;  %v214_v26 = vld [vmem:[%s5020_s17 + $0x7c] sm:$0xf]  ;;  %v705_v32 = vld [vmem:[#allocation2 + $0xc0] sm:$0xf] }
 0x160   : > { %3456 = vrot.lane.b32.xlu1 %v4654_v52, %s4925_s25  ;;  %v4543_v50 = vrot.slane %v1447_v0, 9  ;;  %v4527_v59 = vcombine.low %v1257_v45, %v1267_v42  ;;  %v1275_v60 = vor.u32 %v1274_v35, %v1271_v56  ;;  %v1280_v61 = vrot.slane %v1278_v57, 5  ;;  %v1948_v20 = vld [vmem:[#allocation2 + $0xb4] sm:$0xf]  ;;  %v1949_v21 = vld [vmem:[#allocation2 + $0xb8] sm:$0xf] }
 0x161   : > { %v1284_v3 = vrot.slane %v1282_v38, 4  ;;  %3777 = vrot.lane.b32.xlu0 %v4686_v47, %s4923_s23  ;;  %v1290_v4 = vrot.slane %v1288_v46, 5  ;;  %v1604_v53 = vrot.slane %v1448_v33, 5  ;;  %v1607_v8 = vrot.slane %v1449_v34, 5  ;;  %v1860_v58 = vpop.permute.xlu1 %1859  ;;  %v2403_v10 = vpop.permute.xlu0 %2402  ;;  %v1950_v27 = vld [vmem:[#allocation2 + $0xbc] sm:$0x1] }
 0x162   : > { %v4544_v2 = vrot.slane %v1450_v39, 9  ;;  %v1276_v11 = vrot.slane %v1275_v60, 4  ;;  %v1611_v12 = vrot.slane %v1451_v51, 5  ;;  %v1614_v30 = vrot.slane %v1452_v54, 5  ;;  %1899 = vst.msk [vmem:[#allocation3 + $0x48] sm:$0xff] %vm1889_vm2, %v1860_v58  ;;  %v4897_v62 = vld [vmem:[#allocation2 + $0xb4] sm:$0xff]  }
 0x163   : > { %v1285_v18 = vor.u32 %v1284_v3, %v1280_v61  ;;  %2443 = vst.msk [vmem:[#allocation3 + $0x40] sm:$0xff] %vm2434_vm3, %v2403_v10  ;;  %v1605_v6 = vsel %vm5026_vm9, %v4543_v50, %v1604_v53  ;;  %v1606_v9 = vrot.slane %v1604_v53, 4  ;;  %v532_v13 = vrot.slane %v530_v7, 7  ;;  %v2493_v0 = vld [vmem:[#allocation2 + $0xb4] sm:$0xe] }
 0x164   : > { %1368 = vrot.lane.b32.xlu1 %v4527_v59, %s4919_s19  ;;  %v533_v14 = vshll.u32 %v5823_v1, 16  ;;  %v1281_v15 = vsel %vm5033_vm10, %v1276_v11, %v1280_v61  ;;  %v1612_v44 = vsel %vm5026_vm9, %v4544_v2, %v1611_v12  ;;  %v1613_v5 = vrot.slane %v1611_v12, 4  ;;  %v709_v33 = vld [vmem:[#allocation2 + $0xc8] sm:$0x1]  ;;  %v2995_v52 = vld [vmem:[#allocation2 + $0xcc] sm:$0xf] }
 0x165   : > { %v1286_v63 = vrot.slane %v1285_v18, 4  ;;  %v1608_v16 = vsel %vm5026_vm9, %v1606_v9, %v1607_v8  ;;  %v536_v17 = vrot.slane %v532_v13, 4  ;;  %v538_v43 = vshrl.u32 %v214_v26, 16  ;;  %v2724_v7 = vpop.permute.xlu0 %2723  ;;  %v2494_v36 = vld [vmem:[#allocation2 + $0xb8] sm:$0xf] }
 0x166   : > { %v535_v25 = vor.u32 %v533_v14, %v532_v13  ;;  %v4559_v40 = vcombine.low %v1605_v6, %v1608_v16  ;;  %v1615_v24 = vsel %vm5026_vm9, %v1613_v5, %v1614_v30  ;;  %v541_v22 = vshll.u32 %v214_v26, 16  ;;  %2764 = vst.msk [vmem:[#allocation3 + $0x40] sm:$0xff] %vm2755_vm4, %v2724_v7  ;;  %v2495_v39 = vld [vmem:[#allocation2 + $0xbc] sm:$0x1]  ;;  %v5939_v3 = vld [vmem:[#allocation2 + $0xd0] sm:$0xf] }
 0x167   : > { %v1291_v1 = vsel %vm5033_vm10, %v1286_v63, %v1290_v4  ;;  %v4560_v48 = vcombine.low %v1612_v44, %v1615_v24  ;;  %v540_v28 = vrot.slane %v538_v43, 7  ;;  %v2291_v45 = vshrl.u32 %v1948_v20, 16 }
 0x168   : > { %v4528_v49 = vcombine.low %v1281_v15, %v1291_v1  ;;  %v706_v31 = vsel %vm5041_vm11, %v535_v25, %v705_v32  ;;  %1692 = vrot.lane.b32.xlu0 %v4559_v40, %s4918_s18  ;;  %v2294_v23 = vshll.u32 %v1948_v20, 16  ;;  %v2300_v56 = vshll.u32 %v1949_v21, 16 }
 0x169   : > { %707 = vst [vmem:[#allocation2 + $0xc0] sm:$0xf] %v706_v31  ;;  %v2304_v34 = vshrl.u32 %v1949_v21, 16  ;;  %v543_v35 = vor.u32 %v541_v22, %v540_v28  ;;  %v545_v57 = vrot.slane %v540_v28, 4  ;;  %v2310_v38 = vshll.u32 %v1950_v27, 16  ;;  %v2902_v47 = vpop.permute.xlu0 %2901 }
 0x16a   : > { %1370 = vrot.lane.b32.xlu1 %v4528_v49, %s4919_s19  ;;  %v4607_v42 = vrot.slane %v2493_v0, 9  ;;  %v2293_v37 = vrot.slane %v2291_v45, 4  ;;  %v2296_v46 = vrot.slane %v2294_v23, 5  ;;  %v2302_v50 = vrot.slane %v2300_v56, 5  ;;  %2942 = vst.msk [vmem:[#allocation3 + $0x40] sm:$0xff] %vm2933_vm5, %v2902_v47 }
 0x16b   : > { %v2306_v51 = vrot.slane %v2304_v34, 4  ;;  %v544_v54 = vsel %vm5049_vm12, %v536_v17, %v543_v35  ;;  %v2312_v59 = vrot.slane %v2310_v38, 5  ;;  %v710_v60 = vsel %vm5064_vm13, %v545_v57, %v709_v33 }
 0x16c   : > { %v2647_v61 = vrot.slane %v2494_v36, 5  ;;  %1869 = vrot.lane.b32.xlu0 %v4897_v62, %s4920_s20  ;;  %708 = vst.msk [vmem:[#allocation2 + $0xc4] sm:$0xf] %vm215_vm0, %v544_v54  ;;  %v2297_v4 = vor.u32 %v2296_v46, %v2293_v37  ;;  %711 = vst [vmem:[#allocation2 + $0xc8] sm:$0x1] %v710_v60  ;;  %v2650_v8 = vrot.slane %v2495_v39, 5 }
 0x16d   : > { %v2405_v26 = vpop.permute.xlu1 %2404  ;;  %v2307_v53 = vor.u32 %v2306_v51, %v2302_v50  ;;  %v3359_v2 = vshrl.u32 %v2995_v52, 16  ;;  %v3362_v55 = vshll.u32 %v2995_v52, 16  ;;  %v3368_v18 = vshll.u32 %v5939_v3, 16  ;;  %vm6218_vm0 = vmmov %vm6217_vm8  ;;  %v2997_v60 = vld [vmem:[#allocation2 + $0xd4] sm:$0x1] }
 0x16e   : > { %2444 = vst.msk [vmem:[#allocation3 + $0x48] sm:$0xff] %vm2434_vm3, %v2405_v26  ;;  %1694 = vrot.lane.b32.xlu1 %v4560_v48, %s4918_s18  ;;  %v2649_v41 = vrot.slane %v2647_v61, 4  ;;  %v2298_v58 = vrot.slane %v2297_v4, 4  ;;  %v2648_v30 = vsel %vm5026_vm9, %v4607_v42, %v2647_v61  ;;  %v3372_v17 = vshrl.u32 %v5939_v3, 16  ;;  %vm6219_vm11 = vmmov %vm6218_vm0 }
 0x16f   : > { %v2308_v10 = vrot.slane %v2307_v53, 4  ;;  %v5945_v11 = vrot.slane %v3359_v2, 4  ;;  %v5958_v7 = vrot.slane %v3362_v55, 5  ;;  %vm6222_vm12 = vmmov %vm6218_vm0  ;;  %vm4194_vm13 = vcmask 60416  }
 0x170   : > { %v1951_v12 = vld [vmem:[#allocation2 + $0xc0] sm:$0xf]  ;;  %v2651_v6 = vsel %vm5026_vm9, %v2649_v41, %v2650_v8  ;;  %v2303_v14 = vsel %vm5033_vm10, %v2298_v58, %v2302_v50  ;;  %vm4227_vm14 = vcmask 64512   ;;  %vm6223_vm8 = vmmov %vm6218_vm0 }
 0x171   : > { %v2496_v9 = vld [vmem:[#allocation2 + $0xc0] sm:$0xe]  ;;  %v2726_v13 = vpop.permute.xlu1 %2725  ;;  %v2313_v15 = vsel %vm5033_vm10, %v2308_v10, %v2312_v59  ;;  %v2315_v63 = vshrl.u32 %v1951_v12, 16  ;;  %v2318_v44 = vshll.u32 %v1951_v12, 16  ;;  %v3447_v1 = vpop.permute.xlu0 %3446  ;;  %v4623_v22 = vcombine.low %v2648_v30, %v2651_v6 }
 0x172   : > { %v2992_v5 = vld [vmem:[#allocation2 + $0xc0] sm:$0xf]  ;;  %2765 = vst.msk [vmem:[#allocation3 + $0x48] sm:$0xff] %vm2755_vm4, %v2726_v13  ;;  %v4591_v32 = vcombine.low %v2303_v14, %v2313_v15  ;;  %v4608_v16 = vrot.slane %v2496_v9, 9  ;;  %v3365_v61 = vor.u32 %v5958_v7, %v5945_v11  ;;  %v3370_v12 = vrot.slane %v3368_v18, 5 }
 0x173   : > { %v3335_v25 = vshrl.u32 %v2992_v5, 16  ;;  %v2317_v43 = vrot.slane %v2315_v63, 4  ;;  %v2320_v20 = vrot.slane %v2318_v44, 5  ;;  %v3338_v21 = vshll.u32 %v2992_v5, 16  ;;  %v4898_v40 = vld [vmem:[#allocation2 + $0xc0] sm:$0xff]   ;;  %3487 = vst.msk [vmem:[#allocation3 + $0x40] sm:$0xff] %vm3478_vm6, %v3447_v1 }
 0x174   : > { %2414 = vrot.lane.b32.xlu0 %v4591_v32, %s4924_s24  ;;  %v1952_v24 = vld [vmem:[#allocation2 + $0xc4] sm:$0xf]  ;;  %v1953_v49 = vld [vmem:[#allocation2 + $0xc8] sm:$0x1]  ;;  %1871 = vrot.lane.b32.xlu1 %v4898_v40, %s4920_s20  ;;  %v3537_v2 = vld [vmem:[#allocation2 + $0xc0] sm:$0xe] }
 0x175   : > { %v3337_v27 = vrot.slane %v3335_v25, 4  ;;  %v2904_v0 = vpop.permute.xlu1 %2903  ;;  %v2321_v48 = vor.u32 %v2320_v20, %v2317_v43  ;;  %v2324_v62 = vshll.u32 %v1952_v24, 16  ;;  %v2328_v28 = vshrl.u32 %v1952_v24, 16  ;;  %v2497_v31 = vld [vmem:[#allocation2 + $0xc4] sm:$0xf]  ;;  %v3768_v35 = vpop.permute.xlu0 %3767 }
 0x176   : > { %2943 = vst.msk [vmem:[#allocation3 + $0x48] sm:$0xff] %vm2933_vm5, %v2904_v0  ;;  %v2334_v33 = vshll.u32 %v1953_v49, 16  ;;  %v2498_v52 = vld [vmem:[#allocation2 + $0xc8] sm:$0x1]  ;;  %v2654_v45 = vrot.slane %v2497_v31, 5  ;;  %v4901_v38 = vld [vmem:[#allocation2 + $0xc0] sm:$0xff]  }
 0x177   : > { %v2322_v23 = vrot.slane %v2321_v48, 4  ;;  %v2326_v56 = vrot.slane %v2324_v62, 5  ;;  %v2330_v34 = vrot.slane %v2328_v28, 4  ;;  %v2657_v36 = vrot.slane %v2498_v52, 5  ;;  %v2993_v39 = vld [vmem:[#allocation2 + $0xc4] sm:$0xf] }
 0x178   : > { %2735 = vrot.lane.b32.xlu0 %v4623_v22, %s4922_s22  ;;  %v2656_v57 = vrot.slane %v2654_v45, 4  ;;  %v2994_v42 = vld [vmem:[#allocation2 + $0xc8] sm:$0x1]  ;;  %3808 = vst.msk [vmem:[#allocation3 + $0x40] sm:$0xff] %vm6218_vm0, %v3768_v35  ;;  %v2336_v37 = vrot.slane %v2334_v33, 5  ;;  %v3340_v46 = vrot.slane %v3338_v21, 5  ;;  %v2655_v51 = vsel %vm5026_vm9, %v4608_v16, %v2654_v45 }
 0x179   : > { %v2331_v47 = vor.u32 %v2330_v34, %v2326_v56  ;;  %v3344_v50 = vshll.u32 %v2993_v39, 16  ;;  %v3348_v54 = vshrl.u32 %v2993_v39, 16  ;;  %v3354_v59 = vshll.u32 %v2994_v42, 16  ;;  %v3538_v41 = vld [vmem:[#allocation2 + $0xc4] sm:$0xf]  ;;  %v3770_v55 = vpop.permute.xlu0 %3769  ;;  %v4902_v33 = vld [vmem:[#allocation2 + $0xcc] sm:$0xff]  }
 0x17a   : > { %v2327_v26 = vsel %vm5033_vm10, %v2322_v23, %v2326_v56  ;;  %v3341_v53 = vor.u32 %v3340_v46, %v3337_v27  ;;  %v2658_v58 = vsel %vm5026_vm9, %v2656_v57, %v2657_v36  ;;  %v3374_v30 = vrot.slane %v3372_v17, 4  ;;  %v3539_v11 = vld [vmem:[#allocation2 + $0xc8] sm:$0x1]  ;;  %v3449_v6 = vpop.permute.xlu1 %3448  ;;  %v3541_v16 = vld [vmem:[#allocation2 + $0xd0] sm:$0xf] }
 0x17b   : > { %v2332_v4 = vrot.slane %v2331_v47, 4  ;;  %v3346_v8 = vrot.slane %v3344_v50, 5  ;;  %v3350_v10 = vrot.slane %v3348_v54, 4  ;;  %v3356_v14 = vrot.slane %v3354_v59, 5  ;;  %3488 = vst.msk [vmem:[#allocation3 + $0x48] sm:$0xff] %vm3478_vm6, %v3449_v6 }
 0x17c   : > { %2913 = vrot.lane.b32.xlu0 %v4901_v38, %s4921_s21  ;;  %v3342_v13 = vrot.slane %v3341_v53, 4  ;;  %v3378_v15 = vshll.u32 %v2997_v60, 16  ;;  %v3375_v5 = vor.u32 %v3374_v30, %v3370_v12  ;;  %v4671_v32 = vrot.slane %v3537_v2, 9  ;;  %3809 = vst.msk [vmem:[#allocation3 + $0x48] sm:$0xff] %vm6219_vm11, %v3770_v55  ;;  %v3540_v22 = vld [vmem:[#allocation2 + $0xcc] sm:$0xe] }
 0x17d   : > { %v2337_v9 = vsel %vm5033_vm10, %v2332_v4, %v2336_v37  ;;  %v3351_v44 = vor.u32 %v3350_v10, %v3346_v8  ;;  %v3691_v3 = vrot.slane %v3538_v41, 5  ;;  %v3694_v18 = vrot.slane %v3539_v11, 5  ;;  %v3542_v48 = vld [vmem:[#allocation2 + $0xd4] sm:$0x1] }
 0x17e   : > { %v4592_v63 = vcombine.low %v2327_v26, %v2337_v9  ;;  %v4624_v17 = vcombine.low %v2655_v51, %v2658_v58  ;;  %v3347_v43 = vsel %vm5033_vm10, %v3342_v13, %v3346_v8  ;;  %v3366_v21 = vrot.slane %v3365_v61, 4  ;;  %v1361_v7 = vpop.permute.xlu1 %1360 }
 0x17f   : > { %v3824_v25 = vld [vmem:[#allocation3 + $0x40] sm:$0xff]  ;;  %v3352_v20 = vrot.slane %v3351_v44, 4  ;;  %v3376_v1 = vrot.slane %v3375_v5, 4  ;;  %v3380_v40 = vrot.slane %v3378_v15, 5  ;;  %v3693_v24 = vrot.slane %v3691_v3, 4  ;;  %1399 = vst.msk [vmem:[#allocation3 + $0x50] sm:$0xff] %vm1388_vm15, %v1361_v7 }
 0x180   : > { %2416 = vrot.lane.b32.xlu1 %v4592_v63, %s4924_s24  ;;  %4817 = vmatprep.mubr.msk.bf16.mxu1 %vm3852_vm7, %v3824_v25  ;;  %v3698_v27 = vrot.slane %v3541_v16, 5  ;;  %v3692_v49 = vsel %vm5026_vm9, %v4671_v32, %v3691_v3  ;;  %v1685_v62 = vpop.permute.xlu0 %1684  ;;  %v3371_v52 = vsel %vm5033_vm10, %v3366_v21, %v3370_v12  ;;  %v4672_v45 = vrot.slane %v3540_v22, 9 }
 0x181   : > { %v3357_v0 = vsel %vm5033_vm10, %v3352_v20, %v3356_v14  ;;  %v3695_v31 = vsel %vm5026_vm9, %v3693_v24, %v3694_v18  ;;  %1723 = vst.msk [vmem:[#allocation3 + $0x50] sm:$0xff] %vm1712_vm1, %v1685_v62  ;;  %v3381_v56 = vsel %vm5033_vm10, %v3376_v1, %v3380_v40  ;;  %v3701_v35 = vrot.slane %v3542_v48, 5  ;;  %vm6221_vm10 = vmmov %vm6218_vm0 }
 0x182   : > { %v4655_v28 = vcombine.low %v3347_v43, %v3357_v0  ;;  %v1363_v23 = vpop.permute.xlu1 %1362  ;;  %v4687_v34 = vcombine.low %v3692_v49, %v3695_v31  ;;  %v3700_v36 = vrot.slane %v3698_v27, 4  ;;  %v4656_v39 = vcombine.low %v3371_v52, %v3381_v56 }
 0x183   : > { %1400 = vst.msk [vmem:[#allocation3 + $0x58] sm:$0xff] %vm1388_vm15, %v1363_v23  ;;  %v3825_v57 = vld [vmem:[#allocation3 + $0x48] sm:$0xff]  ;;  %v3699_v29 = vsel %vm5026_vm9, %v4672_v45, %v3698_v27 }
 0x184   : > { %2737 = vrot.lane.b32.xlu1 %v4624_v17, %s4922_s22  ;;  %3458 = vrot.lane.b32.xlu0 %v4655_v28, %s4925_s25  ;;  %v1862_v38 = vpop.permute.xlu0 %1861  ;;  %v3702_v47 = vsel %vm5026_vm9, %v3700_v36, %v3701_v35  ;;  %vm6220_vm9 = vmmov %vm6218_vm0 }
 0x185   : > { %4818 = vmatmul.mubr.msk.bf16.vlgmr.msra.gmra.mrb[0].mxu1 %vm3852_vm7, %v3825_v57  ;;  %1900 = vst.msk [vmem:[#allocation3 + $0x50] sm:$0xff] %vm1889_vm2, %v1862_v38  ;;  %v4688_v37 = vcombine.low %v3699_v29, %v3702_v47 }
 0x186   : > { %v1687_v42 = vpop.permute.xlu1 %1686 }
 0x187   : > { %1724 = vst.msk [vmem:[#allocation3 + $0x58] sm:$0xff] %vm1712_vm1, %v1687_v42 }
 0x188   : > { %2915 = vrot.lane.b32.xlu1 %v4902_v33, %s4921_s21  ;;  %3779 = vrot.lane.b32.xlu0 %v4687_v34, %s4923_s23 }
 0x18c   : > { %3460 = vrot.lane.b32.xlu1 %v4656_v39, %s4925_s25  ;;  %v2407_v46 = vpop.permute.xlu0 %2406 }
 0x18d   : > { %2445 = vst.msk [vmem:[#allocation3 + $0x50] sm:$0xff] %vm2434_vm3, %v2407_v46 }
 0x18e   : > { %v1864_v50 = vpop.permute.xlu1 %1863 }
 0x18f   : > { %1901 = vst.msk [vmem:[#allocation3 + $0x58] sm:$0xff] %vm1889_vm2, %v1864_v50 }
 0x190   : > { %3781 = vrot.lane.b32.xlu1 %v4688_v37, %s4923_s23  ;;  %v2728_v51 = vpop.permute.xlu0 %2727 }
 0x191   : > { %2766 = vst.msk [vmem:[#allocation3 + $0x50] sm:$0xff] %vm2755_vm4, %v2728_v51 }
 0x194   : > { %v2906_v54 = vpop.permute.xlu0 %2905 }
 0x195   : > { %2944 = vst.msk [vmem:[#allocation3 + $0x50] sm:$0xff] %vm2933_vm5, %v2906_v54 }
 0x19a   : > { %v2409_v19 = vpop.permute.xlu1 %2408 }
 0x19b   : > { %2446 = vst.msk [vmem:[#allocation3 + $0x58] sm:$0xff] %vm2434_vm3, %v2409_v19 }
 0x19e   : > { %v2730_v59 = vpop.permute.xlu1 %2729 }
 0x19f   : > { %2767 = vst.msk [vmem:[#allocation3 + $0x58] sm:$0xff] %vm2755_vm4, %v2730_v59  ;;  %v3451_v60 = vpop.permute.xlu0 %3450 }
 0x1a0   : > { %3489 = vst.msk [vmem:[#allocation3 + $0x50] sm:$0xff] %vm3478_vm6, %v3451_v60 }
 0x1a2   : > { %v2908_v61 = vpop.permute.xlu1 %2907 }
 0x1a3   : > { %2945 = vst.msk [vmem:[#allocation3 + $0x58] sm:$0xff] %vm2933_vm5, %v2908_v61  ;;  %v3772_v26 = vpop.permute.xlu0 %3771 }
 0x1a4   : > { %3810 = vst.msk [vmem:[#allocation3 + $0x50] sm:$0xff] %vm6220_vm9, %v3772_v26 }
 0x1a7   : > { %v3453_v4 = vpop.permute.xlu1 %3452  ;;  %v3774_v53 = vpop.permute.xlu0 %3773 }
 0x1a8   : > { %3490 = vst.msk [vmem:[#allocation3 + $0x58] sm:$0xff] %vm3478_vm6, %v3453_v4 }
 0x1a9   : > { %3811 = vst.msk [vmem:[#allocation3 + $0x58] sm:$0xff] %vm6221_vm10, %v3774_v53 }
 0x1ab   : > { %v1365_v8 = vpop.permute.xlu1 %1364  ;;  %v3826_v2 = vld [vmem:[#allocation3 + $0x50] sm:$0xff] }
 0x1ac   : > { %1401 = vst.msk [vmem:[#allocation3 + $0x60] sm:$0xff] %vm1388_vm15, %v1365_v8  ;;  %4821 = vmatprep.mubr.msk.bf16.mxu1 %vm3852_vm7, %v3826_v2 }
 0x1ae   : > { %v1689_v41 = vpop.permute.xlu0 %1688 }
 0x1af   : > { %v1367_v55 = vpop.permute.xlu1 %1366  ;;  %1725 = vst.msk [vmem:[#allocation3 + $0x60] sm:$0xff] %vm1712_vm1, %v1689_v41 }
 0x1b0   : > { %1402 = vst.msk [vmem:[#allocation3 + $0x68] sm:$0xff] %vm1388_vm15, %v1367_v55  ;;  %v3827_v58 = vld [vmem:[#allocation3 + $0x58] sm:$0xff] }
 0x1b1   : > { %4822 = vmatmul.mubr.msk.bf16.gmra.mrb[4].mxu1 %vm3852_vm7, %v3827_v58 }
 0x1b2   : > { %v1866_v10 = vpop.permute.xlu0 %1865 }
 0x1b3   : > { %v1691_v12 = vpop.permute.xlu1 %1690  ;;  %1902 = vst.msk [vmem:[#allocation3 + $0x60] sm:$0xff] %vm1889_vm2, %v1866_v10 }
 0x1b4   : > { %1726 = vst.msk [vmem:[#allocation3 + $0x68] sm:$0xff] %vm1712_vm1, %v1691_v12 }
 0x1ba   : > { %v2411_v30 = vpop.permute.xlu0 %2410  ;;  %v1868_v11 = vpop.permute.xlu1 %1867 }
 0x1bb   : > { %2447 = vst.msk [vmem:[#allocation3 + $0x60] sm:$0xff] %vm2434_vm3, %v2411_v30 }
 0x1bc   : > { %1903 = vst.msk [vmem:[#allocation3 + $0x68] sm:$0xff] %vm1889_vm2, %v1868_v11 }
 0x1be   : > { %v2732_v6 = vpop.permute.xlu0 %2731 }
 0x1bf   : > { %2768 = vst.msk [vmem:[#allocation3 + $0x60] sm:$0xff] %vm2755_vm4, %v2732_v6 }
 0x1c2   : > { %v2910_v9 = vpop.permute.xlu0 %2909 }
 0x1c3   : > { %2946 = vst.msk [vmem:[#allocation3 + $0x60] sm:$0xff] %vm2933_vm5, %v2910_v9 }
 0x1c6   : > { %v2413_v13 = vpop.permute.xlu1 %2412 }
 0x1c7   : > { %2448 = vst.msk [vmem:[#allocation3 + $0x68] sm:$0xff] %vm2434_vm3, %v2413_v13 }
 0x1ca   : > { %v2734_v14 = vpop.permute.xlu1 %2733  ;;  %v3455_v15 = vpop.permute.xlu0 %3454 }
 0x1cb   : > { %2769 = vst.msk [vmem:[#allocation3 + $0x68] sm:$0xff] %vm2755_vm4, %v2734_v14 }
 0x1cc   : > { %3491 = vst.msk [vmem:[#allocation3 + $0x60] sm:$0xff] %vm3478_vm6, %v3455_v15 }
 0x1ce   : > { %v2912_v63 = vpop.permute.xlu1 %2911  ;;  %v3776_v44 = vpop.permute.xlu0 %3775 }
 0x1cf   : > { %2947 = vst.msk [vmem:[#allocation3 + $0x68] sm:$0xff] %vm2933_vm5, %v2912_v63  ;;  %v4803_v5 = vpop.f32.mrb[0].mxu0 }
 0x1d0   : > { %3812 = vst.msk [vmem:[#allocation3 + $0x60] sm:$0xff] %vm6222_vm12, %v3776_v44  ;;  %v4746_v32 = vpack.c.bf16 %v4803_v5, %v4803_v5  ;;  %v3939_v16 = vpop.f32.mrb[1].mxu0  ;;  %v4301_v43 = vmul.f32 %v4803_v5, %v4803_v5  ;;  %v4231_v48 = vsel %vm4227_vm14, %v4803_v5, 0.0 }
 0x1d1   : > { %v4744_v18 = vpack.c.bf16 %v3939_v16, %v3939_v16  ;;  %v4299_v25 = vmul.f32 %v3939_v16, %v3939_v16  ;;  %v4804_v17 = vpop.f32.mrb[2].mxu0  ;;  %v4228_v1 = vsel %vm4227_vm14, %v3939_v16, 0.0 }
 0x1d2   : > { %v3457_v3 = vpop.permute.xlu1 %3456  ;;  %4197 = vst.msk [vmem:[%s6043_s7 + $0x8] sm:$0xf] %vm4194_vm13, %v4746_v32  ;;  %v4747_v20 = vpack.c.bf16 %v4804_v17, %v4804_v17  ;;  %v3942_v21 = vpop.f32.mrb[3].mxu0  ;;  %v4302_v27 = vmul.f32 %v4804_v17, %v4804_v17  ;;  %v4334_v45 = vsel %vm4227_vm14, %v4301_v43, 0.0  ;;  %v4233_v56 = vsel %vm4227_vm14, %v4804_v17, 0.0 }
 0x1d3   : > { %3492 = vst.msk [vmem:[#allocation3 + $0x68] sm:$0xff] %vm3478_vm6, %v3457_v3  ;;  %v3778_v7 = vpop.permute.xlu0 %3777  ;;  %v4745_v40 = vpack.c.bf16 %v3942_v21, %v3942_v21  ;;  %v4229_v24 = vsel %vm4227_vm14, %v3942_v21, 0.0  ;;  %v4300_v22 = vmul.f32 %v3942_v21, %v3942_v21  ;;  %v4331_v62 = vsel %vm4227_vm14, %v4299_v25, 0.0 }
 0x1d4   : > { %4195 = vst.msk [vmem:[%s6043_s7] sm:$0xf] %vm4194_vm13, %v4744_v18  ;;  %4198 = vst.msk [vmem:[%s6043_s7 + $0xc] sm:$0xf] %vm4194_vm13, %v4747_v20  ;;  %v4230_v0 = vadd.f32 %v4229_v24, %v4228_v1  ;;  %v4336_v34 = vsel %vm4227_vm14, %v4302_v27, 0.0 }
 0x1d5   : > { %3813 = vst.msk [vmem:[#allocation3 + $0x68] sm:$0xff] %vm6223_vm8, %v3778_v7  ;;  %v4332_v28 = vsel %vm4227_vm14, %v4300_v22, 0.0 }
 0x1d6   : > { %v1369_v49 = vpop.permute.xlu1 %1368  ;;  %4196 = vst.msk [vmem:[%s6043_s7 + $0x4] sm:$0xf] %vm4194_vm13, %v4745_v40  ;;  %v4232_v33 = vadd.f32 %v4231_v48, %v4230_v0  ;;  %v4333_v52 = vadd.f32 %v4332_v28, %v4331_v62 }
 0x1d7   : > { %1403 = vst.msk [vmem:[#allocation3 + $0x70] sm:$0xff] %vm1388_vm15, %v1369_v49  ;;  %v3828_v31 = vld [vmem:[#allocation3 + $0x60] sm:$0xff]  ;;  %v4807_v23 = vpop.f32.mrb[4].mxu0 }
 0x1d8   : > { %4825 = vmatprep.mubr.msk.bf16.mxu1 %vm3852_vm7, %v3828_v31  ;;  %v4335_v36 = vadd.f32 %v4334_v45, %v4333_v52  ;;  %v4750_v35 = vpack.c.bf16 %v4807_v23, %v4807_v23  ;;  %v3955_v57 = vpop.f32.mrb[5].mxu0  ;;  %v4234_v39 = vadd.f32 %v4233_v56, %v4232_v33  ;;  %v4305_v26 = vmul.f32 %v4807_v23, %v4807_v23 }
 0x1d9   : > { %v4748_v38 = vpack.c.bf16 %v3955_v57, %v3955_v57  ;;  %v4235_v42 = vsel %vm4227_vm14, %v3955_v57, 0.0  ;;  %v4303_v29 = vmul.f32 %v3955_v57, %v3955_v57  ;;  %v4808_v47 = vpop.f32.mrb[6].mxu0  ;;  %v4239_v55 = vsel %vm4227_vm14, %v4807_v23, 0.0 }
 0x1da   : > { %v1693_v37 = vpop.permute.xlu0 %1692  ;;  %4201 = vst.msk [vmem:[%s6043_s7 + $0x18] sm:$0xf] %vm4194_vm13, %v4750_v35  ;;  %v4337_v46 = vadd.f32 %v4336_v34, %v4335_v36  ;;  %v4751_v50 = vpack.c.bf16 %v4808_v47, %v4808_v47  ;;  %v3958_v51 = vpop.f32.mrb[7].mxu0  ;;  %v4236_v59 = vadd.f32 %v4235_v42, %v4234_v39  ;;  %v4306_v58 = vmul.f32 %v4808_v47, %v4808_v47 }
 0x1db   : > { %1727 = vst.msk [vmem:[#allocation3 + $0x70] sm:$0xff] %vm1712_vm1, %v1693_v37  ;;  %v4338_v60 = vsel %vm4227_vm14, %v4303_v29, 0.0  ;;  %v4749_v61 = vpack.c.bf16 %v3958_v51, %v3958_v51  ;;  %v4237_v53 = vsel %vm4227_vm14, %v3958_v51, 0.0  ;;  %v4304_v8 = vmul.f32 %v3958_v51, %v3958_v51 }
 0x1dc   : > { %v1371_v54 = vpop.permute.xlu1 %1370  ;;  %v3829_v19 = vld [vmem:[#allocation3 + $0x68] sm:$0xff]  ;;  %4199 = vst.msk [vmem:[%s6043_s7 + $0x10] sm:$0xf] %vm4194_vm13, %v4748_v38  ;;  %v4339_v4 = vadd.f32 %v4338_v60, %v4337_v46  ;;  %4202 = vst.msk [vmem:[%s6043_s7 + $0x1c] sm:$0xf] %vm4194_vm13, %v4751_v50  ;;  %v4238_v2 = vadd.f32 %v4237_v53, %v4236_v59  ;;  %v4342_v6 = vsel %vm4227_vm14, %v4305_v26, 0.0 }
 0x1dd   : > { %1404 = vst.msk [vmem:[#allocation3 + $0x78] sm:$0xff] %vm1388_vm15, %v1371_v54  ;;  %4826 = vmatmul.mubr.msk.bf16.gmra.mrb[8].mxu1 %vm3852_vm7, %v3829_v19  ;;  %v4340_v10 = vsel %vm4227_vm14, %v4304_v8, 0.0  ;;  %v4241_v9 = vsel %vm4227_vm14, %v4808_v47, 0.0  ;;  %v4344_v15 = vsel %vm4227_vm14, %v4306_v58, 0.0  ;;  %vm6224_vm15 = vmmov %vm6218_vm0 }
 0x1de   : > { %4200 = vst.msk [vmem:[%s6043_s7 + $0x14] sm:$0xf] %vm4194_vm13, %v4749_v61  ;;  %v1870_v41 = vpop.permute.xlu0 %1869  ;;  %v4240_v30 = vadd.f32 %v4239_v55, %v4238_v2  ;;  %v4341_v11 = vadd.f32 %v4340_v10, %v4339_v4 }
 0x1df   : > { %1904 = vst.msk [vmem:[#allocation3 + $0x70] sm:$0xff] %vm1889_vm2, %v1870_v41 }
 0x1e0   : > { %v1695_v12 = vpop.permute.xlu1 %1694  ;;  %v4343_v13 = vadd.f32 %v4342_v6, %v4341_v11  ;;  %v4242_v14 = vadd.f32 %v4241_v9, %v4240_v30 }
 0x1e1   : > { %1728 = vst.msk [vmem:[#allocation3 + $0x78] sm:$0xff] %vm1712_vm1, %v1695_v12  ;;  %vm6225_vm1 = vmmov %vm6218_vm0 }
 0x1e2   : > { %v4345_v63 = vadd.f32 %v4344_v15, %v4343_v13 }
 0x1e6   : > { %v2415_v44 = vpop.permute.xlu0 %2414  ;;  %v1872_v5 = vpop.permute.xlu1 %1871 }
 0x1e7   : > { %2449 = vst.msk [vmem:[#allocation3 + $0x70] sm:$0xff] %vm2434_vm3, %v2415_v44 }
 0x1e8   : > { %1905 = vst.msk [vmem:[#allocation3 + $0x78] sm:$0xff] %vm1889_vm2, %v1872_v5  ;;  %vm4297_vm2 = vcmask 57344  }
 0x1ea   : > { %v2736_v32 = vpop.permute.xlu0 %2735 }
 0x1eb   : > { %2770 = vst.msk [vmem:[#allocation3 + $0x70] sm:$0xff] %vm2755_vm4, %v2736_v32 }
 0x1ee   : > { %v2914_v16 = vpop.permute.xlu0 %2913 }
 0x1ef   : > { %2948 = vst.msk [vmem:[#allocation3 + $0x70] sm:$0xff] %vm2933_vm5, %v2914_v16 }
 0x1f2   : > { %v2417_v3 = vpop.permute.xlu1 %2416 }
 0x1f3   : > { %2450 = vst.msk [vmem:[#allocation3 + $0x78] sm:$0xff] %vm2434_vm3, %v2417_v3 }
 0x1f6   : > { %v2738_v18 = vpop.permute.xlu1 %2737  ;;  %v3459_v25 = vpop.permute.xlu0 %3458 }
 0x1f7   : > { %2771 = vst.msk [vmem:[#allocation3 + $0x78] sm:$0xff] %vm2755_vm4, %v2738_v18 }
 0x1f8   : > { %3493 = vst.msk [vmem:[#allocation3 + $0x70] sm:$0xff] %vm3478_vm6, %v3459_v25 }
 0x1fa   : > { %v2916_v17 = vpop.permute.xlu1 %2915  ;;  %v3780_v43 = vpop.permute.xlu0 %3779 }
 0x1fb   : > { %2949 = vst.msk [vmem:[#allocation3 + $0x78] sm:$0xff] %vm2933_vm5, %v2916_v17 }
 0x1fc   : > { %3814 = vst.msk [vmem:[#allocation3 + $0x70] sm:$0xff] %vm6224_vm15, %v3780_v43 }
 0x1fd   : > { %v4811_v21 = vpop.f32.mrb[8].mxu0 }
 0x1fe   : > { %v3461_v20 = vpop.permute.xlu1 %3460  ;;  %v4754_v7 = vpack.c.bf16 %v4811_v21, %v4811_v21  ;;  %v3971_v1 = vpop.f32.mrb[9].mxu0  ;;  %v4309_v45 = vmul.f32 %v4811_v21, %v4811_v21  ;;  %v4247_v36 = vsel %vm4227_vm14, %v4811_v21, 0.0 }
 0x1ff   : > { %3494 = vst.msk [vmem:[#allocation3 + $0x78] sm:$0xff] %vm3478_vm6, %v3461_v20  ;;  %v4752_v40 = vpack.c.bf16 %v3971_v1, %v3971_v1  ;;  %v4243_v24 = vsel %vm4227_vm14, %v3971_v1, 0.0  ;;  %v4307_v22 = vmul.f32 %v3971_v1, %v3971_v1  ;;  %v4812_v27 = vpop.f32.mrb[10].mxu0 }
 0x200   : > { %4205 = vst.msk [vmem:[%s6043_s7 + $0x28] sm:$0xf] %vm4194_vm13, %v4754_v7  ;;  %v4244_v49 = vadd.f32 %v4243_v24, %v4242_v14  ;;  %v4755_v48 = vpack.c.bf16 %v4812_v27, %v4812_v27  ;;  %v3974_v62 = vpop.f32.mrb[11].mxu0  ;;  %v4310_v35 = vmul.f32 %v4812_v27, %v4812_v27  ;;  %v4249_v39 = vsel %vm4227_vm14, %v4812_v27, 0.0 }
 0x201   : > { %4203 = vst.msk [vmem:[%s6043_s7 + $0x20] sm:$0xf] %vm4194_vm13, %v4752_v40  ;;  %v4346_v31 = vsel %vm4227_vm14, %v4307_v22, 0.0  ;;  %v4753_v33 = vpack.c.bf16 %v3974_v62, %v3974_v62  ;;  %v4245_v52 = vsel %vm4227_vm14, %v3974_v62, 0.0  ;;  %v4308_v34 = vmul.f32 %v3974_v62, %v3974_v62 }
 0x202   : > { %v3782_v0 = vpop.permute.xlu1 %3781  ;;  %v4347_v23 = vadd.f32 %v4346_v31, %v4345_v63  ;;  %4206 = vst.msk [vmem:[%s6043_s7 + $0x2c] sm:$0xf] %vm4194_vm13, %v4755_v48  ;;  %v4246_v56 = vadd.f32 %v4245_v52, %v4244_v49  ;;  %v4350_v29 = vsel %vm4227_vm14, %v4309_v45, 0.0  ;;  %v4352_v50 = vsel %vm4227_vm14, %v4310_v35, 0.0 }
 0x203   : > { %3815 = vst.msk [vmem:[#allocation3 + $0x78] sm:$0xff] %vm6225_vm1, %v3782_v0  ;;  %v3830_v28 = vld [vmem:[#allocation3 + $0x70] sm:$0xff]  ;;  %v4348_v38 = vsel %vm4227_vm14, %v4308_v34, 0.0 }
 0x204   : > { %4829 = vmatprep.mubr.msk.bf16.mxu1 %vm3852_vm7, %v3830_v28  ;;  %4204 = vst.msk [vmem:[%s6043_s7 + $0x24] sm:$0xf] %vm4194_vm13, %v4753_v33  ;;  %v4248_v57 = vadd.f32 %v4247_v36, %v4246_v56  ;;  %v4349_v42 = vadd.f32 %v4348_v38, %v4347_v23 }
 0x206   : > { %v4250_v47 = vadd.f32 %v4249_v39, %v4248_v57  ;;  %v4351_v37 = vadd.f32 %v4350_v29, %v4349_v42 }
 0x208   : > { %v4353_v51 = vadd.f32 %v4352_v50, %v4351_v37 }
 0x20a   : > { %v3831_v46 = vld [vmem:[#allocation3 + $0x78] sm:$0xff] }
 0x20b   : > { %4830 = vmatmul.mubr.msk.bf16.gmra.mrb[12].mxu1 %vm3852_vm7, %v3831_v46 }
 0x229   : > { %v4815_v54 = vpop.f32.mrb[12].mxu0 }
 0x22a   : > { %v4758_v19 = vpack.c.bf16 %v4815_v54, %v4815_v54  ;;  %v3987_v59 = vpop.f32.mrb[13].mxu0  ;;  %v4313_v10 = vmul.f32 %v4815_v54, %v4815_v54  ;;  %v4255_v6 = vsel %vm4227_vm14, %v4815_v54, 0.0 }
 0x22b   : > { %v4756_v60 = vpack.c.bf16 %v3987_v59, %v3987_v59  ;;  %v4251_v61 = vsel %vm4227_vm14, %v3987_v59, 0.0  ;;  %v4311_v26 = vmul.f32 %v3987_v59, %v3987_v59  ;;  %v4816_v4 = vpop.f32.mrb[14].mxu0 }
 0x22c   : > { %4209 = vst.msk [vmem:[%s6043_s7 + $0x38] sm:$0xf] %vm4194_vm13, %v4758_v19  ;;  %v4252_v53 = vadd.f32 %v4251_v61, %v4250_v47  ;;  %v4759_v8 = vpack.c.bf16 %v4816_v4, %v4816_v4  ;;  %v3990_v2 = vpop.f32.mrb[15].mxu0  ;;  %v4314_v9 = vmul.f32 %v4816_v4, %v4816_v4  ;;  %v4257_v15 = vsel %vm4227_vm14, %v4816_v4, 0.0 }
 0x22d   : > { %4207 = vst.msk [vmem:[%s6043_s7 + $0x30] sm:$0xf] %vm4194_vm13, %v4756_v60  ;;  %v4354_v41 = vsel %vm4227_vm14, %v4311_v26, 0.0  ;;  %v4757_v55 = vpack.c.bf16 %v3990_v2, %v3990_v2  ;;  %v4253_v58 = vsel %vm4227_vm14, %v3990_v2, 0.0  ;;  %v4312_v11 = vmul.f32 %v3990_v2, %v3990_v2 }
 0x22e   : > { %v4355_v12 = vadd.f32 %v4354_v41, %v4353_v51  ;;  %4210 = vst.msk [vmem:[%s6043_s7 + $0x3c] sm:$0xf] %vm4194_vm13, %v4759_v8  ;;  %v4254_v30 = vadd.f32 %v4253_v58, %v4252_v53  ;;  %v4358_v44 = vsel %vm4227_vm14, %v4313_v10, 0.0  ;;  %v4360_v16 = vsel %vm4227_vm14, %v4314_v9, 0.0 }
 0x22f   : > { %4208 = vst.msk [vmem:[%s6043_s7 + $0x34] sm:$0xf] %vm4194_vm13, %v4757_v55  ;;  %v4356_v14 = vsel %vm4227_vm14, %v4312_v11, 0.0 }
 0x230   : > { %v4256_v13 = vadd.f32 %v4255_v6, %v4254_v30  ;;  %v4357_v63 = vadd.f32 %v4356_v14, %v4355_v12 }
 0x232   : > { %v4258_v5 = vadd.f32 %v4257_v15, %v4256_v13  ;;  %v4359_v32 = vadd.f32 %v4358_v44, %v4357_v63 }
 0x234   : > { %v4361_v3 = vadd.f32 %v4360_v16, %v4359_v32 }
 0x258   : > { %v4819_v18 = vpop.f32.mrb[0].mxu1 }
 0x259   : > { %v4762_v25 = vpack.c.bf16 %v4819_v18, %v4819_v18  ;;  %v4003_v17 = vpop.f32.mrb[1].mxu1  ;;  %v4317_v49 = vmul.f32 %v4819_v18, %v4819_v18  ;;  %v4263_v31 = vsel %vm4227_vm14, %v4819_v18, 0.0 }
 0x25a   : > { %v4760_v43 = vpack.c.bf16 %v4003_v17, %v4003_v17  ;;  %v4259_v20 = vsel %vm4227_vm14, %v4003_v17, 0.0  ;;  %v4315_v21 = vmul.f32 %v4003_v17, %v4003_v17  ;;  %v4820_v7 = vpop.f32.mrb[2].mxu1 }
 0x25b   : > { %4213 = vst.msk [vmem:[%s6043_s7 + $0x48] sm:$0xf] %vm4194_vm13, %v4762_v25  ;;  %v4260_v1 = vadd.f32 %v4259_v20, %v4258_v5  ;;  %v4763_v40 = vpack.c.bf16 %v4820_v7, %v4820_v7  ;;  %v4006_v24 = vpop.f32.mrb[3].mxu1  ;;  %v4318_v33 = vmul.f32 %v4820_v7, %v4820_v7  ;;  %v4265_v23 = vsel %vm4227_vm14, %v4820_v7, 0.0 }
 0x25c   : > { %4211 = vst.msk [vmem:[%s6043_s7 + $0x40] sm:$0xf] %vm4194_vm13, %v4760_v43  ;;  %v4362_v22 = vsel %vm4227_vm14, %v4315_v21, 0.0  ;;  %v4761_v27 = vpack.c.bf16 %v4006_v24, %v4006_v24  ;;  %v4261_v0 = vsel %vm4227_vm14, %v4006_v24, 0.0  ;;  %v4316_v28 = vmul.f32 %v4006_v24, %v4006_v24 }
 0x25d   : > { %v4363_v48 = vadd.f32 %v4362_v22, %v4361_v3  ;;  %4214 = vst.msk [vmem:[%s6043_s7 + $0x4c] sm:$0xf] %vm4194_vm13, %v4763_v40  ;;  %v4262_v62 = vadd.f32 %v4261_v0, %v4260_v1  ;;  %v4366_v34 = vsel %vm4227_vm14, %v4317_v49, 0.0  ;;  %v4368_v57 = vsel %vm4227_vm14, %v4318_v33, 0.0 }
 0x25e   : > { %4212 = vst.msk [vmem:[%s6043_s7 + $0x44] sm:$0xf] %vm4194_vm13, %v4761_v27  ;;  %v4364_v45 = vsel %vm4227_vm14, %v4316_v28, 0.0 }
 0x25f   : > { %v4264_v52 = vadd.f32 %v4263_v31, %v4262_v62  ;;  %v4365_v56 = vadd.f32 %v4364_v45, %v4363_v48 }
 0x261   : > { %v4266_v36 = vadd.f32 %v4265_v23, %v4264_v52  ;;  %v4367_v35 = vadd.f32 %v4366_v34, %v4365_v56 }
 0x263   : > { %v4369_v38 = vadd.f32 %v4368_v57, %v4367_v35 }
 0x284   : > { %v4823_v39 = vpop.f32.mrb[4].mxu1 }
 0x285   : > { %v4766_v42 = vpack.c.bf16 %v4823_v39, %v4823_v39  ;;  %v4019_v29 = vpop.f32.mrb[5].mxu1  ;;  %v4321_v26 = vmul.f32 %v4823_v39, %v4823_v39  ;;  %v4271_v2 = vsel %vm4227_vm14, %v4823_v39, 0.0 }
 0x286   : > { %v4764_v47 = vpack.c.bf16 %v4019_v29, %v4019_v29  ;;  %v4267_v37 = vsel %vm4227_vm14, %v4019_v29, 0.0  ;;  %v4319_v46 = vmul.f32 %v4019_v29, %v4019_v29  ;;  %v4824_v50 = vpop.f32.mrb[6].mxu1 }
 0x287   : > { %4217 = vst.msk [vmem:[%s6043_s7 + $0x58] sm:$0xf] %vm4194_vm13, %v4766_v42  ;;  %v4268_v51 = vadd.f32 %v4267_v37, %v4266_v36  ;;  %v4767_v54 = vpack.c.bf16 %v4824_v50, %v4824_v50  ;;  %v4022_v19 = vpop.f32.mrb[7].mxu1  ;;  %v4322_v41 = vmul.f32 %v4824_v50, %v4824_v50  ;;  %v4273_v10 = vsel %vm4227_vm14, %v4824_v50, 0.0 }
 0x288   : > { %4215 = vst.msk [vmem:[%s6043_s7 + $0x50] sm:$0xf] %vm4194_vm13, %v4764_v47  ;;  %v4370_v59 = vsel %vm4227_vm14, %v4319_v46, 0.0  ;;  %v4765_v60 = vpack.c.bf16 %v4022_v19, %v4022_v19  ;;  %v4269_v61 = vsel %vm4227_vm14, %v4022_v19, 0.0  ;;  %v4320_v8 = vmul.f32 %v4022_v19, %v4022_v19 }
 0x289   : > { %v4371_v4 = vadd.f32 %v4370_v59, %v4369_v38  ;;  %4218 = vst.msk [vmem:[%s6043_s7 + $0x5c] sm:$0xf] %vm4194_vm13, %v4767_v54  ;;  %v4270_v53 = vadd.f32 %v4269_v61, %v4268_v51  ;;  %v4374_v30 = vsel %vm4227_vm14, %v4321_v26, 0.0  ;;  %v4376_v9 = vsel %vm4227_vm14, %v4322_v41, 0.0 }
 0x28a   : > { %4216 = vst.msk [vmem:[%s6043_s7 + $0x54] sm:$0xf] %vm4194_vm13, %v4765_v60  ;;  %v4372_v58 = vsel %vm4227_vm14, %v4320_v8, 0.0 }
 0x28b   : > { %v4272_v55 = vadd.f32 %v4271_v2, %v4270_v53  ;;  %v4373_v12 = vadd.f32 %v4372_v58, %v4371_v4 }
 0x28d   : > { %v4274_v11 = vadd.f32 %v4273_v10, %v4272_v55  ;;  %v4375_v6 = vadd.f32 %v4374_v30, %v4373_v12 }
 0x28f   : > { %v4377_v13 = vadd.f32 %v4376_v9, %v4375_v6 }
 0x2b0   : > { %v4827_v14 = vpop.f32.mrb[8].mxu1 }
 0x2b1   : > { %v4770_v15 = vpack.c.bf16 %v4827_v14, %v4827_v14  ;;  %v4035_v63 = vpop.f32.mrb[9].mxu1  ;;  %v4325_v21 = vmul.f32 %v4827_v14, %v4827_v14  ;;  %v4279_v24 = vsel %vm4227_vm14, %v4827_v14, 0.0 }
 0x2b2   : > { %v4768_v44 = vpack.c.bf16 %v4035_v63, %v4035_v63  ;;  %v4275_v5 = vsel %vm4227_vm14, %v4035_v63, 0.0  ;;  %v4323_v32 = vmul.f32 %v4035_v63, %v4035_v63  ;;  %v4828_v16 = vpop.f32.mrb[10].mxu1 }
 0x2b3   : > { %4221 = vst.msk [vmem:[%s6043_s7 + $0x68] sm:$0xf] %vm4194_vm13, %v4770_v15  ;;  %v4276_v3 = vadd.f32 %v4275_v5, %v4274_v11  ;;  %v4771_v18 = vpack.c.bf16 %v4828_v16, %v4828_v16  ;;  %v4038_v25 = vpop.f32.mrb[11].mxu1  ;;  %v4326_v22 = vmul.f32 %v4828_v16, %v4828_v16  ;;  %v4281_v49 = vsel %vm4227_vm14, %v4828_v16, 0.0 }
 0x2b4   : > { %4219 = vst.msk [vmem:[%s6043_s7 + $0x60] sm:$0xf] %vm4194_vm13, %v4768_v44  ;;  %v4378_v17 = vsel %vm4227_vm14, %v4323_v32, 0.0  ;;  %v4769_v43 = vpack.c.bf16 %v4038_v25, %v4038_v25  ;;  %v4277_v20 = vsel %vm4227_vm14, %v4038_v25, 0.0  ;;  %v4324_v40 = vmul.f32 %v4038_v25, %v4038_v25 }
 0x2b5   : > { %v4379_v7 = vadd.f32 %v4378_v17, %v4377_v13  ;;  %4222 = vst.msk [vmem:[%s6043_s7 + $0x6c] sm:$0xf] %vm4194_vm13, %v4771_v18  ;;  %v4278_v1 = vadd.f32 %v4277_v20, %v4276_v3  ;;  %v4382_v62 = vsel %vm4227_vm14, %v4325_v21, 0.0  ;;  %v4384_v33 = vsel %vm4227_vm14, %v4326_v22, 0.0 }
 0x2b6   : > { %4220 = vst.msk [vmem:[%s6043_s7 + $0x64] sm:$0xf] %vm4194_vm13, %v4769_v43  ;;  %v4380_v0 = vsel %vm4227_vm14, %v4324_v40, 0.0 }
 0x2b7   : > { %v4280_v27 = vadd.f32 %v4279_v24, %v4278_v1  ;;  %v4381_v48 = vadd.f32 %v4380_v0, %v4379_v7 }
 0x2b9   : > { %v4282_v28 = vadd.f32 %v4281_v49, %v4280_v27  ;;  %v4383_v31 = vadd.f32 %v4382_v62, %v4381_v48 }
 0x2bb   : > { %v4385_v52 = vadd.f32 %v4384_v33, %v4383_v31 }
 0x2de   : > { %v4831_v45 = vpop.f32.mrb[12].mxu1 }
 0x2df   : > { %v4774_v23 = vpack.c.bf16 %v4831_v45, %v4831_v45  ;;  %v4051_v56 = vpop.f32.mrb[13].mxu1  ;;  %v4329_v46 = vmul.f32 %v4831_v45, %v4831_v45  ;;  %v4287_v19 = vsel %vm4227_vm14, %v4831_v45, 0.0 }
 0x2e0   : > { %v4772_v34 = vpack.c.bf16 %v4051_v56, %v4051_v56  ;;  %v4283_v36 = vsel %vm4227_vm14, %v4051_v56, 0.0  ;;  %v4327_v35 = vmul.f32 %v4051_v56, %v4051_v56  ;;  %v4832_v57 = vpop.f32.mrb[14].mxu1 }
 0x2e1   : > { %4225 = vst.msk [vmem:[%s6043_s7 + $0x78] sm:$0xf] %vm4194_vm13, %v4774_v23  ;;  %v4284_v38 = vadd.f32 %v4283_v36, %v4282_v28  ;;  %v4775_v39 = vpack.c.bf16 %v4832_v57, %v4832_v57  ;;  %v4054_v42 = vpop.f32.mrb[15].mxu1  ;;  %v4330_v59 = vmul.f32 %v4832_v57, %v4832_v57  ;;  %v4289_v26 = vsel %vm4227_vm14, %v4832_v57, 0.0 }
 0x2e2   : > { %4223 = vst.msk [vmem:[%s6043_s7 + $0x70] sm:$0xf] %vm4194_vm13, %v4772_v34  ;;  %v4386_v29 = vsel %vm4227_vm14, %v4327_v35, 0.0  ;;  %v4773_v47 = vpack.c.bf16 %v4054_v42, %v4054_v42  ;;  %v4285_v37 = vsel %vm4227_vm14, %v4054_v42, 0.0  ;;  %v4328_v54 = vmul.f32 %v4054_v42, %v4054_v42 }
 0x2e3   : > { %v4387_v50 = vadd.f32 %v4386_v29, %v4385_v52  ;;  %4226 = vst.msk [vmem:[%s6043_s7 + $0x7c] sm:$0xf] %vm4194_vm13, %v4775_v39  ;;  %v4286_v51 = vadd.f32 %v4285_v37, %v4284_v38  ;;  %v4390_v53 = vsel %vm4227_vm14, %v4329_v46, 0.0  ;;  %v4392_v41 = vsel %vm4227_vm14, %v4330_v59, 0.0 }
 0x2e4   : > { %4224 = vst.msk [vmem:[%s6043_s7 + $0x74] sm:$0xf] %vm4194_vm13, %v4773_v47  ;;  %v4388_v61 = vsel %vm4227_vm14, %v4328_v54, 0.0 }
 0x2e5   : > { %v4288_v60 = vadd.f32 %v4287_v19, %v4286_v51  ;;  %v4389_v4 = vadd.f32 %v4388_v61, %v4387_v50 }
 0x2e7   : > { %v4290_v8 = vadd.f32 %v4289_v26, %v4288_v60  ;;  %v4391_v2 = vadd.f32 %v4390_v53, %v4389_v4 }
 0x2e9   : > { %v4291_v55 = vrot.slane %v4290_v8, 4  ;;  %v4393_v58 = vadd.f32 %v4392_v41, %v4391_v2 }
 0x2eb   : > { %v4292_v10 = vadd.f32 %v4291_v55, %v4290_v8  ;;  %v4394_v12 = vrot.slane %v4393_v58, 4 }
 0x2ed   : > { %v4293_v30 = vrot.slane %v4292_v10, 2  ;;  %v4395_v11 = vadd.f32 %v4394_v12, %v4393_v58 }
 0x2ef   : > { %v4294_v6 = vadd.f32 %v4293_v30, %v4292_v10  ;;  %v4396_v9 = vrot.slane %v4395_v11, 2 }
 0x2f1   : > { %v4295_v13 = vrot.slane %v4294_v6, 1  ;;  %v4397_v14 = vadd.f32 %v4396_v9, %v4395_v11 }
 0x2f3   : > { %v4296_v15 = vadd.f32 %v4295_v13, %v4294_v6  ;;  %v4398_v63 = vrot.slane %v4397_v14, 1 }
 0x2f5   : > { %4298 = vst.msk [vmem:[%s181_s11] sm:$0x1] %vm4297_vm2, %v4296_v15  ;;  %v4399_v44 = vadd.f32 %v4398_v63, %v4397_v14 }
 0x2f7   : > { %4400 = vst.msk [vmem:[%s181_s11 + $0x1] sm:$0x1] %vm4297_vm2, %v4399_v44 }
 0x2f8 PF: > { %s14_s12 = sadd.s32 1, %s4915_s12  }
 0x2f9   : > { %p11_p4 = scmp.ge.s32.totalorder %s14_s12, 4  }
 0x2fb   :  { %13 = sbr.rel (!%p11_p4) target bundleno = 1 (0x1), region = 72 }

// kernel: resconv_block.4
= control target key start
LH: loop header
LB: loop body
LE: loop exit
PB: predicated region body
PF: predicated region fallthrough
CT: control target
= control target key end

     0   :  { %s5426_s18 = smov 0   ;;  %s7005_s0 = inlined_call_operand.vmem [shape: bf16[2,256,8], index: 0, kind: input, shape index: {}]   ;;  %s7006_s1 = inlined_call_operand.vmem [shape: f32[1,8], index: 1, kind: input, shape index: {}]   ;;  %s7007_s2 = inlined_call_operand.vmem [shape: f32[1,8], index: 2, kind: input, shape index: {}]   ;;  %s7008_s3 = inlined_call_operand.vmem [shape: bf16[72,8], index: 3, kind: input, shape index: {}]   ;;  %s7009_s4 = inlined_call_operand.vmem [shape: bf16[2,256,8], index: 4, kind: output, shape index: {0}]   ;;  %s7010_s5 = inlined_call_operand.vmem [shape: f32[2,2,8], index: 5, kind: output, shape index: {1}]  }
   0x1 LB: > { %s4792_s19 = sadd.s32 4294967295, %s5385_s18   ;;  %p4796_p0 = scmp.ge.s32.totalorder %s5385_s18, 1  ;;  %s5385_s18 = sphi %s5426_s18, %s16_s18  }
   0x2   : > { %p190_p1 = scmp.lt.s32.totalorder %s5385_s18, 3 }
   0x4   : > { %p191_p2 = pnand %p4796_p0, %p190_p1 }
   0x5   : > { %vm427_vm0 = vcmask (!%p191_p2), 60416   ;;  %vm7011_vm1 = vcmask (!%p191_p2), 57344   ;;  %v5387_v0 = vmov (!%p191_p2), 0   ;;  %p222_p3 = scmp.lt.s32.totalorder (!%p191_p2), %s4792_s19, 1  ;;  %vm1793_vm2 = vcmask (!%p191_p2), 1042432   ;;  %s5388_s28 = smov (!%p191_p2), 16  }
   0x6   : > { %194 = sbr.rel (%p191_p2) target bundleno = 785 (0x311), region = 36  ;;  %428 = vst.msk [vmem:[#allocation2] sm:$0xf] (!%p191_p2), %vm427_vm0, %v5387_v0  ;;  %429 = vst.msk [vmem:[#allocation2 + $0x4] sm:$0xf] (!%p191_p2), %vm427_vm0, %v5387_v0  ;;  %vm1794_vm3 = vcmask (!%p191_p2), 1046532  }
   0x7   : > { %431 = vst.msk [vmem:[#allocation2 + $0x8] sm:$0x1] (!%p191_p2), %vm7011_vm1, %v5387_v0  ;;  %434 = vst.msk [vmem:[#allocation2 + $0x14] sm:$0x1] (!%p191_p2), %vm7011_vm1, %v5387_v0  ;;  %vm1197_vm4 = vsmask.f32 (!%p191_p2), 3328 }
   0x8   : > { %432 = vst.msk [vmem:[#allocation2 + $0xc] sm:$0xf] (!%p191_p2), %vm427_vm0, %v5387_v0  ;;  %433 = vst.msk [vmem:[#allocation2 + $0x10] sm:$0xf] (!%p191_p2), %vm427_vm0, %v5387_v0  ;;  %v5509_v2 = vld [vmem:[%s7006_s1] ss:$0 sm:$0xff] (!%p191_p2) }
   0x9   : > { %435 = vst.msk [vmem:[#allocation2 + $0x18] sm:$0xf] (!%p191_p2), %vm427_vm0, %v5387_v0  ;;  %436 = vst.msk [vmem:[#allocation2 + $0x1c] sm:$0xf] (!%p191_p2), %vm427_vm0, %v5387_v0  ;;  %vm1198_vm6 = vsmask.f32 (!%p191_p2), 7440 }
   0xa   : > { %437 = vst.msk [vmem:[#allocation2 + $0x20] sm:$0x1] (!%p191_p2), %vm7011_vm1, %v5387_v0  ;;  %440 = vst.msk [vmem:[#allocation2 + $0x2c] sm:$0x1] (!%p191_p2), %vm7011_vm1, %v5387_v0  ;;  %v5515_v4 = vld [vmem:[%s7007_s2] ss:$0 sm:$0xff] (!%p191_p2) }
   0xb   : > { %438 = vst.msk [vmem:[#allocation2 + $0x24] sm:$0xf] (!%p191_p2), %vm427_vm0, %v5387_v0  ;;  %439 = vst.msk [vmem:[#allocation2 + $0x28] sm:$0xf] (!%p191_p2), %vm427_vm0, %v5387_v0  ;;  %vm888_vm7 = vsmask.f32 (!%p191_p2), 7938 }
   0xc   : > { %441 = vst.msk [vmem:[#allocation2 + $0x30] sm:$0xf] (!%p191_p2), %vm427_vm0, %v5387_v0  ;;  %442 = vst.msk [vmem:[#allocation2 + $0x34] sm:$0xf] (!%p191_p2), %vm427_vm0, %v5387_v0  ;;  %vm563_vm8 = vsmask.f32 (!%p191_p2), 256 }
   0xd   : > { %443 = vst.msk [vmem:[#allocation2 + $0x38] sm:$0x1] %vm7011_vm1, %v5387_v0  ;;  %446 = vst.msk [vmem:[#allocation2 + $0x44] sm:$0x1] %vm7011_vm1, %v5387_v0  ;;  %s7108_s19 = smov (!%p222_p3, %s4792_s19), 1  ;;  %s5389_s29 = smov 8  }
   0xe   : > { %444 = vst.msk [vmem:[#allocation2 + $0x3c] sm:$0xf] %vm427_vm0, %v5387_v0  ;;  %445 = vst.msk [vmem:[#allocation2 + $0x40] sm:$0xf] %vm427_vm0, %v5387_v0  ;;  %s5083_s20 = sshll.u32 %s7108_s19, 7  ;;  %s5390_s30 = smov 24  }
   0xf   : > { %447 = vst.msk [vmem:[#allocation2 + $0x48] sm:$0xf] %vm427_vm0, %v5387_v0  ;;  %448 = vst.msk [vmem:[#allocation2 + $0x4c] sm:$0xf] %vm427_vm0, %v5387_v0  ;;  %s5504_s23 = scalar_lea.vmem %s7005_s0, %s5083_s20  ;;  %v1697_v7 = vld [vmem:[#allocation2] sm:$0xe] }
  0x10   : > { %449 = vst.msk [vmem:[#allocation2 + $0x50] sm:$0x1] %vm7011_vm1, %v5387_v0  ;;  %452 = vst.msk [vmem:[#allocation2 + $0x5c] sm:$0x1] %vm7011_vm1, %v5387_v0  ;;  %v5213_v3 = vld [vmem:[%s5504_s23 + $0x8] sm:$0xff]   ;;  %v5150_v5 = vld [vmem:[%s5504_s23] sm:$0xff]  }
  0x11   : > { %450 = vst.msk [vmem:[#allocation2 + $0x54] sm:$0xf] %vm427_vm0, %v5387_v0  ;;  %451 = vst.msk [vmem:[#allocation2 + $0x58] sm:$0xf] %vm427_vm0, %v5387_v0  ;;  %v5214_v6 = vld [vmem:[%s5504_s23 + $0x10] sm:$0xff]   ;;  %v5155_v10 = vunpack.c.l.bf16 %v5213_v3  ;;  %v5156_v11 = vunpack.c.h.bf16 %v5213_v3  ;;  %v5151_v12 = vunpack.c.l.bf16 %v5150_v5  ;;  %v5152_v13 = vunpack.c.h.bf16 %v5150_v5  ;;  %v5215_v54 = vld [vmem:[%s5504_s23 + $0x18] sm:$0xff]  }
  0x12   : > { %453 = vst.msk [vmem:[#allocation2 + $0x60] sm:$0xf] %vm427_vm0, %v5387_v0  ;;  %454 = vst.msk [vmem:[#allocation2 + $0x64] sm:$0xf] %vm427_vm0, %v5387_v0  ;;  %v1698_v8 = vld [vmem:[#allocation2 + $0x4] sm:$0xf]  ;;  %v5159_v18 = vunpack.c.l.bf16 %v5214_v6  ;;  %v5160_v48 = vunpack.c.h.bf16 %v5214_v6 }
  0x13   : > { %455 = vst.msk [vmem:[#allocation2 + $0x68] sm:$0x1] %vm7011_vm1, %v5387_v0  ;;  %458 = vst.msk [vmem:[#allocation2 + $0x74] sm:$0x1] %vm7011_vm1, %v5387_v0  ;;  %v1699_v9 = vld [vmem:[#allocation2 + $0x8] sm:$0x1]  ;;  %v310_v23 = vmul.f32 %v5155_v10, %v5509_v2  ;;  %v311_v24 = vmul.f32 %v5156_v11, %v5509_v2  ;;  %v308_v44 = vmul.f32 %v5151_v12, %v5509_v2  ;;  %v5163_v11 = vunpack.c.l.bf16 %v5215_v54 }
  0x14   : > { %456 = vst.msk [vmem:[#allocation2 + $0x6c] sm:$0xf] %vm427_vm0, %v5387_v0  ;;  %457 = vst.msk [vmem:[#allocation2 + $0x70] sm:$0xf] %vm427_vm0, %v5387_v0  ;;  %v4868_v14 = vrot.slane %v1697_v7, 9  ;;  %v1798_v15 = vrot.slane %v1698_v8, 5  ;;  %v309_v45 = vmul.f32 %v5152_v13, %v5509_v2  ;;  %v312_v49 = vmul.f32 %v5159_v18, %v5509_v2 }
  0x15   : > { %459 = vst.msk [vmem:[#allocation2 + $0x78] sm:$0xf] %vm427_vm0, %v5387_v0  ;;  %460 = vst.msk [vmem:[#allocation2 + $0x7c] sm:$0xf] %vm427_vm0, %v5387_v0  ;;  %v1801_v16 = vrot.slane %v1699_v9, 5  ;;  %v349_v32 = vadd.f32 %v5515_v4, %v310_v23  ;;  %v350_v36 = vadd.f32 %v5515_v4, %v311_v24  ;;  %v347_v52 = vadd.f32 %v5515_v4, %v308_v44  ;;  %s5391_s6 = smov 48  }
  0x16   : > { %461 = vst.msk [vmem:[#allocation2 + $0x80] sm:$0x1] %vm7011_vm1, %v5387_v0  ;;  %464 = vst.msk [vmem:[#allocation2 + $0x8c] sm:$0x1] %vm7011_vm1, %v5387_v0  ;;  %v1149_v17 = vld [vmem:[#allocation2] sm:$0xf]  ;;  %v348_v53 = vadd.f32 %v5515_v4, %v309_v45  ;;  %v313_v58 = vmul.f32 %v5160_v48, %v5509_v2  ;;  %v351_v6 = vadd.f32 %v5515_v4, %v312_v49 }
  0x17   : > { %462 = vst.msk [vmem:[#allocation2 + $0x84] sm:$0xf] %vm427_vm0, %v5387_v0  ;;  %463 = vst.msk [vmem:[#allocation2 + $0x88] sm:$0xf] %vm427_vm0, %v5387_v0  ;;  %v1150_v19 = vld [vmem:[#allocation2 + $0x4] sm:$0xf] }
  0x18   : > { %465 = vst.msk [vmem:[#allocation2 + $0x90] sm:$0xf] %vm427_vm0, %v5387_v0  ;;  %466 = vst.msk [vmem:[#allocation2 + $0x94] sm:$0xf] %vm427_vm0, %v5387_v0  ;;  %v1151_v20 = vld [vmem:[#allocation2 + $0x8] sm:$0x1]  ;;  %v352_v10 = vadd.f32 %v5515_v4, %v313_v58 }
  0x19   : > { %467 = vst.msk [vmem:[#allocation2 + $0x98] sm:$0x1] %vm7011_vm1, %v5387_v0  ;;  %470 = vst.msk [vmem:[#allocation2 + $0xa4] sm:$0x1] %vm7011_vm1, %v5387_v0  ;;  %v1201_v21 = vshrl.u32 %v1149_v17, 16  ;;  %v1204_v22 = vshll.u32 %v1149_v17, 16 }
  0x1a   : > { %468 = vst.msk [vmem:[#allocation2 + $0x9c] sm:$0xf] %vm427_vm0, %v5387_v0  ;;  %469 = vst.msk [vmem:[#allocation2 + $0xa0] sm:$0xf] %vm427_vm0, %v5387_v0  ;;  %v1800_v26 = vrot.slane %v1798_v15, 4  ;;  %v1210_v27 = vshll.u32 %v1150_v19, 16 }
  0x1b   : > { %471 = vst.msk [vmem:[#allocation2 + $0xa8] sm:$0xf] %vm427_vm0, %v5387_v0  ;;  %472 = vst.msk [vmem:[#allocation2 + $0xac] sm:$0xf] %vm427_vm0, %v5387_v0  ;;  %v1214_v28 = vshrl.u32 %v1150_v19, 16  ;;  %v1203_v29 = vrot.slane %v1201_v21, 4 }
  0x1c   : > { %473 = vst.msk [vmem:[#allocation2 + $0xb0] sm:$0x1] %vm7011_vm1, %v5387_v0  ;;  %476 = vst.msk [vmem:[#allocation2 + $0xbc] sm:$0x1] %vm7011_vm1, %v5387_v0  ;;  %vm564_vm9 = vsmask.f32 4368 }
  0x1d   : > { %474 = vst.msk [vmem:[#allocation2 + $0xb4] sm:$0xf] %vm427_vm0, %v5387_v0  ;;  %475 = vst.msk [vmem:[#allocation2 + $0xb8] sm:$0xf] %vm427_vm0, %v5387_v0  ;;  %v1206_v30 = vrot.slane %v1204_v22, 5  ;;  %v1220_v31 = vshll.u32 %v1151_v20, 16 }
  0x1e   : > { %477 = vst.msk [vmem:[#allocation2 + $0xc0] sm:$0xf] %vm427_vm0, %v5387_v0  ;;  %478 = vst.msk [vmem:[#allocation2 + $0xc4] sm:$0xf] %vm427_vm0, %v5387_v0  ;;  %v1212_v34 = vrot.slane %v1210_v27, 5  ;;  %v1216_v35 = vrot.slane %v1214_v28, 4 }
  0x1f   : > { %479 = vst.msk [vmem:[#allocation2 + $0xc8] sm:$0x1] %vm7011_vm1, %v5387_v0  ;;  %482 = vst.msk [vmem:[#allocation2 + $0xd4] sm:$0x1] %vm7011_vm1, %v5387_v0  ;;  %v1207_v38 = vor.u32 %v1206_v30, %v1203_v29  ;;  %v1222_v39 = vrot.slane %v1220_v31, 5  ;;  %v381_v40 = vmax.f32 %v349_v32, 0.0  ;;  %v5164_v30 = vunpack.c.h.bf16 %v5215_v54 }
  0x20   : > { %480 = vst.msk [vmem:[#allocation2 + $0xcc] sm:$0xf] %vm427_vm0, %v5387_v0  ;;  %481 = vst.msk [vmem:[#allocation2 + $0xd0] sm:$0xf] %vm427_vm0, %v5387_v0  ;;  %v1217_v42 = vor.u32 %v1216_v35, %v1212_v34  ;;  %v382_v43 = vmax.f32 %v350_v36, 0.0  ;;  %v379_v62 = vmax.f32 %v347_v52, 0.0 }
  0x21   : > { %vm5494_vm5 = vmor %vm1793_vm2, %vm1794_vm3  ;;  %v1208_v46 = vrot.slane %v1207_v38, 4  ;;  %v5087_v47 = vpack.c.bf16 %v381_v40, %v381_v40  ;;  %v899_v3 = vld [vmem:[#allocation2 + $0x18] sm:$0xf]  ;;  %v380_v5 = vmax.f32 %v348_v53, 0.0  ;;  %v903_v21 = vld [vmem:[#allocation2 + $0x20] sm:$0x1]  ;;  %v315_v49 = vmul.f32 %v5164_v30, %v5509_v2 }
  0x22   : > { %v1799_v25 = vsel %vm5494_vm5, %v4868_v14, %v1798_v15  ;;  %v1802_v33 = vsel %vm5494_vm5, %v1800_v26, %v1801_v16  ;;  %vm5529_vm10 = vmor %vm1197_vm4, %vm1198_vm6  ;;  %v1218_v50 = vrot.slane %v1217_v42, 4  ;;  %v5088_v51 = vpack.c.bf16 %v382_v43, %v382_v43  ;;  %v890_v32 = vld [vmem:[#allocation2 + $0xc] sm:$0xf]  ;;  %v896_v40 = vld [vmem:[#allocation2 + $0x14] sm:$0x1]  ;;  %s5392_s7 = smov 40  }
  0x23   : > { %v4884_v37 = vcombine.low %v1799_v25, %v1802_v33  ;;  %v1213_v55 = vsel %vm5529_vm10, %v1208_v46, %v1212_v34  ;;  %v584_v56 = vshrl.u32 %v5087_v47, 16  ;;  %v587_v57 = vshll.u32 %v5087_v47, 16  ;;  %vm5548_vm11 = vmand %vm427_vm0, %vm888_vm7  ;;  %v5216_v42 = vld [vmem:[%s5504_s23 + $0x20] sm:$0xff]   ;;  %s5393_s8 = smov 64   ;;  %s5394_s9 = smov 32  }
  0x24   : > { %v1223_v59 = vsel %vm5529_vm10, %v1218_v50, %v1222_v39  ;;  %v592_v60 = vshrl.u32 %v5088_v51, 16  ;;  %v595_v61 = vshll.u32 %v5088_v51, 16  ;;  %v5085_v9 = vpack.c.bf16 %v379_v62, %v379_v62  ;;  %vm5556_vm12 = vmor %vm563_vm8, %vm564_vm9  ;;  %v906_v53 = vld [vmem:[#allocation2 + $0x24] sm:$0xf]  ;;  %s5395_s10 = smov 56  }
  0x25   : > { %1956 = vrot.lane.b32.xlu1 %v4884_v37, %s5388_s28  ;;  %v4852_v63 = vcombine.low %v1213_v55, %v1223_v59  ;;  %v586_v0 = vrot.slane %v584_v56, 7  ;;  %v5086_v15 = vpack.c.bf16 %v380_v5, %v380_v5  ;;  %v383_v16 = vmax.f32 %v351_v6, 0.0  ;;  %vm5566_vm13 = vmand %vm7011_vm1, %vm563_vm8 }
  0x26   : > { %v594_v7 = vrot.slane %v592_v60, 7  ;;  %v567_v19 = vshrl.u32 %v5085_v9, 16  ;;  %v570_v20 = vshll.u32 %v5085_v9, 16  ;;  %v384_v25 = vmax.f32 %v352_v10, 0.0  ;;  %v910_v60 = vld [vmem:[#allocation2 + $0x2c] sm:$0x1] }
  0x27   : > { %1632 = vrot.lane.b32.xlu0 %v4852_v63, %s5389_s29  ;;  %v589_v13 = vor.u32 %v587_v57, %v586_v0  ;;  %v590_v14 = vrot.slane %v586_v0, 4  ;;  %v575_v23 = vshrl.u32 %v5086_v15, 16  ;;  %v578_v24 = vshll.u32 %v5086_v15, 16 }
  0x28   : > { %v597_v17 = vor.u32 %v595_v61, %v594_v7  ;;  %v599_v18 = vrot.slane %v594_v7, 4  ;;  %v569_v28 = vrot.slane %v567_v19, 7  ;;  %v5089_v29 = vpack.c.bf16 %v383_v16, %v383_v16  ;;  %v5217_v61 = vld [vmem:[%s5504_s23 + $0x28] sm:$0xff]  }
  0x29   : > { %v900_v22 = vsel %vm5548_vm11, %v589_v13, %v899_v3  ;;  %v577_v31 = vrot.slane %v575_v23, 7  ;;  %v5090_v33 = vpack.c.bf16 %v384_v25, %v384_v25  ;;  %v314_v34 = vmul.f32 %v5163_v11, %v5509_v2 }
  0x2a   : > { %v598_v26 = vsel %vm5556_vm12, %v590_v14, %v597_v17  ;;  %901 = vst [vmem:[#allocation2 + $0x18] sm:$0xf] %v900_v22  ;;  %v904_v35 = vsel %vm5566_vm13, %v599_v18, %v903_v21  ;;  %v572_v36 = vor.u32 %v570_v20, %v569_v28  ;;  %v573_v37 = vrot.slane %v569_v28, 4  ;;  %v913_v22 = vld [vmem:[#allocation2 + $0x30] sm:$0xf] }
  0x2b   : > { %902 = vst.msk [vmem:[#allocation2 + $0x1c] sm:$0xf] %vm427_vm0, %v598_v26  ;;  %v601_v38 = vshrl.u32 %v5089_v29, 16  ;;  %v604_v39 = vshll.u32 %v5089_v29, 16  ;;  %905 = vst [vmem:[#allocation2 + $0x20] sm:$0x1] %v904_v35  ;;  %v580_v43 = vor.u32 %v578_v24, %v577_v31  ;;  %v353_v50 = vadd.f32 %v5515_v4, %v314_v34 }
  0x2c   : > { %v582_v44 = vrot.slane %v577_v31, 4  ;;  %v609_v45 = vshrl.u32 %v5090_v33, 16  ;;  %v612_v46 = vshll.u32 %v5090_v33, 16  ;;  %v891_v47 = vsel %vm5548_vm11, %v572_v36, %v890_v32  ;;  %v5600_v33 = vld [vmem:[%s5504_s23 + $0x30] sm:$0xff]  }
  0x2d   : > { %v603_v48 = vrot.slane %v601_v38, 7  ;;  %v581_v51 = vsel %vm5556_vm12, %v573_v37, %v580_v43  ;;  %892 = vst [vmem:[#allocation2 + $0xc] sm:$0xf] %v891_v47  ;;  %v5167_v55 = vunpack.c.l.bf16 %v5216_v42  ;;  %v354_v58 = vadd.f32 %v5515_v4, %v315_v49 }
  0x2e   : > { %v611_v52 = vrot.slane %v609_v45, 7  ;;  %v897_v54 = vsel %vm5566_vm13, %v582_v44, %v896_v40  ;;  %893 = vst.msk [vmem:[#allocation2 + $0x10] sm:$0xf] %vm427_vm0, %v581_v51  ;;  %v385_v59 = vmax.f32 %v353_v50, 0.0  ;;  %v5168_v0 = vunpack.c.h.bf16 %v5216_v42 }
  0x2f   : > { %v606_v56 = vor.u32 %v604_v39, %v603_v48  ;;  %v607_v57 = vrot.slane %v603_v48, 4  ;;  %898 = vst [vmem:[#allocation2 + $0x14] sm:$0x1] %v897_v54  ;;  %v316_v3 = vmul.f32 %v5167_v55, %v5509_v2  ;;  %v386_v7 = vmax.f32 %v354_v58, 0.0  ;;  %v917_v39 = vld [vmem:[#allocation2 + $0x38] sm:$0x1] }
  0x30   : > { %v614_v62 = vor.u32 %v612_v46, %v611_v52  ;;  %v616_v63 = vrot.slane %v611_v52, 4  ;;  %v5091_v9 = vpack.c.bf16 %v385_v59, %v385_v59  ;;  %v317_v15 = vmul.f32 %v5168_v0, %v5509_v2 }
  0x31   : > { %v907_v6 = vsel %vm5548_vm11, %v606_v56, %v906_v53  ;;  %v3787_v11 = vld [vmem:[#allocation2 + $0x18] sm:$0xe]  ;;  %v5171_v16 = vunpack.c.l.bf16 %v5217_v61  ;;  %v5092_v17 = vpack.c.bf16 %v386_v7, %v386_v7  ;;  %v5597_v26 = vadd.f32 %v5515_v4, %v316_v3 }
  0x32   : > { %v5320_v5 = vld [vmem:[#allocation2 + $0x18] sm:$0xff]   ;;  %v615_v10 = vsel %vm5556_vm12, %v607_v57, %v614_v62  ;;  %908 = vst [vmem:[#allocation2 + $0x24] sm:$0xf] %v907_v6  ;;  %v911_v14 = vsel %vm5566_vm13, %v616_v63, %v910_v60  ;;  %v618_v18 = vshrl.u32 %v5091_v9, 16  ;;  %v621_v19 = vshll.u32 %v5091_v9, 16 }
  0x33   : > { %v3788_v13 = vld [vmem:[#allocation2 + $0x1c] sm:$0xf]  ;;  %2135 = vrot.lane.b32.xlu1 %v5320_v5, %s5390_s30  ;;  %909 = vst.msk [vmem:[#allocation2 + $0x28] sm:$0xf] %vm427_vm0, %v615_v10  ;;  %v3789_v20 = vld [vmem:[#allocation2 + $0x20] sm:$0x1]  ;;  %v5172_v28 = vunpack.c.h.bf16 %v5217_v61  ;;  %v5607_v40 = vadd.f32 %v5515_v4, %v317_v15  ;;  %v318_v42 = vmul.f32 %v5171_v16, %v5509_v2  ;;  %v5175_v63 = vunpack.c.l.bf16 %v5600_v33 }
  0x34   : > { %v4996_v21 = vrot.slane %v3787_v11, 9  ;;  %912 = vst [vmem:[#allocation2 + $0x2c] sm:$0x1] %v911_v14  ;;  %v3885_v23 = vrot.slane %v3788_v13, 5  ;;  %v3888_v24 = vrot.slane %v3789_v20, 5  ;;  %v620_v29 = vrot.slane %v618_v18, 7 }
  0x35   : > { %v2746_v25 = vld [vmem:[#allocation2 + $0x18] sm:$0xe]  ;;  %v626_v30 = vshrl.u32 %v5092_v17, 16  ;;  %v629_v31 = vshll.u32 %v5092_v17, 16  ;;  %v5321_v34 = vld [vmem:[#allocation2 + $0xc] sm:$0xff]   ;;  %v319_v48 = vmul.f32 %v5172_v28, %v5509_v2  ;;  %v5630_v10 = vadd.f32 %v5515_v4, %v318_v42 }
  0x36   : > { %v4933_v32 = vrot.slane %v2746_v25, 9  ;;  %v2743_v35 = vld [vmem:[#allocation2 + $0xc] sm:$0xe]  ;;  %v5604_v36 = vsel %vm5494_vm5, %v4996_v21, %v3885_v23  ;;  %v3887_v37 = vrot.slane %v3885_v23, 4  ;;  %v2747_v38 = vld [vmem:[#allocation2 + $0x1c] sm:$0xf]  ;;  %v623_v43 = vor.u32 %v621_v19, %v620_v29  ;;  %2133 = vrot.lane.b32.xlu0 %v5321_v34, %s5390_s30 }
  0x37   : > { %v624_v44 = vrot.slane %v620_v29, 4  ;;  %v628_v45 = vrot.slane %v626_v30, 7  ;;  %v2744_v46 = vld [vmem:[#allocation2 + $0x10] sm:$0xf]  ;;  %v2745_v47 = vld [vmem:[#allocation2 + $0x14] sm:$0x1]  ;;  %v5638_v17 = vadd.f32 %v5515_v4, %v319_v48  ;;  %v5176_v23 = vunpack.c.h.bf16 %v5600_v33 }
  0x38   : > { %v5323_v49 = vld [vmem:[#allocation2 + $0x18] sm:$0xff]   ;;  %v4932_v50 = vrot.slane %v2743_v35, 9  ;;  %v2841_v51 = vrot.slane %v2744_v46, 5  ;;  %v2844_v52 = vrot.slane %v2745_v47, 5  ;;  %v1700_v53 = vld [vmem:[#allocation2 + $0xc] sm:$0xe]  ;;  %v5614_v54 = vsel %vm5494_vm5, %v3887_v37, %v3888_v24 }
  0x39   : > { %v631_v55 = vor.u32 %v629_v31, %v628_v45  ;;  %v633_v56 = vrot.slane %v628_v45, 4  ;;  %v914_v57 = vsel %vm5548_vm11, %v623_v43, %v913_v22  ;;  %v4869_v58 = vrot.slane %v1700_v53, 9  ;;  %v1701_v5 = vld [vmem:[#allocation2 + $0x10] sm:$0xf]  ;;  %v1702_v6 = vld [vmem:[#allocation2 + $0x14] sm:$0x1] }
  0x3a   : > { %v5322_v59 = vld [vmem:[#allocation2 + $0x24] sm:$0xff]   ;;  %915 = vst [vmem:[#allocation2 + $0x30] sm:$0xf] %v914_v57  ;;  %v5620_v60 = vsel %vm5494_vm5, %v4932_v50, %v2841_v51  ;;  %v2843_v61 = vrot.slane %v2841_v51, 4  ;;  %v5012_v62 = vcombine.low %v5604_v36, %v5614_v54  ;;  %v2848_v7 = vrot.slane %v2747_v38, 5  ;;  %3177 = vrot.lane.b32.xlu0 %v5323_v49, %s5391_s6 }
  0x3b   : > { %v632_v0 = vsel %vm5556_vm12, %v624_v44, %v631_v55  ;;  %v5325_v3 = vld [vmem:[#allocation2 + $0x24] sm:$0xff]   ;;  %v918_v9 = vsel %vm5566_vm13, %v633_v56, %v917_v39  ;;  %3179 = vrot.lane.b32.xlu1 %v5322_v59, %s5391_s6  ;;  %v1805_v13 = vrot.slane %v1701_v5, 5  ;;  %v1808_v14 = vrot.slane %v1702_v6, 5  ;;  %v2748_v15 = vld [vmem:[#allocation2 + $0x20] sm:$0x1] }
  0x3c   : > { %916 = vst.msk [vmem:[#allocation2 + $0x34] sm:$0xf] %vm427_vm0, %v632_v0  ;;  %v2845_v11 = vsel %vm5494_vm5, %v2843_v61, %v2844_v52  ;;  %v3790_v16 = vld [vmem:[#allocation2 + $0x24] sm:$0xe]  ;;  %919 = vst [vmem:[#allocation2 + $0x38] sm:$0x1] %v918_v9  ;;  %v5642_v18 = vsel %vm5494_vm5, %v4933_v32, %v2848_v7  ;;  %v5662_v44 = vmul.f32 %v5175_v63, %v5509_v2 }
  0x3d   : > { %v2850_v19 = vrot.slane %v2848_v7, 4  ;;  %v2851_v20 = vrot.slane %v2748_v15, 5  ;;  %v3791_v21 = vld [vmem:[#allocation2 + $0x28] sm:$0xf]  ;;  %v3792_v22 = vld [vmem:[#allocation2 + $0x2c] sm:$0x1]  ;;  %v5647_v24 = vsel %vm5494_vm5, %v4869_v58, %v1805_v13  ;;  %v4948_v4 = vcombine.low %v5620_v60, %v2845_v11 }
  0x3e   : > { %v1807_v25 = vrot.slane %v1805_v13, 4  ;;  %v4997_v28 = vrot.slane %v3790_v16, 9  ;;  %v3892_v29 = vrot.slane %v3791_v21, 5  ;;  %v1706_v30 = vld [vmem:[#allocation2 + $0x24] sm:$0xe]  ;;  %v3895_v32 = vrot.slane %v3792_v22, 5  ;;  %2137 = vrot.lane.b32.xlu0 %v5325_v3, %s5390_s30 }
  0x3f   : > { %v5652_v31 = vsel %vm5494_vm5, %v2850_v19, %v2851_v20  ;;  %v1707_v34 = vld [vmem:[#allocation2 + $0x28] sm:$0xf]  ;;  %v1708_v35 = vld [vmem:[#allocation2 + $0x2c] sm:$0x1]  ;;  %v4871_v37 = vrot.slane %v1706_v30, 9  ;;  %v5675_v61 = vmul.f32 %v5176_v23, %v5509_v2  ;;  %vm7012_vm14 = vcmask 64512  }
  0x40   : > { %v1809_v33 = vsel %vm5494_vm5, %v1807_v25, %v1808_v14  ;;  %v5659_v38 = vsel %vm5494_vm5, %v4997_v28, %v3892_v29  ;;  %v3894_v39 = vrot.slane %v3892_v29, 4  ;;  %v1703_v42 = vld [vmem:[#allocation2 + $0x18] sm:$0xe]  ;;  %v1704_v43 = vld [vmem:[#allocation2 + $0x1c] sm:$0xf]  ;;  %v4949_v46 = vcombine.low %v5642_v18, %v5652_v31 }
  0x41   : > { %v4885_v45 = vcombine.low %v5647_v24, %v1809_v33  ;;  %v1819_v47 = vrot.slane %v1707_v34, 5  ;;  %v1822_v48 = vrot.slane %v1708_v35, 5  ;;  %v1705_v49 = vld [vmem:[#allocation2 + $0x20] sm:$0x1]  ;;  %v4870_v51 = vrot.slane %v1703_v42, 9 }
  0x42   : > { %v3896_v50 = vsel %vm5494_vm5, %v3894_v39, %v3895_v32  ;;  %v1812_v52 = vrot.slane %v1704_v43, 5  ;;  %v1815_v53 = vrot.slane %v1705_v49, 5  ;;  %v2201_v55 = vld [vmem:[#allocation2 + $0x18] sm:$0xf]  ;;  %v2202_v60 = vld [vmem:[#allocation2 + $0x1c] sm:$0xf]  ;;  %2999 = vrot.lane.b32.xlu0 %v4948_v4, %s5392_s7 }
  0x43   : > { %v5324_v56 = vld [vmem:[#allocation2 + $0x30] sm:$0xff]   ;;  %v5013_v57 = vcombine.low %v5659_v38, %v3896_v50  ;;  %v5672_v58 = vsel %vm5494_vm5, %v4871_v37, %v1819_v47  ;;  %v1821_v59 = vrot.slane %v1819_v47, 4  ;;  %v2203_v3 = vld [vmem:[#allocation2 + $0x20] sm:$0x1]  ;;  %v2271_v5 = vshrl.u32 %v2201_v55, 16 }
  0x44   : > { %v5680_v63 = vsel %vm5494_vm5, %v4870_v51, %v1812_v52  ;;  %v1814_v0 = vrot.slane %v1812_v52, 4  ;;  %v2274_v6 = vshll.u32 %v2201_v55, 16  ;;  %2139 = vrot.lane.b32.xlu1 %v5324_v56, %s5390_s30  ;;  %v2280_v9 = vshll.u32 %v2202_v60, 16  ;;  %v3245_v13 = vld [vmem:[#allocation2 + $0x24] sm:$0xf] }
  0x45   : > { %v5685_v7 = vsel %vm5494_vm5, %v1821_v59, %v1822_v48  ;;  %v2284_v2 = vshrl.u32 %v2202_v60, 16  ;;  %v2290_v11 = vshll.u32 %v2203_v3, 16  ;;  %v2273_v16 = vrot.slane %v2271_v5, 4  ;;  %v3246_v20 = vld [vmem:[#allocation2 + $0x28] sm:$0xf] }
  0x46   : > { %v4887_v14 = vcombine.low %v5672_v58, %v5685_v7  ;;  %v1816_v15 = vsel %vm5494_vm5, %v1814_v0, %v1815_v53  ;;  %v2276_v19 = vrot.slane %v2274_v6, 5  ;;  %v3247_v21 = vld [vmem:[#allocation2 + $0x2c] sm:$0x1]  ;;  %v2282_v23 = vrot.slane %v2280_v9, 5  ;;  %4043 = vrot.lane.b32.xlu0 %v5012_v62, %s5393_s8  ;;  %v1153_v33 = vld [vmem:[#allocation2 + $0x10] sm:$0xf] }
  0x47   : > { %v4886_v22 = vcombine.low %v5680_v63, %v1816_v15  ;;  %v2286_v24 = vrot.slane %v2284_v2, 4  ;;  %v2292_v25 = vrot.slane %v2290_v11, 5  ;;  %v1152_v28 = vld [vmem:[#allocation2 + $0xc] sm:$0xf]  ;;  %v3315_v30 = vshrl.u32 %v3245_v13, 16 }
  0x48   : > { %v2277_v29 = vor.u32 %v2276_v19, %v2273_v16  ;;  %v3318_v4 = vshll.u32 %v3245_v13, 16  ;;  %v3324_v32 = vshll.u32 %v3246_v20, 16  ;;  %1958 = vrot.lane.b32.xlu1 %v4885_v45, %s5388_s28  ;;  %v3328_v35 = vshrl.u32 %v3246_v20, 16  ;;  %v1154_v48 = vld [vmem:[#allocation2 + $0x14] sm:$0x1] }
  0x49   : > { %v2287_v34 = vor.u32 %v2286_v24, %v2282_v23  ;;  %v3334_v37 = vshll.u32 %v3247_v21, 16  ;;  %v1225_v38 = vshrl.u32 %v1152_v28, 16  ;;  %v3317_v42 = vrot.slane %v3315_v30, 4  ;;  %v1155_v53 = vld [vmem:[#allocation2 + $0x18] sm:$0xf] }
  0x4a   : > { %v2278_v39 = vrot.slane %v2277_v29, 4  ;;  %v3320_v43 = vrot.slane %v3318_v4, 5  ;;  %v3326_v47 = vrot.slane %v3324_v32, 5  ;;  %v3330_v50 = vrot.slane %v3328_v35, 4  ;;  %4045 = vrot.lane.b32.xlu0 %v5013_v57, %s5393_s8  ;;  %v1156_v60 = vld [vmem:[#allocation2 + $0x1c] sm:$0xf] }
  0x4b   : > { %v2288_v49 = vrot.slane %v2287_v34, 4  ;;  %v3336_v36 = vrot.slane %v3334_v37, 5  ;;  %v1227_v54 = vrot.slane %v1225_v38, 4  ;;  %v1228_v51 = vshll.u32 %v1152_v28, 16  ;;  %v2198_v13 = vld [vmem:[#allocation2 + $0xc] sm:$0xf] }
  0x4c   : > { %v2283_v62 = vsel %vm5529_vm10, %v2278_v39, %v2282_v23  ;;  %v3321_v45 = vor.u32 %v3320_v43, %v3317_v42  ;;  %v1234_v52 = vshll.u32 %v1153_v33, 16  ;;  %3001 = vrot.lane.b32.xlu1 %v4949_v46, %s5392_s7  ;;  %v3331_v56 = vor.u32 %v3330_v50, %v3326_v47  ;;  %v1157_v46 = vld [vmem:[#allocation2 + $0x20] sm:$0x1]  ;;  %v2199_v21 = vld [vmem:[#allocation2 + $0x10] sm:$0xf] }
  0x4d   : > { %v2293_v55 = vsel %vm5529_vm10, %v2288_v49, %v2292_v25  ;;  %v1238_v58 = vshrl.u32 %v1153_v33, 16  ;;  %v1244_v59 = vshll.u32 %v1154_v48, 16  ;;  %v1230_v0 = vrot.slane %v1228_v51, 5  ;;  %v1158_v33 = vld [vmem:[#allocation2 + $0x24] sm:$0xf] }
  0x4e   : > { %v4917_v57 = vcombine.low %v2283_v62, %v2293_v55  ;;  %v3322_v63 = vrot.slane %v3321_v45, 4  ;;  %v1236_v3 = vrot.slane %v1234_v52, 5  ;;  %v3332_v5 = vrot.slane %v3331_v56, 4  ;;  %1960 = vrot.lane.b32.xlu0 %v4886_v22, %s5388_s28  ;;  %v1160_v55 = vld [vmem:[#allocation2 + $0x2c] sm:$0x1] }
  0x4f   : > { %v1240_v6 = vrot.slane %v1238_v58, 4  ;;  %v1246_v7 = vrot.slane %v1244_v59, 5  ;;  %v1249_v9 = vshrl.u32 %v1155_v53, 16  ;;  %v1231_v31 = vor.u32 %v1230_v0, %v1227_v54  ;;  %v3242_v59 = vld [vmem:[#allocation2 + $0x18] sm:$0xf] }
  0x50   : > { %v3327_v18 = vsel %vm5529_vm10, %v3322_v63, %v3326_v47  ;;  %v1252_v2 = vshll.u32 %v1155_v53, 16  ;;  %v1258_v11 = vshll.u32 %v1156_v60, 16  ;;  %1962 = vrot.lane.b32.xlu1 %v4887_v14, %s5388_s28  ;;  %v3337_v15 = vsel %vm5529_vm10, %v3332_v5, %v3336_v36  ;;  %v2200_v14 = vld [vmem:[#allocation2 + $0x14] sm:$0x1]  ;;  %v1159_v47 = vld [vmem:[#allocation2 + $0x28] sm:$0xf] }
  0x51   : > { %v1241_v16 = vor.u32 %v1240_v6, %v1236_v3  ;;  %v1251_v19 = vrot.slane %v1249_v9, 4  ;;  %v1262_v20 = vshrl.u32 %v1156_v60, 16  ;;  %v4981_v23 = vcombine.low %v3327_v18, %v3337_v15  ;;  %v3244_v18 = vld [vmem:[#allocation2 + $0x20] sm:$0x1] }
  0x52   : > { %v1232_v24 = vrot.slane %v1231_v31, 4  ;;  %v1254_v22 = vrot.slane %v1252_v2, 5  ;;  %v1260_v25 = vrot.slane %v1258_v11, 5  ;;  %v1268_v30 = vshll.u32 %v1157_v46, 16 }
  0x53   : > { %v1242_v28 = vrot.slane %v1241_v16, 4  ;;  %v1264_v29 = vrot.slane %v1262_v20, 4  ;;  %v2247_v4 = vshrl.u32 %v2198_v13, 16  ;;  %v2250_v35 = vshll.u32 %v2198_v13, 16  ;;  %v2204_v20 = vld [vmem:[#allocation2 + $0x24] sm:$0xf] }
  0x54   : > { %v1237_v32 = vsel %vm5529_vm10, %v1232_v24, %v1236_v3  ;;  %v1255_v34 = vor.u32 %v1254_v22, %v1251_v19  ;;  %v2256_v37 = vshll.u32 %v2199_v21, 16  ;;  %2680 = vrot.lane.b32.xlu1 %v4917_v57, %s5394_s9  ;;  %v1270_v42 = vrot.slane %v1268_v30, 5  ;;  %v3243_v3 = vld [vmem:[#allocation2 + $0x1c] sm:$0xf] }
  0x55   : > { %v1247_v38 = vsel %vm5529_vm10, %v1242_v28, %v1246_v7  ;;  %v1265_v39 = vor.u32 %v1264_v29, %v1260_v25  ;;  %v2249_v43 = vrot.slane %v2247_v4, 4  ;;  %v2252_v50 = vrot.slane %v2250_v35, 5 }
  0x56   : > { %v4853_v48 = vcombine.low %v1237_v32, %v1247_v38  ;;  %v1256_v49 = vrot.slane %v1255_v34, 4  ;;  %v2258_v36 = vrot.slane %v2256_v37, 5  ;;  %v2260_v62 = vshrl.u32 %v2199_v21, 16 }
  0x57   : > { %v1266_v54 = vrot.slane %v1265_v39, 4  ;;  %v2266_v45 = vshll.u32 %v2200_v14, 16  ;;  %v1273_v51 = vshrl.u32 %v1158_v33, 16  ;;  %v2253_v53 = vor.u32 %v2252_v50, %v2249_v43  ;;  %v2205_v14 = vld [vmem:[#allocation2 + $0x28] sm:$0xf] }
  0x58   : > { %1634 = vrot.lane.b32.xlu0 %v4853_v48, %s5389_s29  ;;  %v1261_v52 = vsel %vm5529_vm10, %v1256_v49, %v1260_v25  ;;  %v1276_v56 = vshll.u32 %v1158_v33, 16  ;;  %v1282_v58 = vshll.u32 %v1159_v47, 16  ;;  %3724 = vrot.lane.b32.xlu1 %v4981_v23, %s5395_s10  ;;  %v2262_v57 = vrot.slane %v2260_v62, 4  ;;  %v2207_v43 = vld [vmem:[#allocation2 + $0x30] sm:$0xf] }
  0x59   : > { %v1271_v60 = vsel %vm5529_vm10, %v1266_v54, %v1270_v42  ;;  %v2268_v63 = vrot.slane %v2266_v45, 5  ;;  %v1275_v0 = vrot.slane %v1273_v51, 4  ;;  %v2254_v6 = vrot.slane %v2253_v53, 4  ;;  %v2206_v42 = vld [vmem:[#allocation2 + $0x2c] sm:$0x1] }
  0x5a   : > { %v4854_v5 = vcombine.low %v1261_v52, %v1271_v60  ;;  %v1278_v7 = vrot.slane %v1276_v56, 5  ;;  %v1284_v9 = vrot.slane %v1282_v58, 5  ;;  %v2263_v31 = vor.u32 %v2262_v57, %v2258_v36  ;;  %v2208_v51 = vld [vmem:[#allocation2 + $0x34] sm:$0xf]  ;;  %v2209_v56 = vld [vmem:[#allocation2 + $0x38] sm:$0x1] }
  0x5b   : > { %v1286_v46 = vshrl.u32 %v1159_v47, 16  ;;  %v1292_v2 = vshll.u32 %v1160_v55, 16  ;;  %v3291_v11 = vshrl.u32 %v3242_v59, 16  ;;  %v2259_v13 = vsel %vm5529_vm10, %v2254_v6, %v2258_v36 }
  0x5c   : > { %v1279_v15 = vor.u32 %v1278_v7, %v1275_v0  ;;  %v3294_v16 = vshll.u32 %v3242_v59, 16  ;;  %v3300_v19 = vshll.u32 %v3243_v3, 16  ;;  %1636 = vrot.lane.b32.xlu1 %v4854_v5, %s5389_s29  ;;  %v2264_v21 = vrot.slane %v2263_v31, 4  ;;  %v2749_v0 = vld [vmem:[#allocation2 + $0x24] sm:$0xe] }
  0x5d   : > { %v1288_v23 = vrot.slane %v1286_v46, 4  ;;  %v1294_v24 = vrot.slane %v1292_v2, 5  ;;  %v3293_v22 = vrot.slane %v3291_v11, 4  ;;  %v3304_v30 = vshrl.u32 %v3243_v3, 16  ;;  %v2750_v3 = vld [vmem:[#allocation2 + $0x28] sm:$0xf] }
  0x5e   : > { %v1280_v25 = vrot.slane %v1279_v15, 4  ;;  %v3296_v28 = vrot.slane %v3294_v16, 5  ;;  %v3302_v29 = vrot.slane %v3300_v19, 5  ;;  %v2269_v4 = vsel %vm5529_vm10, %v2264_v21, %v2268_v63  ;;  %v2753_v21 = vld [vmem:[#allocation2 + $0x34] sm:$0xf] }
  0x5f   : > { %v1289_v32 = vor.u32 %v1288_v23, %v1284_v9  ;;  %v3310_v34 = vshll.u32 %v3244_v18, 16  ;;  %v2295_v35 = vshrl.u32 %v2204_v20, 16  ;;  %v4916_v37 = vcombine.low %v2259_v13, %v2269_v4  ;;  %v2751_v18 = vld [vmem:[#allocation2 + $0x2c] sm:$0x1]  ;;  %v2752_v13 = vld [vmem:[#allocation2 + $0x30] sm:$0xe] }
  0x60   : > { %v1285_v33 = vsel %vm5529_vm10, %v1280_v25, %v1284_v9  ;;  %v3297_v38 = vor.u32 %v3296_v28, %v3293_v22  ;;  %v3306_v39 = vrot.slane %v3304_v30, 4  ;;  %v2298_v50 = vshll.u32 %v2204_v20, 16  ;;  %v2754_v23 = vld [vmem:[#allocation2 + $0x38] sm:$0x1] }
  0x61   : > { %v1290_v47 = vrot.slane %v1289_v32, 4  ;;  %v3312_v48 = vrot.slane %v3310_v34, 5  ;;  %v2297_v49 = vrot.slane %v2295_v35, 4  ;;  %2678 = vrot.lane.b32.xlu0 %v4916_v37, %s5394_s9  ;;  %v2304_v62 = vshll.u32 %v2205_v14, 16 }
  0x62   : > { %v3298_v36 = vrot.slane %v3297_v38, 4  ;;  %v3307_v54 = vor.u32 %v3306_v39, %v3302_v29  ;;  %v2308_v45 = vshrl.u32 %v2205_v14, 16  ;;  %v2300_v53 = vrot.slane %v2298_v50, 5 }
  0x63   : > { %v1295_v52 = vsel %vm5529_vm10, %v1290_v47, %v1294_v24  ;;  %v2314_v55 = vshll.u32 %v2206_v42, 16  ;;  %v2319_v58 = vshrl.u32 %v2207_v43, 16  ;;  %v2306_v63 = vrot.slane %v2304_v62, 5 }
  0x64   : > { %v4855_v59 = vcombine.low %v1285_v33, %v1295_v52  ;;  %v3303_v60 = vsel %vm5529_vm10, %v3298_v36, %v3302_v29  ;;  %v3308_v57 = vrot.slane %v3307_v54, 4  ;;  %v2301_v5 = vor.u32 %v2300_v53, %v2297_v49  ;;  %v3248_v33 = vld [vmem:[#allocation2 + $0x30] sm:$0xf] }
  0x65   : > { %v2310_v6 = vrot.slane %v2308_v45, 4  ;;  %v2316_v7 = vrot.slane %v2314_v55, 5  ;;  %v2321_v9 = vrot.slane %v2319_v58, 4  ;;  %v2322_v46 = vshll.u32 %v2207_v43, 16 }
  0x66   : > { %1638 = vrot.lane.b32.xlu1 %v4855_v59, %s5389_s29  ;;  %v3313_v31 = vsel %vm5529_vm10, %v3308_v57, %v3312_v48  ;;  %v2328_v2 = vshll.u32 %v2208_v51, 16  ;;  %v2332_v11 = vshrl.u32 %v2208_v51, 16  ;;  %v2302_v16 = vrot.slane %v2301_v5, 4  ;;  %v3249_v51 = vld [vmem:[#allocation2 + $0x34] sm:$0xf] }
  0x67   : > { %v4980_v15 = vcombine.low %v3303_v60, %v3313_v31  ;;  %v2311_v19 = vor.u32 %v2310_v6, %v2306_v63  ;;  %v2338_v20 = vshll.u32 %v2209_v56, 16  ;;  %v2324_v24 = vrot.slane %v2322_v46, 5  ;;  %v3250_v57 = vld [vmem:[#allocation2 + $0x38] sm:$0x1]  ;;  %v3793_v6 = vld [vmem:[#allocation2 + $0x30] sm:$0xe] }
  0x68   : > { %v2330_v22 = vrot.slane %v2328_v2, 5  ;;  %v2334_v25 = vrot.slane %v2332_v11, 4  ;;  %v4934_v28 = vrot.slane %v2749_v0, 9  ;;  %v2307_v29 = vsel %vm5529_vm10, %v2302_v16, %v2306_v63  ;;  %v5326_v2 = vld [vmem:[#allocation2 + $0x30] sm:$0xff]  }
  0x69   : > { %3722 = vrot.lane.b32.xlu0 %v4980_v15, %s5395_s10  ;;  %v2312_v30 = vrot.slane %v2311_v19, 4  ;;  %v2340_v4 = vrot.slane %v2338_v20, 5  ;;  %v2855_v32 = vrot.slane %v2750_v3, 5  ;;  %v2325_v34 = vor.u32 %v2324_v24, %v2321_v9  ;;  %v920_v20 = vld [vmem:[#allocation2 + $0x3c] sm:$0xf] }
  0x6a   : > { %v2335_v14 = vor.u32 %v2334_v25, %v2330_v22  ;;  %v2858_v35 = vrot.slane %v2751_v18, 5  ;;  %v4935_v37 = vrot.slane %v2752_v13, 9  ;;  %v2862_v43 = vrot.slane %v2753_v21, 5 }
  0x6b   : > { %v2317_v38 = vsel %vm5529_vm10, %v2312_v30, %v2316_v7  ;;  %v2856_v39 = vsel %vm5494_vm5, %v4934_v28, %v2855_v32  ;;  %v2857_v42 = vrot.slane %v2855_v32, 4  ;;  %v2326_v48 = vrot.slane %v2325_v34, 4  ;;  %v3794_v7 = vld [vmem:[#allocation2 + $0x34] sm:$0xf]  ;;  %v1161_v30 = vld [vmem:[#allocation2 + $0x30] sm:$0xf] }
  0x6c   : > { %v4918_v47 = vcombine.low %v2307_v29, %v2317_v38  ;;  %v2336_v49 = vrot.slane %v2335_v14, 4  ;;  %v2865_v50 = vrot.slane %v2754_v23, 5  ;;  %v2863_v54 = vsel %vm5494_vm5, %v4935_v37, %v2862_v43 }
  0x6d   : > { %v2859_v36 = vsel %vm5494_vm5, %v2857_v42, %v2858_v35  ;;  %v2864_v62 = vrot.slane %v2862_v43, 4  ;;  %v387_v45 = vmax.f32 %v5597_v26, 0.0  ;;  %v2331_v52 = vsel %vm5529_vm10, %v2326_v48, %v2330_v22  ;;  %v924_v35 = vld [vmem:[#allocation2 + $0x44] sm:$0x1]  ;;  %v1162_v42 = vld [vmem:[#allocation2 + $0x34] sm:$0xf] }
  0x6e   : > { %2682 = vrot.lane.b32.xlu0 %v4918_v47, %s5394_s9  ;;  %v2341_v53 = vsel %vm5529_vm10, %v2336_v49, %v2340_v4  ;;  %v4950_v55 = vcombine.low %v2856_v39, %v2859_v36  ;;  %v388_v56 = vmax.f32 %v5607_v40, 0.0  ;;  %v3339_v63 = vshrl.u32 %v3248_v33, 16  ;;  %v3795_v40 = vld [vmem:[#allocation2 + $0x38] sm:$0x1] }
  0x6f   : > { %v4919_v58 = vcombine.low %v2331_v52, %v2341_v53  ;;  %v2866_v59 = vsel %vm5494_vm5, %v2864_v62, %v2865_v50  ;;  %v5093_v60 = vpack.c.bf16 %v387_v45, %v387_v45  ;;  %v3342_v3 = vshll.u32 %v3248_v33, 16  ;;  %v1163_v49 = vld [vmem:[#allocation2 + $0x38] sm:$0x1]  ;;  %v1710_v52 = vld [vmem:[#allocation2 + $0x34] sm:$0xf] }
  0x70   : > { %v4951_v26 = vcombine.low %v2863_v54, %v2866_v59  ;;  %v5094_v0 = vpack.c.bf16 %v388_v56, %v388_v56  ;;  %v3348_v5 = vshll.u32 %v3249_v51, 16  ;;  %v3341_v31 = vrot.slane %v3339_v63, 4  ;;  %v1711_v59 = vld [vmem:[#allocation2 + $0x38] sm:$0x1] }
  0x71   : > { %2684 = vrot.lane.b32.xlu1 %v4919_v58, %s5394_s9  ;;  %v635_v9 = vshrl.u32 %v5093_v60, 16  ;;  %v638_v18 = vshll.u32 %v5093_v60, 16  ;;  %v3352_v46 = vshrl.u32 %v3249_v51, 16  ;;  %v3344_v15 = vrot.slane %v3342_v3, 5  ;;  %v1709_v51 = vld [vmem:[#allocation2 + $0x30] sm:$0xe] }
  0x72   : > { %3003 = vrot.lane.b32.xlu0 %v4950_v55, %s5392_s7  ;;  %v643_v11 = vshrl.u32 %v5094_v0, 16  ;;  %v646_v13 = vshll.u32 %v5094_v0, 16  ;;  %v3350_v16 = vrot.slane %v3348_v5, 5  ;;  %v3358_v23 = vshll.u32 %v3250_v57, 16 }
  0x73   : > { %v637_v19 = vrot.slane %v635_v9, 7  ;;  %v3354_v21 = vrot.slane %v3352_v46, 4  ;;  %v4998_v24 = vrot.slane %v3793_v6, 9  ;;  %v3345_v25 = vor.u32 %v3344_v15, %v3341_v31  ;;  %v5780_v46 = vld [vmem:[%s5504_s23 + $0x38] sm:$0xff]  }
  0x74   : > { %v645_v22 = vrot.slane %v643_v11, 7  ;;  %v3899_v28 = vrot.slane %v3794_v7, 5  ;;  %v3902_v29 = vrot.slane %v3795_v40, 5  ;;  %v3360_v14 = vrot.slane %v3358_v23, 5 }
  0x75   : > { %3005 = vrot.lane.b32.xlu1 %v4951_v26, %s5392_s7  ;;  %v640_v4 = vor.u32 %v638_v18, %v637_v19  ;;  %v641_v32 = vrot.slane %v637_v19, 4  ;;  %v3355_v34 = vor.u32 %v3354_v21, %v3350_v16  ;;  %v3346_v38 = vrot.slane %v3345_v25, 4  ;;  %v5799_v21 = vld [vmem:[%s5504_s23 + $0x40] sm:$0xff]  }
  0x76   : > { %3181 = vrot.lane.b32.xlu0 %v5326_v2, %s5391_s6  ;;  %v648_v37 = vor.u32 %v646_v13, %v645_v22  ;;  %v650_v33 = vrot.slane %v645_v22, 4  ;;  %v3900_v39 = vsel %vm5494_vm5, %v4998_v24, %v3899_v28  ;;  %v3901_v48 = vrot.slane %v3899_v28, 4  ;;  %v5790_v13 = vld [vmem:[%s7007_s2] ss:$0 sm:$0xff] }
  0x77   : > { %v921_v43 = vsel %vm5548_vm11, %v640_v4, %v920_v20  ;;  %v3356_v47 = vrot.slane %v3355_v34, 4  ;;  %v1297_v50 = vshrl.u32 %v1161_v30, 16  ;;  %v3351_v54 = vsel %vm5529_vm10, %v3346_v38, %v3350_v16 }
  0x78   : > { %v649_v36 = vsel %vm5556_vm12, %v641_v32, %v648_v37  ;;  %922 = vst [vmem:[#allocation2 + $0x3c] sm:$0xf] %v921_v43  ;;  %v925_v62 = vsel %vm5566_vm13, %v650_v33, %v924_v35  ;;  %v1300_v45 = vshll.u32 %v1161_v30, 16  ;;  %v3903_v55 = vsel %vm5494_vm5, %v3901_v48, %v3902_v29 }
  0x79   : > { %923 = vst.msk [vmem:[#allocation2 + $0x40] sm:$0xf] %vm427_vm0, %v649_v36  ;;  %v3361_v53 = vsel %vm5529_vm10, %v3356_v47, %v3360_v14  ;;  %926 = vst [vmem:[#allocation2 + $0x44] sm:$0x1] %v925_v62  ;;  %v1299_v56 = vrot.slane %v1297_v50, 4  ;;  %v1306_v58 = vshll.u32 %v1162_v42, 16  ;;  %v5014_v57 = vcombine.low %v3900_v39, %v3903_v55 }
  0x7a   : > { %v4982_v60 = vcombine.low %v3351_v54, %v3361_v53  ;;  %v1302_v63 = vrot.slane %v1300_v45, 5  ;;  %v1310_v26 = vshrl.u32 %v1162_v42, 16  ;;  %v1316_v3 = vshll.u32 %v1163_v49, 16  ;;  %v5822_v47 = vld [vmem:[%s7006_s1] ss:$0 sm:$0xff] }
  0x7b   : > { %v1308_v0 = vrot.slane %v1306_v58, 5  ;;  %v4872_v5 = vrot.slane %v1709_v51, 9  ;;  %v1826_v6 = vrot.slane %v1710_v52, 5  ;;  %v1829_v18 = vrot.slane %v1711_v59, 5 }
  0x7c   : > { %3726 = vrot.lane.b32.xlu0 %v4982_v60, %s5395_s10  ;;  %v1303_v7 = vor.u32 %v1302_v63, %v1299_v56  ;;  %v1312_v9 = vrot.slane %v1310_v26, 4  ;;  %v389_v31 = vmax.f32 %v5630_v10, 0.0  ;;  %v390_v11 = vmax.f32 %v5638_v17, 0.0 }
  0x7d   : > { %v5784_v40 = vsel %vm5494_vm5, %v4872_v5, %v1826_v6  ;;  %v1828_v2 = vrot.slane %v1826_v6, 4  ;;  %v5794_v15 = vadd.f32 %v5790_v13, %v5662_v44  ;;  %v1318_v19 = vrot.slane %v1316_v3, 5 }
  0x7e   : > { %v1304_v16 = vrot.slane %v1303_v7, 4  ;;  %v1313_v10 = vor.u32 %v1312_v9, %v1308_v0  ;;  %v5796_v20 = vpack.c.bf16 %v389_v31, %v389_v31  ;;  %v5805_v22 = vpack.c.bf16 %v390_v11, %v390_v11 }
  0x7f   : > { %v3251_v23 = vld [vmem:[#allocation2 + $0x3c] sm:$0xf]  ;;  %v5803_v17 = vsel %vm5494_vm5, %v1828_v2, %v1829_v18  ;;  %v5809_v25 = vadd.f32 %v5790_v13, %v5675_v61  ;;  %v5179_v44 = vunpack.c.l.bf16 %v5780_v46  ;;  %v5180_v34 = vunpack.c.h.bf16 %v5780_v46 }
  0x80   : > { %v3796_v24 = vld [vmem:[#allocation2 + $0x3c] sm:$0xe]  ;;  %v3252_v29 = vld [vmem:[#allocation2 + $0x40] sm:$0xf]  ;;  %v3363_v30 = vshrl.u32 %v3251_v23, 16  ;;  %4047 = vrot.lane.b32.xlu0 %v5014_v57, %s5393_s8  ;;  %v1309_v4 = vsel %vm5529_vm10, %v1304_v16, %v1308_v0  ;;  %v4888_v32 = vcombine.low %v5784_v40, %v5803_v17  ;;  %v3366_v35 = vshll.u32 %v3251_v23, 16 }
  0x81   : > { %v5327_v28 = vld [vmem:[#allocation2 + $0x3c] sm:$0xff]   ;;  %v3253_v14 = vld [vmem:[#allocation2 + $0x44] sm:$0x1]  ;;  %v3372_v37 = vshll.u32 %v3252_v29, 16  ;;  %v3376_v61 = vshrl.u32 %v3252_v29, 16  ;;  %v1314_v33 = vrot.slane %v1313_v10, 4  ;;  %v5825_v48 = vmul.f32 %v5822_v47, %v5179_v44 }
  0x82   : > { %3183 = vrot.lane.b32.xlu1 %v5327_v28, %s5391_s6  ;;  %v3365_v38 = vrot.slane %v3363_v30, 4  ;;  %v3382_v39 = vshll.u32 %v3253_v14, 16  ;;  %v3797_v42 = vld [vmem:[#allocation2 + $0x40] sm:$0xf]  ;;  %v3798_v43 = vld [vmem:[#allocation2 + $0x44] sm:$0x1]  ;;  %v5183_v49 = vunpack.c.l.bf16 %v5799_v21 }
  0x83   : > { %v3368_v50 = vrot.slane %v3366_v35, 5  ;;  %v3374_v36 = vrot.slane %v3372_v37, 5  ;;  %v3378_v54 = vrot.slane %v3376_v61, 4  ;;  %v1319_v62 = vsel %vm5529_vm10, %v1314_v33, %v1318_v19  ;;  %v1164_v45 = vld [vmem:[#allocation2 + $0x3c] sm:$0xf] }
  0x84   : > { %v3384_v51 = vrot.slane %v3382_v39, 5  ;;  %v5830_v52 = vcombine.low %v1309_v4, %v1319_v62  ;;  %v4999_v53 = vrot.slane %v3796_v24, 9  ;;  %v3906_v55 = vrot.slane %v3797_v42, 5  ;;  %v1165_v56 = vld [vmem:[#allocation2 + $0x40] sm:$0xf] }
  0x85   : > { %v3369_v58 = vor.u32 %v3368_v50, %v3365_v38  ;;  %v3379_v59 = vor.u32 %v3378_v54, %v3374_v36  ;;  %v3909_v60 = vrot.slane %v3798_v43, 5  ;;  %v1166_v57 = vld [vmem:[#allocation2 + $0x44] sm:$0x1]  ;;  %v1321_v63 = vshrl.u32 %v1164_v45, 16  ;;  %v1712_v26 = vld [vmem:[#allocation2 + $0x3c] sm:$0xe] }
  0x86   : > { %v3907_v0 = vsel %vm5494_vm5, %v4999_v53, %v3906_v55  ;;  %v3908_v3 = vrot.slane %v3906_v55, 4  ;;  %v1324_v5 = vshll.u32 %v1164_v45, 16  ;;  %v1330_v6 = vshll.u32 %v1165_v56, 16  ;;  %v1713_v7 = vld [vmem:[#allocation2 + $0x40] sm:$0xf] }
  0x87   : > { %v3370_v9 = vrot.slane %v3369_v58, 4  ;;  %v3380_v18 = vrot.slane %v3379_v59, 4  ;;  %v1323_v31 = vrot.slane %v1321_v63, 4  ;;  %v1334_v2 = vshrl.u32 %v1165_v56, 16  ;;  %v1714_v11 = vld [vmem:[#allocation2 + $0x44] sm:$0x1] }
  0x88   : > { %v3910_v16 = vsel %vm5494_vm5, %v3908_v3, %v3909_v60  ;;  %v1326_v10 = vrot.slane %v1324_v5, 5  ;;  %v1332_v19 = vrot.slane %v1330_v6, 5  ;;  %v1340_v23 = vshll.u32 %v1166_v57, 16  ;;  %v5339_v24 = vld [vmem:[%s7008_s3] sm:$0xff]   ;;  %v2210_v42 = vld [vmem:[#allocation2 + $0x3c] sm:$0xf] }
  0x89   : > { %v3375_v44 = vsel %vm5529_vm10, %v3370_v9, %v3374_v36  ;;  %v3385_v28 = vsel %vm5529_vm10, %v3380_v18, %v3384_v51  ;;  %v5015_v29 = vcombine.low %v3907_v0, %v3910_v16  ;;  %v1336_v30 = vrot.slane %v1334_v2, 4  ;;  %5249 = vmatprep.subr.bf16.mxu0 %v5339_v24  ;;  %5291 = vmatprep.subr.bf16.mxu1 %v5339_v24  ;;  %v927_v62 = vld [vmem:[#allocation2 + $0x48] sm:$0xf]  ;;  %v2211_v55 = vld [vmem:[#allocation2 + $0x40] sm:$0xf] }
  0x8a   : > { %v4983_v4 = vcombine.low %v3375_v44, %v3385_v28  ;;  %v1327_v14 = vor.u32 %v1326_v10, %v1323_v31  ;;  %v1342_v35 = vrot.slane %v1340_v23, 5  ;;  %v4873_v37 = vrot.slane %v1712_v26, 9  ;;  %5250 = vmatpush3.bf16.msra.mxu0 %v5339_v24  ;;  %5296 = vmatpush3.bf16.msra.mxu1 %v5339_v24  ;;  %v931_v56 = vld [vmem:[#allocation2 + $0x50] sm:$0x1]  ;;  %v2212_v60 = vld [vmem:[#allocation2 + $0x44] sm:$0x1] }
  0x8b   : > { %4049 = vrot.lane.b32.xlu0 %v5015_v29, %s5393_s8  ;;  %v1337_v61 = vor.u32 %v1336_v30, %v1332_v19  ;;  %v1833_v33 = vrot.slane %v1713_v7, 5  ;;  %v1836_v38 = vrot.slane %v1714_v11, 5  ;;  %v652_v39 = vshrl.u32 %v5796_v20, 16  ;;  %v2755_v5 = vld [vmem:[#allocation2 + $0x3c] sm:$0xe]  ;;  %v5345_v23 = vld [vmem:[%s7008_s3 + $0x10] sm:$0xff]  }
  0x8c   : > { %3728 = vrot.lane.b32.xlu1 %v4983_v4, %s5395_s10  ;;  %v1328_v43 = vrot.slane %v1327_v14, 4  ;;  %v655_v50 = vshll.u32 %v5796_v20, 16  ;;  %v660_v36 = vshrl.u32 %v5805_v22, 16  ;;  %v663_v54 = vshll.u32 %v5805_v22, 16  ;;  %v5342_v20 = vld [vmem:[%s7008_s3 + $0x8] sm:$0xff]  }
  0x8d   : > { %v1338_v45 = vrot.slane %v1337_v61, 4  ;;  %v1835_v51 = vrot.slane %v1833_v33, 4  ;;  %v654_v53 = vrot.slane %v652_v39, 7  ;;  %v5852_v58 = vmul.f32 %v5822_v47, %v5180_v34  ;;  %v5328_v34 = vld [vmem:[#allocation2 + $0x3c] sm:$0xff]   ;;  %5251 = vmatprep.subr.bf16.mxu0 %v5342_v20  ;;  %v2757_v11 = vld [vmem:[#allocation2 + $0x44] sm:$0x1]  ;;  %5292 = vmatprep.subr.bf16.mxu1 %v5342_v20 }
  0x8e   : > { %v1333_v59 = vsel %vm5529_vm10, %v1328_v43, %v1332_v19  ;;  %v662_v22 = vrot.slane %v660_v36, 7  ;;  %v2343_v57 = vshrl.u32 %v2210_v42, 16  ;;  %v2346_v63 = vshll.u32 %v2210_v42, 16  ;;  %v2756_v31 = vld [vmem:[#allocation2 + $0x40] sm:$0xf]  ;;  %5252 = vmatpush3.bf16.msra.mxu0 %v5342_v20  ;;  %5297 = vmatpush3.bf16.msra.mxu1 %v5342_v20  ;;  %v5340_v61 = vld [vmem:[#allocation2 + $0xc] sm:$0xff]  }
  0x8f   : > { %v1343_v26 = vsel %vm5529_vm10, %v1338_v45, %v1342_v35  ;;  %1964 = vrot.lane.b32.xlu0 %v4888_v32, %s5388_s28  ;;  %v1834_v46 = vsel %vm5494_vm5, %v4873_v37, %v1833_v33  ;;  %v657_v0 = vor.u32 %v655_v50, %v654_v53  ;;  %v658_v3 = vrot.slane %v654_v53, 4  ;;  %v5334_v37 = vld [vmem:[#allocation2] sm:$0xff]   ;;  %v5344_v33 = vld [vmem:[#allocation2 + $0x18] sm:$0xff]   ;;  %5253 = vmatprep.subr.bf16.mxu0 %v5345_v23  ;;  %v5905_v53 = vld [vmem:[%s5504_s23 + $0x50] sm:$0xff]  }
  0x90   : > { %1640 = vrot.lane.b32.xlu1 %v5830_v52, %s5389_s29  ;;  %v4857_v6 = vcombine.low %v1333_v59, %v1343_v26  ;;  %v1837_v7 = vsel %vm5494_vm5, %v1835_v51, %v1836_v38  ;;  %v665_v9 = vor.u32 %v663_v54, %v662_v22  ;;  %v667_v18 = vrot.slane %v662_v22, 4  ;;  %5293 = vmatprep.subr.bf16.mxu1 %v5345_v23 }
  0x91   : > { %v928_v40 = vsel %vm5548_vm11, %v657_v0, %v927_v62  ;;  %v2345_v17 = vrot.slane %v2343_v57, 4  ;;  %v2348_v32 = vrot.slane %v2346_v63, 5  ;;  %v2352_v2 = vshll.u32 %v2211_v55, 16  ;;  %v5894_v62 = vld [vmem:[%s5504_s23 + $0x48] sm:$0xff]   ;;  %1133 = vst.msk [vmem:[#allocation3] sm:$0xff] %vm7012_vm14, %v5334_v37  ;;  %1134 = vst.msk [vmem:[#allocation3 + $0x8] sm:$0xff] %vm7012_vm14, %v5340_v61 }
  0x92   : > { %v666_v16 = vsel %vm5556_vm12, %v658_v3, %v665_v9  ;;  %929 = vst [vmem:[#allocation2 + $0x48] sm:$0xf] %v928_v40  ;;  %v2356_v52 = vshrl.u32 %v2211_v55, 16  ;;  %v2362_v10 = vshll.u32 %v2212_v60, 16  ;;  %v932_v19 = vsel %vm5566_vm13, %v667_v18, %v931_v56  ;;  %5254 = vmatpush3.bf16.msra.mxu0 %v5345_v23  ;;  %5298 = vmatpush3.bf16.msra.mxu1 %v5345_v23 }
  0x93   : > { %2141 = vrot.lane.b32.xlu0 %v5328_v34, %s5390_s30  ;;  %930 = vst.msk [vmem:[#allocation2 + $0x4c] sm:$0xf] %vm427_vm0, %v666_v16  ;;  %v2349_v24 = vor.u32 %v2348_v32, %v2345_v17  ;;  %v2354_v44 = vrot.slane %v2352_v2, 5  ;;  %933 = vst [vmem:[#allocation2 + $0x50] sm:$0x1] %v932_v19  ;;  %v4936_v28 = vrot.slane %v2755_v5, 9  ;;  %v4889_v30 = vcombine.low %v1834_v46, %v1837_v7 }
  0x94   : > { %v2869_v29 = vrot.slane %v2756_v31, 5  ;;  %1642 = vrot.lane.b32.xlu1 %v4857_v6, %s5389_s29  ;;  %v2358_v4 = vrot.slane %v2356_v52, 4  ;;  %v2872_v14 = vrot.slane %v2757_v11, 5  ;;  %v391_v35 = vmax.f32 %v5794_v15, 0.0  ;;  %1135 = vst.msk [vmem:[#allocation3 + $0x10] sm:$0xff] %vm7012_vm14, %v5344_v33 }
  0x95   : > { %v2350_v38 = vrot.slane %v2349_v24, 4  ;;  %v2364_v39 = vrot.slane %v2362_v10, 5  ;;  %v392_v43 = vmax.f32 %v5809_v25, 0.0  ;;  %v5891_v15 = vadd.f32 %v5790_v13, %v5825_v48  ;;  %v934_v19 = vld [vmem:[#allocation2 + $0x54] sm:$0xf] }
  0x96   : > { %v2871_v42 = vrot.slane %v2869_v29, 4  ;;  %v2359_v50 = vor.u32 %v2358_v4, %v2354_v44  ;;  %v5887_v36 = vsel %vm5494_vm5, %v4936_v28, %v2869_v29  ;;  %v5097_v54 = vpack.c.bf16 %v391_v35, %v391_v35 }
  0x97   : > { %v2355_v45 = vsel %vm5529_vm10, %v2350_v38, %v2354_v44  ;;  %v5902_v51 = vadd.f32 %v5790_v13, %v5852_v58  ;;  %v5908_v55 = vpack.c.bf16 %v392_v43, %v392_v43  ;;  %v5184_v60 = vunpack.c.h.bf16 %v5799_v21 }
  0x98   : > { %v2873_v25 = vsel %vm5494_vm5, %v2871_v42, %v2872_v14  ;;  %1966 = vrot.lane.b32.xlu1 %v4889_v30, %s5388_s28  ;;  %v2360_v48 = vrot.slane %v2359_v50, 4  ;;  %v669_v56 = vshrl.u32 %v5097_v54, 16  ;;  %v672_v20 = vshll.u32 %v5097_v54, 16 }
  0x99   : > { %v2213_v59 = vld [vmem:[#allocation2 + $0x48] sm:$0xf]  ;;  %v4952_v58 = vcombine.low %v5887_v36, %v2873_v25  ;;  %v324_v57 = vmul.f32 %v5822_v47, %v5183_v49  ;;  %v5187_v63 = vunpack.c.l.bf16 %v5894_v62  ;;  %v5188_v3 = vunpack.c.h.bf16 %v5894_v62 }
  0x9a   : > { %v2758_v22 = vld [vmem:[#allocation2 + $0x48] sm:$0xe]  ;;  %v2365_v46 = vsel %vm5529_vm10, %v2360_v48, %v2364_v39  ;;  %v2214_v34 = vld [vmem:[#allocation2 + $0x4c] sm:$0xf]  ;;  %v2367_v0 = vshrl.u32 %v2213_v59, 16  ;;  %v5191_v5 = vunpack.c.l.bf16 %v5905_v53  ;;  %v2370_v9 = vshll.u32 %v2213_v59, 16 }
  0x9b   : > { %v5329_v26 = vld [vmem:[#allocation2 + $0x48] sm:$0xff]   ;;  %v4920_v6 = vcombine.low %v2355_v45, %v2365_v46  ;;  %v2215_v7 = vld [vmem:[#allocation2 + $0x50] sm:$0x1]  ;;  %v2376_v18 = vshll.u32 %v2214_v34, 16  ;;  %v2380_v31 = vshrl.u32 %v2214_v34, 16  ;;  %v5925_v32 = vmul.f32 %v5822_v47, %v5184_v60 }
  0x9c   : > { %2143 = vrot.lane.b32.xlu1 %v5329_v26, %s5390_s30  ;;  %v2369_v21 = vrot.slane %v2367_v0, 4  ;;  %v2386_v49 = vshll.u32 %v2215_v7, 16  ;;  %v2759_v40 = vld [vmem:[#allocation2 + $0x4c] sm:$0xf]  ;;  %v2760_v17 = vld [vmem:[#allocation2 + $0x50] sm:$0x1]  ;;  %v5928_v2 = vadd.f32 %v5790_v13, %v324_v57 }
  0x9d   : > { %2686 = vrot.lane.b32.xlu0 %v4920_v6, %s5394_s9  ;;  %v2372_v11 = vrot.slane %v2370_v9, 5  ;;  %v2378_v16 = vrot.slane %v2376_v18, 5  ;;  %v2382_v52 = vrot.slane %v2380_v31, 4  ;;  %v4937_v10 = vrot.slane %v2758_v22, 9  ;;  %v3254_v35 = vld [vmem:[#allocation2 + $0x48] sm:$0xf]  ;;  %v5947_v18 = vpop.permute.xlu0 %1632 }
  0x9e   : > { %v2388_v23 = vrot.slane %v2386_v49, 5  ;;  %v2876_v24 = vrot.slane %v2759_v40, 5  ;;  %v2879_v44 = vrot.slane %v2760_v17, 5  ;;  %v671_v28 = vrot.slane %v669_v56, 7  ;;  %v3255_v37 = vld [vmem:[#allocation2 + $0x4c] sm:$0xf] }
  0x9f   : > { %v2373_v29 = vor.u32 %v2372_v11, %v2369_v21  ;;  %v2383_v30 = vor.u32 %v2382_v52, %v2378_v16  ;;  %v677_v4 = vshrl.u32 %v5908_v55, 16  ;;  %v680_v14 = vshll.u32 %v5908_v55, 16  ;;  %v5330_v50 = vld [vmem:[#allocation2 + $0x48] sm:$0xff]   ;;  %v3256_v48 = vld [vmem:[#allocation2 + $0x50] sm:$0x1]  ;;  %v5952_v11 = vpop.permute.xlu1 %1956 }
  0xa0   : > { %v5935_v61 = vsel %vm5494_vm5, %v4937_v10, %v2876_v24  ;;  %v2878_v33 = vrot.slane %v2876_v24, 4  ;;  %v674_v38 = vor.u32 %v672_v20, %v671_v28  ;;  %v675_v39 = vrot.slane %v671_v28, 4  ;;  %v938_v59 = vld [vmem:[#allocation2 + $0x5c] sm:$0x1]  ;;  %v3799_v57 = vld [vmem:[#allocation2 + $0x48] sm:$0xe] }
  0xa1   : > { %v2374_v42 = vrot.slane %v2373_v29, 4  ;;  %v2384_v43 = vrot.slane %v2383_v30, 4  ;;  %3007 = vrot.lane.b32.xlu0 %v4952_v58, %s5392_s7  ;;  %v679_v36 = vrot.slane %v677_v4, 7  ;;  %v3387_v54 = vshrl.u32 %v3254_v35, 16  ;;  %v3800_v26 = vld [vmem:[#allocation2 + $0x4c] sm:$0xf] }
  0xa2   : > { %v2880_v45 = vsel %vm5494_vm5, %v2878_v33, %v2879_v44  ;;  %v935_v25 = vsel %vm5548_vm11, %v674_v38, %v934_v19  ;;  %v3390_v55 = vshll.u32 %v3254_v35, 16  ;;  %v3396_v56 = vshll.u32 %v3255_v37, 16  ;;  %v3801_v46 = vld [vmem:[#allocation2 + $0x50] sm:$0x1]  ;;  %v1167_v9 = vld [vmem:[#allocation2 + $0x48] sm:$0xf] }
  0xa3   : > { %v2379_v20 = vsel %vm5529_vm10, %v2374_v42, %v2378_v16  ;;  %v2389_v22 = vsel %vm5529_vm10, %v2384_v43, %v2388_v23  ;;  %v4953_v58 = vcombine.low %v5935_v61, %v2880_v45  ;;  %v682_v60 = vor.u32 %v680_v14, %v679_v36  ;;  %936 = vst [vmem:[#allocation2 + $0x54] sm:$0xf] %v935_v25  ;;  %v5346_v31 = vld [vmem:[#allocation2 + $0x24] sm:$0xff]   ;;  %v5347_v16 = vld [vmem:[%s7008_s3 + $0x18] sm:$0xff]   ;;  %v1168_v24 = vld [vmem:[#allocation2 + $0x4c] sm:$0xf] }
  0xa4   : > { %v4921_v34 = vcombine.low %v2379_v20, %v2389_v22  ;;  %v684_v0 = vrot.slane %v679_v36, 4  ;;  %v3389_v6 = vrot.slane %v3387_v54, 4  ;;  %v3392_v7 = vrot.slane %v3390_v55, 5  ;;  %1136 = vst.msk [vmem:[#allocation3 + $0x18] sm:$0xff] %vm7012_vm14, %v5346_v31  ;;  %v1169_v30 = vld [vmem:[#allocation2 + $0x50] sm:$0x1]  ;;  %5255 = vmatprep.subr.bf16.mxu0 %v5347_v16  ;;  %5294 = vmatprep.subr.bf16.mxu1 %v5347_v16 }
  0xa5   : > { %3185 = vrot.lane.b32.xlu0 %v5330_v50, %s5391_s6  ;;  %v683_v21 = vsel %vm5556_vm12, %v675_v39, %v682_v60  ;;  %v3398_v49 = vrot.slane %v3396_v56, 5  ;;  %v3400_v40 = vshrl.u32 %v3255_v37, 16  ;;  %v3406_v17 = vshll.u32 %v3256_v48, 16  ;;  %5256 = vmatpush3.bf16.msra.mxu0 %v5347_v16  ;;  %v5974_v20 = vpop.permute.xlu1 %2135 }
  0xa6   : > { %2688 = vrot.lane.b32.xlu1 %v4921_v34, %s5394_s9  ;;  %937 = vst.msk [vmem:[#allocation2 + $0x58] sm:$0xf] %vm427_vm0, %v683_v21  ;;  %v3393_v52 = vor.u32 %v3392_v7, %v3389_v6  ;;  %v939_v10 = vsel %vm5566_vm13, %v684_v0, %v938_v59  ;;  %v5000_v19 = vrot.slane %v3799_v57, 9  ;;  %v3913_v23 = vrot.slane %v3800_v26, 5  ;;  %5299 = vmatpush3.bf16.msra.mxu1 %v5347_v16 }
  0xa7   : > { %v3402_v44 = vrot.slane %v3400_v40, 4  ;;  %v3408_v28 = vrot.slane %v3406_v17, 5  ;;  %940 = vst [vmem:[#allocation2 + $0x5c] sm:$0x1] %v939_v10  ;;  %v3916_v29 = vrot.slane %v3801_v46, 5  ;;  %v1345_v4 = vshrl.u32 %v1167_v9, 16 }
  0xa8   : > { %v3394_v14 = vrot.slane %v3393_v52, 4  ;;  %v5964_v35 = vsel %vm5494_vm5, %v5000_v19, %v3913_v23  ;;  %v3915_v37 = vrot.slane %v3913_v23, 4  ;;  %v1348_v61 = vshll.u32 %v1167_v9, 16  ;;  %v5971_v25 = vpop.permute.xlu0 %2133 }
  0xa9   : > { %v3403_v33 = vor.u32 %v3402_v44, %v3398_v49  ;;  %v1347_v38 = vrot.slane %v1345_v4, 4  ;;  %v1354_v39 = vshll.u32 %v1168_v24, 16  ;;  %v1358_v42 = vshrl.u32 %v1168_v24, 16 }
  0xaa   : > { %3009 = vrot.lane.b32.xlu1 %v4953_v58, %s5392_s7  ;;  %v3399_v43 = vsel %vm5529_vm10, %v3394_v14, %v3398_v49  ;;  %v3257_v50 = vld [vmem:[#allocation2 + $0x54] sm:$0xf]  ;;  %v3917_v36 = vsel %vm5494_vm5, %v3915_v37, %v3916_v29  ;;  %v1350_v54 = vrot.slane %v1348_v61, 5  ;;  %v1364_v45 = vshll.u32 %v1169_v30, 16  ;;  %v1715_v61 = vld [vmem:[#allocation2 + $0x48] sm:$0xe] }
  0xab   : > { %v3404_v48 = vrot.slane %v3403_v33, 4  ;;  %v3411_v55 = vshrl.u32 %v3257_v50, 16  ;;  %v3414_v56 = vshll.u32 %v3257_v50, 16  ;;  %v5016_v59 = vcombine.low %v5964_v35, %v3917_v36  ;;  %v3802_v26 = vld [vmem:[#allocation2 + $0x54] sm:$0xe] }
  0xac   : > { %v1351_v22 = vor.u32 %v1350_v54, %v1347_v38  ;;  %v1356_v58 = vrot.slane %v1354_v39, 5  ;;  %v1360_v60 = vrot.slane %v1358_v42, 4  ;;  %v1366_v57 = vrot.slane %v1364_v45, 5  ;;  %v1170_v7 = vld [vmem:[#allocation2 + $0x54] sm:$0xf]  ;;  %v5987_v52 = vpop.permute.xlu0 %3177 }
  0xad   : > { %v5331_v46 = vld [vmem:[#allocation2 + $0x54] sm:$0xff]   ;;  %v3409_v34 = vsel %vm5529_vm10, %v3404_v48, %v3408_v28  ;;  %v3413_v6 = vrot.slane %v3411_v55, 4  ;;  %v5980_v9 = vadd.f32 %v5790_v13, %v5925_v32  ;;  %v5985_v31 = vmul.f32 %v5822_v47, %v5187_v63  ;;  %v5998_v33 = vpop.permute.xlu1 %3179  ;;  %v1716_v55 = vld [vmem:[#allocation2 + $0x4c] sm:$0xf] }
  0xae   : > { %v3258_v0 = vld [vmem:[#allocation2 + $0x58] sm:$0xf]  ;;  %v4984_v21 = vcombine.low %v3399_v43, %v3409_v34  ;;  %v3259_v49 = vld [vmem:[#allocation2 + $0x5c] sm:$0x1]  ;;  %v3416_v40 = vrot.slane %v3414_v56, 5  ;;  %3187 = vrot.lane.b32.xlu1 %v5331_v46, %s5391_s6  ;;  %v1352_v19 = vrot.slane %v1351_v22, 4  ;;  %v1361_v23 = vor.u32 %v1360_v60, %v1356_v58 }
  0xaf   : > { %v3420_v17 = vshll.u32 %v3258_v0, 16  ;;  %v3424_v16 = vshrl.u32 %v3258_v0, 16  ;;  %v3430_v10 = vshll.u32 %v3259_v49, 16  ;;  %v3803_v24 = vld [vmem:[#allocation2 + $0x58] sm:$0xf]  ;;  %v5993_v44 = vmul.f32 %v5822_v47, %v5188_v3 }
  0xb0   : > { %v3804_v32 = vld [vmem:[#allocation2 + $0x5c] sm:$0x1]  ;;  %3730 = vrot.lane.b32.xlu0 %v4984_v21, %s5395_s10  ;;  %v3417_v63 = vor.u32 %v3416_v40, %v3413_v6  ;;  %v5001_v30 = vrot.slane %v3802_v26, 9  ;;  %v1357_v14 = vsel %vm5529_vm10, %v1352_v19, %v1356_v58  ;;  %v1362_v35 = vrot.slane %v1361_v23, 4  ;;  %v1171_v3 = vld [vmem:[#allocation2 + $0x58] sm:$0xf]  ;;  %v6000_v43 = vpop.permute.xlu0 %2137 }
  0xb1   : > { %v3422_v28 = vrot.slane %v3420_v17, 5  ;;  %v3426_v29 = vrot.slane %v3424_v16, 4  ;;  %v3432_v4 = vrot.slane %v3430_v10, 5  ;;  %v3920_v37 = vrot.slane %v3803_v24, 5  ;;  %v1172_v45 = vld [vmem:[#allocation2 + $0x5c] sm:$0x1] }
  0xb2   : > { %v3418_v38 = vrot.slane %v3417_v63, 4  ;;  %v3923_v39 = vrot.slane %v3804_v32, 5  ;;  %v1369_v42 = vshrl.u32 %v1170_v7, 16  ;;  %v1367_v50 = vsel %vm5529_vm10, %v1362_v35, %v1366_v57  ;;  %v1717_v56 = vld [vmem:[#allocation2 + $0x50] sm:$0x1] }
  0xb3   : > { %v3427_v62 = vor.u32 %v3426_v29, %v3422_v28  ;;  %v3921_v36 = vsel %vm5494_vm5, %v5001_v30, %v3920_v37  ;;  %v3922_v54 = vrot.slane %v3920_v37, 4  ;;  %v1372_v48 = vshll.u32 %v1170_v7, 16  ;;  %v1718_v6 = vld [vmem:[#allocation2 + $0x54] sm:$0xe]  ;;  %v1719_v17 = vld [vmem:[#allocation2 + $0x58] sm:$0xf] }
  0xb4   : > { %v3423_v22 = vsel %vm5529_vm10, %v3418_v38, %v3422_v28  ;;  %4051 = vrot.lane.b32.xlu0 %v5016_v59, %s5393_s8  ;;  %v4858_v60 = vcombine.low %v1357_v14, %v1367_v50  ;;  %v1371_v26 = vrot.slane %v1369_v42, 4  ;;  %v1378_v34 = vshll.u32 %v1171_v3, 16  ;;  %v1720_v16 = vld [vmem:[#allocation2 + $0x5c] sm:$0x1]  ;;  %v6013_v10 = vpop.permute.xlu0 %2999 }
  0xb5   : > { %v3428_v58 = vrot.slane %v3427_v62, 4  ;;  %v3924_v46 = vsel %vm5494_vm5, %v3922_v54, %v3923_v39  ;;  %v1374_v57 = vrot.slane %v1372_v48, 5  ;;  %v1382_v0 = vshrl.u32 %v1171_v3, 16 }
  0xb6   : > { %v5017_v21 = vcombine.low %v3921_v36, %v3924_v46  ;;  %v1388_v49 = vshll.u32 %v1172_v45, 16  ;;  %v4874_v40 = vrot.slane %v1715_v61, 9  ;;  %v1380_v23 = vrot.slane %v1378_v34, 5  ;;  %v6015_v32 = vpop.permute.xlu1 %2139  ;;  %v2216_v61 = vld [vmem:[#allocation2 + $0x54] sm:$0xf] }
  0xb7   : > { %v3433_v7 = vsel %vm5529_vm10, %v3428_v58, %v3432_v4  ;;  %v1375_v19 = vor.u32 %v1374_v57, %v1371_v26  ;;  %v1384_v24 = vrot.slane %v1382_v0, 4  ;;  %v1840_v28 = vrot.slane %v1716_v55, 5  ;;  %v5351_v55 = vld [vmem:[#allocation2 + $0x30] sm:$0xff]   ;;  %v2217_v57 = vld [vmem:[#allocation2 + $0x58] sm:$0xf] }
  0xb8   : > { %v4985_v59 = vcombine.low %v3423_v22, %v3433_v7  ;;  %4053 = vrot.lane.b32.xlu0 %v5017_v21, %s5393_s8  ;;  %v1390_v63 = vrot.slane %v1388_v49, 5  ;;  %v1843_v29 = vrot.slane %v1717_v56, 5  ;;  %v4875_v30 = vrot.slane %v1718_v6, 9  ;;  %v6023_v42 = vpop.permute.xlu0 %4043  ;;  %v2218_v34 = vld [vmem:[#allocation2 + $0x5c] sm:$0x1]  ;;  %1137 = vst.msk [vmem:[#allocation3 + $0x20] sm:$0xff] %vm7012_vm14, %v5351_v55 }
  0xb9   : > { %v1376_v4 = vrot.slane %v1375_v19, 4  ;;  %v1385_v14 = vor.u32 %v1384_v24, %v1380_v23  ;;  %v1847_v35 = vrot.slane %v1719_v17, 5  ;;  %v1850_v37 = vrot.slane %v1720_v16, 5  ;;  %v2762_v17 = vld [vmem:[#allocation2 + $0x58] sm:$0xf] }
  0xba   : > { %3732 = vrot.lane.b32.xlu1 %v4985_v59, %s5395_s10  ;;  %v1841_v38 = vsel %vm5494_vm5, %v4874_v40, %v1840_v28  ;;  %v1842_v62 = vrot.slane %v1840_v28, 4  ;;  %v393_v39 = vmax.f32 %v5891_v15, 0.0  ;;  %v394_v3 = vmax.f32 %v5902_v51, 0.0  ;;  %v6029_v48 = vpop.permute.xlu1 %1958  ;;  %v2761_v40 = vld [vmem:[#allocation2 + $0x54] sm:$0xe]  ;;  %v5352_v28 = vld [vmem:[#allocation2 + $0x3c] sm:$0xff]  }
  0xbb   : > { %v1381_v50 = vsel %vm5529_vm10, %v1376_v4, %v1380_v23  ;;  %v1386_v36 = vrot.slane %v1385_v14, 4  ;;  %v1848_v54 = vsel %vm5494_vm5, %v4875_v30, %v1847_v35  ;;  %v1849_v45 = vrot.slane %v1847_v35, 4  ;;  %v941_v30 = vld [vmem:[#allocation2 + $0x60] sm:$0xf]  ;;  %1138 = vst.msk [vmem:[#allocation3 + $0x28] sm:$0xff] %vm7012_vm14, %v5352_v28 }
  0xbc   : > { %v1844_v56 = vsel %vm5494_vm5, %v1842_v62, %v1843_v29  ;;  %v5099_v22 = vpack.c.bf16 %v393_v39, %v393_v39  ;;  %v5100_v15 = vpack.c.bf16 %v394_v3, %v394_v3  ;;  %v2391_v58 = vshrl.u32 %v2216_v61, 16  ;;  %v6039_v16 = vpop.permute.xlu0 %4045 }
  0xbd   : > { %v1391_v51 = vsel %vm5529_vm10, %v1386_v36, %v1390_v63  ;;  %v4890_v26 = vcombine.low %v1841_v38, %v1844_v56  ;;  %v1851_v46 = vsel %vm5494_vm5, %v1849_v45, %v1850_v37  ;;  %v2394_v0 = vshll.u32 %v2216_v61, 16  ;;  %v945_v38 = vld [vmem:[#allocation2 + $0x68] sm:$0x1]  ;;  %v2763_v45 = vld [vmem:[#allocation2 + $0x5c] sm:$0x1] }
  0xbe   : > { %1644 = vrot.lane.b32.xlu1 %v4858_v60, %s5389_s29  ;;  %v4859_v6 = vcombine.low %v1381_v50, %v1391_v51  ;;  %v4891_v7 = vcombine.low %v1848_v54, %v1851_v46  ;;  %v686_v21 = vshrl.u32 %v5099_v22, 16  ;;  %v689_v49 = vshll.u32 %v5099_v22, 16  ;;  %v5332_v60 = vld [vmem:[#allocation2 + $0x54] sm:$0xff]   ;;  %v6042_v63 = vpop.permute.xlu1 %3001 }
  0xbf   : > { %1968 = vrot.lane.b32.xlu0 %v4890_v26, %s5388_s28  ;;  %v694_v59 = vshrl.u32 %v5100_v15, 16  ;;  %v697_v19 = vshll.u32 %v5100_v15, 16  ;;  %v2393_v23 = vrot.slane %v2391_v58, 4  ;;  %v2396_v24 = vrot.slane %v2394_v0, 5 }
  0xc0   : > { %v688_v29 = vrot.slane %v686_v21, 7  ;;  %v2400_v4 = vshll.u32 %v2217_v57, 16  ;;  %v2404_v14 = vshrl.u32 %v2217_v57, 16  ;;  %v2410_v35 = vshll.u32 %v2218_v34, 16  ;;  %v6055_v34 = vpop.permute.xlu0 %1960 }
  0xc1   : > { %v696_v37 = vrot.slane %v694_v59, 7  ;;  %v2397_v61 = vor.u32 %v2396_v24, %v2393_v23  ;;  %v4938_v62 = vrot.slane %v2761_v40, 9  ;;  %v2883_v39 = vrot.slane %v2762_v17, 5 }
  0xc2   : > { %1646 = vrot.lane.b32.xlu1 %v4859_v6, %s5389_s29  ;;  %v691_v3 = vor.u32 %v689_v49, %v688_v29  ;;  %v692_v50 = vrot.slane %v688_v29, 4  ;;  %v2402_v36 = vrot.slane %v2400_v4, 5  ;;  %v2406_v54 = vrot.slane %v2404_v14, 4  ;;  %v6047_v58 = vpop.permute.xlu1 %1962 }
  0xc3   : > { %2145 = vrot.lane.b32.xlu0 %v5332_v60, %s5390_s30  ;;  %v699_v55 = vor.u32 %v697_v19, %v696_v37  ;;  %v701_v56 = vrot.slane %v696_v37, 4  ;;  %v2398_v22 = vrot.slane %v2397_v61, 4  ;;  %v2412_v15 = vrot.slane %v2410_v35, 5  ;;  %v6091_v35 = vld [vmem:[%s5504_s23 + $0x58] sm:$0xff]  }
  0xc4   : > { %v942_v51 = vsel %vm5548_vm11, %v691_v3, %v941_v30  ;;  %v2407_v26 = vor.u32 %v2406_v54, %v2402_v36  ;;  %v6053_v46 = vsel %vm5494_vm5, %v4938_v62, %v2883_v39  ;;  %v2885_v57 = vrot.slane %v2883_v39, 4 }
  0xc5   : > { %v700_v0 = vsel %vm5556_vm12, %v692_v50, %v699_v55  ;;  %943 = vst [vmem:[#allocation2 + $0x60] sm:$0xf] %v942_v51  ;;  %v2403_v6 = vsel %vm5529_vm10, %v2398_v22, %v2402_v36  ;;  %v946_v21 = vsel %vm5566_vm13, %v701_v56, %v945_v38  ;;  %v2886_v49 = vrot.slane %v2763_v45, 5 }
  0xc6   : > { %1970 = vrot.lane.b32.xlu1 %v4891_v7, %s5388_s28  ;;  %944 = vst.msk [vmem:[#allocation2 + $0x64] sm:$0xf] %vm427_vm0, %v700_v0  ;;  %v2408_v40 = vrot.slane %v2407_v26, 4  ;;  %947 = vst [vmem:[#allocation2 + $0x68] sm:$0x1] %v946_v21  ;;  %vm1680_vm15 = vcmask 130112   ;;  %v365_v59 = vadd.f32 %v5790_v13, %v5985_v31  ;;  %v2681_v19 = vpop.permute.xlu1 %2680  ;;  %v366_v31 = vadd.f32 %v5790_v13, %v5993_v44 }
  0xc7   : > { %v395_v17 = vmax.f32 %v5928_v2, 0.0  ;;  %v396_v7 = vmax.f32 %v5980_v9, 0.0  ;;  %v2887_v60 = vsel %vm5494_vm5, %v2885_v57, %v2886_v49  ;;  %1681 = vst.msk [vmem:[#allocation3] sm:$0xff] %vm1680_vm15, %v5947_v18  ;;  %vm2004_vm2 = vcmask 195712   ;;  %v6099_v13 = vld [vmem:[%s5504_s23 + $0x60] sm:$0xff]  }
  0xc8   : > { %vm7014_vm3 = vcmask 261312   ;;  %v2413_v23 = vsel %vm5529_vm10, %v2408_v40, %v2412_v15  ;;  %2005 = vst.msk [vmem:[#allocation3] sm:$0xff] %vm2004_vm2, %v5952_v11  ;;  %v5192_v9 = vunpack.c.h.bf16 %v5905_v53  ;;  %v4954_v28 = vcombine.low %v6053_v46, %v2887_v60 }
  0xc9   : > { %v6075_v24 = vpack.c.bf16 %v395_v17, %v395_v17  ;;  %v6077_v2 = vpack.c.bf16 %v396_v7, %v396_v7  ;;  %v4922_v18 = vcombine.low %v2403_v6, %v2413_v23  ;;  %2182 = vst.msk [vmem:[#allocation3] sm:$0xff] %vm7014_vm3, %v5971_v25  ;;  %v397_v29 = vmax.f32 %v365_v59, 0.0 }
  0xca   : > { %vm2726_vm4 = vcmask 326912   ;;  %v1635_v11 = vpop.permute.xlu0 %1634  ;;  %v398_v25 = vmax.f32 %v366_v31, 0.0  ;;  %v6095_v61 = vpop.permute.xlu1 %3724  ;;  %vm3047_vm6 = vcmask 392512   ;;  %vm7013_vm7 = vcmask 458112  }
  0xcb   : > { %v703_v30 = vshrl.u32 %v6075_v24, 16  ;;  %v706_v4 = vshll.u32 %v6075_v24, 16  ;;  %v711_v14 = vshrl.u32 %v6077_v2, 16  ;;  %2690 = vrot.lane.b32.xlu0 %v4922_v18, %s5394_s9  ;;  %v714_v37 = vshll.u32 %v6077_v2, 16  ;;  %1682 = vst.msk [vmem:[#allocation3 + $0x8] sm:$0xff] %vm1680_vm15, %v1635_v11 }
  0xcc   : > { %v2219_v44 = vld [vmem:[#allocation2 + $0x60] sm:$0xf]  ;;  %v6101_v62 = vpack.c.bf16 %v397_v29, %v397_v29  ;;  %2006 = vst.msk [vmem:[#allocation3 + $0x8] sm:$0xff] %vm2004_vm2, %v6029_v48  ;;  %v328_v39 = vmul.f32 %v5822_v47, %v5191_v5  ;;  %v6109_v3 = vmul.f32 %v5822_v47, %v5192_v9  ;;  %v6111_v45 = vpack.c.bf16 %v398_v25, %v398_v25  ;;  %v952_v25 = vld [vmem:[#allocation2 + $0x74] sm:$0x1] }
  0xcd   : > { %v2764_v38 = vld [vmem:[#allocation2 + $0x60] sm:$0xe]  ;;  %v2220_v36 = vld [vmem:[#allocation2 + $0x64] sm:$0xf]  ;;  %v2415_v54 = vshrl.u32 %v2219_v44, 16  ;;  %2183 = vst.msk [vmem:[#allocation3 + $0x8] sm:$0xff] %vm7014_vm3, %v5974_v20  ;;  %v5195_v55 = vunpack.c.l.bf16 %v6091_v35  ;;  %v5196_v56 = vunpack.c.h.bf16 %v6091_v35  ;;  %v5199_v57 = vunpack.c.l.bf16 %v6099_v13 }
  0xce   : > { %v5333_v50 = vld [vmem:[#allocation2 + $0x60] sm:$0xff]   ;;  %v2221_v48 = vld [vmem:[#allocation2 + $0x68] sm:$0x1]  ;;  %v2418_v22 = vshll.u32 %v2219_v44, 16  ;;  %v2424_v53 = vshll.u32 %v2220_v36, 16  ;;  %v2428_v15 = vshrl.u32 %v2220_v36, 16  ;;  %v1637_v20 = vpop.permute.xlu1 %1636  ;;  %v5200_v0 = vunpack.c.h.bf16 %v6099_v13 }
  0xcf   : > { %v4939_v5 = vrot.slane %v2764_v38, 9  ;;  %2728 = vst.msk [vmem:[#allocation3 + $0x8] sm:$0xff] %vm2726_vm4, %v2681_v19  ;;  %2147 = vrot.lane.b32.xlu1 %v5333_v50, %s5390_s30  ;;  %v2417_v47 = vrot.slane %v2415_v54, 4  ;;  %v2434_v51 = vshll.u32 %v2221_v48, 16  ;;  %3011 = vrot.lane.b32.xlu0 %v4954_v28, %s5392_s7  ;;  %v2765_v26 = vld [vmem:[#allocation2 + $0x64] sm:$0xf] }
  0xd0   : > { %v2766_v46 = vld [vmem:[#allocation2 + $0x68] sm:$0x1]  ;;  %3049 = vst.msk [vmem:[#allocation3 + $0x8] sm:$0xff] %vm3047_vm6, %v6042_v63  ;;  %v2420_v6 = vrot.slane %v2418_v22, 5  ;;  %v2426_v21 = vrot.slane %v2424_v53, 5  ;;  %v2430_v49 = vrot.slane %v2428_v15, 4 }
  0xd1   : > { %v2890_v40 = vrot.slane %v2765_v26, 5  ;;  %3227 = vst.msk [vmem:[#allocation3 + $0x8] sm:$0xff] %vm7013_vm7, %v5998_v33  ;;  %v2436_v17 = vrot.slane %v2434_v51, 5  ;;  %v2893_v7 = vrot.slane %v2766_v46, 5  ;;  %v5335_v60 = vld [vmem:[#allocation2 + $0x60] sm:$0xff]   ;;  %v705_v59 = vrot.slane %v703_v30, 7 }
  0xd2   : > { %1683 = vst.msk [vmem:[#allocation3 + $0x10] sm:$0xff] %vm1680_vm15, %v1637_v20  ;;  %v6130_v63 = vld [vmem:[%s7007_s2] ss:$0 sm:$0xff]  ;;  %v2421_v23 = vor.u32 %v2420_v6, %v2417_v47  ;;  %v2431_v9 = vor.u32 %v2430_v49, %v2426_v21  ;;  %v948_v28 = vld [vmem:[#allocation2 + $0x6c] sm:$0xf]  ;;  %vm3770_vm8 = vcmask 523712  }
  0xd3   : > { %v6133_v19 = vadd.f32 %v6130_v63, %v328_v39  ;;  %2007 = vst.msk [vmem:[#allocation3 + $0x10] sm:$0xff] %vm2004_vm2, %v6055_v34  ;;  %v6139_v33 = vsel %vm5494_vm5, %v4939_v5, %v2890_v40  ;;  %v2892_v18 = vrot.slane %v2890_v40, 4  ;;  %v3260_v31 = vld [vmem:[#allocation2 + $0x60] sm:$0xf]  ;;  %3189 = vrot.lane.b32.xlu0 %v5335_v60, %s5391_s6  ;;  %v708_v29 = vor.u32 %v706_v4, %v705_v59  ;;  %v3261_v50 = vld [vmem:[#allocation2 + $0x64] sm:$0xf]  ;;  %v2679_v54 = vpop.permute.xlu0 %2678 }
  0xd4   : > { %2184 = vst.msk [vmem:[#allocation3 + $0x10] sm:$0xff] %vm7014_vm3, %v6000_v43  ;;  %v709_v30 = vrot.slane %v705_v59, 4  ;;  %v713_v34 = vrot.slane %v711_v14, 7  ;;  %v3435_v11 = vshrl.u32 %v3260_v31, 16  ;;  %v2422_v44 = vrot.slane %v2421_v23, 4 }
  0xd5   : > { %v2432_v38 = vrot.slane %v2431_v9, 4  ;;  %v2894_v39 = vsel %vm5494_vm5, %v2892_v18, %v2893_v7  ;;  %v3438_v36 = vshll.u32 %v3260_v31, 16  ;;  %v949_v48 = vsel %vm5548_vm11, %v708_v29, %v948_v28  ;;  %v3262_v14 = vld [vmem:[#allocation2 + $0x68] sm:$0x1]  ;;  %v3805_v22 = vld [vmem:[#allocation2 + $0x60] sm:$0xe] }
  0xd6   : > { %v4955_v43 = vcombine.low %v6139_v33, %v2894_v39  ;;  %v716_v24 = vor.u32 %v714_v37, %v713_v34  ;;  %v718_v4 = vrot.slane %v713_v34, 4  ;;  %2727 = vst.msk [vmem:[#allocation3] sm:$0xff] %vm2726_vm4, %v2679_v54  ;;  %v2427_v53 = vsel %vm5529_vm10, %v2422_v44, %v2426_v21  ;;  %950 = vst [vmem:[#allocation2 + $0x6c] sm:$0xf] %v949_v48  ;;  %v3806_v51 = vld [vmem:[#allocation2 + $0x64] sm:$0xf] }
  0xd7   : > { %v2437_v15 = vsel %vm5529_vm10, %v2432_v38, %v2436_v17  ;;  %v3437_v5 = vrot.slane %v3435_v11, 4  ;;  %v3440_v47 = vrot.slane %v3438_v36, 5  ;;  %v3807_v2 = vld [vmem:[#allocation2 + $0x68] sm:$0x1]  ;;  %3048 = vst.msk [vmem:[#allocation3] sm:$0xff] %vm3047_vm6, %v6013_v10  ;;  %v3444_v46 = vshll.u32 %v3261_v50, 16 }
  0xd8   : > { %v4923_v37 = vcombine.low %v2427_v53, %v2437_v15  ;;  %v717_v26 = vsel %vm5556_vm12, %v709_v30, %v716_v24  ;;  %v3448_v20 = vshrl.u32 %v3261_v50, 16  ;;  %v1173_v6 = vld [vmem:[#allocation2 + $0x60] sm:$0xf]  ;;  %3226 = vst.msk [vmem:[#allocation3] sm:$0xff] %vm7013_vm7, %v5987_v52  ;;  %v3454_v49 = vshll.u32 %v3262_v14, 16  ;;  %v1639_v10 = vpop.permute.xlu1 %1638 }
  0xd9   : > { %951 = vst.msk [vmem:[#allocation2 + $0x70] sm:$0xf] %vm427_vm0, %v717_v26  ;;  %v3441_v21 = vor.u32 %v3440_v47, %v3437_v5  ;;  %v953_v40 = vsel %vm5566_vm13, %v718_v4, %v952_v25  ;;  %v5002_v17 = vrot.slane %v3805_v22, 9  ;;  %v1174_v7 = vld [vmem:[#allocation2 + $0x64] sm:$0xf]  ;;  %v3446_v60 = vrot.slane %v3444_v46, 5 }
  0xda   : > { %2692 = vrot.lane.b32.xlu1 %v4923_v37, %s5394_s9  ;;  %v3450_v59 = vrot.slane %v3448_v20, 4  ;;  %954 = vst [vmem:[#allocation2 + $0x74] sm:$0x1] %v953_v40  ;;  %v3927_v23 = vrot.slane %v3806_v51, 5  ;;  %v3930_v9 = vrot.slane %v3807_v2, 5  ;;  %1684 = vst.msk [vmem:[#allocation3 + $0x18] sm:$0xff] %vm1680_vm15, %v1639_v10  ;;  %v6175_v34 = vadd.f32 %v6130_v63, %v6109_v3 }
  0xdb   : > { %v3442_v52 = vrot.slane %v3441_v21, 4  ;;  %v3456_v33 = vrot.slane %v3454_v49, 5  ;;  %v1393_v18 = vshrl.u32 %v1173_v6, 16  ;;  %v1396_v28 = vshll.u32 %v1173_v6, 16  ;;  %2008 = vst.msk [vmem:[#allocation3 + $0x18] sm:$0xff] %vm2004_vm2, %v6047_v58  ;;  %v6179_v11 = vpop.permute.xlu0 %3722 }
  0xdc   : > { %v3451_v31 = vor.u32 %v3450_v59, %v3446_v60  ;;  %v3929_v29 = vrot.slane %v3927_v23, 4  ;;  %v1402_v30 = vshll.u32 %v1174_v7, 16  ;;  %2185 = vst.msk [vmem:[#allocation3 + $0x18] sm:$0xff] %vm7014_vm3, %v6015_v32  ;;  %v6183_v25 = vsel %vm5494_vm5, %v5002_v17, %v3927_v23  ;;  %v1175_v4 = vld [vmem:[#allocation2 + $0x68] sm:$0x1] }
  0xdd   : > { %v1395_v44 = vrot.slane %v1393_v18, 4  ;;  %v1398_v38 = vrot.slane %v1396_v28, 5  ;;  %v1406_v39 = vshrl.u32 %v1174_v7, 16  ;;  %v3447_v58 = vsel %vm5529_vm10, %v3442_v52, %v3446_v60  ;;  %v3263_v3 = vld [vmem:[#allocation2 + $0x6c] sm:$0xf]  ;;  %3772 = vst.msk [vmem:[#allocation3 + $0x8] sm:$0xff] %vm3770_vm8, %v6095_v61 }
  0xde   : > { %3013 = vrot.lane.b32.xlu1 %v4955_v43, %s5392_s7  ;;  %v3452_v50 = vrot.slane %v3451_v31, 4  ;;  %v3931_v36 = vsel %vm5494_vm5, %v3929_v29, %v3930_v9  ;;  %v6190_v32 = vrot.slane %v1402_v30, 5  ;;  %v3459_v54 = vshrl.u32 %v3263_v3, 16  ;;  %v3808_v14 = vld [vmem:[#allocation2 + $0x6c] sm:$0xe]  ;;  %3771 = vst.msk [vmem:[#allocation3] sm:$0xff] %vm3770_vm8, %v6179_v11 }
  0xdf   : > { %v3462_v24 = vshll.u32 %v3263_v3, 16  ;;  %v1399_v48 = vor.u32 %v1398_v38, %v1395_v44  ;;  %v6195_v22 = vld [vmem:[%s7006_s1] ss:$0 sm:$0xff]  ;;  %v5018_v47 = vcombine.low %v6183_v25, %v3931_v36  ;;  %v1408_v51 = vrot.slane %v1406_v39, 4  ;;  %v1721_v38 = vld [vmem:[#allocation2 + $0x60] sm:$0xe] }
  0xe0   : > { %v6200_v43 = vmul.f32 %v6195_v22, %v5195_v55  ;;  %v5336_v53 = vld [vmem:[#allocation2 + $0x6c] sm:$0xff]   ;;  %v3457_v15 = vsel %vm5529_vm10, %v3452_v50, %v3456_v33  ;;  %v6208_v2 = vmul.f32 %v6195_v22, %v5196_v56  ;;  %v3461_v46 = vrot.slane %v3459_v54, 4  ;;  %v2683_v21 = vpop.permute.xlu0 %2682 }
  0xe1   : > { %v3264_v5 = vld [vmem:[#allocation2 + $0x70] sm:$0xf]  ;;  %v4986_v37 = vcombine.low %v3447_v58, %v3457_v15  ;;  %v3265_v26 = vld [vmem:[#allocation2 + $0x74] sm:$0x1]  ;;  %v3464_v20 = vrot.slane %v3462_v24, 5  ;;  %v1400_v17 = vrot.slane %v1399_v48, 4  ;;  %v1409_v7 = vor.u32 %v1408_v51, %v6190_v32 }
  0xe2   : > { %v3468_v6 = vshll.u32 %v3264_v5, 16  ;;  %v1176_v55 = vld [vmem:[#allocation2 + $0x6c] sm:$0xf]  ;;  %3191 = vrot.lane.b32.xlu1 %v5336_v53, %s5391_s6  ;;  %v3472_v49 = vshrl.u32 %v3264_v5, 16  ;;  %v3478_v40 = vshll.u32 %v3265_v26, 16  ;;  %2729 = vst.msk [vmem:[#allocation3 + $0x10] sm:$0xff] %vm2726_vm4, %v2683_v21 }
  0xe3   : > { %v3809_v10 = vld [vmem:[#allocation2 + $0x70] sm:$0xf]  ;;  %3734 = vrot.lane.b32.xlu0 %v4986_v37, %s5395_s10  ;;  %v3465_v35 = vor.u32 %v3464_v20, %v3461_v46  ;;  %v1412_v60 = vshll.u32 %v1175_v4, 16  ;;  %v3810_v59 = vld [vmem:[#allocation2 + $0x74] sm:$0x1]  ;;  %v5003_v23 = vrot.slane %v3808_v14, 9  ;;  %v1405_v33 = vsel %vm5529_vm10, %v1400_v17, %v6190_v32  ;;  %v2685_v31 = vpop.permute.xlu1 %2684 }
  0xe4   : > { %v3470_v56 = vrot.slane %v3468_v6, 5  ;;  %v3474_v9 = vrot.slane %v3472_v49, 4  ;;  %v3480_v52 = vrot.slane %v3478_v40, 5  ;;  %v1410_v18 = vrot.slane %v1409_v7, 4  ;;  %v1177_v28 = vld [vmem:[#allocation2 + $0x70] sm:$0xf]  ;;  %v3004_v39 = vpop.permute.xlu0 %3003 }
  0xe5   : > { %v3466_v29 = vrot.slane %v3465_v35, 4  ;;  %v1414_v30 = vrot.slane %v1412_v60, 5  ;;  %v3934_v25 = vrot.slane %v3809_v10, 5  ;;  %v3937_v44 = vrot.slane %v3810_v59, 5  ;;  %2730 = vst.msk [vmem:[#allocation3 + $0x18] sm:$0xff] %vm2726_vm4, %v2685_v31 }
  0xe6   : > { %v3475_v58 = vor.u32 %v3474_v9, %v3470_v56  ;;  %v1178_v50 = vld [vmem:[#allocation2 + $0x74] sm:$0x1]  ;;  %v1417_v3 = vshrl.u32 %v1176_v55, 16  ;;  %v1420_v36 = vshll.u32 %v1176_v55, 16  ;;  %v1426_v54 = vshll.u32 %v1177_v28, 16  ;;  %3050 = vst.msk [vmem:[#allocation3 + $0x10] sm:$0xff] %vm3047_vm6, %v3004_v39 }
  0xe7   : > { %v1722_v24 = vld [vmem:[#allocation2 + $0x64] sm:$0xf]  ;;  %v3471_v32 = vsel %vm5529_vm10, %v3466_v29, %v3470_v56  ;;  %4055 = vrot.lane.b32.xlu0 %v5018_v47, %s5393_s8  ;;  %v1415_v4 = vsel %vm5529_vm10, %v1410_v18, %v1414_v30  ;;  %v3935_v48 = vsel %vm5494_vm5, %v5003_v23, %v3934_v25  ;;  %v3936_v14 = vrot.slane %v3934_v25, 4  ;;  %v1723_v53 = vld [vmem:[#allocation2 + $0x68] sm:$0x1]  ;;  %v3006_v20 = vpop.permute.xlu1 %3005 }
  0xe8   : > { %v1724_v15 = vld [vmem:[#allocation2 + $0x6c] sm:$0xe]  ;;  %v1725_v5 = vld [vmem:[#allocation2 + $0x70] sm:$0xf]  ;;  %v3476_v51 = vrot.slane %v3475_v58, 4  ;;  %v4860_v37 = vcombine.low %v1405_v33, %v1415_v4  ;;  %v1419_v26 = vrot.slane %v1417_v3, 4  ;;  %v3182_v49 = vpop.permute.xlu0 %3181 }
  0xe9   : > { %v1422_v46 = vrot.slane %v1420_v36, 5  ;;  %v3938_v6 = vsel %vm5494_vm5, %v3936_v14, %v3937_v44  ;;  %v1428_v55 = vrot.slane %v1426_v54, 5  ;;  %v1430_v47 = vshrl.u32 %v1177_v28, 16  ;;  %3051 = vst.msk [vmem:[#allocation3 + $0x18] sm:$0xff] %vm3047_vm6, %v3006_v20  ;;  %v1726_v35 = vld [vmem:[#allocation2 + $0x74] sm:$0x1] }
  0xea   : > { %v1436_v21 = vshll.u32 %v1178_v50, 16  ;;  %v3481_v40 = vsel %vm5529_vm10, %v3476_v51, %v3480_v52  ;;  %v5019_v17 = vcombine.low %v3935_v48, %v3938_v6  ;;  %v4876_v10 = vrot.slane %v1721_v38, 9  ;;  %3228 = vst.msk [vmem:[#allocation3 + $0x10] sm:$0xff] %vm7013_vm7, %v3182_v49  ;;  %v5357_v9 = vld [vmem:[#allocation2 + $0x48] sm:$0xff]   ;;  %v2223_v4 = vld [vmem:[#allocation2 + $0x70] sm:$0xf] }
  0xeb   : > { %v1423_v7 = vor.u32 %v1422_v46, %v1419_v26  ;;  %v4987_v56 = vcombine.low %v3471_v32, %v3481_v40  ;;  %v1432_v60 = vrot.slane %v1430_v47, 4  ;;  %v1854_v23 = vrot.slane %v1722_v24, 5  ;;  %1139 = vst.msk [vmem:[#allocation3 + $0x30] sm:$0xff] %vm7012_vm14, %v5357_v9  ;;  %v2222_v50 = vld [vmem:[#allocation2 + $0x6c] sm:$0xf]  ;;  %v5358_v48 = vld [vmem:[#allocation2 + $0x54] sm:$0xff]  }
  0xec   : > { %v1438_v59 = vrot.slane %v1436_v21, 5  ;;  %4057 = vrot.lane.b32.xlu0 %v5019_v17, %s5393_s8  ;;  %v1857_v18 = vrot.slane %v1723_v53, 5  ;;  %v4877_v28 = vrot.slane %v1724_v15, 9  ;;  %v1861_v31 = vrot.slane %v1725_v5, 5  ;;  %v955_v32 = vld [vmem:[#allocation2 + $0x78] sm:$0xf] }
  0xed   : > { %v1424_v33 = vrot.slane %v1423_v7, 4  ;;  %3736 = vrot.lane.b32.xlu1 %v4987_v56, %s5395_s10  ;;  %v1433_v52 = vor.u32 %v1432_v60, %v1428_v55  ;;  %v1855_v29 = vsel %vm5494_vm5, %v4876_v10, %v1854_v23  ;;  %v1856_v30 = vrot.slane %v1854_v23, 4  ;;  %v2224_v20 = vld [vmem:[#allocation2 + $0x74] sm:$0x1]  ;;  %1140 = vst.msk [vmem:[#allocation3 + $0x38] sm:$0xff] %vm7012_vm14, %v5358_v48  ;;  %v5337_v21 = vld [vmem:[#allocation2 + $0x6c] sm:$0xff]  }
  0xee   : > { %v1864_v25 = vrot.slane %v1726_v35, 5  ;;  %v6241_v38 = vsel %vm5494_vm5, %v4877_v28, %v1861_v31  ;;  %v1863_v39 = vrot.slane %v1861_v31, 4  ;;  %v720_v58 = vshrl.u32 %v6101_v62, 16  ;;  %v3727_v51 = vpop.permute.xlu0 %3726  ;;  %v2767_v17 = vld [vmem:[#allocation2 + $0x6c] sm:$0xe] }
  0xef   : > { %v1429_v44 = vsel %vm5529_vm10, %v1424_v33, %v1428_v55  ;;  %v1434_v3 = vrot.slane %v1433_v52, 4  ;;  %v1858_v36 = vsel %vm5494_vm5, %v1856_v30, %v1857_v18  ;;  %v723_v54 = vshll.u32 %v6101_v62, 16  ;;  %v959_v55 = vld [vmem:[#allocation2 + $0x80] sm:$0x1]  ;;  %v2768_v56 = vld [vmem:[#allocation2 + $0x70] sm:$0xf] }
  0xf0   : > { %v728_v24 = vshrl.u32 %v6111_v45, 16  ;;  %v4892_v14 = vcombine.low %v1855_v29, %v1858_v36  ;;  %v1865_v53 = vsel %vm5494_vm5, %v1863_v39, %v1864_v25  ;;  %v722_v15 = vrot.slane %v720_v58, 7  ;;  %v2769_v33 = vld [vmem:[#allocation2 + $0x74] sm:$0x1]  ;;  %3773 = vst.msk [vmem:[#allocation3 + $0x10] sm:$0xff] %vm3770_vm8, %v3727_v51 }
  0xf1   : > { %v731_v5 = vshll.u32 %v6111_v45, 16  ;;  %1648 = vrot.lane.b32.xlu1 %v4860_v37, %s5389_s29  ;;  %v1439_v26 = vsel %vm5529_vm10, %v1434_v3, %v1438_v59  ;;  %v4893_v62 = vcombine.low %v6241_v38, %v1865_v53  ;;  %v2439_v6 = vshrl.u32 %v2222_v50, 16  ;;  %v5348_v38 = vld [vmem:[%s7008_s3 + $0x20] ss:$0 sps:$4 sm:$0xff]  }
  0xf2   : > { %v730_v46 = vrot.slane %v728_v24, 7  ;;  %v4861_v47 = vcombine.low %v1429_v44, %v1439_v26  ;;  %1972 = vrot.lane.b32.xlu0 %v4892_v14, %s5388_s28  ;;  %v725_v49 = vor.u32 %v723_v54, %v722_v15  ;;  %v726_v45 = vrot.slane %v722_v15, 4  ;;  %v4048_v58 = vpop.permute.xlu0 %4047 }
  0xf3   : > { %v2442_v40 = vshll.u32 %v2222_v50, 16  ;;  %v2441_v10 = vrot.slane %v2439_v6, 4  ;;  %v2448_v35 = vshll.u32 %v2223_v4, 16  ;;  %v2452_v23 = vshrl.u32 %v2223_v4, 16 }
  0xf4   : > { %v733_v37 = vor.u32 %v731_v5, %v730_v46  ;;  %v735_v7 = vrot.slane %v730_v46, 4  ;;  %v956_v60 = vsel %vm5548_vm11, %v725_v49, %v955_v32  ;;  %v2458_v9 = vshll.u32 %v2224_v20, 16  ;;  %v3184_v29 = vpop.permute.xlu1 %3183 }
  0xf5   : > { %v2444_v59 = vrot.slane %v2442_v40, 5  ;;  %1650 = vrot.lane.b32.xlu1 %v4861_v47, %s5389_s29  ;;  %957 = vst [vmem:[#allocation2 + $0x78] sm:$0xf] %v956_v60  ;;  %v2450_v28 = vrot.slane %v2448_v35, 5  ;;  %v4940_v52 = vrot.slane %v2767_v17, 9  ;;  %v2454_v25 = vrot.slane %v2452_v23, 4 }
  0xf6   : > { %v734_v18 = vsel %vm5556_vm12, %v726_v45, %v733_v37  ;;  %v960_v31 = vsel %vm5566_vm13, %v735_v7, %v959_v55  ;;  %2149 = vrot.lane.b32.xlu0 %v5337_v21, %s5390_s30  ;;  %v2897_v44 = vrot.slane %v2768_v56, 5  ;;  %3229 = vst.msk [vmem:[#allocation3 + $0x18] sm:$0xff] %vm7013_vm7, %v3184_v29  ;;  %v6272_v39 = vadd.f32 %v6130_v63, %v6200_v43 }
  0xf7   : > { %958 = vst.msk [vmem:[#allocation2 + $0x7c] sm:$0xf] %vm427_vm0, %v734_v18  ;;  %v2445_v30 = vor.u32 %v2444_v59, %v2441_v10  ;;  %961 = vst [vmem:[#allocation2 + $0x80] sm:$0x1] %v960_v31  ;;  %v2900_v50 = vrot.slane %v2769_v33, 5  ;;  %vm4091_vm9 = vcmask 589312   ;;  %v2455_v54 = vor.u32 %v2454_v25, %v2450_v28 }
  0xf8   : > { %v399_v3 = vmax.f32 %v6133_v19, 0.0  ;;  %v2460_v24 = vrot.slane %v2458_v9, 5  ;;  %v2899_v32 = vrot.slane %v2897_v44, 4  ;;  %v6283_v43 = vsel %vm5494_vm5, %v4940_v52, %v2897_v44  ;;  %4093 = vst.msk [vmem:[#allocation3 + $0x8] sm:$0xff] %vm4091_vm9, %v6039_v16  ;;  %4092 = vst.msk [vmem:[#allocation3] sm:$0xff] %vm4091_vm9, %v6023_v42  ;;  %v6298_v16 = vld [vmem:[%s5504_s23 + $0x68] sm:$0xff]  }
  0xf9   : > { %v2446_v36 = vrot.slane %v2445_v30, 4  ;;  %1974 = vrot.lane.b32.xlu1 %v4893_v62, %s5388_s28  ;;  %v400_v19 = vmax.f32 %v6175_v34, 0.0  ;;  %vm4209_vm1 = vcmask 1043456   ;;  %4094 = vst.msk [vmem:[#allocation3 + $0x10] sm:$0xff] %vm4091_vm9, %v4048_v58  ;;  %v2456_v11 = vrot.slane %v2455_v54, 4 }
  0xfa   : > { %v6288_v4 = vpack.c.bf16 %v399_v3, %v399_v3  ;;  %v2901_v48 = vsel %vm5494_vm5, %v2899_v32, %v2900_v50  ;;  %5301 = vmatprep.subr.msk.bf16.mxu0 %vm4209_vm1, %v5348_v38  ;;  %v4211_v14 = vsel %vm4209_vm1, %v5348_v38, 0  ;;  %5302 = vmatprep.subr.msk.bf16.mxu1 %vm4209_vm1, %v5348_v38  ;;  %vm4160_vm14 = vcmask 588800   ;;  %v962_v18 = vld [vmem:[#allocation2 + $0x84] sm:$0xf] }
  0xfb   : > { %v2451_v61 = vsel %vm5529_vm10, %v2446_v36, %v2450_v28  ;;  %5258 = vmatpush3.bf16.msra.mxu0 %v4211_v14  ;;  %v6304_v42 = vadd.f32 %v6130_v63, %v6208_v2  ;;  %5300 = vmatpush3.bf16.msra.mxu1 %v4211_v14  ;;  %v2461_v15 = vsel %vm5529_vm10, %v2456_v11, %v2460_v24  ;;  %v5203_v21 = vunpack.c.l.bf16 %v6298_v16 }
  0xfc   : > { %v737_v34 = vshrl.u32 %v6288_v4, 16  ;;  %v740_v53 = vshll.u32 %v6288_v4, 16  ;;  %v2225_v5 = vld [vmem:[#allocation2 + $0x78] sm:$0xf]  ;;  %v4956_v51 = vcombine.low %v6283_v43, %v2901_v48  ;;  %v6309_v62 = vpack.c.bf16 %v400_v19, %v400_v19 }
  0xfd   : > { %v2770_v26 = vld [vmem:[#allocation2 + $0x78] sm:$0xe]  ;;  %v332_v46 = vmul.f32 %v6195_v22, %v5199_v57  ;;  %v4924_v6 = vcombine.low %v2451_v61, %v2461_v15  ;;  %v2463_v47 = vshrl.u32 %v2225_v5, 16  ;;  %v333_v2 = vmul.f32 %v6195_v22, %v5200_v0  ;;  %v4050_v7 = vpop.permute.xlu0 %4049 }
  0xfe   : > { %v5338_v20 = vld [vmem:[#allocation2 + $0x78] sm:$0xff]   ;;  %v2227_v49 = vld [vmem:[#allocation2 + $0x80] sm:$0x1]  ;;  %v2466_v45 = vshll.u32 %v2225_v5, 16  ;;  %v4941_v37 = vrot.slane %v2770_v26, 9  ;;  %v3729_v60 = vpop.permute.xlu1 %3728  ;;  %v5204_v0 = vunpack.c.h.bf16 %v6298_v16  ;;  %v739_v52 = vrot.slane %v737_v34, 7 }
  0xff   : > { %v2226_v55 = vld [vmem:[#allocation2 + $0x7c] sm:$0xf]  ;;  %2151 = vrot.lane.b32.xlu1 %v5338_v20, %s5390_s30  ;;  %2694 = vrot.lane.b32.xlu0 %v4924_v6, %s5394_s9  ;;  %v2465_v57 = vrot.slane %v2463_v47, 4  ;;  %v2482_v10 = vshll.u32 %v2227_v49, 16  ;;  %v2772_v56 = vld [vmem:[#allocation2 + $0x80] sm:$0x1]  ;;  %v6321_v13 = vadd.f32 %v6130_v63, %v332_v46  ;;  %v6327_v29 = vadd.f32 %v6130_v63, %v333_v2 }
 0x100   : > { %v2472_v40 = vshll.u32 %v2226_v55, 16  ;;  %v2476_v17 = vshrl.u32 %v2226_v55, 16  ;;  %v2771_v35 = vld [vmem:[#allocation2 + $0x7c] sm:$0xf]  ;;  %v2468_v59 = vrot.slane %v2466_v45, 5  ;;  %3774 = vst.msk [vmem:[#allocation3 + $0x18] sm:$0xff] %vm3770_vm8, %v3729_v60  ;;  %v742_v54 = vor.u32 %v740_v53, %v739_v52 }
 0x101   : > { %v2904_v33 = vrot.slane %v2771_v35, 5  ;;  %v2484_v28 = vrot.slane %v2482_v10, 5  ;;  %v2907_v31 = vrot.slane %v2772_v56, 5  ;;  %4095 = vst.msk [vmem:[#allocation3 + $0x18] sm:$0xff] %vm4091_vm9, %v4050_v7  ;;  %v5341_v58 = vld [vmem:[#allocation2 + $0x78] sm:$0xff]   ;;  %v1965_v36 = vpop.permute.xlu0 %1964  ;;  %v743_v24 = vrot.slane %v739_v52, 4 }
 0x102   : > { %v2474_v23 = vrot.slane %v2472_v40, 5  ;;  %v2478_v9 = vrot.slane %v2476_v17, 4  ;;  %v2469_v30 = vor.u32 %v2468_v59, %v2465_v57  ;;  %v3266_v50 = vld [vmem:[#allocation2 + $0x78] sm:$0xf]  ;;  %v745_v32 = vshrl.u32 %v6309_v62, 16  ;;  %v4109_v4 = vld [vmem:[#allocation3 + $0x8] sm:$0xff]  ;;  %v1641_v61 = vpop.permute.xlu1 %1640 }
 0x103   : > { %v6331_v44 = vsel %vm5494_vm5, %v4941_v37, %v2904_v33  ;;  %v2906_v38 = vrot.slane %v2904_v33, 4  ;;  %v4108_v3 = vld [vmem:[#allocation3] sm:$0xff]  ;;  %3015 = vrot.lane.b32.xlu0 %v4956_v51, %s5392_s7  ;;  %v748_v43 = vshll.u32 %v6309_v62, 16  ;;  %v3483_v34 = vshrl.u32 %v3266_v50, 16  ;;  %1685 = vst.msk [vmem:[#allocation3 + $0x20] sm:$0xff] %vm1680_vm15, %v1641_v61  ;;  %v4110_v53 = vld [vmem:[#allocation3 + $0x10] sm:$0xff] }
 0x104   : > { %v2479_v25 = vor.u32 %v2478_v9, %v2474_v23  ;;  %v3267_v19 = vld [vmem:[#allocation2 + $0x7c] sm:$0xf]  ;;  %5259 = vmatprep.mubr.msk.bf16.mxu0 %vm4160_vm14, %v4108_v3  ;;  %v2470_v11 = vrot.slane %v2469_v30, 4  ;;  %v747_v5 = vrot.slane %v745_v32, 7  ;;  %v963_v51 = vsel %vm5548_vm11, %v742_v54, %v962_v18  ;;  %v3268_v26 = vld [vmem:[#allocation2 + $0x80] sm:$0x1] }
 0x105   : > { %v2908_v14 = vsel %vm5494_vm5, %v2906_v38, %v2907_v31  ;;  %5260 = vmatmul.mubr.msk.bf16.vlgmr.msra.gmra.mrb[0].mxu0 %vm4160_vm14, %v4109_v4  ;;  %v3486_v62 = vshll.u32 %v3266_v50, 16  ;;  %v3811_v46 = vld [vmem:[#allocation2 + $0x78] sm:$0xe]  ;;  %2009 = vst.msk [vmem:[#allocation3 + $0x20] sm:$0xff] %vm2004_vm2, %v1965_v36  ;;  %964 = vst [vmem:[#allocation2 + $0x84] sm:$0xf] %v963_v51  ;;  %v2142_v45 = vpop.permute.xlu0 %2141 }
 0x106   : > { %v2480_v48 = vrot.slane %v2479_v25, 4  ;;  %v4957_v15 = vcombine.low %v6331_v44, %v2908_v14  ;;  %5263 = vmatprep.mubr.msk.bf16.mxu0 %vm4160_vm14, %v4110_v53  ;;  %v2475_v20 = vsel %vm5529_vm10, %v2470_v11, %v2474_v23  ;;  %v3485_v55 = vrot.slane %v3483_v34, 4  ;;  %v966_v2 = vld [vmem:[#allocation2 + $0x8c] sm:$0x1]  ;;  %v3812_v49 = vld [vmem:[#allocation2 + $0x7c] sm:$0xf]  ;;  %v1643_v35 = vpop.permute.xlu1 %1642 }
 0x107   : > { %v3492_v47 = vshll.u32 %v3267_v19, 16  ;;  %3193 = vrot.lane.b32.xlu0 %v5341_v58, %s5391_s6  ;;  %v750_v17 = vor.u32 %v748_v43, %v747_v5  ;;  %v752_v37 = vrot.slane %v747_v5, 4  ;;  %v3488_v7 = vrot.slane %v3486_v62, 5  ;;  %v3813_v57 = vld [vmem:[#allocation2 + $0x80] sm:$0x1]  ;;  %2186 = vst.msk [vmem:[#allocation3 + $0x20] sm:$0xff] %vm7014_vm3, %v2142_v45 }
 0x108   : > { %v2485_v6 = vsel %vm5529_vm10, %v2480_v48, %v2484_v28  ;;  %v1179_v10 = vld [vmem:[#allocation2 + $0x78] sm:$0xf]  ;;  %v3496_v60 = vshrl.u32 %v3267_v19, 16  ;;  %v3502_v59 = vshll.u32 %v3268_v26, 16  ;;  %v5004_v23 = vrot.slane %v3811_v46, 9  ;;  %1686 = vst.msk [vmem:[#allocation3 + $0x28] sm:$0xff] %vm1680_vm15, %v1643_v35 }
 0x109   : > { %v4925_v40 = vcombine.low %v2475_v20, %v2485_v6  ;;  %v3494_v56 = vrot.slane %v3492_v47, 5  ;;  %v751_v9 = vsel %vm5556_vm12, %v743_v24, %v750_v17  ;;  %v3489_v33 = vor.u32 %v3488_v7, %v3485_v55  ;;  %v1180_v31 = vld [vmem:[#allocation2 + $0x7c] sm:$0xf]  ;;  %v4111_v52 = vld [vmem:[#allocation3 + $0x18] sm:$0xff]  ;;  %v1181_v44 = vld [vmem:[#allocation2 + $0x80] sm:$0x1] }
 0x10a   : > { %v967_v18 = vsel %vm5566_vm13, %v752_v37, %v966_v2  ;;  %v3941_v28 = vrot.slane %v3812_v49, 5  ;;  %965 = vst.msk [vmem:[#allocation2 + $0x88] sm:$0xf] %vm427_vm0, %v751_v9  ;;  %v3498_v30 = vrot.slane %v3496_v60, 4  ;;  %v3944_v25 = vrot.slane %v3813_v57, 5  ;;  %v1967_v24 = vpop.permute.xlu1 %1966 }
 0x10b   : > { %2696 = vrot.lane.b32.xlu1 %v4925_v40, %s5394_s9  ;;  %968 = vst [vmem:[#allocation2 + $0x8c] sm:$0x1] %v967_v18  ;;  %v1441_v38 = vshrl.u32 %v1179_v10, 16  ;;  %v6362_v58 = vmul.f32 %v6195_v22, %v5203_v21  ;;  %v3490_v50 = vrot.slane %v3489_v33, 4  ;;  %v3504_v3 = vrot.slane %v3502_v59, 5  ;;  %2010 = vst.msk [vmem:[#allocation3 + $0x28] sm:$0xff] %vm2004_vm2, %v1967_v24 }
 0x10c   : > { %v3943_v36 = vrot.slane %v3941_v28, 4  ;;  %v1444_v54 = vshll.u32 %v1179_v10, 16  ;;  %v3499_v32 = vor.u32 %v3498_v30, %v3494_v56  ;;  %v1450_v19 = vshll.u32 %v1180_v31, 16  ;;  %v3269_v21 = vld [vmem:[#allocation2 + $0x84] sm:$0xf] }
 0x10d   : > { %v1443_v43 = vrot.slane %v1441_v38, 4  ;;  %v1454_v4 = vshrl.u32 %v1180_v31, 16  ;;  %5264 = vmatmul.mubr.msk.bf16.gmra.mrb[4].mxu0 %vm4160_vm14, %v4111_v52  ;;  %v3495_v61 = vsel %vm5529_vm10, %v3490_v50, %v3494_v56  ;;  %v3942_v11 = vsel %vm5494_vm5, %v5004_v23, %v3941_v28  ;;  %v3814_v26 = vld [vmem:[#allocation2 + $0x84] sm:$0xe]  ;;  %v1727_v16 = vld [vmem:[#allocation2 + $0x78] sm:$0xe] }
 0x10e   : > { %v1446_v48 = vrot.slane %v1444_v54, 5  ;;  %v1460_v14 = vshll.u32 %v1181_v44, 16  ;;  %v3500_v34 = vrot.slane %v3499_v32, 4  ;;  %v3507_v53 = vshrl.u32 %v3269_v21, 16  ;;  %v2144_v6 = vpop.permute.xlu1 %2143  ;;  %v1182_v35 = vld [vmem:[#allocation2 + $0x84] sm:$0xf] }
 0x10f   : > { %3017 = vrot.lane.b32.xlu1 %v4957_v15, %s5392_s7  ;;  %v3510_v5 = vshll.u32 %v3269_v21, 16  ;;  %v3945_v51 = vsel %vm5494_vm5, %v3943_v36, %v3944_v25  ;;  %v1452_v46 = vrot.slane %v1450_v19, 5  ;;  %v1456_v20 = vrot.slane %v1454_v4, 4  ;;  %2187 = vst.msk [vmem:[#allocation3 + $0x28] sm:$0xff] %vm7014_vm3, %v2144_v6  ;;  %v2687_v45 = vpop.permute.xlu0 %2686  ;;  %v1729_v19 = vld [vmem:[#allocation2 + $0x80] sm:$0x1] }
 0x110   : > { %v1447_v62 = vor.u32 %v1446_v48, %v1443_v43  ;;  %v1462_v15 = vrot.slane %v1460_v14, 5  ;;  %v3505_v55 = vsel %vm5529_vm10, %v3500_v34, %v3504_v3  ;;  %v3509_v47 = vrot.slane %v3507_v53, 4  ;;  %2731 = vst.msk [vmem:[#allocation3 + $0x20] sm:$0xff] %vm2726_vm4, %v2687_v45  ;;  %v1728_v43 = vld [vmem:[#allocation2 + $0x7c] sm:$0xf] }
 0x111   : > { %v3512_v2 = vrot.slane %v3510_v5, 5  ;;  %v5005_v49 = vrot.slane %v3814_v26, 9  ;;  %v5343_v40 = vld [vmem:[#allocation2 + $0x84] sm:$0xff]   ;;  %v4988_v17 = vcombine.low %v3495_v61, %v3505_v55  ;;  %v5020_v7 = vcombine.low %v3942_v11, %v3945_v51 }
 0x112   : > { %v3270_v37 = vld [vmem:[#allocation2 + $0x88] sm:$0xf]  ;;  %v1448_v57 = vrot.slane %v1447_v62, 4  ;;  %v1457_v10 = vor.u32 %v1456_v20, %v1452_v46  ;;  %v3271_v56 = vld [vmem:[#allocation2 + $0x8c] sm:$0x1]  ;;  %v6380_v33 = vmul.f32 %v6195_v22, %v5204_v0  ;;  %v1465_v11 = vshrl.u32 %v1182_v35, 16 }
 0x113   : > { %v3513_v60 = vor.u32 %v3512_v2, %v3509_v47  ;;  %v3516_v59 = vshll.u32 %v3270_v37, 16  ;;  %v3520_v23 = vshrl.u32 %v3270_v37, 16  ;;  %v3815_v9 = vld [vmem:[#allocation2 + $0x88] sm:$0xf]  ;;  %3195 = vrot.lane.b32.xlu1 %v5343_v40, %s5391_s6  ;;  %3738 = vrot.lane.b32.xlu0 %v4988_v17, %s5395_s10  ;;  %v3526_v18 = vshll.u32 %v3271_v56, 16  ;;  %v3008_v36 = vpop.permute.xlu0 %3007 }
 0x114   : > { %v1453_v28 = vsel %vm5529_vm10, %v1448_v57, %v1452_v46  ;;  %v1458_v31 = vrot.slane %v1457_v10, 4  ;;  %v3816_v52 = vld [vmem:[#allocation2 + $0x8c] sm:$0x1]  ;;  %v3948_v30 = vrot.slane %v3815_v9, 5  ;;  %v1183_v3 = vld [vmem:[#allocation2 + $0x88] sm:$0xf] }
 0x115   : > { %v3514_v25 = vrot.slane %v3513_v60, 4  ;;  %v3518_v44 = vrot.slane %v3516_v59, 5  ;;  %v3522_v38 = vrot.slane %v3520_v23, 4  ;;  %v3951_v50 = vrot.slane %v3816_v52, 5  ;;  %v1184_v32 = vld [vmem:[#allocation2 + $0x8c] sm:$0x1] }
 0x116   : > { %v3528_v22 = vrot.slane %v3526_v18, 5  ;;  %v1463_v0 = vsel %vm5529_vm10, %v1458_v31, %v1462_v15  ;;  %v3949_v54 = vsel %vm5494_vm5, %v5005_v49, %v3948_v30  ;;  %v3950_v24 = vrot.slane %v3948_v30, 4  ;;  %3052 = vst.msk [vmem:[#allocation3 + $0x20] sm:$0xff] %vm3047_vm6, %v3008_v36  ;;  %v1730_v48 = vld [vmem:[#allocation2 + $0x84] sm:$0xe] }
 0x117   : > { %v3519_v4 = vsel %vm5529_vm10, %v3514_v25, %v3518_v44  ;;  %v3523_v61 = vor.u32 %v3522_v38, %v3518_v44  ;;  %v4862_v21 = vcombine.low %v1453_v28, %v1463_v0  ;;  %4059 = vrot.lane.b32.xlu0 %v5020_v7, %s5393_s8  ;;  %v1468_v34 = vshll.u32 %v1182_v35, 16  ;;  %v1731_v20 = vld [vmem:[#allocation2 + $0x88] sm:$0xf]  ;;  %v3186_v15 = vpop.permute.xlu0 %3185  ;;  %v1732_v49 = vld [vmem:[#allocation2 + $0x8c] sm:$0x1]  ;;  %v5363_v57 = vld [vmem:[#allocation2 + $0x60] sm:$0xff]  }
 0x118   : > { %v3952_v14 = vsel %vm5494_vm5, %v3950_v24, %v3951_v50  ;;  %v1474_v53 = vshll.u32 %v1183_v3, 16  ;;  %v1478_v5 = vshrl.u32 %v1183_v3, 16  ;;  %v1467_v62 = vrot.slane %v1465_v11, 4  ;;  %v2689_v45 = vpop.permute.xlu1 %2688  ;;  %3230 = vst.msk [vmem:[#allocation3 + $0x20] sm:$0xff] %vm7013_vm7, %v3186_v15  ;;  %v2228_v59 = vld [vmem:[#allocation2 + $0x84] sm:$0xf] }
 0x119   : > { %v3524_v51 = vrot.slane %v3523_v61, 4  ;;  %v5021_v26 = vcombine.low %v3949_v54, %v3952_v14  ;;  %v1484_v46 = vshll.u32 %v1184_v32, 16  ;;  %v1470_v6 = vrot.slane %v1468_v34, 5  ;;  %2732 = vst.msk [vmem:[#allocation3 + $0x28] sm:$0xff] %vm2726_vm4, %v2689_v45  ;;  %v5364_v38 = vld [vmem:[#allocation2 + $0x6c] sm:$0xff]  }
 0x11a   : > { %v1476_v55 = vrot.slane %v1474_v53, 5  ;;  %v1480_v47 = vrot.slane %v1478_v5, 4  ;;  %v4878_v2 = vrot.slane %v1727_v16, 9  ;;  %v1868_v37 = vrot.slane %v1728_v43, 5  ;;  %v2229_v54 = vld [vmem:[#allocation2 + $0x88] sm:$0xf] }
 0x11b   : > { %v3529_v40 = vsel %vm5529_vm10, %v3524_v51, %v3528_v22  ;;  %v1486_v17 = vrot.slane %v1484_v46, 5  ;;  %v1871_v7 = vrot.slane %v1729_v19, 5  ;;  %4061 = vrot.lane.b32.xlu0 %v5021_v26, %s5393_s8  ;;  %v1471_v35 = vor.u32 %v1470_v6, %v1467_v62  ;;  %v2230_v19 = vld [vmem:[#allocation2 + $0x8c] sm:$0x1]  ;;  %v2774_v14 = vld [vmem:[#allocation2 + $0x88] sm:$0xf] }
 0x11c   : > { %v4989_v10 = vcombine.low %v3519_v4, %v3529_v40  ;;  %v1481_v56 = vor.u32 %v1480_v47, %v1476_v55  ;;  %v4879_v60 = vrot.slane %v1730_v48, 9  ;;  %v1869_v23 = vsel %vm5494_vm5, %v4878_v2, %v1868_v37  ;;  %v3010_v44 = vpop.permute.xlu1 %3009  ;;  %v2773_v26 = vld [vmem:[#allocation2 + $0x84] sm:$0xe]  ;;  %v969_v15 = vld [vmem:[#allocation2 + $0x90] sm:$0xf] }
 0x11d   : > { %v1870_v9 = vrot.slane %v1868_v37, 4  ;;  %v1875_v18 = vrot.slane %v1731_v20, 5  ;;  %v1878_v28 = vrot.slane %v1732_v49, 5  ;;  %vm7025_vm1 = vcmask 64512   ;;  %3053 = vst.msk [vmem:[#allocation3 + $0x28] sm:$0xff] %vm3047_vm6, %v3010_v44 }
 0x11e   : > { %1141 = vst.msk [vmem:[#allocation3 + $0x40] sm:$0xff] %vm7025_vm1, %v5363_v57  ;;  %3740 = vrot.lane.b32.xlu1 %v4989_v10, %s5395_s10  ;;  %v1472_v31 = vrot.slane %v1471_v35, 4  ;;  %v1482_v52 = vrot.slane %v1481_v56, 4  ;;  %v401_v30 = vmax.f32 %v6272_v39, 0.0  ;;  %v402_v25 = vmax.f32 %v6304_v42, 0.0  ;;  %1142 = vst.msk [vmem:[#allocation3 + $0x48] sm:$0xff] %vm7025_vm1, %v5364_v38 }
 0x11f   : > { %v1872_v50 = vsel %vm5494_vm5, %v1870_v9, %v1871_v7  ;;  %v1877_v3 = vrot.slane %v1875_v18, 4  ;;  %v2487_v16 = vshrl.u32 %v2228_v59, 16  ;;  %v6412_v36 = vadd.f32 %v6130_v63, %v6362_v58  ;;  %v5349_v63 = vld [vmem:[#allocation2 + $0x84] sm:$0xff]   ;;  %v2775_v45 = vld [vmem:[#allocation2 + $0x8c] sm:$0x1] }
 0x120   : > { %v1477_v22 = vsel %vm5529_vm10, %v1472_v31, %v1476_v55  ;;  %v1487_v39 = vsel %vm5529_vm10, %v1482_v52, %v1486_v17  ;;  %v4894_v42 = vcombine.low %v1869_v23, %v1872_v50  ;;  %v5107_v0 = vpack.c.bf16 %v401_v30, %v401_v30  ;;  %v3188_v62 = vpop.permute.xlu1 %3187  ;;  %v973_v57 = vld [vmem:[#allocation2 + $0x98] sm:$0x1] }
 0x121   : > { %v4863_v24 = vcombine.low %v1477_v22, %v1487_v39  ;;  %v1876_v32 = vsel %vm5494_vm5, %v4879_v60, %v1875_v18  ;;  %v1879_v43 = vsel %vm5494_vm5, %v1877_v3, %v1878_v28  ;;  %v5108_v58 = vpack.c.bf16 %v402_v25, %v402_v25  ;;  %3231 = vst.msk [vmem:[#allocation3 + $0x28] sm:$0xff] %vm7013_vm7, %v3188_v62  ;;  %v5226_v22 = vld [vmem:[%s5504_s23 + $0x70] sm:$0xff]   ;;  %v5367_v39 = vld [vmem:[#allocation2 + $0x78] sm:$0xff]   ;;  %vm7026_vm7 = vmmov %vm7025_vm1 }
 0x122   : > { %1652 = vrot.lane.b32.xlu1 %v4862_v21, %s5389_s29  ;;  %1976 = vrot.lane.b32.xlu0 %v4894_v42, %s5388_s28  ;;  %v754_v4 = vshrl.u32 %v5107_v0, 16  ;;  %v757_v61 = vshll.u32 %v5107_v0, 16  ;;  %v2489_v11 = vrot.slane %v2487_v16, 4  ;;  %v2490_v48 = vshll.u32 %v2228_v59, 16  ;;  %v3731_v21 = vpop.permute.xlu0 %3730  ;;  %v6447_v16 = vld [vmem:[%s7007_s2] ss:$0 sm:$0xff] }
 0x123   : > { %v762_v34 = vshrl.u32 %v5108_v58, 16  ;;  %v765_v53 = vshll.u32 %v5108_v58, 16  ;;  %v2496_v5 = vshll.u32 %v2229_v54, 16  ;;  %v2500_v51 = vshrl.u32 %v2229_v54, 16  ;;  %3775 = vst.msk [vmem:[#allocation3 + $0x20] sm:$0xff] %vm3770_vm8, %v3731_v21  ;;  %v5368_v42 = vld [vmem:[#allocation2 + $0x84] sm:$0xff]  }
 0x124   : > { %v4895_v46 = vcombine.low %v1876_v32, %v1879_v43  ;;  %v756_v20 = vrot.slane %v754_v4, 7  ;;  %v2492_v6 = vrot.slane %v2490_v48, 5  ;;  %v2506_v55 = vshll.u32 %v2230_v19, 16  ;;  %1143 = vst.msk [vmem:[#allocation3 + $0x50] sm:$0xff] %vm7025_vm1, %v5367_v39 }
 0x125   : > { %v764_v47 = vrot.slane %v762_v34, 7  ;;  %v2498_v2 = vrot.slane %v2496_v5, 5  ;;  %v2502_v49 = vrot.slane %v2500_v51, 4  ;;  %v2911_v40 = vrot.slane %v2774_v14, 5  ;;  %1144 = vst.msk [vmem:[#allocation3 + $0x58] sm:$0xff] %vm7026_vm7, %v5368_v42 }
 0x126   : > { %1654 = vrot.lane.b32.xlu1 %v4863_v24, %s5389_s29  ;;  %2153 = vrot.lane.b32.xlu0 %v5349_v63, %s5390_s30  ;;  %v759_v17 = vor.u32 %v757_v61, %v756_v20  ;;  %v760_v37 = vrot.slane %v756_v20, 4  ;;  %v2493_v7 = vor.u32 %v2492_v6, %v2489_v11  ;;  %v4942_v10 = vrot.slane %v2773_v26, 9  ;;  %v4052_v31 = vpop.permute.xlu0 %4051  ;;  %v976_v5 = vld [vmem:[#allocation2 + $0x9c] sm:$0xf] }
 0x127   : > { %v767_v35 = vor.u32 %v765_v53, %v764_v47  ;;  %v769_v56 = vrot.slane %v764_v47, 4  ;;  %v2503_v60 = vor.u32 %v2502_v49, %v2498_v2  ;;  %v2508_v59 = vrot.slane %v2506_v55, 5  ;;  %4096 = vst.msk [vmem:[#allocation3 + $0x20] sm:$0xff] %vm4091_vm9, %v4052_v31  ;;  %v6476_v20 = vld [vmem:[%s5504_s23 + $0x78] sm:$0xff]  }
 0x128   : > { %v970_v23 = vsel %vm5548_vm11, %v759_v17, %v969_v15  ;;  %v2494_v9 = vrot.slane %v2493_v7, 4  ;;  %v2913_v18 = vrot.slane %v2911_v40, 4  ;;  %v2914_v28 = vrot.slane %v2775_v45, 5 }
 0x129   : > { %v768_v52 = vsel %vm5556_vm12, %v760_v37, %v767_v35  ;;  %971 = vst [vmem:[#allocation2 + $0x90] sm:$0xf] %v970_v23  ;;  %v2504_v30 = vrot.slane %v2503_v60, 4  ;;  %v974_v25 = vsel %vm5566_vm13, %v769_v56, %v973_v57  ;;  %v403_v44 = vmax.f32 %v6321_v13, 0.0 }
 0x12a   : > { %1978 = vrot.lane.b32.xlu1 %v4895_v46, %s5388_s28  ;;  %972 = vst.msk [vmem:[#allocation2 + $0x94] sm:$0xf] %vm427_vm0, %v768_v52  ;;  %v2499_v38 = vsel %vm5529_vm10, %v2494_v9, %v2498_v2  ;;  %975 = vst [vmem:[#allocation2 + $0x98] sm:$0x1] %v974_v25  ;;  %v2912_v50 = vsel %vm5494_vm5, %v4942_v10, %v2911_v40  ;;  %v404_v3 = vmax.f32 %v6327_v29, 0.0  ;;  %v405_v29 = vmax.f32 %v6412_v36, 0.0  ;;  %v4054_v63 = vpop.permute.xlu0 %4053 }
 0x12b   : > { %v6451_v13 = vadd.f32 %v6447_v16, %v6380_v33  ;;  %v2509_v0 = vsel %vm5529_vm10, %v2504_v30, %v2508_v59  ;;  %v2915_v54 = vsel %vm5494_vm5, %v2913_v18, %v2914_v28  ;;  %v5109_v24 = vpack.c.bf16 %v403_v44, %v403_v44  ;;  %v6482_v2 = vld [vmem:[%s7006_s1] ss:$0 sm:$0xff] }
 0x12c   : > { %v4926_v32 = vcombine.low %v2499_v38, %v2509_v0  ;;  %v6459_v43 = vpack.c.bf16 %v404_v3, %v404_v3  ;;  %v6463_v19 = vpack.c.bf16 %v405_v29, %v405_v29  ;;  %v3733_v4 = vpop.permute.xlu1 %3732  ;;  %v5207_v61 = vunpack.c.l.bf16 %v5226_v22 }
 0x12d   : > { %v771_v33 = vshrl.u32 %v5109_v24, 16  ;;  %v774_v58 = vshll.u32 %v5109_v24, 16  ;;  %v4958_v11 = vcombine.low %v2912_v50, %v2915_v54  ;;  %v406_v48 = vmax.f32 %v6451_v13, 0.0  ;;  %3776 = vst.msk [vmem:[#allocation3 + $0x28] sm:$0xff] %vm3770_vm8, %v3733_v4 }
 0x12e   : > { %2698 = vrot.lane.b32.xlu0 %v4926_v32, %s5394_s9  ;;  %v779_v36 = vshrl.u32 %v6459_v43, 16  ;;  %v5208_v14 = vunpack.c.h.bf16 %v5226_v22  ;;  %v782_v53 = vshll.u32 %v6459_v43, 16  ;;  %v788_v51 = vshrl.u32 %v6463_v19, 16  ;;  %4097 = vst.msk [vmem:[#allocation3 + $0x28] sm:$0xff] %vm4091_vm9, %v4054_v63  ;;  %v4112_v24 = vld [vmem:[#allocation3 + $0x20] sm:$0xff] }
 0x12f   : > { %v6469_v34 = vrot.slane %v771_v33, 7  ;;  %v791_v26 = vshll.u32 %v6463_v19, 16  ;;  %v6485_v49 = vmul.f32 %v6482_v2, %v5207_v61  ;;  %v5211_v50 = vunpack.c.l.bf16 %v6476_v20  ;;  %5267 = vmatprep.mubr.msk.bf16.mxu0 %vm4160_vm14, %v4112_v24 }
 0x130   : > { %v2231_v62 = vld [vmem:[#allocation2 + $0x90] sm:$0xf]  ;;  %v1645_v47 = vpop.permute.xlu1 %1644  ;;  %v6493_v59 = vmul.f32 %v6482_v2, %v5208_v14  ;;  %v781_v29 = vrot.slane %v779_v36, 7  ;;  %vm7027_vm7 = vcmask 458112  }
 0x131   : > { %v2776_v46 = vld [vmem:[#allocation2 + $0x90] sm:$0xe]  ;;  %v2232_v6 = vld [vmem:[#allocation2 + $0x94] sm:$0xf]  ;;  %v2511_v55 = vshrl.u32 %v2231_v62, 16  ;;  %v776_v21 = vor.u32 %v774_v58, %v6469_v34  ;;  %v2514_v40 = vshll.u32 %v2231_v62, 16  ;;  %v1969_v23 = vpop.permute.xlu0 %1968 }
 0x132   : > { %v5350_v15 = vld [vmem:[#allocation2 + $0x90] sm:$0xff]   ;;  %v2233_v45 = vld [vmem:[#allocation2 + $0x98] sm:$0x1]  ;;  %v2520_v17 = vshll.u32 %v2232_v6, 16  ;;  %v2524_v37 = vshrl.u32 %v2232_v6, 16  ;;  %3019 = vrot.lane.b32.xlu0 %v4958_v11, %s5392_s7  ;;  %v4943_v7 = vrot.slane %v2776_v46, 9  ;;  %v784_v36 = vor.u32 %v782_v53, %v781_v29 }
 0x133   : > { %1687 = vst.msk [vmem:[#allocation3 + $0x30] sm:$0xff] %vm1680_vm15, %v1645_v47  ;;  %2155 = vrot.lane.b32.xlu1 %v5350_v15, %s5390_s30  ;;  %v2513_v57 = vrot.slane %v2511_v55, 4  ;;  %v2530_v10 = vshll.u32 %v2233_v45, 16  ;;  %v2777_v35 = vld [vmem:[#allocation2 + $0x94] sm:$0xf]  ;;  %v977_v60 = vsel %vm5548_vm11, %v776_v21, %v976_v5  ;;  %v2516_v9 = vrot.slane %v2514_v40, 5 }
 0x134   : > { %v2778_v56 = vld [vmem:[#allocation2 + $0x98] sm:$0x1]  ;;  %v2522_v18 = vrot.slane %v2520_v17, 5  ;;  %v2526_v28 = vrot.slane %v2524_v37, 4  ;;  %v2918_v31 = vrot.slane %v2777_v35, 5  ;;  %2011 = vst.msk [vmem:[#allocation3 + $0x30] sm:$0xff] %vm2004_vm2, %v1969_v23  ;;  %v1647_v38 = vpop.permute.xlu1 %1646 }
 0x135   : > { %978 = vst [vmem:[#allocation2 + $0x9c] sm:$0xf] %v977_v60  ;;  %v2532_v52 = vrot.slane %v2530_v10, 5  ;;  %v2921_v30 = vrot.slane %v2778_v56, 5  ;;  %v5353_v25 = vld [vmem:[#allocation2 + $0x90] sm:$0xff]   ;;  %v777_v44 = vrot.slane %v6469_v34, 4  ;;  %v2517_v3 = vor.u32 %v2516_v9, %v2513_v57  ;;  %v2146_v58 = vpop.permute.xlu0 %2145 }
 0x136   : > { %v2527_v22 = vor.u32 %v2526_v28, %v2522_v18  ;;  %v6500_v39 = vsel %vm5494_vm5, %v4943_v7, %v2918_v31  ;;  %v2920_v42 = vrot.slane %v2918_v31, 4  ;;  %v3272_v0 = vld [vmem:[#allocation2 + $0x90] sm:$0xf]  ;;  %v3273_v54 = vld [vmem:[#allocation2 + $0x94] sm:$0xf]  ;;  %1688 = vst.msk [vmem:[#allocation3 + $0x38] sm:$0xff] %vm1680_vm15, %v1647_v38  ;;  %3197 = vrot.lane.b32.xlu0 %v5353_v25, %s5391_s6 }
 0x137   : > { %v3531_v32 = vshrl.u32 %v3272_v0, 16  ;;  %v3534_v63 = vshll.u32 %v3272_v0, 16  ;;  %v3540_v33 = vshll.u32 %v3273_v54, 16  ;;  %v2518_v4 = vrot.slane %v2517_v3, 4  ;;  %v3274_v14 = vld [vmem:[#allocation2 + $0x98] sm:$0x1] }
 0x138   : > { %v2528_v61 = vrot.slane %v2527_v22, 4  ;;  %v2922_v11 = vsel %vm5494_vm5, %v2920_v42, %v2921_v30  ;;  %v3544_v34 = vshrl.u32 %v3273_v54, 16  ;;  %2188 = vst.msk [vmem:[#allocation3 + $0x30] sm:$0xff] %vm7014_vm3, %v2146_v58  ;;  %v4113_v5 = vld [vmem:[#allocation3 + $0x28] sm:$0xff]  ;;  %v786_v46 = vrot.slane %v781_v29, 4  ;;  %v1971_v21 = vpop.permute.xlu1 %1970 }
 0x139   : > { %v4959_v62 = vcombine.low %v6500_v39, %v2922_v11  ;;  %v3533_v15 = vrot.slane %v3531_v32, 4  ;;  %v980_v6 = vld [vmem:[#allocation2 + $0xa4] sm:$0x1]  ;;  %v3817_v55 = vld [vmem:[#allocation2 + $0x90] sm:$0xe]  ;;  %5268 = vmatmul.mubr.msk.bf16.gmra.mrb[8].mxu0 %vm4160_vm14, %v4113_v5  ;;  %v2523_v47 = vsel %vm5529_vm10, %v2518_v4, %v2522_v18  ;;  %v3536_v40 = vrot.slane %v3534_v63, 5 }
 0x13a   : > { %v2533_v45 = vsel %vm5529_vm10, %v2528_v61, %v2532_v52  ;;  %v3542_v17 = vrot.slane %v3540_v33, 5  ;;  %v3818_v37 = vld [vmem:[#allocation2 + $0x94] sm:$0xf]  ;;  %v3819_v7 = vld [vmem:[#allocation2 + $0x98] sm:$0x1]  ;;  %2012 = vst.msk [vmem:[#allocation3 + $0x38] sm:$0xff] %vm2004_vm2, %v1971_v21  ;;  %v785_v53 = vsel %vm5556_vm12, %v777_v44, %v784_v36  ;;  %v981_v60 = vsel %vm5566_vm13, %v786_v46, %v980_v6 }
 0x13b   : > { %v4927_v43 = vcombine.low %v2523_v47, %v2533_v45  ;;  %v3546_v57 = vrot.slane %v3544_v34, 4  ;;  %v3550_v10 = vshll.u32 %v3274_v14, 16  ;;  %979 = vst.msk [vmem:[#allocation2 + $0xa0] sm:$0xf] %vm427_vm0, %v785_v53  ;;  %v3537_v56 = vor.u32 %v3536_v40, %v3533_v15  ;;  %v1185_v18 = vld [vmem:[#allocation2 + $0x90] sm:$0xf] }
 0x13c   : > { %v3275_v35 = vld [vmem:[#allocation2 + $0x9c] sm:$0xf]  ;;  %982 = vst [vmem:[#allocation2 + $0xa4] sm:$0x1] %v981_v60  ;;  %v5006_v52 = vrot.slane %v3817_v55, 9  ;;  %v3955_v30 = vrot.slane %v3818_v37, 5  ;;  %v6538_v15 = vpack.c.bf16 %v406_v48, %v406_v48  ;;  %v6542_v47 = vadd.f32 %v6447_v16, %v6485_v49 }
 0x13d   : > { %v3555_v23 = vshrl.u32 %v3275_v35, 16  ;;  %v3558_v9 = vshll.u32 %v3275_v35, 16  ;;  %2700 = vrot.lane.b32.xlu1 %v4927_v43, %s5394_s9  ;;  %v3547_v28 = vor.u32 %v3546_v57, %v3542_v17  ;;  %v3552_v31 = vrot.slane %v3550_v10, 5  ;;  %v1186_v25 = vld [vmem:[#allocation2 + $0x94] sm:$0xf]  ;;  %v2691_v24 = vpop.permute.xlu0 %2690 }
 0x13e   : > { %v3538_v44 = vrot.slane %v3537_v56, 4  ;;  %v3958_v22 = vrot.slane %v3819_v7, 5  ;;  %v3956_v42 = vsel %vm5494_vm5, %v5006_v52, %v3955_v30  ;;  %v3957_v0 = vrot.slane %v3955_v30, 4  ;;  %2733 = vst.msk [vmem:[#allocation3 + $0x30] sm:$0xff] %vm2726_vm4, %v2691_v24  ;;  %v1187_v61 = vld [vmem:[#allocation2 + $0x98] sm:$0x1] }
 0x13f   : > { %v3557_v38 = vrot.slane %v3555_v23, 4  ;;  %v3560_v3 = vrot.slane %v3558_v9, 5  ;;  %v3548_v39 = vrot.slane %v3547_v28, 4  ;;  %v1489_v54 = vshrl.u32 %v1185_v18, 16  ;;  %v3820_v46 = vld [vmem:[#allocation2 + $0x9c] sm:$0xe] }
 0x140   : > { %v3543_v29 = vsel %vm5529_vm10, %v3538_v44, %v3542_v17  ;;  %v1492_v63 = vshll.u32 %v1185_v18, 16  ;;  %v1498_v33 = vshll.u32 %v1186_v25, 16  ;;  %v3959_v4 = vsel %vm5494_vm5, %v3957_v0, %v3958_v22  ;;  %v5369_v28 = vld [vmem:[#allocation2 + $0x90] sm:$0xff]  }
 0x141   : > { %v3561_v32 = vor.u32 %v3560_v3, %v3557_v38  ;;  %3021 = vrot.lane.b32.xlu1 %v4959_v62, %s5392_s7  ;;  %v3553_v58 = vsel %vm5529_vm10, %v3548_v39, %v3552_v31  ;;  %v1491_v11 = vrot.slane %v1489_v54, 4  ;;  %v1502_v14 = vshrl.u32 %v1186_v25, 16  ;;  %v2148_v40 = vpop.permute.xlu1 %2147  ;;  %v3012_v17 = vpop.permute.xlu0 %3011  ;;  %1145 = vst.msk [vmem:[#allocation3 + $0x60] sm:$0xff] %vm7025_vm1, %v5369_v28 }
 0x142   : > { %v4990_v34 = vcombine.low %v3543_v29, %v3553_v58  ;;  %v1494_v36 = vrot.slane %v1492_v63, 5  ;;  %v5354_v62 = vld [vmem:[#allocation2 + $0x9c] sm:$0xff]   ;;  %v5022_v55 = vcombine.low %v3956_v42, %v3959_v4  ;;  %v1500_v21 = vrot.slane %v1498_v33, 5  ;;  %2189 = vst.msk [vmem:[#allocation3 + $0x38] sm:$0xff] %vm7014_vm3, %v2148_v40  ;;  %v1733_v42 = vld [vmem:[#allocation2 + $0x90] sm:$0xe]  ;;  %vm7028_vm3 = vmmov %vm7025_vm1 }
 0x143   : > { %v6533_v5 = vrot.slane %v3561_v32, 4  ;;  %v3276_v6 = vld [vmem:[#allocation2 + $0xa0] sm:$0xf]  ;;  %v6546_v45 = vadd.f32 %v6447_v16, %v6493_v59  ;;  %v3277_v13 = vld [vmem:[#allocation2 + $0xa4] sm:$0x1]  ;;  %v1504_v43 = vrot.slane %v1502_v14, 4  ;;  %v5212_v10 = vunpack.c.h.bf16 %v6476_v20 }
 0x144   : > { %3742 = vrot.lane.b32.xlu0 %v4990_v34, %s5395_s10  ;;  %v3564_v37 = vshll.u32 %v3276_v6, 16  ;;  %v3568_v48 = vshrl.u32 %v3276_v6, 16  ;;  %v1495_v7 = vor.u32 %v1494_v36, %v1491_v11  ;;  %3054 = vst.msk [vmem:[#allocation3 + $0x30] sm:$0xff] %vm3047_vm6, %v3012_v17  ;;  %v3574_v49 = vshll.u32 %v3277_v13, 16  ;;  %v3821_v57 = vld [vmem:[#allocation2 + $0xa0] sm:$0xf] }
 0x145   : > { %3199 = vrot.lane.b32.xlu1 %v5354_v62, %s5391_s6  ;;  %v1508_v53 = vshll.u32 %v1187_v61, 16  ;;  %v1188_v59 = vld [vmem:[#allocation2 + $0x9c] sm:$0xf]  ;;  %v6556_v35 = vmul.f32 %v6482_v2, %v5211_v50  ;;  %v1505_v9 = vor.u32 %v1504_v43, %v1500_v21  ;;  %v3822_v18 = vld [vmem:[#allocation2 + $0xa4] sm:$0x1]  ;;  %v5007_v30 = vrot.slane %v3820_v46, 9  ;;  %v3190_v38 = vpop.permute.xlu0 %3189 }
 0x146   : > { %v3566_v56 = vrot.slane %v3564_v37, 5  ;;  %v3570_v60 = vrot.slane %v3568_v48, 4  ;;  %v1496_v23 = vrot.slane %v1495_v7, 4  ;;  %v3576_v31 = vrot.slane %v3574_v49, 5  ;;  %v1189_v44 = vld [vmem:[#allocation2 + $0xa0] sm:$0xf] }
 0x147   : > { %v1510_v52 = vrot.slane %v1508_v53, 5  ;;  %v3962_v25 = vrot.slane %v3821_v57, 5  ;;  %v1506_v39 = vrot.slane %v1505_v9, 4  ;;  %3232 = vst.msk [vmem:[#allocation3 + $0x30] sm:$0xff] %vm7027_vm7, %v3190_v38  ;;  %v5370_v0 = vld [vmem:[#allocation2 + $0x9c] sm:$0xff]   ;;  %v3965_v29 = vrot.slane %v3822_v18, 5 }
 0x148   : > { %v3567_v3 = vsel %vm5529_vm10, %v6533_v5, %v3566_v56  ;;  %v3571_v22 = vor.u32 %v3570_v60, %v3566_v56  ;;  %4063 = vrot.lane.b32.xlu0 %v5022_v55, %s5393_s8  ;;  %v1501_v50 = vsel %vm5529_vm10, %v1496_v23, %v1500_v21  ;;  %v1513_v32 = vshrl.u32 %v1188_v59, 16  ;;  %v1734_v63 = vld [vmem:[#allocation2 + $0x94] sm:$0xf]  ;;  %v1735_v33 = vld [vmem:[#allocation2 + $0x98] sm:$0x1]  ;;  %1146 = vst.msk [vmem:[#allocation3 + $0x68] sm:$0xff] %vm7028_vm3, %v5370_v0  ;;  %vm7029_vm3 = vmmov %vm7027_vm7 }
 0x149   : > { %v3963_v54 = vsel %vm5494_vm5, %v5007_v30, %v3962_v25  ;;  %v3964_v24 = vrot.slane %v3962_v25, 4  ;;  %v1511_v4 = vsel %vm5529_vm10, %v1506_v39, %v1510_v52  ;;  %v1190_v61 = vld [vmem:[#allocation2 + $0xa4] sm:$0x1]  ;;  %v1516_v11 = vshll.u32 %v1188_v59, 16  ;;  %v1736_v62 = vld [vmem:[#allocation2 + $0x9c] sm:$0xe] }
 0x14a   : > { %v3572_v58 = vrot.slane %v3571_v22, 4  ;;  %v1522_v14 = vshll.u32 %v1189_v44, 16  ;;  %v4864_v34 = vcombine.low %v1501_v50, %v1511_v4  ;;  %v1515_v36 = vrot.slane %v1513_v32, 4  ;;  %v1737_v6 = vld [vmem:[#allocation2 + $0xa0] sm:$0xf] }
 0x14b   : > { %v3966_v5 = vsel %vm5494_vm5, %v3964_v24, %v3965_v29  ;;  %v1526_v46 = vshrl.u32 %v1189_v44, 16  ;;  %v1518_v40 = vrot.slane %v1516_v11, 5  ;;  %v1738_v13 = vld [vmem:[#allocation2 + $0xa4] sm:$0x1]  ;;  %v1532_v7 = vshll.u32 %v1190_v61, 16  ;;  %v5355_v61 = vld [vmem:[#allocation2 + $0x9c] sm:$0xff]  }
 0x14c   : > { %v3577_v55 = vsel %vm5529_vm10, %v3572_v58, %v3576_v31  ;;  %v5023_v21 = vcombine.low %v3963_v54, %v3966_v5  ;;  %v1524_v17 = vrot.slane %v1522_v14, 5  ;;  %v4880_v43 = vrot.slane %v1733_v42, 9  ;;  %v2693_v49 = vpop.permute.xlu1 %2692  ;;  %v2234_v54 = vld [vmem:[#allocation2 + $0x9c] sm:$0xf]  ;;  %v2235_v24 = vld [vmem:[#allocation2 + $0xa0] sm:$0xf] }
 0x14d   : > { %v4991_v37 = vcombine.low %v3567_v3, %v3577_v55  ;;  %v1528_v48 = vrot.slane %v1526_v46, 4  ;;  %v1519_v53 = vor.u32 %v1518_v40, %v1515_v36  ;;  %v1882_v57 = vrot.slane %v1734_v63, 5  ;;  %2734 = vst.msk [vmem:[#allocation3 + $0x38] sm:$0xff] %vm2726_vm4, %v2693_v49  ;;  %v983_v3 = vld [vmem:[#allocation2 + $0xa8] sm:$0xf] }
 0x14e   : > { %4065 = vrot.lane.b32.xlu0 %v5023_v21, %s5393_s8  ;;  %v1885_v59 = vrot.slane %v1735_v33, 5  ;;  %v4881_v56 = vrot.slane %v1736_v62, 9  ;;  %v1534_v23 = vrot.slane %v1532_v7, 5  ;;  %v1889_v9 = vrot.slane %v1737_v6, 5  ;;  %v2236_v33 = vld [vmem:[#allocation2 + $0xa4] sm:$0x1] }
 0x14f   : > { %3744 = vrot.lane.b32.xlu1 %v4991_v37, %s5395_s10  ;;  %v1529_v60 = vor.u32 %v1528_v48, %v1524_v17  ;;  %v1892_v18 = vrot.slane %v1738_v13, 5  ;;  %v1520_v28 = vrot.slane %v1519_v53, 4  ;;  %v1883_v31 = vsel %vm5494_vm5, %v4880_v43, %v1882_v57  ;;  %v987_v58 = vld [vmem:[#allocation2 + $0xb0] sm:$0x1]  ;;  %v2779_v14 = vld [vmem:[#allocation2 + $0x9c] sm:$0xe] }
 0x150   : > { %v1884_v52 = vrot.slane %v1882_v57, 4  ;;  %v790_v30 = vrot.slane %v788_v51, 7  ;;  %v1891_v44 = vrot.slane %v1889_v9, 4  ;;  %v796_v38 = vshrl.u32 %v6538_v15, 16  ;;  %v3014_v22 = vpop.permute.xlu1 %3013  ;;  %v2780_v62 = vld [vmem:[#allocation2 + $0xa0] sm:$0xf] }
 0x151   : > { %v1530_v25 = vrot.slane %v1529_v60, 4  ;;  %v6585_v50 = vadd.f32 %v6447_v16, %v6556_v35  ;;  %v1525_v39 = vsel %vm5529_vm10, %v1520_v28, %v1524_v17  ;;  %v1890_v0 = vsel %vm5494_vm5, %v4881_v56, %v1889_v9  ;;  %3055 = vst.msk [vmem:[#allocation3 + $0x38] sm:$0xff] %vm3047_vm6, %v3014_v22  ;;  %v2781_v13 = vld [vmem:[#allocation2 + $0xa4] sm:$0x1] }
 0x152   : > { %v1886_v42 = vsel %vm5494_vm5, %v1884_v52, %v1885_v59  ;;  %v793_v51 = vor.u32 %v791_v26, %v790_v30  ;;  %v1893_v32 = vsel %vm5494_vm5, %v1891_v44, %v1892_v18  ;;  %v798_v63 = vrot.slane %v796_v38, 7 }
 0x153   : > { %1656 = vrot.lane.b32.xlu1 %v4864_v34, %s5389_s29  ;;  %v1535_v35 = vsel %vm5529_vm10, %v1530_v25, %v1534_v23  ;;  %v4896_v29 = vcombine.low %v1883_v31, %v1886_v42  ;;  %v794_v19 = vrot.slane %v790_v30, 4  ;;  %v799_v26 = vshll.u32 %v6538_v15, 16 }
 0x154   : > { %v4865_v4 = vcombine.low %v1525_v39, %v1535_v35  ;;  %v984_v11 = vsel %vm5548_vm11, %v793_v51, %v983_v3  ;;  %v803_v34 = vrot.slane %v798_v63, 4  ;;  %v2535_v5 = vshrl.u32 %v2234_v54, 16  ;;  %v3192_v6 = vpop.permute.xlu1 %3191 }
 0x155   : > { %1980 = vrot.lane.b32.xlu0 %v4896_v29, %s5388_s28  ;;  %985 = vst [vmem:[#allocation2 + $0xa8] sm:$0xf] %v984_v11  ;;  %v2538_v36 = vshll.u32 %v2234_v54, 16  ;;  %v2544_v46 = vshll.u32 %v2235_v24, 16  ;;  %v4897_v55 = vcombine.low %v1890_v0, %v1893_v32  ;;  %v801_v21 = vor.u32 %v799_v26, %v798_v63  ;;  %3233 = vst.msk [vmem:[#allocation3 + $0x38] sm:$0xff] %vm7029_vm3, %v3192_v6  ;;  %v3735_v15 = vpop.permute.xlu0 %3734 }
 0x156   : > { %v2548_v40 = vshrl.u32 %v2235_v24, 16  ;;  %v2554_v17 = vshll.u32 %v2236_v33, 16  ;;  %v2537_v37 = vrot.slane %v2535_v5, 4  ;;  %v988_v43 = vsel %vm5566_vm13, %v803_v34, %v987_v58  ;;  %3777 = vst.msk [vmem:[#allocation3 + $0x30] sm:$0xff] %vm3770_vm8, %v3735_v15 }
 0x157   : > { %1658 = vrot.lane.b32.xlu1 %v4865_v4, %s5389_s29  ;;  %v2540_v48 = vrot.slane %v2538_v36, 5  ;;  %v2546_v7 = vrot.slane %v2544_v46, 5  ;;  %v802_v49 = vsel %vm5556_vm12, %v794_v19, %v801_v21  ;;  %989 = vst [vmem:[#allocation2 + $0xb0] sm:$0x1] %v988_v43  ;;  %v4944_v57 = vrot.slane %v2779_v14, 9 }
 0x158   : > { %v2550_v53 = vrot.slane %v2548_v40, 4  ;;  %v2925_v59 = vrot.slane %v2780_v62, 5  ;;  %986 = vst.msk [vmem:[#allocation2 + $0xac] sm:$0xf] %vm427_vm0, %v802_v49  ;;  %v2928_v60 = vrot.slane %v2781_v13, 5  ;;  %v407_v23 = vmax.f32 %v6542_v47, 0.0 }
 0x159   : > { %2157 = vrot.lane.b32.xlu0 %v5355_v61, %s5390_s30  ;;  %v2541_v56 = vor.u32 %v2540_v48, %v2537_v37  ;;  %v408_v9 = vmax.f32 %v6546_v45, 0.0  ;;  %v2556_v28 = vrot.slane %v2554_v17, 5  ;;  %v4056_v52 = vpop.permute.xlu0 %4055  ;;  %v339_v44 = vmul.f32 %v6482_v2, %v5212_v10 }
 0x15a   : > { %v2551_v18 = vor.u32 %v2550_v53, %v2546_v7  ;;  %v2927_v31 = vrot.slane %v2925_v59, 4  ;;  %v5113_v25 = vpack.c.bf16 %v407_v23, %v407_v23  ;;  %4098 = vst.msk [vmem:[#allocation3 + $0x30] sm:$0xff] %vm4091_vm9, %v4056_v52  ;;  %v2926_v47 = vsel %vm5494_vm5, %v4944_v57, %v2925_v59 }
 0x15b   : > { %1982 = vrot.lane.b32.xlu1 %v4897_v55, %s5388_s28  ;;  %v2542_v30 = vrot.slane %v2541_v56, 4  ;;  %v6623_v45 = vpack.c.bf16 %v408_v9, %v408_v9  ;;  %v409_v22 = vmax.f32 %v6585_v50, 0.0  ;;  %v6633_v14 = vadd.f32 %v6447_v16, %v339_v44  ;;  %v990_v55 = vld [vmem:[#allocation2 + $0xb4] sm:$0xf] }
 0x15c   : > { %v2552_v38 = vrot.slane %v2551_v18, 4  ;;  %v2237_v3 = vld [vmem:[#allocation2 + $0xa8] sm:$0xf]  ;;  %v2929_v20 = vsel %vm5494_vm5, %v2927_v31, %v2928_v60  ;;  %v805_v54 = vshrl.u32 %v5113_v25, 16  ;;  %v808_v24 = vshll.u32 %v5113_v25, 16 }
 0x15d   : > { %v2547_v39 = vsel %vm5529_vm10, %v2542_v30, %v2546_v7  ;;  %v2559_v42 = vshrl.u32 %v2237_v3, 16  ;;  %v2562_v0 = vshll.u32 %v2237_v3, 16  ;;  %v2782_v2 = vld [vmem:[#allocation2 + $0xa8] sm:$0xe]  ;;  %v4960_v26 = vcombine.low %v2926_v47, %v2929_v20 }
 0x15e   : > { %v2557_v10 = vsel %vm5529_vm10, %v2552_v38, %v2556_v28  ;;  %v4945_v51 = vrot.slane %v2782_v2, 9  ;;  %v2239_v29 = vld [vmem:[#allocation2 + $0xb0] sm:$0x1]  ;;  %v4058_v58 = vpop.permute.xlu0 %4057  ;;  %v3278_v11 = vld [vmem:[#allocation2 + $0xa8] sm:$0xf]  ;;  %v807_v17 = vrot.slane %v805_v54, 7 }
 0x15f   : > { %v4928_v35 = vcombine.low %v2547_v39, %v2557_v10  ;;  %v2561_v32 = vrot.slane %v2559_v42, 4  ;;  %v2564_v63 = vrot.slane %v2562_v0, 5  ;;  %v2784_v33 = vld [vmem:[#allocation2 + $0xb0] sm:$0x1]  ;;  %v5356_v4 = vld [vmem:[#allocation2 + $0xa8] sm:$0xff]   ;;  %v2578_v19 = vshll.u32 %v2239_v29, 16  ;;  %v3737_v34 = vpop.permute.xlu1 %3736 }
 0x160   : > { %v2238_v61 = vld [vmem:[#allocation2 + $0xac] sm:$0xf]  ;;  %v2935_v6 = vrot.slane %v2784_v33, 5  ;;  %3778 = vst.msk [vmem:[#allocation3 + $0x38] sm:$0xff] %vm3770_vm8, %v3737_v34  ;;  %2159 = vrot.lane.b32.xlu1 %v5356_v4, %s5390_s30  ;;  %v813_v13 = vshrl.u32 %v6623_v45, 16  ;;  %v816_v48 = vshll.u32 %v6623_v45, 16  ;;  %v810_v53 = vor.u32 %v808_v24, %v807_v17 }
 0x161   : > { %2702 = vrot.lane.b32.xlu0 %v4928_v35, %s5394_s9  ;;  %v2565_v5 = vor.u32 %v2564_v63, %v2561_v32  ;;  %v2568_v36 = vshll.u32 %v2238_v61, 16  ;;  %v2572_v46 = vshrl.u32 %v2238_v61, 16  ;;  %v2783_v62 = vld [vmem:[#allocation2 + $0xac] sm:$0xf]  ;;  %v2580_v21 = vrot.slane %v2578_v19, 5  ;;  %4099 = vst.msk [vmem:[#allocation3 + $0x38] sm:$0xff] %vm4091_vm9, %v4058_v58 }
 0x162   : > { %v2932_v40 = vrot.slane %v2783_v62, 5  ;;  %v3279_v7 = vld [vmem:[#allocation2 + $0xac] sm:$0xf]  ;;  %v811_v57 = vrot.slane %v807_v17, 4  ;;  %v815_v9 = vrot.slane %v813_v13, 7  ;;  %v3579_v18 = vshrl.u32 %v3278_v11, 16 }
 0x163   : > { %v2566_v16 = vrot.slane %v2565_v5, 4  ;;  %v2570_v15 = vrot.slane %v2568_v36, 5  ;;  %v2574_v37 = vrot.slane %v2572_v46, 4  ;;  %v1649_v59 = vpop.permute.xlu1 %1648  ;;  %v5359_v23 = vld [vmem:[#allocation2 + $0xa8] sm:$0xff]   ;;  %v994_v28 = vld [vmem:[#allocation2 + $0xbc] sm:$0x1]  ;;  %v991_v30 = vsel %vm5548_vm11, %v810_v53, %v990_v55 }
 0x164   : > { %v6643_v43 = vsel %vm5494_vm5, %v4945_v51, %v2932_v40  ;;  %v2934_v49 = vrot.slane %v2932_v40, 4  ;;  %1689 = vst.msk [vmem:[#allocation3 + $0x40] sm:$0xff] %vm1680_vm15, %v1649_v59  ;;  %v1973_v31 = vpop.permute.xlu0 %1972  ;;  %v3280_v25 = vld [vmem:[#allocation2 + $0xb0] sm:$0x1]  ;;  %v3582_v44 = vshll.u32 %v3278_v11, 16  ;;  %v3588_v38 = vshll.u32 %v3279_v7, 16 }
 0x165   : > { %v2571_v56 = vsel %vm5529_vm10, %v2566_v16, %v2570_v15  ;;  %v2575_v60 = vor.u32 %v2574_v37, %v2570_v15  ;;  %3023 = vrot.lane.b32.xlu0 %v4960_v26, %s5392_s7  ;;  %v3823_v3 = vld [vmem:[#allocation2 + $0xa8] sm:$0xe]  ;;  %2013 = vst.msk [vmem:[#allocation3 + $0x40] sm:$0xff] %vm2004_vm2, %v1973_v31  ;;  %v818_v39 = vor.u32 %v816_v48, %v815_v9  ;;  %v820_v42 = vrot.slane %v815_v9, 4  ;;  %v3824_v0 = vld [vmem:[#allocation2 + $0xac] sm:$0xf] }
 0x166   : > { %v2936_v52 = vsel %vm5494_vm5, %v2934_v49, %v2935_v6  ;;  %992 = vst [vmem:[#allocation2 + $0xb4] sm:$0xf] %v991_v30  ;;  %v3825_v20 = vld [vmem:[#allocation2 + $0xb0] sm:$0x1]  ;;  %v3581_v2 = vrot.slane %v3579_v18, 4  ;;  %v3584_v10 = vrot.slane %v3582_v44, 5 }
 0x167   : > { %v2576_v47 = vrot.slane %v2575_v60, 4  ;;  %v4961_v45 = vcombine.low %v6643_v43, %v2936_v52  ;;  %v3590_v51 = vrot.slane %v3588_v38, 5  ;;  %v3592_v54 = vshrl.u32 %v3279_v7, 16  ;;  %v1191_v24 = vld [vmem:[#allocation2 + $0xa8] sm:$0xf]  ;;  %v1651_v35 = vpop.permute.xlu1 %1650 }
 0x168   : > { %v819_v32 = vsel %vm5556_vm12, %v811_v57, %v818_v39  ;;  %v3598_v63 = vshll.u32 %v3280_v25, 16  ;;  %v995_v33 = vsel %vm5566_vm13, %v820_v42, %v994_v28  ;;  %v1192_v58 = vld [vmem:[#allocation2 + $0xac] sm:$0xf]  ;;  %1690 = vst.msk [vmem:[#allocation3 + $0x48] sm:$0xff] %vm1680_vm15, %v1651_v35  ;;  %v2150_v61 = vpop.permute.xlu0 %2149  ;;  %v4115_v19 = vld [vmem:[#allocation3 + $0x38] sm:$0xff]  ;;  %v3585_v11 = vor.u32 %v3584_v10, %v3581_v2 }
 0x169   : > { %v2581_v29 = vsel %vm5529_vm10, %v2576_v47, %v2580_v21  ;;  %3201 = vrot.lane.b32.xlu0 %v5359_v23, %s5391_s6  ;;  %v4114_v4 = vld [vmem:[#allocation3 + $0x30] sm:$0xff]  ;;  %993 = vst.msk [vmem:[#allocation2 + $0xb8] sm:$0xf] %vm427_vm0, %v819_v32  ;;  %v3594_v34 = vrot.slane %v3592_v54, 4  ;;  %996 = vst [vmem:[#allocation2 + $0xbc] sm:$0x1] %v995_v33 }
 0x16a   : > { %v4929_v26 = vcombine.low %v2571_v56, %v2581_v29  ;;  %v5008_v5 = vrot.slane %v3823_v3, 9  ;;  %5271 = vmatprep.mubr.msk.bf16.mxu0 %vm4160_vm14, %v4114_v4  ;;  %vm7030_vm7 = vcmask 261312   ;;  %v3600_v36 = vrot.slane %v3598_v63, 5  ;;  %v1193_v9 = vld [vmem:[#allocation2 + $0xb0] sm:$0x1]  ;;  %v5371_v52 = vld [vmem:[#allocation2 + $0xa8] sm:$0xff]  }
 0x16b   : > { %2190 = vst.msk [vmem:[#allocation3 + $0x40] sm:$0xff] %vm7030_vm7, %v2150_v61  ;;  %v3969_v46 = vrot.slane %v3824_v0, 5  ;;  %v3972_v62 = vrot.slane %v3825_v20, 5  ;;  %v1537_v6 = vshrl.u32 %v1191_v24, 16  ;;  %5272 = vmatmul.mubr.msk.bf16.gmra.mrb[12].mxu0 %vm4160_vm14, %v4115_v19  ;;  %v3586_v55 = vrot.slane %v3585_v11, 4  ;;  %v1975_v13 = vpop.permute.xlu1 %1974  ;;  %vm7031_vm3 = vmmov %vm7030_vm7 }
 0x16c   : > { %2704 = vrot.lane.b32.xlu1 %v4929_v26, %s5394_s9  ;;  %v3595_v21 = vor.u32 %v3594_v34, %v3590_v51  ;;  %v1540_v40 = vshll.u32 %v1191_v24, 16  ;;  %v1546_v17 = vshll.u32 %v1192_v58, 16  ;;  %v1550_v37 = vshrl.u32 %v1192_v58, 16  ;;  %2014 = vst.msk [vmem:[#allocation3 + $0x48] sm:$0xff] %vm2004_vm2, %v1975_v13  ;;  %v1739_v34 = vld [vmem:[#allocation2 + $0xa8] sm:$0xe]  ;;  %vm7032_vm7 = vmmov %vm7025_vm1 }
 0x16d   : > { %v3971_v16 = vrot.slane %v3969_v46, 4  ;;  %v1539_v15 = vrot.slane %v1537_v6, 4  ;;  %v410_v48 = vmax.f32 %v6633_v14, 0.0  ;;  %v3591_v7 = vsel %vm5529_vm10, %v3586_v55, %v3590_v51  ;;  %v3281_v49 = vld [vmem:[#allocation2 + $0xb4] sm:$0xf]  ;;  %1147 = vst.msk [vmem:[#allocation3 + $0x70] sm:$0xff] %vm7025_vm1, %v5371_v52 }
 0x16e   : > { %v3596_v43 = vrot.slane %v3595_v21, 4  ;;  %v1542_v53 = vrot.slane %v1540_v40, 5  ;;  %v3603_v57 = vshrl.u32 %v3281_v49, 16  ;;  %v3606_v59 = vshll.u32 %v3281_v49, 16  ;;  %v3826_v31 = vld [vmem:[#allocation2 + $0xb4] sm:$0xe] }
 0x16f   : > { %v3970_v56 = vsel %vm5494_vm5, %v5008_v5, %v3969_v46  ;;  %v1548_v60 = vrot.slane %v1546_v17, 5  ;;  %v3973_v14 = vsel %vm5494_vm5, %v3971_v16, %v3972_v62  ;;  %v1552_v28 = vrot.slane %v1550_v37, 4  ;;  %v1194_v58 = vld [vmem:[#allocation2 + $0xb4] sm:$0xf] }
 0x170   : > { %3025 = vrot.lane.b32.xlu1 %v4961_v45, %s5392_s7  ;;  %v3601_v23 = vsel %vm5529_vm10, %v3596_v43, %v3600_v36  ;;  %v1543_v18 = vor.u32 %v1542_v53, %v1539_v15  ;;  %v5360_v30 = vld [vmem:[#allocation2 + $0xb4] sm:$0xff]   ;;  %v3605_v38 = vrot.slane %v3603_v57, 4  ;;  %v6682_v3 = vpack.c.bf16 %v409_v22, %v409_v22  ;;  %v3283_v45 = vld [vmem:[#allocation2 + $0xbc] sm:$0x1]  ;;  %v1740_v43 = vld [vmem:[#allocation2 + $0xac] sm:$0xf] }
 0x171   : > { %v4992_v25 = vcombine.low %v3591_v7, %v3601_v23  ;;  %v3282_v44 = vld [vmem:[#allocation2 + $0xb8] sm:$0xf]  ;;  %v6684_v47 = vpack.c.bf16 %v410_v48, %v410_v48  ;;  %v3608_v39 = vrot.slane %v3606_v59, 5  ;;  %v2152_v2 = vpop.permute.xlu1 %2151  ;;  %v2695_v10 = vpop.permute.xlu0 %2694  ;;  %v3622_v51 = vshll.u32 %v3283_v45, 16  ;;  %v3828_v22 = vld [vmem:[#allocation2 + $0xbc] sm:$0x1] }
 0x172   : > { %v3612_v42 = vshll.u32 %v3282_v44, 16  ;;  %v3616_v0 = vshrl.u32 %v3282_v44, 16  ;;  %v1544_v20 = vrot.slane %v1543_v18, 4  ;;  %v5024_v54 = vcombine.low %v3970_v56, %v3973_v14  ;;  %v3827_v35 = vld [vmem:[#allocation2 + $0xb8] sm:$0xf]  ;;  %2191 = vst.msk [vmem:[#allocation3 + $0x48] sm:$0xff] %vm7031_vm3, %v2152_v2 }
 0x173   : > { %3746 = vrot.lane.b32.xlu0 %v4992_v25, %s5395_s10  ;;  %v1553_v24 = vor.u32 %v1552_v28, %v1548_v60  ;;  %v1556_v50 = vshll.u32 %v1193_v9, 16  ;;  %2735 = vst.msk [vmem:[#allocation3 + $0x40] sm:$0xff] %vm2726_vm4, %v2695_v10  ;;  %v3609_v29 = vor.u32 %v3608_v39, %v3605_v38  ;;  %v1195_v4 = vld [vmem:[#allocation2 + $0xb8] sm:$0xf]  ;;  %v3624_v61 = vrot.slane %v3622_v51, 5 }
 0x174   : > { %3203 = vrot.lane.b32.xlu1 %v5360_v30, %s5391_s6  ;;  %v3614_v32 = vrot.slane %v3612_v42, 5  ;;  %v3618_v63 = vrot.slane %v3616_v0, 4  ;;  %v1549_v33 = vsel %vm5529_vm10, %v1544_v20, %v1548_v60  ;;  %v5009_v11 = vrot.slane %v3826_v31, 9  ;;  %v1196_v6 = vld [vmem:[#allocation2 + $0xbc] sm:$0x1]  ;;  %v5372_v16 = vld [vmem:[#allocation2 + $0xb4] sm:$0xff]  }
 0x175   : > { %v1554_v19 = vrot.slane %v1553_v24, 4  ;;  %v1558_v26 = vrot.slane %v1556_v50, 5  ;;  %v3610_v5 = vrot.slane %v3609_v29, 4  ;;  %v3976_v46 = vrot.slane %v3827_v35, 5  ;;  %v3016_v55 = vpop.permute.xlu0 %3015  ;;  %v1741_v56 = vld [vmem:[#allocation2 + $0xb0] sm:$0x1] }
 0x176   : > { %v3619_v36 = vor.u32 %v3618_v63, %v3614_v32  ;;  %v3979_v62 = vrot.slane %v3828_v22, 5  ;;  %v1561_v40 = vshrl.u32 %v1194_v58, 16  ;;  %v1564_v17 = vshll.u32 %v1194_v58, 16  ;;  %3056 = vst.msk [vmem:[#allocation3 + $0x40] sm:$0xff] %vm3047_vm6, %v3016_v55  ;;  %v1742_v18 = vld [vmem:[#allocation2 + $0xb4] sm:$0xe] }
 0x177   : > { %4067 = vrot.lane.b32.xlu0 %v5024_v54, %s5393_s8  ;;  %v1559_v21 = vsel %vm5529_vm10, %v1554_v19, %v1558_v26  ;;  %v1570_v13 = vshll.u32 %v1195_v4, 16  ;;  %v3615_v15 = vsel %vm5529_vm10, %v3610_v5, %v3614_v32  ;;  %v3977_v7 = vsel %vm5494_vm5, %v5009_v11, %v3976_v46  ;;  %1148 = vst.msk [vmem:[#allocation3 + $0x78] sm:$0xff] %vm7032_vm7, %v5372_v16  ;;  %v1743_v44 = vld [vmem:[#allocation2 + $0xb8] sm:$0xf]  ;;  %v1744_v38 = vld [vmem:[#allocation2 + $0xbc] sm:$0x1]  ;;  %vm7039_vm7 = vmmov %vm7031_vm3 }
 0x178   : > { %v3620_v37 = vrot.slane %v3619_v36, 4  ;;  %v4866_v48 = vcombine.low %v1549_v33, %v1559_v21  ;;  %v3978_v49 = vrot.slane %v3976_v46, 4  ;;  %v1563_v53 = vrot.slane %v1561_v40, 4  ;;  %v2240_v20 = vld [vmem:[#allocation2 + $0xb4] sm:$0xf] }
 0x179   : > { %v1566_v57 = vrot.slane %v1564_v17, 5  ;;  %v1572_v59 = vrot.slane %v1570_v13, 5  ;;  %v1574_v23 = vshrl.u32 %v1195_v4, 16  ;;  %v1580_v14 = vshll.u32 %v1196_v6, 16  ;;  %v3194_v28 = vpop.permute.xlu0 %3193  ;;  %v2241_v4 = vld [vmem:[#allocation2 + $0xb8] sm:$0xf] }
 0x17a   : > { %v3625_v60 = vsel %vm5529_vm10, %v3620_v37, %v3624_v61  ;;  %v4882_v9 = vrot.slane %v1739_v34, 9  ;;  %v3980_v52 = vsel %vm5494_vm5, %v3978_v49, %v3979_v62  ;;  %v1896_v25 = vrot.slane %v1740_v43, 5  ;;  %v997_v34 = vld [vmem:[#allocation2 + $0xc0] sm:$0xf]  ;;  %v1001_v55 = vld [vmem:[#allocation2 + $0xc8] sm:$0x1] }
 0x17b   : > { %v4993_v31 = vcombine.low %v3615_v15, %v3625_v60  ;;  %v1567_v30 = vor.u32 %v1566_v57, %v1563_v53  ;;  %vm7033_vm1 = vcmask 458112   ;;  %v5025_v45 = vcombine.low %v3977_v7, %v3980_v52  ;;  %v5361_v40 = vld [vmem:[#allocation2 + $0xb4] sm:$0xff]   ;;  %v2242_v17 = vld [vmem:[#allocation2 + $0xbc] sm:$0x1]  ;;  %v3287_v7 = vld [vmem:[#allocation2 + $0xcc] sm:$0xf] }
 0x17c   : > { %3234 = vst.msk [vmem:[#allocation3 + $0x40] sm:$0xff] %vm7033_vm1, %v3194_v28  ;;  %v1576_v39 = vrot.slane %v1574_v23, 4  ;;  %v1582_v42 = vrot.slane %v1580_v14, 5  ;;  %v1899_v0 = vrot.slane %v1741_v56, 5  ;;  %v1897_v51 = vsel %vm5494_vm5, %v4882_v9, %v1896_v25  ;;  %v3288_v43 = vld [vmem:[#allocation2 + $0xd0] sm:$0xf] }
 0x17d   : > { %v2697_v2 = vpop.permute.xlu1 %2696  ;;  %3748 = vrot.lane.b32.xlu1 %v4993_v31, %s5395_s10  ;;  %v1568_v10 = vrot.slane %v1567_v30, 4  ;;  %v1898_v54 = vrot.slane %v1896_v25, 4  ;;  %v4883_v24 = vrot.slane %v1742_v18, 9  ;;  %4069 = vrot.lane.b32.xlu0 %v5025_v45, %s5393_s8  ;;  %v1903_v35 = vrot.slane %v1743_v44, 5  ;;  %v2786_v56 = vld [vmem:[#allocation2 + $0xb8] sm:$0xf] }
 0x17e   : > { %2736 = vst.msk [vmem:[#allocation3 + $0x48] sm:$0xff] %vm2726_vm4, %v2697_v2  ;;  %v1577_v50 = vor.u32 %v1576_v39, %v1572_v59  ;;  %v1906_v22 = vrot.slane %v1744_v38, 5  ;;  %v822_v29 = vshrl.u32 %v6682_v3, 16  ;;  %v825_v33 = vshll.u32 %v6682_v3, 16  ;;  %v2785_v18 = vld [vmem:[#allocation2 + $0xb4] sm:$0xe] }
 0x17f   : > { %v1573_v32 = vsel %vm5529_vm10, %v1568_v10, %v1572_v59  ;;  %v1900_v63 = vsel %vm5494_vm5, %v1898_v54, %v1899_v0  ;;  %v830_v58 = vshrl.u32 %v6684_v47, 16  ;;  %v1904_v26 = vsel %vm5494_vm5, %v4883_v24, %v1903_v35  ;;  %v2787_v30 = vld [vmem:[#allocation2 + $0xbc] sm:$0x1] }
 0x180   : > { %v1578_v61 = vrot.slane %v1577_v50, 4  ;;  %v4898_v19 = vcombine.low %v1897_v51, %v1900_v63  ;;  %v1905_v11 = vrot.slane %v1903_v35, 4  ;;  %v824_v36 = vrot.slane %v822_v29, 7  ;;  %v6741_v51 = vld [vmem:[#allocation2 + $0xd4] sm:$0x1] }
 0x181   : > { %v3018_v5 = vpop.permute.xlu1 %3017  ;;  %1660 = vrot.lane.b32.xlu1 %v4866_v48, %s5389_s29  ;;  %v832_v46 = vrot.slane %v830_v58, 7  ;;  %v833_v62 = vshll.u32 %v6684_v47, 16  ;;  %v2583_v6 = vshrl.u32 %v2240_v20, 16  ;;  %v2586_v13 = vshll.u32 %v2240_v20, 16 }
 0x182   : > { %3057 = vst.msk [vmem:[#allocation3 + $0x48] sm:$0xff] %vm3047_vm6, %v3018_v5  ;;  %v1583_v3 = vsel %vm5529_vm10, %v1578_v61, %v1582_v42  ;;  %1984 = vrot.lane.b32.xlu0 %v4898_v19, %s5388_s28  ;;  %v1907_v21 = vsel %vm5494_vm5, %v1905_v11, %v1906_v22  ;;  %v2592_v16 = vshll.u32 %v2241_v4, 16  ;;  %v827_v48 = vor.u32 %v825_v33, %v824_v36 }
 0x183   : > { %v4867_v15 = vcombine.low %v1573_v32, %v1583_v3  ;;  %v4899_v37 = vcombine.low %v1904_v26, %v1907_v21  ;;  %v828_v47 = vrot.slane %v824_v36, 4  ;;  %v835_v49 = vor.u32 %v833_v62, %v832_v46 }
 0x184   : > { %v837_v53 = vrot.slane %v832_v46, 4  ;;  %v2585_v57 = vrot.slane %v2583_v6, 4  ;;  %v2588_v59 = vrot.slane %v2586_v13, 5  ;;  %v998_v60 = vsel %vm5548_vm11, %v827_v48, %v997_v34  ;;  %vm7034_vm11 = vmmov %vm7033_vm1 }
 0x185   : > { %1662 = vrot.lane.b32.xlu1 %v4867_v15, %s5389_s29  ;;  %v2594_v23 = vrot.slane %v2592_v16, 5  ;;  %v2596_v14 = vshrl.u32 %v2241_v4, 16  ;;  %v2602_v9 = vshll.u32 %v2242_v17, 16  ;;  %v836_v28 = vsel %vm5556_vm12, %v828_v47, %v835_v49  ;;  %999 = vst [vmem:[#allocation2 + $0xc0] sm:$0xf] %v998_v60  ;;  %v3196_v25 = vpop.permute.xlu1 %3195  ;;  %v3739_v44 = vpop.permute.xlu0 %3738  ;;  %vm7035_vm12 = vmmov %vm7031_vm3  ;;  %s6837_s29 = scalar_lea.vmem %s7009_s4, %s5083_s20  ;;  %s4801_s20 = sshll.u32 %s7108_s19, 1 }
 0x186   : > { %2161 = vrot.lane.b32.xlu0 %v5361_v40, %s5390_s30  ;;  %v2589_v31 = vor.u32 %v2588_v59, %v2585_v57  ;;  %v1002_v52 = vsel %vm5566_vm13, %v837_v53, %v1001_v55  ;;  %1000 = vst.msk [vmem:[#allocation2 + $0xc4] sm:$0xf] %vm427_vm0, %v836_v28  ;;  %v2939_v38 = vrot.slane %v2786_v56, 5  ;;  %v3651_v45 = vshrl.u32 %v3287_v7, 16  ;;  %vm7037_vm13 = vmmov %vm7033_vm1 }
 0x187   : > { %v2598_v8 = vrot.slane %v2596_v14, 4  ;;  %1003 = vst [vmem:[#allocation2 + $0xc8] sm:$0x1] %v1002_v52  ;;  %3235 = vst.msk [vmem:[#allocation3 + $0x48] sm:$0xff] %vm7034_vm11, %v3196_v25  ;;  %v4946_v39 = vrot.slane %v2785_v18, 9  ;;  %v3654_v42 = vshll.u32 %v3287_v7, 16 }
 0x188   : > { %3779 = vst.msk [vmem:[#allocation3 + $0x40] sm:$0xff] %vm3770_vm8, %v3739_v44  ;;  %v2590_v12 = vrot.slane %v2589_v31, 4  ;;  %v3660_v0 = vshll.u32 %v3288_v43, 16  ;;  %v2604_v20 = vrot.slane %v2602_v9, 5  ;;  %v2941_v2 = vrot.slane %v2939_v38, 4 }
 0x189   : > { %1986 = vrot.lane.b32.xlu1 %v4899_v37, %s5388_s28  ;;  %v2599_v27 = vor.u32 %v2598_v8, %v2594_v23  ;;  %v2942_v10 = vrot.slane %v2787_v30, 5  ;;  %v4060_v54 = vpop.permute.xlu0 %4059  ;;  %v3664_v35 = vshrl.u32 %v3288_v43, 16  ;;  %v6746_v22 = vrot.slane %v3651_v45, 4 }
 0x18a   : > { %v2595_v24 = vsel %vm5529_vm10, %v2590_v12, %v2594_v23  ;;  %4100 = vst.msk [vmem:[#allocation3 + $0x40] sm:$0xff] %vm4091_vm9, %v4060_v54  ;;  %v6748_v29 = vrot.slane %v3654_v42, 5  ;;  %v6750_v32 = vrot.slane %v3660_v0, 5  ;;  %v3670_v63 = vshll.u32 %v6741_v51, 16 }
 0x18b   : > { %v2600_v50 = vrot.slane %v2599_v27, 4  ;;  %v2940_v4 = vsel %vm5494_vm5, %v4946_v39, %v2939_v38  ;;  %v2943_v61 = vsel %vm5494_vm5, %v2941_v2, %v2942_v10  ;;  %v6759_v3 = vrot.slane %v3664_v35, 4 }
 0x18c   : > { %v2243_v58 = vld [vmem:[#allocation2 + $0xc0] sm:$0xf]  ;;  %v4962_v17 = vcombine.low %v2940_v4, %v2943_v61  ;;  %v3657_v9 = vor.u32 %v6748_v29, %v6746_v22  ;;  %v3833_v29 = vld [vmem:[#allocation2 + $0xd0] sm:$0xf]  ;;  %vm7040_vm11 = vcmask 64512  }
 0x18d   : > { %v2605_v33 = vsel %vm5529_vm10, %v2600_v50, %v2604_v20  ;;  %v2788_v19 = vld [vmem:[#allocation2 + $0xc0] sm:$0xe]  ;;  %v2244_v34 = vld [vmem:[#allocation2 + $0xc4] sm:$0xf]  ;;  %v2607_v5 = vshrl.u32 %v2243_v58, 16  ;;  %v4062_v36 = vpop.permute.xlu0 %4061  ;;  %v2610_v62 = vshll.u32 %v2243_v58, 16  ;;  %v3667_v39 = vor.u32 %v6759_v3, %v6750_v32 }
 0x18e   : > { %v5362_v26 = vld [vmem:[#allocation2 + $0xc0] sm:$0xff]   ;;  %v4930_v11 = vcombine.low %v2595_v24, %v2605_v33  ;;  %v2245_v46 = vld [vmem:[#allocation2 + $0xc8] sm:$0x1]  ;;  %v2616_v6 = vshll.u32 %v2244_v34, 16  ;;  %v2620_v55 = vshrl.u32 %v2244_v34, 16  ;;  %v4947_v49 = vrot.slane %v2788_v19, 9 }
 0x18f   : > { %2163 = vrot.lane.b32.xlu1 %v5362_v26, %s5390_s30  ;;  %v2609_v21 = vrot.slane %v2607_v5, 4  ;;  %v2626_v40 = vshll.u32 %v2245_v46, 16  ;;  %v2789_v13 = vld [vmem:[#allocation2 + $0xc4] sm:$0xf]  ;;  %v2790_v16 = vld [vmem:[#allocation2 + $0xc8] sm:$0x1] }
 0x190   : > { %2706 = vrot.lane.b32.xlu0 %v4930_v11, %s5394_s9  ;;  %v3741_v15 = vpop.permute.xlu1 %3740  ;;  %v2612_v37 = vrot.slane %v2610_v62, 5  ;;  %v2618_v48 = vrot.slane %v2616_v6, 5  ;;  %v2622_v47 = vrot.slane %v2620_v55, 4  ;;  %v2946_v7 = vrot.slane %v2789_v13, 5  ;;  %v5365_v57 = vld [vmem:[#allocation2 + $0xc0] sm:$0xff]  }
 0x191   : > { %3780 = vst.msk [vmem:[#allocation3 + $0x48] sm:$0xff] %vm3770_vm8, %v3741_v15  ;;  %v2628_v43 = vrot.slane %v2626_v40, 5  ;;  %v2949_v53 = vrot.slane %v2790_v16, 5  ;;  %v3284_v23 = vld [vmem:[#allocation2 + $0xc0] sm:$0xf]  ;;  %v4116_v18 = vld [vmem:[#allocation3 + $0x40] sm:$0xff] }
 0x192   : > { %4101 = vst.msk [vmem:[#allocation3 + $0x48] sm:$0xff] %vm4091_vm9, %v4062_v36  ;;  %v2613_v59 = vor.u32 %v2612_v37, %v2609_v21  ;;  %v2623_v56 = vor.u32 %v2622_v47, %v2618_v48  ;;  %v2948_v60 = vrot.slane %v2946_v7, 4  ;;  %v3285_v14 = vld [vmem:[#allocation2 + $0xc4] sm:$0xf]  ;;  %v3286_v28 = vld [vmem:[#allocation2 + $0xc8] sm:$0x1]  ;;  %5275 = vmatprep.mubr.msk.bf16.mxu1 %vm4160_vm14, %v4116_v18  ;;  %v2947_v0 = vsel %vm5494_vm5, %v4947_v49, %v2946_v7 }
 0x193   : > { %v3627_v31 = vshrl.u32 %v3284_v23, 16  ;;  %v3630_v52 = vshll.u32 %v3284_v23, 16  ;;  %v3636_v30 = vshll.u32 %v3285_v14, 16  ;;  %v3640_v25 = vshrl.u32 %v3285_v14, 16  ;;  %v3829_v42 = vld [vmem:[#allocation2 + $0xc0] sm:$0xe] }
 0x194   : > { %3027 = vrot.lane.b32.xlu0 %v4962_v17, %s5392_s7  ;;  %v1653_v44 = vpop.permute.xlu1 %1652  ;;  %v1977_v8 = vpop.permute.xlu0 %1976  ;;  %v2614_v38 = vrot.slane %v2613_v59, 4  ;;  %v2624_v45 = vrot.slane %v2623_v56, 4  ;;  %v3646_v12 = vshll.u32 %v3286_v28, 16  ;;  %v3830_v10 = vld [vmem:[#allocation2 + $0xc4] sm:$0xf]  ;;  %v2950_v50 = vsel %vm5494_vm5, %v2948_v60, %v2949_v53  ;;  %v5366_v47 = vld [vmem:[#allocation2 + $0xcc] sm:$0xff]  }
 0x195   : > { %1691 = vst.msk [vmem:[#allocation3 + $0x50] sm:$0xff] %vm1680_vm15, %v1653_v44  ;;  %v3629_v27 = vrot.slane %v3627_v31, 4  ;;  %v3632_v20 = vrot.slane %v3630_v52, 5  ;;  %v3638_v2 = vrot.slane %v3636_v30, 5  ;;  %v3642_v35 = vrot.slane %v3640_v25, 4 }
 0x196   : > { %2015 = vst.msk [vmem:[#allocation3 + $0x50] sm:$0xff] %vm2004_vm2, %v1977_v8  ;;  %v2619_v54 = vsel %vm5529_vm10, %v2614_v38, %v2618_v48  ;;  %v2629_v24 = vsel %vm5529_vm10, %v2624_v45, %v2628_v43  ;;  %v3831_v22 = vld [vmem:[#allocation2 + $0xc8] sm:$0x1]  ;;  %v3648_v4 = vrot.slane %v3646_v12, 5  ;;  %v5010_v11 = vrot.slane %v3829_v42, 9 }
 0x197   : > { %v4931_v33 = vcombine.low %v2619_v54, %v2629_v24  ;;  %v3633_v58 = vor.u32 %v3632_v20, %v3629_v27  ;;  %v3643_v26 = vor.u32 %v3642_v35, %v3638_v2  ;;  %v3983_v34 = vrot.slane %v3830_v10, 5  ;;  %v3832_v13 = vld [vmem:[#allocation2 + $0xcc] sm:$0xe]  ;;  %v3834_v15 = vld [vmem:[#allocation2 + $0xd4] sm:$0x1] }
 0x198   : > { %3205 = vrot.lane.b32.xlu0 %v5365_v57, %s5391_s6  ;;  %v1655_v61 = vpop.permute.xlu1 %1654  ;;  %v2154_v19 = vpop.permute.xlu0 %2153  ;;  %v3986_v5 = vrot.slane %v3831_v22, 5  ;;  %v4963_v46 = vcombine.low %v2947_v0, %v2950_v50  ;;  %v3672_v6 = vrot.slane %v3670_v63, 5  ;;  %v3990_v55 = vrot.slane %v3833_v29, 5 }
 0x199   : > { %1692 = vst.msk [vmem:[#allocation3 + $0x58] sm:$0xff] %vm1680_vm15, %v1655_v61  ;;  %v4117_v36 = vld [vmem:[#allocation3 + $0x48] sm:$0xff]  ;;  %2708 = vrot.lane.b32.xlu1 %v4931_v33, %s5394_s9  ;;  %v3634_v62 = vrot.slane %v3633_v58, 4  ;;  %v3644_v3 = vrot.slane %v3643_v26, 4  ;;  %v3658_v21 = vrot.slane %v3657_v9, 4  ;;  %v3668_v40 = vrot.slane %v3667_v39, 4 }
 0x19a   : > { %2192 = vst.msk [vmem:[#allocation3 + $0x50] sm:$0xff] %vm7035_vm12, %v2154_v19  ;;  %5276 = vmatmul.mubr.msk.bf16.vlgmr.msra.gmra.mrb[0].mxu1 %vm4160_vm14, %v4117_v36  ;;  %v3985_v17 = vrot.slane %v3983_v34, 4  ;;  %v3984_v51 = vsel %vm5494_vm5, %v5010_v11, %v3983_v34  ;;  %v5011_v43 = vrot.slane %v3832_v13, 9  ;;  %v3992_v57 = vrot.slane %v3990_v55, 4  ;;  %vm7041_vm12 = vmmov %vm7040_vm11 }
 0x19b   : > { %v3639_v16 = vsel %vm5529_vm10, %v3634_v62, %v3638_v2  ;;  %v3649_v48 = vsel %vm5529_vm10, %v3644_v3, %v3648_v4  ;;  %v3663_v49 = vsel %vm5529_vm10, %v3658_v21, %v6750_v32  ;;  %v3673_v53 = vsel %vm5529_vm10, %v3668_v40, %v3672_v6  ;;  %vm7036_vm10 = vmmov %vm7031_vm3 }
 0x19c   : > { %v1979_v37 = vpop.permute.xlu1 %1978  ;;  %v3987_v63 = vsel %vm5494_vm5, %v3985_v17, %v3986_v5  ;;  %v4994_v7 = vcombine.low %v3639_v16, %v3649_v48  ;;  %v3993_v59 = vrot.slane %v3834_v15, 5  ;;  %v4995_v23 = vcombine.low %v3663_v49, %v3673_v53 }
 0x19d   : > { %2016 = vst.msk [vmem:[#allocation3 + $0x58] sm:$0xff] %vm2004_vm2, %v1979_v37  ;;  %3029 = vrot.lane.b32.xlu1 %v4963_v46, %s5392_s7  ;;  %v5026_v56 = vcombine.low %v3984_v51, %v3987_v63  ;;  %v3991_v14 = vsel %vm5494_vm5, %v5011_v43, %v3990_v55  ;;  %s235_s7 = scalar_lea.vmem %s7010_s5, %s4801_s20 }
 0x19e   : > { %3750 = vrot.lane.b32.xlu0 %v4994_v7, %s5395_s10  ;;  %v3994_v32 = vsel %vm5494_vm5, %v3992_v57, %v3993_v59  ;;  %vm7038_vm5 = vmmov %vm7033_vm1 }
 0x19f   : > { %v5027_v18 = vcombine.low %v3991_v14, %v3994_v32 }
 0x1a0   : > { %v2699_v60 = vpop.permute.xlu0 %2698 }
 0x1a1   : > { %2737 = vst.msk [vmem:[#allocation3 + $0x50] sm:$0xff] %vm2726_vm4, %v2699_v60  ;;  %3207 = vrot.lane.b32.xlu1 %v5366_v47, %s5391_s6 }
 0x1a2   : > { %4071 = vrot.lane.b32.xlu0 %v5026_v56, %s5393_s8 }
 0x1a4   : > { %v3020_v41 = vpop.permute.xlu0 %3019 }
 0x1a5   : > { %v2156_v9 = vpop.permute.xlu1 %2155  ;;  %3058 = vst.msk [vmem:[#allocation3 + $0x50] sm:$0xff] %vm3047_vm6, %v3020_v41  ;;  %3752 = vrot.lane.b32.xlu1 %v4995_v23, %s5395_s10 }
 0x1a6   : > { %2193 = vst.msk [vmem:[#allocation3 + $0x58] sm:$0xff] %vm7036_vm10, %v2156_v9  ;;  %vm7042_vm10 = vmmov %vm7040_vm11 }
 0x1a8   : > { %v3198_v28 = vpop.permute.xlu0 %3197 }
 0x1a9   : > { %4073 = vrot.lane.b32.xlu1 %v5027_v18, %s5393_s8  ;;  %3236 = vst.msk [vmem:[#allocation3 + $0x50] sm:$0xff] %vm7037_vm13, %v3198_v28  ;;  %vm7043_vm13 = vmmov %vm7042_vm10 }
 0x1af   : > { %v2701_v31 = vpop.permute.xlu1 %2700 }
 0x1b0   : > { %2738 = vst.msk [vmem:[#allocation3 + $0x58] sm:$0xff] %vm2726_vm4, %v2701_v31 }
 0x1b3   : > { %v3022_v1 = vpop.permute.xlu1 %3021 }
 0x1b4   : > { %3059 = vst.msk [vmem:[#allocation3 + $0x58] sm:$0xff] %vm3047_vm6, %v3022_v1 }
 0x1b6   : > { %v3743_v52 = vpop.permute.xlu0 %3742 }
 0x1b7   : > { %v3200_v30 = vpop.permute.xlu1 %3199  ;;  %3781 = vst.msk [vmem:[#allocation3 + $0x50] sm:$0xff] %vm3770_vm8, %v3743_v52 }
 0x1b8   : > { %3237 = vst.msk [vmem:[#allocation3 + $0x58] sm:$0xff] %vm7038_vm5, %v3200_v30  ;;  %vm7044_vm5 = vmmov %vm7042_vm10 }
 0x1ba   : > { %v4064_v25 = vpop.permute.xlu0 %4063 }
 0x1bb   : > { %4102 = vst.msk [vmem:[#allocation3 + $0x50] sm:$0xff] %vm4091_vm9, %v4064_v25 }
 0x1c0   : > { %v4066_v44 = vpop.permute.xlu0 %4065 }
 0x1c1   : > { %v3745_v8 = vpop.permute.xlu1 %3744 }
 0x1c2   : > { %3782 = vst.msk [vmem:[#allocation3 + $0x58] sm:$0xff] %vm3770_vm8, %v3745_v8  ;;  %v4118_v38 = vld [vmem:[#allocation3 + $0x50] sm:$0xff] }
 0x1c3   : > { %4103 = vst.msk [vmem:[#allocation3 + $0x58] sm:$0xff] %vm4091_vm9, %v4066_v44  ;;  %5279 = vmatprep.mubr.msk.bf16.mxu1 %vm4160_vm14, %v4118_v38 }
 0x1c5   : > { %v1657_v45 = vpop.permute.xlu1 %1656 }
 0x1c6   : > { %1693 = vst.msk [vmem:[#allocation3 + $0x60] sm:$0xff] %vm1680_vm15, %v1657_v45 }
 0x1c7   : > { %v1981_v12 = vpop.permute.xlu0 %1980 }
 0x1c8   : > { %2017 = vst.msk [vmem:[#allocation3 + $0x60] sm:$0xff] %vm2004_vm2, %v1981_v12 }
 0x1c9   : > { %v1659_v39 = vpop.permute.xlu1 %1658 }
 0x1ca   : > { %1694 = vst.msk [vmem:[#allocation3 + $0x68] sm:$0xff] %vm1680_vm15, %v1659_v39  ;;  %v4119_v42 = vld [vmem:[#allocation3 + $0x58] sm:$0xff] }
 0x1cb   : > { %v2158_v0 = vpop.permute.xlu0 %2157  ;;  %5280 = vmatmul.mubr.msk.bf16.gmra.mrb[4].mxu1 %vm4160_vm14, %v4119_v42 }
 0x1cc   : > { %2194 = vst.msk [vmem:[#allocation3 + $0x60] sm:$0xff] %vm7031_vm3, %v2158_v0  ;;  %vm7045_vm3 = vmmov %vm7044_vm5 }
 0x1cd   : > { %v1983_v27 = vpop.permute.xlu1 %1982 }
 0x1ce   : > { %2018 = vst.msk [vmem:[#allocation3 + $0x68] sm:$0xff] %vm2004_vm2, %v1983_v27 }
 0x1d2   : > { %v2160_v2 = vpop.permute.xlu1 %2159 }
 0x1d3   : > { %v2703_v20 = vpop.permute.xlu0 %2702  ;;  %2195 = vst.msk [vmem:[#allocation3 + $0x68] sm:$0xff] %vm7039_vm7, %v2160_v2  ;;  %vm7046_vm7 = vmmov %vm7045_vm3 }
 0x1d4   : > { %2739 = vst.msk [vmem:[#allocation3 + $0x60] sm:$0xff] %vm2726_vm4, %v2703_v20 }
 0x1d7   : > { %v3024_v10 = vpop.permute.xlu0 %3023 }
 0x1d8   : > { %3060 = vst.msk [vmem:[#allocation3 + $0x60] sm:$0xff] %vm3047_vm6, %v3024_v10  ;;  %v5261_v54 = vpop.f32.mrb[0].mxu0 }
 0x1d9   : > { %v5119_v24 = vpack.c.bf16 %v5261_v54, %v5261_v54  ;;  %v4247_v50 = vpop.f32.mrb[1].mxu0  ;;  %v4606_v58 = vmul.f32 %v5261_v54, %v5261_v54  ;;  %v4537_v62 = vsel %vm7042_vm10, %v5261_v54, 0.0 }
 0x1da   : > { %v5117_v35 = vpack.c.bf16 %v4247_v50, %v4247_v50  ;;  %v4604_v22 = vmul.f32 %v4247_v50, %v4247_v50  ;;  %v5262_v29 = vpop.f32.mrb[2].mxu0  ;;  %v4534_v19 = vsel %vm7040_vm11, %v4247_v50, 0.0 }
 0x1db   : > { %v3202_v33 = vpop.permute.xlu0 %3201  ;;  %4504 = vst.msk [vmem:[%s6837_s29 + $0x8] sm:$0xf] %vm427_vm0, %v5119_v24  ;;  %v5120_v4 = vpack.c.bf16 %v5262_v29, %v5262_v29  ;;  %v4250_v61 = vpop.f32.mrb[3].mxu0  ;;  %v4607_v5 = vmul.f32 %v5262_v29, %v5262_v29  ;;  %v4639_v40 = vsel %vm7045_vm3, %v4606_v58, 0.0  ;;  %v4539_v13 = vsel %vm7046_vm7, %v5262_v29, 0.0 }
 0x1dc   : > { %3238 = vst.msk [vmem:[#allocation3 + $0x60] sm:$0xff] %vm7033_vm1, %v3202_v33  ;;  %v5118_v26 = vpack.c.bf16 %v4250_v61, %v4250_v61  ;;  %v4535_v11 = vsel %vm7041_vm12, %v4250_v61, 0.0  ;;  %v4605_v34 = vmul.f32 %v4250_v61, %v4250_v61  ;;  %v4636_v6 = vsel %vm7043_vm13, %v4604_v22, 0.0  ;;  %vm7047_vm1 = vmmov %vm7045_vm3 }
 0x1dd   : > { %4502 = vst.msk [vmem:[%s6837_s29] sm:$0xf] %vm427_vm0, %v5117_v35  ;;  %4505 = vst.msk [vmem:[%s6837_s29 + $0xc] sm:$0xf] %vm427_vm0, %v5120_v4  ;;  %v4536_v36 = vadd.f32 %v4535_v11, %v4534_v19  ;;  %v4641_v16 = vsel %vm7047_vm1, %v4607_v5, 0.0  ;;  %vm7051_vm13 = vcmask 458112  }
 0x1de   : > { %v2705_v46 = vpop.permute.xlu1 %2704  ;;  %4503 = vst.msk [vmem:[%s6837_s29 + $0x4] sm:$0xf] %vm427_vm0, %v5118_v26  ;;  %v4637_v55 = vsel %vm7044_vm5, %v4605_v34, 0.0  ;;  %vm7048_vm11 = vmmov %vm7047_vm1 }
 0x1df   : > { %2740 = vst.msk [vmem:[#allocation3 + $0x68] sm:$0xff] %vm2726_vm4, %v2705_v46  ;;  %v4538_v3 = vadd.f32 %v4537_v62, %v4536_v36  ;;  %v4638_v21 = vadd.f32 %v4637_v55, %v4636_v6  ;;  %vm7049_vm12 = vmmov %vm7047_vm1 }
 0x1e0   : > { %v5265_v17 = vpop.f32.mrb[4].mxu0  ;;  %vm7050_vm10 = vmmov %vm7047_vm1 }
 0x1e1   : > { %v4640_v15 = vadd.f32 %v4639_v40, %v4638_v21  ;;  %v5123_v37 = vpack.c.bf16 %v5265_v17, %v5265_v17  ;;  %v4263_v48 = vpop.f32.mrb[5].mxu0  ;;  %v4540_v47 = vadd.f32 %v4539_v13, %v4538_v3  ;;  %v4610_v32 = vmul.f32 %v5265_v17, %v5265_v17  ;;  %vm7052_vm5 = vmmov %vm7047_vm1 }
 0x1e2   : > { %v3026_v51 = vpop.permute.xlu1 %3025  ;;  %v5121_v63 = vpack.c.bf16 %v4263_v48, %v4263_v48  ;;  %v4541_v7 = vsel %vm7048_vm11, %v4263_v48, 0.0  ;;  %v4608_v43 = vmul.f32 %v4263_v48, %v4263_v48  ;;  %v5266_v49 = vpop.f32.mrb[6].mxu0  ;;  %v4545_v1 = vsel %vm7052_vm5, %v5265_v17, 0.0  ;;  %vm7053_vm3 = vmmov %vm7047_vm1 }
 0x1e3   : > { %3061 = vst.msk [vmem:[#allocation3 + $0x68] sm:$0xff] %vm3047_vm6, %v3026_v51  ;;  %v4642_v53 = vadd.f32 %v4641_v16, %v4640_v15  ;;  %v5124_v57 = vpack.c.bf16 %v5266_v49, %v5266_v49  ;;  %v4266_v59 = vpop.f32.mrb[7].mxu0  ;;  %v4542_v56 = vadd.f32 %v4541_v7, %v4540_v47  ;;  %v4611_v52 = vmul.f32 %v5266_v49, %v5266_v49  ;;  %vm7054_vm7 = vmmov %vm7047_vm1 }
 0x1e4   : > { %4508 = vst.msk [vmem:[%s6837_s29 + $0x18] sm:$0xf] %vm427_vm0, %v5123_v37  ;;  %4506 = vst.msk [vmem:[%s6837_s29 + $0x10] sm:$0xf] %vm427_vm0, %v5121_v63  ;;  %v4643_v60 = vsel %vm7049_vm12, %v4608_v43, 0.0  ;;  %v5122_v23 = vpack.c.bf16 %v4266_v59, %v4266_v59  ;;  %v4543_v9 = vsel %vm7050_vm10, %v4266_v59, 0.0  ;;  %v4609_v18 = vmul.f32 %v4266_v59, %v4266_v59 }
 0x1e5   : > { %v3747_v14 = vpop.permute.xlu0 %3746  ;;  %v4644_v41 = vadd.f32 %v4643_v60, %v4642_v53  ;;  %4509 = vst.msk [vmem:[%s6837_s29 + $0x1c] sm:$0xf] %vm427_vm0, %v5124_v57  ;;  %v4544_v31 = vadd.f32 %v4543_v9, %v4542_v56  ;;  %v4647_v38 = vsel %vm7054_vm7, %v4610_v32, 0.0  ;;  %v4547_v45 = vsel %vm7047_vm1, %v5266_v49, 0.0  ;;  %vm7055_vm11 = vmmov %vm7047_vm1 }
 0x1e6   : > { %v3204_v28 = vpop.permute.xlu1 %3203  ;;  %3783 = vst.msk [vmem:[#allocation3 + $0x60] sm:$0xff] %vm3770_vm8, %v3747_v14  ;;  %v4645_v30 = vsel %vm7053_vm3, %v4609_v18, 0.0  ;;  %v4649_v42 = vsel %vm7055_vm11, %v4611_v52, 0.0  ;;  %vm7056_vm12 = vcmask 261312   ;;  %vm7062_vm5 = vmmov %vm7047_vm1 }
 0x1e7   : > { %4507 = vst.msk [vmem:[%s6837_s29 + $0x14] sm:$0xf] %vm427_vm0, %v5122_v23  ;;  %v4546_v25 = vadd.f32 %v4545_v1, %v4544_v31  ;;  %v4646_v44 = vadd.f32 %v4645_v30, %v4644_v41  ;;  %vm7057_vm10 = vmmov %vm7056_vm12 }
 0x1e8   : > { %3239 = vst.msk [vmem:[#allocation3 + $0x68] sm:$0xff] %vm7051_vm13, %v3204_v28  ;;  %vm7063_vm3 = vmmov %vm7047_vm1 }
 0x1e9   : > { %v4068_v8 = vpop.permute.xlu0 %4067  ;;  %v4648_v12 = vadd.f32 %v4647_v38, %v4646_v44  ;;  %v4548_v39 = vadd.f32 %v4547_v45, %v4546_v25  ;;  %vm7064_vm7 = vmmov %vm7047_vm1 }
 0x1ea   : > { %4104 = vst.msk [vmem:[#allocation3 + $0x60] sm:$0xff] %vm4091_vm9, %v4068_v8  ;;  %vm7066_vm11 = vmmov %vm7047_vm1 }
 0x1eb   : > { %v4650_v0 = vadd.f32 %v4649_v42, %v4648_v12 }
 0x1ef   : > { %v3749_v27 = vpop.permute.xlu1 %3748  ;;  %v4070_v20 = vpop.permute.xlu0 %4069 }
 0x1f0   : > { %3784 = vst.msk [vmem:[#allocation3 + $0x68] sm:$0xff] %vm3770_vm8, %v3749_v27 }
 0x1f1   : > { %4105 = vst.msk [vmem:[#allocation3 + $0x68] sm:$0xff] %vm4091_vm9, %v4070_v20  ;;  %v4120_v2 = vld [vmem:[#allocation3 + $0x60] sm:$0xff] }
 0x1f2   : > { %5283 = vmatprep.mubr.msk.bf16.mxu1 %vm4160_vm14, %v4120_v2 }
 0x1f3   : > { %v1661_v10 = vpop.permute.xlu1 %1660 }
 0x1f4   : > { %1695 = vst.msk [vmem:[#allocation3 + $0x70] sm:$0xff] %vm1680_vm15, %v1661_v10  ;;  %v1985_v54 = vpop.permute.xlu0 %1984 }
 0x1f5   : > { %2019 = vst.msk [vmem:[#allocation3 + $0x70] sm:$0xff] %vm2004_vm2, %v1985_v54 }
 0x1f7   : > { %v1663_v24 = vpop.permute.xlu1 %1662 }
 0x1f8   : > { %1696 = vst.msk [vmem:[#allocation3 + $0x78] sm:$0xff] %vm1680_vm15, %v1663_v24  ;;  %v2162_v50 = vpop.permute.xlu0 %2161  ;;  %v4121_v35 = vld [vmem:[#allocation3 + $0x68] sm:$0xff]  ;;  %vm7058_vm15 = vmmov %vm7051_vm13 }
 0x1f9   : > { %2196 = vst.msk [vmem:[#allocation3 + $0x70] sm:$0xff] %vm7056_vm12, %v2162_v50  ;;  %5284 = vmatmul.mubr.msk.bf16.gmra.mrb[8].mxu1 %vm4160_vm14, %v4121_v35  ;;  %vm7060_vm13 = vmmov %vm7047_vm1 }
 0x1fa   : > { %vm7067_vm12 = vmmov %vm7047_vm1 }
 0x1fb   : > { %v1987_v22 = vpop.permute.xlu1 %1986 }
 0x1fc   : > { %2020 = vst.msk [vmem:[#allocation3 + $0x78] sm:$0xff] %vm2004_vm2, %v1987_v22  ;;  %vm7059_vm2 = vmmov %vm7047_vm1 }
 0x201   : > { %v2164_v29 = vpop.permute.xlu1 %2163 }
 0x202   : > { %v2707_v33 = vpop.permute.xlu0 %2706  ;;  %2197 = vst.msk [vmem:[#allocation3 + $0x78] sm:$0xff] %vm7057_vm10, %v2164_v29  ;;  %vm7071_vm10 = vmmov %vm7047_vm1 }
 0x203   : > { %2741 = vst.msk [vmem:[#allocation3 + $0x70] sm:$0xff] %vm2726_vm4, %v2707_v33 }
 0x206   : > { %v3028_v58 = vpop.permute.xlu0 %3027 }
 0x207   : > { %3062 = vst.msk [vmem:[#allocation3 + $0x70] sm:$0xff] %vm3047_vm6, %v3028_v58 }
 0x20a   : > { %v3206_v4 = vpop.permute.xlu0 %3205 }
 0x20b   : > { %3240 = vst.msk [vmem:[#allocation3 + $0x70] sm:$0xff] %vm7058_vm15, %v3206_v4  ;;  %v2709_v61 = vpop.permute.xlu1 %2708 }
 0x20c   : > { %v5269_v19 = vpop.f32.mrb[8].mxu0  ;;  %2742 = vst.msk [vmem:[#allocation3 + $0x78] sm:$0xff] %vm2726_vm4, %v2709_v61  ;;  %vm7061_vm4 = vmmov %vm7047_vm1 }
 0x20d   : > { %v5127_v26 = vpack.c.bf16 %v5269_v19, %v5269_v19  ;;  %v4279_v11 = vpop.f32.mrb[9].mxu0  ;;  %v4614_v13 = vmul.f32 %v5269_v19, %v5269_v19  ;;  %v4553_v51 = vsel %vm7062_vm5, %v5269_v19, 0.0  ;;  %vm7076_vm5 = vmmov %vm7047_vm1 }
 0x20e   : > { %v5125_v34 = vpack.c.bf16 %v4279_v11, %v4279_v11  ;;  %v4549_v5 = vsel %vm7059_vm2, %v4279_v11, 0.0  ;;  %v4612_v36 = vmul.f32 %v4279_v11, %v4279_v11  ;;  %v5270_v46 = vpop.f32.mrb[10].mxu0  ;;  %vm7073_vm2 = vmmov %vm7047_vm1 }
 0x20f   : > { %4512 = vst.msk [vmem:[%s6837_s29 + $0x28] sm:$0xf] %vm427_vm0, %v5127_v26  ;;  %v4550_v62 = vadd.f32 %v4549_v5, %v4548_v39  ;;  %v5128_v6 = vpack.c.bf16 %v5270_v46, %v5270_v46  ;;  %v4282_v55 = vpop.f32.mrb[11].mxu0  ;;  %v3030_v3 = vpop.permute.xlu1 %3029  ;;  %v4615_v63 = vmul.f32 %v5270_v46, %v5270_v46  ;;  %v4555_v49 = vsel %vm7064_vm7, %v5270_v46, 0.0  ;;  %vm7078_vm7 = vmmov %vm7047_vm1 }
 0x210   : > { %4510 = vst.msk [vmem:[%s6837_s29 + $0x20] sm:$0xf] %vm427_vm0, %v5125_v34  ;;  %v4651_v21 = vsel %vm7060_vm13, %v4612_v36, 0.0  ;;  %v5126_v40 = vpack.c.bf16 %v4282_v55, %v4282_v55  ;;  %v4551_v17 = vsel %vm7061_vm4, %v4282_v55, 0.0  ;;  %v4613_v37 = vmul.f32 %v4282_v55, %v4282_v55  ;;  %v3751_v48 = vpop.permute.xlu0 %3750  ;;  %vm7074_vm13 = vmmov %vm7047_vm1 }
 0x211   : > { %3063 = vst.msk [vmem:[#allocation3 + $0x78] sm:$0xff] %vm3047_vm6, %v3030_v3  ;;  %v4652_v16 = vadd.f32 %v4651_v21, %v4650_v0  ;;  %v4552_v15 = vadd.f32 %v4551_v17, %v4550_v62  ;;  %vm7065_vm6 = vmmov %vm7058_vm15  ;;  %v4655_v57 = vsel %vm7047_vm1, %v4614_v13, 0.0  ;;  %v4657_v23 = vsel %vm7066_vm11, %v4615_v63, 0.0 }
 0x212   : > { %4513 = vst.msk [vmem:[%s6837_s29 + $0x2c] sm:$0xf] %vm427_vm0, %v5128_v6  ;;  %4511 = vst.msk [vmem:[%s6837_s29 + $0x24] sm:$0xf] %vm427_vm0, %v5126_v40  ;;  %v4653_v7 = vsel %vm7063_vm3, %v4613_v37, 0.0 }
 0x213   : > { %3785 = vst.msk [vmem:[#allocation3 + $0x70] sm:$0xff] %vm3770_vm8, %v3751_v48  ;;  %v4554_v47 = vadd.f32 %v4553_v51, %v4552_v15  ;;  %v3208_v43 = vpop.permute.xlu1 %3207  ;;  %v4654_v53 = vadd.f32 %v4653_v7, %v4652_v16  ;;  %vm7072_vm15 = vmmov %vm7047_vm1 }
 0x214   : > { %3241 = vst.msk [vmem:[#allocation3 + $0x78] sm:$0xff] %vm7065_vm6, %v3208_v43  ;;  %v4072_v56 = vpop.permute.xlu0 %4071  ;;  %vm7075_vm4 = vmmov %vm7047_vm1 }
 0x215   : > { %v4556_v59 = vadd.f32 %v4555_v49, %v4554_v47  ;;  %v4656_v60 = vadd.f32 %v4655_v57, %v4654_v53  ;;  %4106 = vst.msk [vmem:[#allocation3 + $0x70] sm:$0xff] %vm4091_vm9, %v4072_v56  ;;  %vm7077_vm3 = vmmov %vm7047_vm1 }
 0x216   : > { %vm7079_vm6 = vmmov %vm7047_vm1 }
 0x217   : > { %v3753_v14 = vpop.permute.xlu1 %3752  ;;  %v4658_v32 = vadd.f32 %v4657_v23, %v4656_v60  ;;  %vm7080_vm11 = vmmov %vm7047_vm1 }
 0x218   : > { %3786 = vst.msk [vmem:[#allocation3 + $0x78] sm:$0xff] %vm3770_vm8, %v3753_v14  ;;  %vm7068_vm8 = vmmov %vm7047_vm1 }
 0x21b   : > { %v4074_v41 = vpop.permute.xlu1 %4073 }
 0x21c   : > { %4107 = vst.msk [vmem:[#allocation3 + $0x78] sm:$0xff] %vm4091_vm9, %v4074_v41  ;;  %v4122_v9 = vld [vmem:[#allocation3 + $0x70] sm:$0xff]  ;;  %vm7070_vm9 = vmmov %vm7047_vm1 }
 0x21d   : > { %5287 = vmatprep.mubr.msk.bf16.mxu1 %vm4160_vm14, %v4122_v9 }
 0x223   : > { %v4123_v18 = vld [vmem:[#allocation3 + $0x78] sm:$0xff] }
 0x224   : > { %5288 = vmatmul.mubr.msk.bf16.gmra.mrb[12].mxu1 %vm4160_vm14, %v4123_v18  ;;  %vm7069_vm14 = vmmov %vm7047_vm1 }
 0x23e   : > { %v5273_v28 = vpop.f32.mrb[12].mxu0 }
 0x23f   : > { %v5131_v31 = vpack.c.bf16 %v5273_v28, %v5273_v28  ;;  %v4295_v1 = vpop.f32.mrb[13].mxu0  ;;  %v4618_v0 = vmul.f32 %v5273_v28, %v5273_v28  ;;  %v4561_v10 = vsel %vm7070_vm9, %v5273_v28, 0.0  ;;  %vm7084_vm9 = vmmov %vm7047_vm1 }
 0x240   : > { %v5129_v52 = vpack.c.bf16 %v4295_v1, %v4295_v1  ;;  %v4557_v30 = vsel %vm7067_vm12, %v4295_v1, 0.0  ;;  %v4616_v25 = vmul.f32 %v4295_v1, %v4295_v1  ;;  %v5274_v44 = vpop.f32.mrb[14].mxu0  ;;  %vm7081_vm12 = vmmov %vm7047_vm1 }
 0x241   : > { %4516 = vst.msk [vmem:[%s6837_s29 + $0x38] sm:$0xf] %vm427_vm0, %v5131_v31  ;;  %v4558_v8 = vadd.f32 %v4557_v30, %v4556_v59  ;;  %v5132_v38 = vpack.c.bf16 %v5274_v44, %v5274_v44  ;;  %v4298_v45 = vpop.f32.mrb[15].mxu0  ;;  %v4619_v54 = vmul.f32 %v5274_v44, %v5274_v44  ;;  %v4563_v35 = vsel %vm7072_vm15, %v5274_v44, 0.0  ;;  %vm7086_vm15 = vmmov %vm7047_vm1 }
 0x242   : > { %4514 = vst.msk [vmem:[%s6837_s29 + $0x30] sm:$0xf] %vm427_vm0, %v5129_v52  ;;  %v4659_v12 = vsel %vm7068_vm8, %v4616_v25, 0.0  ;;  %v5130_v39 = vpack.c.bf16 %v4298_v45, %v4298_v45  ;;  %v4559_v42 = vsel %vm7069_vm14, %v4298_v45, 0.0  ;;  %v4617_v2 = vmul.f32 %v4298_v45, %v4298_v45  ;;  %vm7082_vm8 = vmmov %vm7047_vm1 }
 0x243   : > { %v4660_v27 = vadd.f32 %v4659_v12, %v4658_v32  ;;  %4517 = vst.msk [vmem:[%s6837_s29 + $0x3c] sm:$0xf] %vm427_vm0, %v5132_v38  ;;  %v4560_v20 = vadd.f32 %v4559_v42, %v4558_v8  ;;  %v4663_v29 = vsel %vm7073_vm2, %v4618_v0, 0.0  ;;  %v4665_v4 = vsel %vm7074_vm13, %v4619_v54, 0.0  ;;  %vm7083_vm14 = vmmov %vm7047_vm1 }
 0x244   : > { %4515 = vst.msk [vmem:[%s6837_s29 + $0x34] sm:$0xf] %vm427_vm0, %v5130_v39  ;;  %v4661_v50 = vsel %vm7071_vm10, %v4617_v2, 0.0  ;;  %vm7085_vm10 = vmmov %vm7047_vm1 }
 0x245   : > { %v4562_v24 = vadd.f32 %v4561_v10, %v4560_v20  ;;  %v4662_v22 = vadd.f32 %v4661_v50, %v4660_v27  ;;  %vm7087_vm2 = vmmov %vm7047_vm1 }
 0x246   : > { %vm7088_vm13 = vmmov %vm7047_vm1 }
 0x247   : > { %v4564_v33 = vadd.f32 %v4563_v35, %v4562_v24  ;;  %v4664_v58 = vadd.f32 %v4663_v29, %v4662_v22 }
 0x249   : > { %v4666_v61 = vadd.f32 %v4665_v4, %v4664_v58 }
 0x26d   : > { %v5277_v19 = vpop.f32.mrb[0].mxu1 }
 0x26e   : > { %v5135_v26 = vpack.c.bf16 %v5277_v19, %v5277_v19  ;;  %v4311_v11 = vpop.f32.mrb[1].mxu1  ;;  %v4622_v17 = vmul.f32 %v5277_v19, %v5277_v19  ;;  %v4569_v37 = vsel %vm7078_vm7, %v5277_v19, 0.0  ;;  %vm7092_vm7 = vmmov %vm7047_vm1 }
 0x26f   : > { %v5133_v34 = vpack.c.bf16 %v4311_v11, %v4311_v11  ;;  %v4565_v5 = vsel %vm7075_vm4, %v4311_v11, 0.0  ;;  %v4620_v36 = vmul.f32 %v4311_v11, %v4311_v11  ;;  %v5278_v46 = vpop.f32.mrb[2].mxu1  ;;  %vm7089_vm4 = vmmov %vm7047_vm1 }
 0x270   : > { %4520 = vst.msk [vmem:[%s6837_s29 + $0x48] sm:$0xf] %vm427_vm0, %v5135_v26  ;;  %v4566_v62 = vadd.f32 %v4565_v5, %v4564_v33  ;;  %v5136_v6 = vpack.c.bf16 %v5278_v46, %v5278_v46  ;;  %v4314_v55 = vpop.f32.mrb[3].mxu1  ;;  %v4623_v48 = vmul.f32 %v5278_v46, %v5278_v46  ;;  %v4571_v47 = vsel %vm7047_vm1, %v5278_v46, 0.0 }
 0x271   : > { %4518 = vst.msk [vmem:[%s6837_s29 + $0x40] sm:$0xf] %vm427_vm0, %v5133_v34  ;;  %v4667_v3 = vsel %vm7076_vm5, %v4620_v36, 0.0  ;;  %v5134_v21 = vpack.c.bf16 %v4314_v55, %v4314_v55  ;;  %v4567_v40 = vsel %vm7077_vm3, %v4314_v55, 0.0  ;;  %v4621_v15 = vmul.f32 %v4314_v55, %v4314_v55  ;;  %vm7090_vm5 = vmmov %vm7047_vm1 }
 0x272   : > { %v4668_v13 = vadd.f32 %v4667_v3, %v4666_v61  ;;  %4521 = vst.msk [vmem:[%s6837_s29 + $0x4c] sm:$0xf] %vm427_vm0, %v5136_v6  ;;  %v4568_v16 = vadd.f32 %v4567_v40, %v4566_v62  ;;  %v4671_v43 = vsel %vm7080_vm11, %v4622_v17, 0.0  ;;  %v4673_v57 = vsel %vm7081_vm12, %v4623_v48, 0.0  ;;  %vm7091_vm3 = vmmov %vm7047_vm1 }
 0x273   : > { %4519 = vst.msk [vmem:[%s6837_s29 + $0x44] sm:$0xf] %vm427_vm0, %v5134_v21  ;;  %v4669_v63 = vsel %vm7079_vm6, %v4621_v15, 0.0  ;;  %vm7093_vm6 = vmmov %vm7047_vm1 }
 0x274   : > { %v4570_v51 = vadd.f32 %v4569_v37, %v4568_v16  ;;  %v4670_v7 = vadd.f32 %v4669_v63, %v4668_v13  ;;  %vm7094_vm11 = vmmov %vm7047_vm1 }
 0x275   : > { %vm7095_vm12 = vmmov %vm7047_vm1 }
 0x276   : > { %v4572_v49 = vadd.f32 %v4571_v47, %v4570_v51  ;;  %v4672_v53 = vadd.f32 %v4671_v43, %v4670_v7 }
 0x278   : > { %v4674_v59 = vadd.f32 %v4673_v57, %v4672_v53 }
 0x29e   : > { %v5281_v56 = vpop.f32.mrb[4].mxu1 }
 0x29f   : > { %v5139_v60 = vpack.c.bf16 %v5281_v56, %v5281_v56  ;;  %v4327_v23 = vpop.f32.mrb[5].mxu1  ;;  %v4626_v25 = vmul.f32 %v5281_v56, %v5281_v56  ;;  %v4577_v45 = vsel %vm7085_vm10, %v5281_v56, 0.0  ;;  %vm7099_vm10 = vmmov %vm7047_vm1 }
 0x2a0   : > { %v5137_v14 = vpack.c.bf16 %v4327_v23, %v4327_v23  ;;  %v4573_v32 = vsel %vm7082_vm8, %v4327_v23, 0.0  ;;  %v4624_v41 = vmul.f32 %v4327_v23, %v4327_v23  ;;  %v5282_v9 = vpop.f32.mrb[6].mxu1  ;;  %vm7096_vm8 = vmmov %vm7047_vm1 }
 0x2a1   : > { %4524 = vst.msk [vmem:[%s6837_s29 + $0x58] sm:$0xf] %vm427_vm0, %v5139_v60  ;;  %v4574_v18 = vadd.f32 %v4573_v32, %v4572_v49  ;;  %v5140_v28 = vpack.c.bf16 %v5282_v9, %v5282_v9  ;;  %v4330_v31 = vpop.f32.mrb[7].mxu1  ;;  %v4627_v12 = vmul.f32 %v5282_v9, %v5282_v9  ;;  %v4579_v0 = vsel %vm7087_vm2, %v5282_v9, 0.0  ;;  %vm7101_vm2 = vmmov %vm7047_vm1 }
 0x2a2   : > { %4522 = vst.msk [vmem:[%s6837_s29 + $0x50] sm:$0xf] %vm427_vm0, %v5137_v14  ;;  %v4675_v1 = vsel %vm7083_vm14, %v4624_v41, 0.0  ;;  %v5138_v52 = vpack.c.bf16 %v4330_v31, %v4330_v31  ;;  %v4575_v30 = vsel %vm7084_vm9, %v4330_v31, 0.0  ;;  %v4625_v38 = vmul.f32 %v4330_v31, %v4330_v31  ;;  %vm7097_vm14 = vmmov %vm7047_vm1 }
 0x2a3   : > { %v4676_v44 = vadd.f32 %v4675_v1, %v4674_v59  ;;  %4525 = vst.msk [vmem:[%s6837_s29 + $0x5c] sm:$0xf] %vm427_vm0, %v5140_v28  ;;  %v4576_v8 = vadd.f32 %v4575_v30, %v4574_v18  ;;  %v4679_v20 = vsel %vm7088_vm13, %v4626_v25, 0.0  ;;  %v4681_v54 = vsel %vm7089_vm4, %v4627_v12, 0.0  ;;  %vm7098_vm9 = vmmov %vm7047_vm1 }
 0x2a4   : > { %4523 = vst.msk [vmem:[%s6837_s29 + $0x54] sm:$0xf] %vm427_vm0, %v5138_v52  ;;  %v4677_v42 = vsel %vm7086_vm15, %v4625_v38, 0.0  ;;  %vm7100_vm15 = vmmov %vm7047_vm1 }
 0x2a5   : > { %v4578_v39 = vadd.f32 %v4577_v45, %v4576_v8  ;;  %v4678_v27 = vadd.f32 %v4677_v42, %v4676_v44  ;;  %vm7102_vm13 = vmmov %vm7047_vm1 }
 0x2a6   : > { %vm7103_vm4 = vmmov %vm7047_vm1 }
 0x2a7   : > { %v4580_v2 = vadd.f32 %v4579_v0, %v4578_v39  ;;  %v4680_v10 = vadd.f32 %v4679_v20, %v4678_v27 }
 0x2a9   : > { %v4682_v24 = vadd.f32 %v4681_v54, %v4680_v10 }
 0x2cc   : > { %v5285_v50 = vpop.f32.mrb[8].mxu1 }
 0x2cd   : > { %v5143_v35 = vpack.c.bf16 %v5285_v50, %v5285_v50  ;;  %v4343_v22 = vpop.f32.mrb[9].mxu1  ;;  %v4630_v36 = vmul.f32 %v5285_v50, %v5285_v50  ;;  %v4585_v55 = vsel %vm7093_vm6, %v5285_v50, 0.0 }
 0x2ce   : > { %v5141_v29 = vpack.c.bf16 %v4343_v22, %v4343_v22  ;;  %v4581_v33 = vsel %vm7090_vm5, %v4343_v22, 0.0  ;;  %v4628_v58 = vmul.f32 %v4343_v22, %v4343_v22  ;;  %v5286_v4 = vpop.f32.mrb[10].mxu1  ;;  %vm7104_vm5 = vmmov %vm7047_vm1 }
 0x2cf   : > { %4528 = vst.msk [vmem:[%s6837_s29 + $0x68] sm:$0xf] %vm427_vm0, %v5143_v35  ;;  %v4582_v61 = vadd.f32 %v4581_v33, %v4580_v2  ;;  %v5144_v19 = vpack.c.bf16 %v5286_v4, %v5286_v4  ;;  %v4346_v26 = vpop.f32.mrb[11].mxu1  ;;  %v4631_v3 = vmul.f32 %v5286_v4, %v5286_v4  ;;  %v4587_v17 = vsel %vm7094_vm11, %v5286_v4, 0.0 }
 0x2d0   : > { %4526 = vst.msk [vmem:[%s6837_s29 + $0x60] sm:$0xf] %vm427_vm0, %v5141_v29  ;;  %v4683_v11 = vsel %vm7091_vm3, %v4628_v58, 0.0  ;;  %v5142_v34 = vpack.c.bf16 %v4346_v26, %v4346_v26  ;;  %v4583_v5 = vsel %vm7092_vm7, %v4346_v26, 0.0  ;;  %v4629_v6 = vmul.f32 %v4346_v26, %v4346_v26 }
 0x2d1   : > { %v4684_v46 = vadd.f32 %v4683_v11, %v4682_v24  ;;  %4529 = vst.msk [vmem:[%s6837_s29 + $0x6c] sm:$0xf] %vm427_vm0, %v5144_v19  ;;  %v4584_v62 = vadd.f32 %v4583_v5, %v4582_v61  ;;  %v4687_v16 = vsel %vm7095_vm12, %v4630_v36, 0.0  ;;  %v4689_v48 = vsel %vm7096_vm8, %v4631_v3, 0.0 }
 0x2d2   : > { %4527 = vst.msk [vmem:[%s6837_s29 + $0x64] sm:$0xf] %vm427_vm0, %v5142_v34  ;;  %v4685_v40 = vsel %vm7047_vm1, %v4629_v6, 0.0 }
 0x2d3   : > { %v4586_v21 = vadd.f32 %v4585_v55, %v4584_v62  ;;  %v4686_v13 = vadd.f32 %v4685_v40, %v4684_v46 }
 0x2d5   : > { %v4588_v15 = vadd.f32 %v4587_v17, %v4586_v21  ;;  %v4688_v37 = vadd.f32 %v4687_v16, %v4686_v13 }
 0x2d7   : > { %v4690_v51 = vadd.f32 %v4689_v48, %v4688_v37 }
 0x2f7   : > { %v5289_v63 = vpop.f32.mrb[12].mxu1 }
 0x2f8   : > { %v5147_v47 = vpack.c.bf16 %v5289_v63, %v5289_v63  ;;  %v4359_v7 = vpop.f32.mrb[13].mxu1  ;;  %v4634_v41 = vmul.f32 %v5289_v63, %v5289_v63  ;;  %v4593_v31 = vsel %vm7100_vm15, %v5289_v63, 0.0 }
 0x2f9   : > { %v5145_v43 = vpack.c.bf16 %v4359_v7, %v4359_v7  ;;  %v4589_v49 = vsel %vm7097_vm14, %v4359_v7, 0.0  ;;  %v4632_v53 = vmul.f32 %v4359_v7, %v4359_v7  ;;  %v5290_v57 = vpop.f32.mrb[14].mxu1 }
 0x2fa   : > { %4532 = vst.msk [vmem:[%s6837_s29 + $0x78] sm:$0xf] %vm427_vm0, %v5147_v47  ;;  %v4590_v59 = vadd.f32 %v4589_v49, %v4588_v15  ;;  %v5148_v56 = vpack.c.bf16 %v5290_v57, %v5290_v57  ;;  %v4362_v60 = vpop.f32.mrb[15].mxu1  ;;  %v4635_v1 = vmul.f32 %v5290_v57, %v5290_v57  ;;  %v4595_v25 = vsel %vm7102_vm13, %v5290_v57, 0.0 }
 0x2fb   : > { %4530 = vst.msk [vmem:[%s6837_s29 + $0x70] sm:$0xf] %vm427_vm0, %v5145_v43  ;;  %v4691_v23 = vsel %vm7098_vm9, %v4632_v53, 0.0  ;;  %v5146_v14 = vpack.c.bf16 %v4362_v60, %v4362_v60  ;;  %v4591_v32 = vsel %vm7099_vm10, %v4362_v60, 0.0  ;;  %v4633_v28 = vmul.f32 %v4362_v60, %v4362_v60 }
 0x2fc   : > { %v4692_v9 = vadd.f32 %v4691_v23, %v4690_v51  ;;  %4533 = vst.msk [vmem:[%s6837_s29 + $0x7c] sm:$0xf] %vm427_vm0, %v5148_v56  ;;  %v4592_v18 = vadd.f32 %v4591_v32, %v4590_v59  ;;  %v4695_v8 = vsel %vm7103_vm4, %v4634_v41, 0.0  ;;  %v4697_v12 = vsel %vm7104_vm5, %v4635_v1, 0.0 }
 0x2fd   : > { %4531 = vst.msk [vmem:[%s6837_s29 + $0x74] sm:$0xf] %vm427_vm0, %v5146_v14  ;;  %v4693_v30 = vsel %vm7101_vm2, %v4633_v28, 0.0  ;;  %vm7105_vm0 = vcmask 57344  }
 0x2fe   : > { %v4594_v52 = vadd.f32 %v4593_v31, %v4592_v18  ;;  %v4694_v44 = vadd.f32 %v4693_v30, %v4692_v9  ;;  %vm7106_vm3 = vmmov %vm7105_vm0 }
 0x300   : > { %v4596_v38 = vadd.f32 %v4595_v25, %v4594_v52  ;;  %v4696_v45 = vadd.f32 %v4695_v8, %v4694_v44 }
 0x302   : > { %v4597_v39 = vrot.slane %v4596_v38, 4  ;;  %v4698_v42 = vadd.f32 %v4697_v12, %v4696_v45 }
 0x304   : > { %v4598_v0 = vadd.f32 %v4597_v39, %v4596_v38  ;;  %v4699_v27 = vrot.slane %v4698_v42, 4 }
 0x306   : > { %v4599_v20 = vrot.slane %v4598_v0, 2  ;;  %v4700_v2 = vadd.f32 %v4699_v27, %v4698_v42 }
 0x308   : > { %v4600_v10 = vadd.f32 %v4599_v20, %v4598_v0  ;;  %v4701_v54 = vrot.slane %v4700_v2, 2 }
 0x30a   : > { %v4601_v24 = vrot.slane %v4600_v10, 1  ;;  %v4702_v50 = vadd.f32 %v4701_v54, %v4700_v2 }
 0x30c   : > { %v4602_v35 = vadd.f32 %v4601_v24, %v4600_v10  ;;  %v4703_v22 = vrot.slane %v4702_v50, 1 }
 0x30e   : > { %4603 = vst.msk [vmem:[%s235_s7] sm:$0x1] %vm7105_vm0, %v4602_v35  ;;  %v4704_v29 = vadd.f32 %v4703_v22, %v4702_v50 }
 0x310   : > { %4705 = vst.msk [vmem:[%s235_s7 + $0x1] sm:$0x1] %vm7106_vm3, %v4704_v29 }
 0x311 PF: > { %s16_s18 = sadd.s32 1, %s5385_s18  }
 0x312   : > { %p13_p4 = scmp.ge.s32.totalorder %s16_s18, 4  }
 0x314   :  { %15 = sbr.rel (!%p13_p4) target bundleno = 1 (0x1), region = 80 }

</bundles_post_ra>
